<compile_context>
chip_gen: v7x
topology: tpu7x:2x2x1
jax: 0.10.0
libtpu: 0.0.40
codegen_flags: <defaults>
</compile_context>

<pallas_src>
import numpy as np
import jax
import jax.numpy as jnp
from jax.experimental import pallas as pl
from jax.experimental.pallas import tpu as pltpu

EPS = 1e-5
NEG = 0.2

IN_C, IN_H, IN_W = 1, 28, 28
C1, C2 = 64, 128
KW, STRIDE, PAD = 4, 2, 1
H1 = (IN_H + 2 * PAD - KW) // STRIDE + 1      # 14
W1 = (IN_W + 2 * PAD - KW) // STRIDE + 1      # 14
H2 = (H1 + 2 * PAD - KW) // STRIDE + 1        # 7
W2 = (W1 + 2 * PAD - KW) // STRIDE + 1        # 7
N_POS = H2 * W2                               # 49
FC_IN = C2 * N_POS                            # 6272
FC_HID = 1024

N_CORES = 2                                   # FC_HID split (v7x megacore)
FC_HALF = FC_HID // N_CORES                   # 512
K_STEPS = 2                                   # fc1-weight HBM chunks
POS_PER_CHUNK = (N_POS + K_STEPS - 1) // K_STEPS   # 25 (position 49 is zero pad)
N_POS_PAD = POS_PER_CHUNK * K_STEPS                # 50
CHUNK_K = POS_PER_CHUNK * C2                       # 3200
FC_IN_PAD = N_POS_PAD * C2                         # 6400


# ----------------------------- Pallas kernel ----------------------------------

def fused_kernel(x2_ref, w2_ref, b2_ref, g2_ref, bt2_ref,
                 w3_ref, b3_ref, g3_ref, bt3_ref, w4_ref,
                 o_ref, y2_scr, acc_scr):
    """conv2 GEMM + BN2d + LReLU + flatten + fc1 + BN1d + LReLU + fc2 partials.

    Grid = (c, k):
      c ("parallel"):  which half of FC_HID this program owns (v7x megacore).
      k ("arbitrary"): which 3200-row chunk of the fc1 weight is resident.
    """
    k = pl.program_id(1)
    n = acc_scr.shape[0]                              # batch size

    @pl.when(k == 0)
    def _():
        # conv2 as a GEMM (bf16 operands, f32 accumulation) + bias.
        y = jnp.dot(x2_ref[...], w2_ref[...], preferred_element_type=jnp.float32)
        y = y + b2_ref[...]
        # BatchNorm2d, training-mode stats over all n*49 rows (per channel),
        # two-pass variance (matches the reference), rsqrt on the EUP.
        mu = jnp.mean(y, axis=0, keepdims=True)
        yc = y - mu
        var = jnp.mean(yc * yc, axis=0, keepdims=True)
        y = yc * jax.lax.rsqrt(var + EPS) * g2_ref[...] + bt2_ref[...]
        y = jnp.maximum(y, NEG * y)                   # LeakyReLU(0.2)

        # Re-pack rows (position, sample) into a sample-major flat layout so
        # each grid step can do ONE [n, CHUNK_K] matmul:
        #   y2_scr[kk, s, q*C2:(q+1)*C2] = y[p*n + s, :],  p = kk*PPC + q.
        # 49 tile-aligned (lane offsets multiple of 128) sub-stores; the padded
        # position slot stays zero (its fc1-weight rows are zero too).
        y2_scr[...] = jnp.zeros_like(y2_scr)
        for p in range(N_POS):
            kk, q = p // POS_PER_CHUNK, p % POS_PER_CHUNK
            y2_scr[kk, :, q * C2:(q + 1) * C2] = (
                y[p * n:(p + 1) * n, :].astype(jnp.bfloat16))
        acc_scr[...] = jnp.zeros_like(acc_scr)

    # fc1 partial product: a single [n, CHUNK_K] @ [CHUNK_K, FC_HALF] MXU dot
    # per grid step (K=3200 fills the MXU; no serialized micro-dot chain).
    acc_scr[...] += jnp.dot(y2_scr[k], w3_ref[...],
                            preferred_element_type=jnp.float32)

    @pl.when(k == K_STEPS - 1)
    def _():
        h = acc_scr[...] + b3_ref[...]
        # BatchNorm1d over the batch, training-mode stats, two-pass variance.
        mu = jnp.mean(h, axis=0, keepdims=True)
        hc = h - mu
        var = jnp.mean(hc * hc, axis=0, keepdims=True)
        h = hc * jax.lax.rsqrt(var + EPS) * g3_ref[...] + bt3_ref[...]
        h = jnp.maximum(h, NEG * h)                   # LeakyReLU(0.2)
        # fc2 partial logits for this core's 512 columns: lane reduce on the
        # VPU/XLU instead of an N=1 MXU matmul.  Halves are summed (+ bias,
        # sigmoid) in XLA.
        o_ref[0] = jnp.sum(h * w4_ref[...], axis=-1, keepdims=True)


# ------------------------- parameters (PyTorch layout) -------------------------

def init_params(key):
    """DCGAN-style init: weights ~ N(0, 0.02), BN gamma ~ N(1, 0.02)."""
    ks = jax.random.split(key, 12)
    nrm = jax.random.normal
    return {
        "conv1_w": 0.02 * nrm(ks[0], (C1, IN_C, KW, KW), jnp.float32),
        "conv1_b": 0.02 * nrm(ks[1], (C1,), jnp.float32),
        "conv2_w": 0.02 * nrm(ks[2], (C2, C1, KW, KW), jnp.float32),
        "conv2_b": 0.02 * nrm(ks[3], (C2,), jnp.float32),
        "bn2_g": 1.0 + 0.02 * nrm(ks[4], (C2,), jnp.float32),
        "bn2_b": 0.02 * nrm(ks[5], (C2,), jnp.float32),
        # torch nn.Linear weight [out, in]; in-index = c2*49 + h*7 + w (NCHW flatten)
        "fc1_w": 0.02 * nrm(ks[6], (FC_HID, FC_IN), jnp.float32),
        "fc1_b": 0.02 * nrm(ks[7], (FC_HID,), jnp.float32),
        "bn3_g": 1.0 + 0.02 * nrm(ks[8], (FC_HID,), jnp.float32),
        "bn3_b": 0.02 * nrm(ks[9], (FC_HID,), jnp.float32),
        "fc2_w": 0.02 * nrm(ks[10], (1, FC_HID), jnp.float32),
        "fc2_b": 0.02 * nrm(ks[11], (1,), jnp.float32),
    }


def prepare_pallas_params(p):
    """One-time repack of PyTorch-layout params into kernel layout (bf16 GEMM weights)."""
    f32, bf16 = jnp.float32, jnp.bfloat16
    # conv2 weight OIHW -> [kh*kw*cin, cout], matching the (ki, kj, c) im2col columns.
    w2 = jnp.transpose(p["conv2_w"], (2, 3, 1, 0)).reshape(KW * KW * C1, C2).astype(bf16)
    # fc1: torch [out, in] with in = c2*49 + pos  ->  kernel [pos*C2 + c2, out],
    # zero-padded from 49 to 50 positions (6272 -> 6400 rows) for 2 even K chunks.
    w3 = (p["fc1_w"].T.reshape(C2, N_POS, FC_HID)
          .transpose(1, 0, 2).reshape(FC_IN, FC_HID))
    w3 = jnp.concatenate(
        [w3, jnp.zeros((FC_IN_PAD - FC_IN, FC_HID), w3.dtype)], axis=0).astype(bf16)
    return {
        "w1": p["conv1_w"].astype(bf16),                  # OIHW, conv1 runs in XLA
        "b1": p["conv1_b"].astype(f32),
        "w2": w2,
        "b2": p["conv2_b"].reshape(1, C2).astype(f32),
        "g2": p["bn2_g"].reshape(1, C2).astype(f32),
        "bt2": p["bn2_b"].reshape(1, C2).astype(f32),
        "w3": w3,
        "b3": p["fc1_b"].reshape(1, FC_HID).astype(f32),
        "g3": p["bn3_g"].reshape(1, FC_HID).astype(f32),
        "bt3": p["bn3_b"].reshape(1, FC_HID).astype(f32),
        "w4": p["fc2_w"].astype(f32),                     # [1, FC_HID] row vector
        "b4": p["fc2_b"].reshape(1, 1).astype(f32),
    }


# --------------------------------- wrapper -------------------------------------

def _im2col_nhwc(x_nhwc, out_h, out_w):
    """Channel-last im2col: [N,H,W,C] -> [N,out_h,out_w,KW*KW*C]; taps ki-major, kj, c."""
    xp = jnp.pad(x_nhwc, ((0, 0), (PAD, PAD), (PAD, PAD), (0, 0)))
    taps = [xp[:, ki:ki + STRIDE * out_h:STRIDE, kj:kj + STRIDE * out_w:STRIDE, :]
            for ki in range(KW) for kj in range(KW)]
    return jnp.concatenate(taps, axis=-1)


def forward_pallas(kp, x):
    n = x.shape[0]
    assert x.shape[1:] == (IN_C, IN_H, IN_W)
    f32, bf16 = jnp.float32, jnp.bfloat16

    # ---- conv1 + LeakyReLU in plain XLA (per perf review: not worth a launch) --
    h = jax.lax.conv_general_dilated(
        x.astype(bf16), kp["w1"], window_strides=(STRIDE, STRIDE),
        padding=[(PAD, PAD), (PAD, PAD)],
        dimension_numbers=("NCHW", "OIHW", "NCHW"),
        preferred_element_type=f32)
    h = h + kp["b1"].reshape(1, -1, 1, 1)
    h = jnp.maximum(h, NEG * h)                                   # [n,64,14,14]

    # ---- conv2 im2col in XLA (channel-last strided slices). Rows ordered ------
    # ---- (position, sample) so the in-kernel flatten is 49 aligned sub-stores. -
    h_nhwc = jnp.transpose(h, (0, 2, 3, 1))                       # [n,14,14,64]
    x2 = _im2col_nhwc(h_nhwc, H2, W2)                             # [n,7,7,1024]
    x2 = (jnp.transpose(x2, (1, 2, 0, 3))
          .reshape(N_POS * n, KW * KW * C1).astype(bf16))         # [49n,1024]

    # ---- ONE fused Pallas call: conv2 + BN2d + LReLU + fc1 + BN1d + LReLU + fc2
    grid_spec = pltpu.PrefetchScalarGridSpec(
        num_scalar_prefetch=0,
        grid=(N_CORES, K_STEPS),
        in_specs=[
            pl.BlockSpec((N_POS * n, KW * KW * C1), lambda c, k: (0, 0)),   # x2
            pl.BlockSpec((KW * KW * C1, C2), lambda c, k: (0, 0)),          # w2
            pl.BlockSpec((1, C2), lambda c, k: (0, 0)),                     # b2
            pl.BlockSpec((1, C2), lambda c, k: (0, 0)),                     # gamma2
            pl.BlockSpec((1, C2), lambda c, k: (0, 0)),                     # beta2
            pl.BlockSpec((CHUNK_K, FC_HALF), lambda c, k: (k, c)),          # w3 chunk
            pl.BlockSpec((1, FC_HALF), lambda c, k: (0, c)),                # b3
            pl.BlockSpec((1, FC_HALF), lambda c, k: (0, c)),                # gamma3
            pl.BlockSpec((1, FC_HALF), lambda c, k: (0, c)),                # beta3
            pl.BlockSpec((1, FC_HALF), lambda c, k: (0, c)),                # w4 row
        ],
        out_specs=pl.BlockSpec((1, n, 1), lambda c, k: (c, 0, 0)),
        scratch_shapes=[
            pltpu.VMEM((K_STEPS, n, CHUNK_K), jnp.bfloat16),   # conv2 act, flat per chunk
            pltpu.VMEM((n, FC_HALF), jnp.float32),             # fc1 accumulator
        ],
    )
    zparts = pl.pallas_call(
        fused_kernel,
        out_shape=jax.ShapeDtypeStruct((N_CORES, n, 1), jnp.float32),
        grid_spec=grid_spec,
        compiler_params=pltpu.CompilerParams(
            dimension_semantics=("parallel", "arbitrary")),
    )(x2, kp["w2"], kp["b2"], kp["g2"], kp["bt2"],
      kp["w3"], kp["b3"], kp["g3"], kp["bt3"], kp["w4"])

    logits = jnp.sum(zparts, axis=0) + kp["b4"]                   # [n,1]
    return jax.nn.sigmoid(logits)


# ----------------------------- pure-JAX reference ------------------------------

def forward_reference(params, x):
    """Mirrors the PyTorch forward (training-mode BN).  Matmul/conv operands are
    rounded to bf16 exactly like the Pallas kernel (f32 accumulation), so the
    remaining kernel-vs-reference differences are at f32 level."""
    bf16, f32 = jnp.bfloat16, jnp.float32

    def conv(h, w):
        return jax.lax.conv_general_dilated(
            h.astype(bf16), w.astype(bf16),
            window_strides=(STRIDE, STRIDE), padding=[(PAD, PAD), (PAD, PAD)],
            dimension_numbers=("NCHW", "OIHW", "NCHW"),
            preferred_element_type=f32)

    h = conv(x, params["conv1_w"]) + params["conv1_b"].reshape(1, -1, 1, 1)
    h = jnp.where(h > 0, h, NEG * h)

    h = conv(h, params["conv2_w"]) + params["conv2_b"].reshape(1, -1, 1, 1)
    mean = h.mean(axis=(0, 2, 3), keepdims=True)
    var = ((h - mean) ** 2).mean(axis=(0, 2, 3), keepdims=True)
    h = (h - mean) / jnp.sqrt(var + EPS)
    h = h * params["bn2_g"].reshape(1, -1, 1, 1) + params["bn2_b"].reshape(1, -1, 1, 1)
    h = jnp.where(h > 0, h, NEG * h)

    f = h.reshape(x.shape[0], -1)                     # torch .view: NCHW flatten
    h1 = jnp.dot(f.astype(bf16), params["fc1_w"].T.astype(bf16),
                 preferred_element_type=f32) + params["fc1_b"]
    mean = h1.mean(axis=0, keepdims=True)
    var = ((h1 - mean) ** 2).mean(axis=0, keepdims=True)
    h1 = (h1 - mean) / jnp.sqrt(var + EPS)
    h1 = h1 * params["bn3_g"] + params["bn3_b"]
    h1 = jnp.where(h1 > 0, h1, NEG * h1)

    z = jnp.dot(h1, params["fc2_w"].T) + params["fc2_b"]
    return jax.nn.sigmoid(z)


# ------------------------------------ main --------------------------------------

if __name__ == "__main__":
    key = jax.random.PRNGKey(0)
    kx, kparam = jax.random.split(key)

    batch = 2
    x = jax.random.normal(kx, (batch, IN_C, IN_H, IN_W), jnp.float32)

    params = init_params(kparam)
    kparams = prepare_pallas_params(params)           # one-time weight repack (bf16)

    out = jax.block_until_ready(jax.jit(forward_pallas)(kparams, x))
    assert out.shape == (batch, 1), out.shape

    ref = jax.block_until_ready(jax.jit(forward_reference)(params, x))
    np.testing.assert_allclose(np.asarray(out), np.asarray(ref),
                               rtol=1e-2, atol=1e-2)
    print("KERNEL_OK")
</pallas_src>

<mosaic_0001>
module attributes {stable_mosaic.version = 11 : i64} {
  func.func @fused_kernel(%arg0: i32, %arg1: i32, %arg2: memref<98x1024xbf16, #tpu.memory_space<vmem>>, %arg3: memref<1024x128xbf16, #tpu.memory_space<vmem>>, %arg4: memref<1x128xf32, #tpu.memory_space<vmem>>, %arg5: memref<1x128xf32, #tpu.memory_space<vmem>>, %arg6: memref<1x128xf32, #tpu.memory_space<vmem>>, %arg7: memref<3200x512xbf16, #tpu.memory_space<vmem>>, %arg8: memref<1x512xf32, #tpu.memory_space<vmem>>, %arg9: memref<1x512xf32, #tpu.memory_space<vmem>>, %arg10: memref<1x512xf32, #tpu.memory_space<vmem>>, %arg11: memref<1x512xf32, #tpu.memory_space<vmem>>, %arg12: memref<1x2x1xf32, #tpu.memory_space<vmem>>, %arg13: memref<2x2x3200xbf16, #tpu.memory_space<vmem>>, %arg14: memref<2x512xf32, #tpu.memory_space<vmem>>) attributes {dimension_semantics = [#tpu.dimension_semantics<parallel>, #tpu.dimension_semantics<arbitrary>], iteration_bounds = array<i64: 2, 2>, scalar_prefetch = 0 : i64, scratch_operands = 2 : i64, tpu.core_type = #tpu.core_type<tc>, window_params = [{pipeline_mode = #tpu.pipeline_mode<synchronous>, transform_indices = @transform_0, window_bounds = array<i64: 98, 1024>}, {pipeline_mode = #tpu.pipeline_mode<synchronous>, transform_indices = @transform_1, window_bounds = array<i64: 1024, 128>}, {pipeline_mode = #tpu.pipeline_mode<synchronous>, transform_indices = @transform_2, window_bounds = array<i64: 1, 128>}, {pipeline_mode = #tpu.pipeline_mode<synchronous>, transform_indices = @transform_3, window_bounds = array<i64: 1, 128>}, {pipeline_mode = #tpu.pipeline_mode<synchronous>, transform_indices = @transform_4, window_bounds = array<i64: 1, 128>}, {transform_indices = @transform_5, window_bounds = array<i64: 3200, 512>}, {transform_indices = @transform_6, window_bounds = array<i64: 1, 512>}, {transform_indices = @transform_7, window_bounds = array<i64: 1, 512>}, {transform_indices = @transform_8, window_bounds = array<i64: 1, 512>}, {transform_indices = @transform_9, window_bounds = array<i64: 1, 512>}, {transform_indices = @transform_10, window_bounds = array<i64: 1, 2, 1>}]} {
    %c0_i32 = arith.constant 0 : i32
    %0 = arith.cmpi eq, %arg1, %c0_i32 : i32
    %1 = arith.extui %0 : i1 to i32
    %c0_i32_0 = arith.constant 0 : i32
    %2 = arith.cmpi ne, %1, %c0_i32_0 : i32
    scf.if %2 {
      %c0_9 = arith.constant 0 : index
      %c0_10 = arith.constant 0 : index
      %14 = vector.load %arg2[%c0_9, %c0_10] : memref<98x1024xbf16, #tpu.memory_space<vmem>>, vector<98x1024xbf16>
      %c0_11 = arith.constant 0 : index
      %c0_12 = arith.constant 0 : index
      %15 = vector.load %arg3[%c0_11, %c0_12] : memref<1024x128xbf16, #tpu.memory_space<vmem>>, vector<1024x128xbf16>
      %cst_13 = arith.constant dense<0.000000e+00> : vector<98x128xf32>
      %16 = tpu.matmul %14, %15, %cst_13 {dimension_numbers = #tpu.dot_dimension_numbers<[1], [0], [0], [1], [0, 0, 1, 1], [], []>} : vector<98x1024xbf16>, vector<1024x128xbf16>, vector<98x128xf32> -> vector<98x128xf32>
      %c0_14 = arith.constant 0 : index
      %c0_15 = arith.constant 0 : index
      %17 = vector.load %arg4[%c0_14, %c0_15] : memref<1x128xf32, #tpu.memory_space<vmem>>, vector<1x128xf32>
      %18 = vector.broadcast %17 : vector<1x128xf32> to vector<98x128xf32>
      %19 = arith.addf %16, %18 : vector<98x128xf32>
      %cst_16 = arith.constant dense<0.000000e+00> : vector<128xf32>
      %20 = vector.multi_reduction <add>, %19, %cst_16 [0] : vector<98x128xf32> to vector<128xf32>
      %21 = vector.shape_cast %20 : vector<128xf32> to vector<1x128xf32>
      %cst_17 = arith.constant 9.800000e+01 : f32
      %22 = vector.broadcast %cst_17 : f32 to vector<1x128xf32>
      %23 = arith.divf %21, %22 : vector<1x128xf32>
      %24 = vector.broadcast %23 : vector<1x128xf32> to vector<98x128xf32>
      %25 = arith.subf %19, %24 : vector<98x128xf32>
      %26 = arith.mulf %25, %25 : vector<98x128xf32>
      %cst_18 = arith.constant dense<0.000000e+00> : vector<128xf32>
      %27 = vector.multi_reduction <add>, %26, %cst_18 [0] : vector<98x128xf32> to vector<128xf32>
      %28 = vector.shape_cast %27 : vector<128xf32> to vector<1x128xf32>
      %cst_19 = arith.constant 9.800000e+01 : f32
      %29 = vector.broadcast %cst_19 : f32 to vector<1x128xf32>
      %30 = arith.divf %28, %29 : vector<1x128xf32>
      %cst_20 = arith.constant 9.99999974E-6 : f32
      %31 = vector.broadcast %cst_20 : f32 to vector<1x128xf32>
      %32 = arith.addf %30, %31 : vector<1x128xf32>
      %33 = math.rsqrt %32 : vector<1x128xf32>
      %34 = vector.broadcast %33 : vector<1x128xf32> to vector<98x128xf32>
      %35 = arith.mulf %25, %34 : vector<98x128xf32>
      %c0_21 = arith.constant 0 : index
      %c0_22 = arith.constant 0 : index
      %36 = vector.load %arg5[%c0_21, %c0_22] : memref<1x128xf32, #tpu.memory_space<vmem>>, vector<1x128xf32>
      %37 = vector.broadcast %36 : vector<1x128xf32> to vector<98x128xf32>
      %38 = arith.mulf %35, %37 : vector<98x128xf32>
      %c0_23 = arith.constant 0 : index
      %c0_24 = arith.constant 0 : index
      %39 = vector.load %arg6[%c0_23, %c0_24] : memref<1x128xf32, #tpu.memory_space<vmem>>, vector<1x128xf32>
      %40 = vector.broadcast %39 : vector<1x128xf32> to vector<98x128xf32>
      %41 = arith.addf %38, %40 : vector<98x128xf32>
      %cst_25 = arith.constant 2.000000e-01 : f32
      %42 = vector.broadcast %cst_25 : f32 to vector<98x128xf32>
      %43 = arith.mulf %42, %41 : vector<98x128xf32>
      %44 = arith.maximumf %41, %43 : vector<98x128xf32>
      %cst_26 = arith.constant 0.000000e+00 : bf16
      %45 = vector.broadcast %cst_26 : bf16 to vector<2x2x3200xbf16>
      %c0_27 = arith.constant 0 : index
      %c0_28 = arith.constant 0 : index
      %c0_29 = arith.constant 0 : index
      %46 = vector.load %arg13[%c0_27, %c0_28, %c0_29] : memref<2x2x3200xbf16, #tpu.memory_space<vmem>>, vector<2x2x3200xbf16>
      tpu.vector_store %arg13[%c0_27, %c0_28, %c0_29], %45 {strides = array<i32>} : memref<2x2x3200xbf16, #tpu.memory_space<vmem>>, vector<2x2x3200xbf16>,
      %47 = vector.extract_strided_slice %44 {offsets = [0, 0], sizes = [2, 128], strides = [1, 1]} : vector<98x128xf32> to vector<2x128xf32>
      %48 = arith.truncf %47 : vector<2x128xf32> to vector<2x128xbf16>
      %c0_30 = arith.constant 0 : index
      %c0_31 = arith.constant 0 : index
      %c0_32 = arith.constant 0 : index
      %49 = vector.load %arg13[%c0_30, %c0_31, %c0_32] : memref<2x2x3200xbf16, #tpu.memory_space<vmem>>, vector<1x2x128xbf16>
      %50 = vector.shape_cast %49 : vector<1x2x128xbf16> to vector<2x128xbf16>
      %51 = vector.shape_cast %48 : vector<2x128xbf16> to vector<1x2x128xbf16>
      tpu.vector_store %arg13[%c0_30, %c0_31, %c0_32], %51 {strides = array<i32>} : memref<2x2x3200xbf16, #tpu.memory_space<vmem>>, vector<1x2x128xbf16>,
      %52 = vector.extract_strided_slice %44 {offsets = [2, 0], sizes = [2, 128], strides = [1, 1]} : vector<98x128xf32> to vector<2x128xf32>
      %53 = arith.truncf %52 : vector<2x128xf32> to vector<2x128xbf16>
      %c0_33 = arith.constant 0 : index
      %c0_34 = arith.constant 0 : index
      %c128 = arith.constant 128 : index
      %54 = vector.load %arg13[%c0_33, %c0_34, %c128] : memref<2x2x3200xbf16, #tpu.memory_space<vmem>>, vector<1x2x128xbf16>
      %55 = vector.shape_cast %54 : vector<1x2x128xbf16> to vector<2x128xbf16>
      %56 = vector.shape_cast %53 : vector<2x128xbf16> to vector<1x2x128xbf16>
      tpu.vector_store %arg13[%c0_33, %c0_34, %c128], %56 {strides = array<i32>} : memref<2x2x3200xbf16, #tpu.memory_space<vmem>>, vector<1x2x128xbf16>,
      %57 = vector.extract_strided_slice %44 {offsets = [4, 0], sizes = [2, 128], strides = [1, 1]} : vector<98x128xf32> to vector<2x128xf32>
      %58 = arith.truncf %57 : vector<2x128xf32> to vector<2x128xbf16>
      %c0_35 = arith.constant 0 : index
      %c0_36 = arith.constant 0 : index
      %c256 = arith.constant 256 : index
      %59 = vector.load %arg13[%c0_35, %c0_36, %c256] : memref<2x2x3200xbf16, #tpu.memory_space<vmem>>, vector<1x2x128xbf16>
      %60 = vector.shape_cast %59 : vector<1x2x128xbf16> to vector<2x128xbf16>
      %61 = vector.shape_cast %58 : vector<2x128xbf16> to vector<1x2x128xbf16>
      tpu.vector_store %arg13[%c0_35, %c0_36, %c256], %61 {strides = array<i32>} : memref<2x2x3200xbf16, #tpu.memory_space<vmem>>, vector<1x2x128xbf16>,
      %62 = vector.extract_strided_slice %44 {offsets = [6, 0], sizes = [2, 128], strides = [1, 1]} : vector<98x128xf32> to vector<2x128xf32>
      %63 = arith.truncf %62 : vector<2x128xf32> to vector<2x128xbf16>
      %c0_37 = arith.constant 0 : index
      %c0_38 = arith.constant 0 : index
      %c384 = arith.constant 384 : index
      %64 = vector.load %arg13[%c0_37, %c0_38, %c384] : memref<2x2x3200xbf16, #tpu.memory_space<vmem>>, vector<1x2x128xbf16>
      %65 = vector.shape_cast %64 : vector<1x2x128xbf16> to vector<2x128xbf16>
      %66 = vector.shape_cast %63 : vector<2x128xbf16> to vector<1x2x128xbf16>
      tpu.vector_store %arg13[%c0_37, %c0_38, %c384], %66 {strides = array<i32>} : memref<2x2x3200xbf16, #tpu.memory_space<vmem>>, vector<1x2x128xbf16>,
      %67 = vector.extract_strided_slice %44 {offsets = [8, 0], sizes = [2, 128], strides = [1, 1]} : vector<98x128xf32> to vector<2x128xf32>
      %68 = arith.truncf %67 : vector<2x128xf32> to vector<2x128xbf16>
      %c0_39 = arith.constant 0 : index
      %c0_40 = arith.constant 0 : index
      %c512 = arith.constant 512 : index
      %69 = vector.load %arg13[%c0_39, %c0_40, %c512] : memref<2x2x3200xbf16, #tpu.memory_space<vmem>>, vector<1x2x128xbf16>
      %70 = vector.shape_cast %69 : vector<1x2x128xbf16> to vector<2x128xbf16>
      %71 = vector.shape_cast %68 : vector<2x128xbf16> to vector<1x2x128xbf16>
      tpu.vector_store %arg13[%c0_39, %c0_40, %c512], %71 {strides = array<i32>} : memref<2x2x3200xbf16, #tpu.memory_space<vmem>>, vector<1x2x128xbf16>,
      %72 = vector.extract_strided_slice %44 {offsets = [10, 0], sizes = [2, 128], strides = [1, 1]} : vector<98x128xf32> to vector<2x128xf32>
      %73 = arith.truncf %72 : vector<2x128xf32> to vector<2x128xbf16>
      %c0_41 = arith.constant 0 : index
      %c0_42 = arith.constant 0 : index
      %c640 = arith.constant 640 : index
      %74 = vector.load %arg13[%c0_41, %c0_42, %c640] : memref<2x2x3200xbf16, #tpu.memory_space<vmem>>, vector<1x2x128xbf16>
      %75 = vector.shape_cast %74 : vector<1x2x128xbf16> to vector<2x128xbf16>
      %76 = vector.shape_cast %73 : vector<2x128xbf16> to vector<1x2x128xbf16>
      tpu.vector_store %arg13[%c0_41, %c0_42, %c640], %76 {strides = array<i32>} : memref<2x2x3200xbf16, #tpu.memory_space<vmem>>, vector<1x2x128xbf16>,
      %77 = vector.extract_strided_slice %44 {offsets = [12, 0], sizes = [2, 128], strides = [1, 1]} : vector<98x128xf32> to vector<2x128xf32>
      %78 = arith.truncf %77 : vector<2x128xf32> to vector<2x128xbf16>
      %c0_43 = arith.constant 0 : index
      %c0_44 = arith.constant 0 : index
      %c768 = arith.constant 768 : index
      %79 = vector.load %arg13[%c0_43, %c0_44, %c768] : memref<2x2x3200xbf16, #tpu.memory_space<vmem>>, vector<1x2x128xbf16>
      %80 = vector.shape_cast %79 : vector<1x2x128xbf16> to vector<2x128xbf16>
      %81 = vector.shape_cast %78 : vector<2x128xbf16> to vector<1x2x128xbf16>
      tpu.vector_store %arg13[%c0_43, %c0_44, %c768], %81 {strides = array<i32>} : memref<2x2x3200xbf16, #tpu.memory_space<vmem>>, vector<1x2x128xbf16>,
      %82 = vector.extract_strided_slice %44 {offsets = [14, 0], sizes = [2, 128], strides = [1, 1]} : vector<98x128xf32> to vector<2x128xf32>
      %83 = arith.truncf %82 : vector<2x128xf32> to vector<2x128xbf16>
      %c0_45 = arith.constant 0 : index
      %c0_46 = arith.constant 0 : index
      %c896 = arith.constant 896 : index
      %84 = vector.load %arg13[%c0_45, %c0_46, %c896] : memref<2x2x3200xbf16, #tpu.memory_space<vmem>>, vector<1x2x128xbf16>
      %85 = vector.shape_cast %84 : vector<1x2x128xbf16> to vector<2x128xbf16>
      %86 = vector.shape_cast %83 : vector<2x128xbf16> to vector<1x2x128xbf16>
      tpu.vector_store %arg13[%c0_45, %c0_46, %c896], %86 {strides = array<i32>} : memref<2x2x3200xbf16, #tpu.memory_space<vmem>>, vector<1x2x128xbf16>,
      %87 = vector.extract_strided_slice %44 {offsets = [16, 0], sizes = [2, 128], strides = [1, 1]} : vector<98x128xf32> to vector<2x128xf32>
      %88 = arith.truncf %87 : vector<2x128xf32> to vector<2x128xbf16>
      %c0_47 = arith.constant 0 : index
      %c0_48 = arith.constant 0 : index
      %c1024 = arith.constant 1024 : index
      %89 = vector.load %arg13[%c0_47, %c0_48, %c1024] : memref<2x2x3200xbf16, #tpu.memory_space<vmem>>, vector<1x2x128xbf16>
      %90 = vector.shape_cast %89 : vector<1x2x128xbf16> to vector<2x128xbf16>
      %91 = vector.shape_cast %88 : vector<2x128xbf16> to vector<1x2x128xbf16>
      tpu.vector_store %arg13[%c0_47, %c0_48, %c1024], %91 {strides = array<i32>} : memref<2x2x3200xbf16, #tpu.memory_space<vmem>>, vector<1x2x128xbf16>,
      %92 = vector.extract_strided_slice %44 {offsets = [18, 0], sizes = [2, 128], strides = [1, 1]} : vector<98x128xf32> to vector<2x128xf32>
      %93 = arith.truncf %92 : vector<2x128xf32> to vector<2x128xbf16>
      %c0_49 = arith.constant 0 : index
      %c0_50 = arith.constant 0 : index
      %c1152 = arith.constant 1152 : index
      %94 = vector.load %arg13[%c0_49, %c0_50, %c1152] : memref<2x2x3200xbf16, #tpu.memory_space<vmem>>, vector<1x2x128xbf16>
      %95 = vector.shape_cast %94 : vector<1x2x128xbf16> to vector<2x128xbf16>
      %96 = vector.shape_cast %93 : vector<2x128xbf16> to vector<1x2x128xbf16>
      tpu.vector_store %arg13[%c0_49, %c0_50, %c1152], %96 {strides = array<i32>} : memref<2x2x3200xbf16, #tpu.memory_space<vmem>>, vector<1x2x128xbf16>,
      %97 = vector.extract_strided_slice %44 {offsets = [20, 0], sizes = [2, 128], strides = [1, 1]} : vector<98x128xf32> to vector<2x128xf32>
      %98 = arith.truncf %97 : vector<2x128xf32> to vector<2x128xbf16>
      %c0_51 = arith.constant 0 : index
      %c0_52 = arith.constant 0 : index
      %c1280 = arith.constant 1280 : index
      %99 = vector.load %arg13[%c0_51, %c0_52, %c1280] : memref<2x2x3200xbf16, #tpu.memory_space<vmem>>, vector<1x2x128xbf16>
      %100 = vector.shape_cast %99 : vector<1x2x128xbf16> to vector<2x128xbf16>
      %101 = vector.shape_cast %98 : vector<2x128xbf16> to vector<1x2x128xbf16>
      tpu.vector_store %arg13[%c0_51, %c0_52, %c1280], %101 {strides = array<i32>} : memref<2x2x3200xbf16, #tpu.memory_space<vmem>>, vector<1x2x128xbf16>,
      %102 = vector.extract_strided_slice %44 {offsets = [22, 0], sizes = [2, 128], strides = [1, 1]} : vector<98x128xf32> to vector<2x128xf32>
      %103 = arith.truncf %102 : vector<2x128xf32> to vector<2x128xbf16>
      %c0_53 = arith.constant 0 : index
      %c0_54 = arith.constant 0 : index
      %c1408 = arith.constant 1408 : index
      %104 = vector.load %arg13[%c0_53, %c0_54, %c1408] : memref<2x2x3200xbf16, #tpu.memory_space<vmem>>, vector<1x2x128xbf16>
      %105 = vector.shape_cast %104 : vector<1x2x128xbf16> to vector<2x128xbf16>
      %106 = vector.shape_cast %103 : vector<2x128xbf16> to vector<1x2x128xbf16>
      tpu.vector_store %arg13[%c0_53, %c0_54, %c1408], %106 {strides = array<i32>} : memref<2x2x3200xbf16, #tpu.memory_space<vmem>>, vector<1x2x128xbf16>,
      %107 = vector.extract_strided_slice %44 {offsets = [24, 0], sizes = [2, 128], strides = [1, 1]} : vector<98x128xf32> to vector<2x128xf32>
      %108 = arith.truncf %107 : vector<2x128xf32> to vector<2x128xbf16>
      %c0_55 = arith.constant 0 : index
      %c0_56 = arith.constant 0 : index
      %c1536 = arith.constant 1536 : index
      %109 = vector.load %arg13[%c0_55, %c0_56, %c1536] : memref<2x2x3200xbf16, #tpu.memory_space<vmem>>, vector<1x2x128xbf16>
      %110 = vector.shape_cast %109 : vector<1x2x128xbf16> to vector<2x128xbf16>
      %111 = vector.shape_cast %108 : vector<2x128xbf16> to vector<1x2x128xbf16>
      tpu.vector_store %arg13[%c0_55, %c0_56, %c1536], %111 {strides = array<i32>} : memref<2x2x3200xbf16, #tpu.memory_space<vmem>>, vector<1x2x128xbf16>,
      %112 = vector.extract_strided_slice %44 {offsets = [26, 0], sizes = [2, 128], strides = [1, 1]} : vector<98x128xf32> to vector<2x128xf32>
      %113 = arith.truncf %112 : vector<2x128xf32> to vector<2x128xbf16>
      %c0_57 = arith.constant 0 : index
      %c0_58 = arith.constant 0 : index
      %c1664 = arith.constant 1664 : index
      %114 = vector.load %arg13[%c0_57, %c0_58, %c1664] : memref<2x2x3200xbf16, #tpu.memory_space<vmem>>, vector<1x2x128xbf16>
      %115 = vector.shape_cast %114 : vector<1x2x128xbf16> to vector<2x128xbf16>
      %116 = vector.shape_cast %113 : vector<2x128xbf16> to vector<1x2x128xbf16>
      tpu.vector_store %arg13[%c0_57, %c0_58, %c1664], %116 {strides = array<i32>} : memref<2x2x3200xbf16, #tpu.memory_space<vmem>>, vector<1x2x128xbf16>,
      %117 = vector.extract_strided_slice %44 {offsets = [28, 0], sizes = [2, 128], strides = [1, 1]} : vector<98x128xf32> to vector<2x128xf32>
      %118 = arith.truncf %117 : vector<2x128xf32> to vector<2x128xbf16>
      %c0_59 = arith.constant 0 : index
      %c0_60 = arith.constant 0 : index
      %c1792 = arith.constant 1792 : index
      %119 = vector.load %arg13[%c0_59, %c0_60, %c1792] : memref<2x2x3200xbf16, #tpu.memory_space<vmem>>, vector<1x2x128xbf16>
      %120 = vector.shape_cast %119 : vector<1x2x128xbf16> to vector<2x128xbf16>
      %121 = vector.shape_cast %118 : vector<2x128xbf16> to vector<1x2x128xbf16>
      tpu.vector_store %arg13[%c0_59, %c0_60, %c1792], %121 {strides = array<i32>} : memref<2x2x3200xbf16, #tpu.memory_space<vmem>>, vector<1x2x128xbf16>,
      %122 = vector.extract_strided_slice %44 {offsets = [30, 0], sizes = [2, 128], strides = [1, 1]} : vector<98x128xf32> to vector<2x128xf32>
      %123 = arith.truncf %122 : vector<2x128xf32> to vector<2x128xbf16>
      %c0_61 = arith.constant 0 : index
      %c0_62 = arith.constant 0 : index
      %c1920 = arith.constant 1920 : index
      %124 = vector.load %arg13[%c0_61, %c0_62, %c1920] : memref<2x2x3200xbf16, #tpu.memory_space<vmem>>, vector<1x2x128xbf16>
      %125 = vector.shape_cast %124 : vector<1x2x128xbf16> to vector<2x128xbf16>
      %126 = vector.shape_cast %123 : vector<2x128xbf16> to vector<1x2x128xbf16>
      tpu.vector_store %arg13[%c0_61, %c0_62, %c1920], %126 {strides = array<i32>} : memref<2x2x3200xbf16, #tpu.memory_space<vmem>>, vector<1x2x128xbf16>,
      %127 = vector.extract_strided_slice %44 {offsets = [32, 0], sizes = [2, 128], strides = [1, 1]} : vector<98x128xf32> to vector<2x128xf32>
      %128 = arith.truncf %127 : vector<2x128xf32> to vector<2x128xbf16>
      %c0_63 = arith.constant 0 : index
      %c0_64 = arith.constant 0 : index
      %c2048 = arith.constant 2048 : index
      %129 = vector.load %arg13[%c0_63, %c0_64, %c2048] : memref<2x2x3200xbf16, #tpu.memory_space<vmem>>, vector<1x2x128xbf16>
      %130 = vector.shape_cast %129 : vector<1x2x128xbf16> to vector<2x128xbf16>
      %131 = vector.shape_cast %128 : vector<2x128xbf16> to vector<1x2x128xbf16>
      tpu.vector_store %arg13[%c0_63, %c0_64, %c2048], %131 {strides = array<i32>} : memref<2x2x3200xbf16, #tpu.memory_space<vmem>>, vector<1x2x128xbf16>,
      %132 = vector.extract_strided_slice %44 {offsets = [34, 0], sizes = [2, 128], strides = [1, 1]} : vector<98x128xf32> to vector<2x128xf32>
      %133 = arith.truncf %132 : vector<2x128xf32> to vector<2x128xbf16>
      %c0_65 = arith.constant 0 : index
      %c0_66 = arith.constant 0 : index
      %c2176 = arith.constant 2176 : index
      %134 = vector.load %arg13[%c0_65, %c0_66, %c2176] : memref<2x2x3200xbf16, #tpu.memory_space<vmem>>, vector<1x2x128xbf16>
      %135 = vector.shape_cast %134 : vector<1x2x128xbf16> to vector<2x128xbf16>
      %136 = vector.shape_cast %133 : vector<2x128xbf16> to vector<1x2x128xbf16>
      tpu.vector_store %arg13[%c0_65, %c0_66, %c2176], %136 {strides = array<i32>} : memref<2x2x3200xbf16, #tpu.memory_space<vmem>>, vector<1x2x128xbf16>,
      %137 = vector.extract_strided_slice %44 {offsets = [36, 0], sizes = [2, 128], strides = [1, 1]} : vector<98x128xf32> to vector<2x128xf32>
      %138 = arith.truncf %137 : vector<2x128xf32> to vector<2x128xbf16>
      %c0_67 = arith.constant 0 : index
      %c0_68 = arith.constant 0 : index
      %c2304 = arith.constant 2304 : index
      %139 = vector.load %arg13[%c0_67, %c0_68, %c2304] : memref<2x2x3200xbf16, #tpu.memory_space<vmem>>, vector<1x2x128xbf16>
      %140 = vector.shape_cast %139 : vector<1x2x128xbf16> to vector<2x128xbf16>
      %141 = vector.shape_cast %138 : vector<2x128xbf16> to vector<1x2x128xbf16>
      tpu.vector_store %arg13[%c0_67, %c0_68, %c2304], %141 {strides = array<i32>} : memref<2x2x3200xbf16, #tpu.memory_space<vmem>>, vector<1x2x128xbf16>,
      %142 = vector.extract_strided_slice %44 {offsets = [38, 0], sizes = [2, 128], strides = [1, 1]} : vector<98x128xf32> to vector<2x128xf32>
      %143 = arith.truncf %142 : vector<2x128xf32> to vector<2x128xbf16>
      %c0_69 = arith.constant 0 : index
      %c0_70 = arith.constant 0 : index
      %c2432 = arith.constant 2432 : index
      %144 = vector.load %arg13[%c0_69, %c0_70, %c2432] : memref<2x2x3200xbf16, #tpu.memory_space<vmem>>, vector<1x2x128xbf16>
      %145 = vector.shape_cast %144 : vector<1x2x128xbf16> to vector<2x128xbf16>
      %146 = vector.shape_cast %143 : vector<2x128xbf16> to vector<1x2x128xbf16>
      tpu.vector_store %arg13[%c0_69, %c0_70, %c2432], %146 {strides = array<i32>} : memref<2x2x3200xbf16, #tpu.memory_space<vmem>>, vector<1x2x128xbf16>,
      %147 = vector.extract_strided_slice %44 {offsets = [40, 0], sizes = [2, 128], strides = [1, 1]} : vector<98x128xf32> to vector<2x128xf32>
      %148 = arith.truncf %147 : vector<2x128xf32> to vector<2x128xbf16>
      %c0_71 = arith.constant 0 : index
      %c0_72 = arith.constant 0 : index
      %c2560 = arith.constant 2560 : index
      %149 = vector.load %arg13[%c0_71, %c0_72, %c2560] : memref<2x2x3200xbf16, #tpu.memory_space<vmem>>, vector<1x2x128xbf16>
      %150 = vector.shape_cast %149 : vector<1x2x128xbf16> to vector<2x128xbf16>
      %151 = vector.shape_cast %148 : vector<2x128xbf16> to vector<1x2x128xbf16>
      tpu.vector_store %arg13[%c0_71, %c0_72, %c2560], %151 {strides = array<i32>} : memref<2x2x3200xbf16, #tpu.memory_space<vmem>>, vector<1x2x128xbf16>,
      %152 = vector.extract_strided_slice %44 {offsets = [42, 0], sizes = [2, 128], strides = [1, 1]} : vector<98x128xf32> to vector<2x128xf32>
      %153 = arith.truncf %152 : vector<2x128xf32> to vector<2x128xbf16>
      %c0_73 = arith.constant 0 : index
      %c0_74 = arith.constant 0 : index
      %c2688 = arith.constant 2688 : index
      %154 = vector.load %arg13[%c0_73, %c0_74, %c2688] : memref<2x2x3200xbf16, #tpu.memory_space<vmem>>, vector<1x2x128xbf16>
      %155 = vector.shape_cast %154 : vector<1x2x128xbf16> to vector<2x128xbf16>
      %156 = vector.shape_cast %153 : vector<2x128xbf16> to vector<1x2x128xbf16>
      tpu.vector_store %arg13[%c0_73, %c0_74, %c2688], %156 {strides = array<i32>} : memref<2x2x3200xbf16, #tpu.memory_space<vmem>>, vector<1x2x128xbf16>,
      %157 = vector.extract_strided_slice %44 {offsets = [44, 0], sizes = [2, 128], strides = [1, 1]} : vector<98x128xf32> to vector<2x128xf32>
      %158 = arith.truncf %157 : vector<2x128xf32> to vector<2x128xbf16>
      %c0_75 = arith.constant 0 : index
      %c0_76 = arith.constant 0 : index
      %c2816 = arith.constant 2816 : index
      %159 = vector.load %arg13[%c0_75, %c0_76, %c2816] : memref<2x2x3200xbf16, #tpu.memory_space<vmem>>, vector<1x2x128xbf16>
      %160 = vector.shape_cast %159 : vector<1x2x128xbf16> to vector<2x128xbf16>
      %161 = vector.shape_cast %158 : vector<2x128xbf16> to vector<1x2x128xbf16>
      tpu.vector_store %arg13[%c0_75, %c0_76, %c2816], %161 {strides = array<i32>} : memref<2x2x3200xbf16, #tpu.memory_space<vmem>>, vector<1x2x128xbf16>,
      %162 = vector.extract_strided_slice %44 {offsets = [46, 0], sizes = [2, 128], strides = [1, 1]} : vector<98x128xf32> to vector<2x128xf32>
      %163 = arith.truncf %162 : vector<2x128xf32> to vector<2x128xbf16>
      %c0_77 = arith.constant 0 : index
      %c0_78 = arith.constant 0 : index
      %c2944 = arith.constant 2944 : index
      %164 = vector.load %arg13[%c0_77, %c0_78, %c2944] : memref<2x2x3200xbf16, #tpu.memory_space<vmem>>, vector<1x2x128xbf16>
      %165 = vector.shape_cast %164 : vector<1x2x128xbf16> to vector<2x128xbf16>
      %166 = vector.shape_cast %163 : vector<2x128xbf16> to vector<1x2x128xbf16>
      tpu.vector_store %arg13[%c0_77, %c0_78, %c2944], %166 {strides = array<i32>} : memref<2x2x3200xbf16, #tpu.memory_space<vmem>>, vector<1x2x128xbf16>,
      %167 = vector.extract_strided_slice %44 {offsets = [48, 0], sizes = [2, 128], strides = [1, 1]} : vector<98x128xf32> to vector<2x128xf32>
      %168 = arith.truncf %167 : vector<2x128xf32> to vector<2x128xbf16>
      %c0_79 = arith.constant 0 : index
      %c0_80 = arith.constant 0 : index
      %c3072 = arith.constant 3072 : index
      %169 = vector.load %arg13[%c0_79, %c0_80, %c3072] : memref<2x2x3200xbf16, #tpu.memory_space<vmem>>, vector<1x2x128xbf16>
      %170 = vector.shape_cast %169 : vector<1x2x128xbf16> to vector<2x128xbf16>
      %171 = vector.shape_cast %168 : vector<2x128xbf16> to vector<1x2x128xbf16>
      tpu.vector_store %arg13[%c0_79, %c0_80, %c3072], %171 {strides = array<i32>} : memref<2x2x3200xbf16, #tpu.memory_space<vmem>>, vector<1x2x128xbf16>,
      %172 = vector.extract_strided_slice %44 {offsets = [50, 0], sizes = [2, 128], strides = [1, 1]} : vector<98x128xf32> to vector<2x128xf32>
      %173 = arith.truncf %172 : vector<2x128xf32> to vector<2x128xbf16>
      %c1 = arith.constant 1 : index
      %c0_81 = arith.constant 0 : index
      %c0_82 = arith.constant 0 : index
      %174 = vector.load %arg13[%c1, %c0_81, %c0_82] : memref<2x2x3200xbf16, #tpu.memory_space<vmem>>, vector<1x2x128xbf16>
      %175 = vector.shape_cast %174 : vector<1x2x128xbf16> to vector<2x128xbf16>
      %176 = vector.shape_cast %173 : vector<2x128xbf16> to vector<1x2x128xbf16>
      tpu.vector_store %arg13[%c1, %c0_81, %c0_82], %176 {strides = array<i32>} : memref<2x2x3200xbf16, #tpu.memory_space<vmem>>, vector<1x2x128xbf16>,
      %177 = vector.extract_strided_slice %44 {offsets = [52, 0], sizes = [2, 128], strides = [1, 1]} : vector<98x128xf32> to vector<2x128xf32>
      %178 = arith.truncf %177 : vector<2x128xf32> to vector<2x128xbf16>
      %c1_83 = arith.constant 1 : index
      %c0_84 = arith.constant 0 : index
      %c128_85 = arith.constant 128 : index
      %179 = vector.load %arg13[%c1_83, %c0_84, %c128_85] : memref<2x2x3200xbf16, #tpu.memory_space<vmem>>, vector<1x2x128xbf16>
      %180 = vector.shape_cast %179 : vector<1x2x128xbf16> to vector<2x128xbf16>
      %181 = vector.shape_cast %178 : vector<2x128xbf16> to vector<1x2x128xbf16>
      tpu.vector_store %arg13[%c1_83, %c0_84, %c128_85], %181 {strides = array<i32>} : memref<2x2x3200xbf16, #tpu.memory_space<vmem>>, vector<1x2x128xbf16>,
      %182 = vector.extract_strided_slice %44 {offsets = [54, 0], sizes = [2, 128], strides = [1, 1]} : vector<98x128xf32> to vector<2x128xf32>
      %183 = arith.truncf %182 : vector<2x128xf32> to vector<2x128xbf16>
      %c1_86 = arith.constant 1 : index
      %c0_87 = arith.constant 0 : index
      %c256_88 = arith.constant 256 : index
      %184 = vector.load %arg13[%c1_86, %c0_87, %c256_88] : memref<2x2x3200xbf16, #tpu.memory_space<vmem>>, vector<1x2x128xbf16>
      %185 = vector.shape_cast %184 : vector<1x2x128xbf16> to vector<2x128xbf16>
      %186 = vector.shape_cast %183 : vector<2x128xbf16> to vector<1x2x128xbf16>
      tpu.vector_store %arg13[%c1_86, %c0_87, %c256_88], %186 {strides = array<i32>} : memref<2x2x3200xbf16, #tpu.memory_space<vmem>>, vector<1x2x128xbf16>,
      %187 = vector.extract_strided_slice %44 {offsets = [56, 0], sizes = [2, 128], strides = [1, 1]} : vector<98x128xf32> to vector<2x128xf32>
      %188 = arith.truncf %187 : vector<2x128xf32> to vector<2x128xbf16>
      %c1_89 = arith.constant 1 : index
      %c0_90 = arith.constant 0 : index
      %c384_91 = arith.constant 384 : index
      %189 = vector.load %arg13[%c1_89, %c0_90, %c384_91] : memref<2x2x3200xbf16, #tpu.memory_space<vmem>>, vector<1x2x128xbf16>
      %190 = vector.shape_cast %189 : vector<1x2x128xbf16> to vector<2x128xbf16>
      %191 = vector.shape_cast %188 : vector<2x128xbf16> to vector<1x2x128xbf16>
      tpu.vector_store %arg13[%c1_89, %c0_90, %c384_91], %191 {strides = array<i32>} : memref<2x2x3200xbf16, #tpu.memory_space<vmem>>, vector<1x2x128xbf16>,
      %192 = vector.extract_strided_slice %44 {offsets = [58, 0], sizes = [2, 128], strides = [1, 1]} : vector<98x128xf32> to vector<2x128xf32>
      %193 = arith.truncf %192 : vector<2x128xf32> to vector<2x128xbf16>
      %c1_92 = arith.constant 1 : index
      %c0_93 = arith.constant 0 : index
      %c512_94 = arith.constant 512 : index
      %194 = vector.load %arg13[%c1_92, %c0_93, %c512_94] : memref<2x2x3200xbf16, #tpu.memory_space<vmem>>, vector<1x2x128xbf16>
      %195 = vector.shape_cast %194 : vector<1x2x128xbf16> to vector<2x128xbf16>
      %196 = vector.shape_cast %193 : vector<2x128xbf16> to vector<1x2x128xbf16>
      tpu.vector_store %arg13[%c1_92, %c0_93, %c512_94], %196 {strides = array<i32>} : memref<2x2x3200xbf16, #tpu.memory_space<vmem>>, vector<1x2x128xbf16>,
      %197 = vector.extract_strided_slice %44 {offsets = [60, 0], sizes = [2, 128], strides = [1, 1]} : vector<98x128xf32> to vector<2x128xf32>
      %198 = arith.truncf %197 : vector<2x128xf32> to vector<2x128xbf16>
      %c1_95 = arith.constant 1 : index
      %c0_96 = arith.constant 0 : index
      %c640_97 = arith.constant 640 : index
      %199 = vector.load %arg13[%c1_95, %c0_96, %c640_97] : memref<2x2x3200xbf16, #tpu.memory_space<vmem>>, vector<1x2x128xbf16>
      %200 = vector.shape_cast %199 : vector<1x2x128xbf16> to vector<2x128xbf16>
      %201 = vector.shape_cast %198 : vector<2x128xbf16> to vector<1x2x128xbf16>
      tpu.vector_store %arg13[%c1_95, %c0_96, %c640_97], %201 {strides = array<i32>} : memref<2x2x3200xbf16, #tpu.memory_space<vmem>>, vector<1x2x128xbf16>,
      %202 = vector.extract_strided_slice %44 {offsets = [62, 0], sizes = [2, 128], strides = [1, 1]} : vector<98x128xf32> to vector<2x128xf32>
      %203 = arith.truncf %202 : vector<2x128xf32> to vector<2x128xbf16>
      %c1_98 = arith.constant 1 : index
      %c0_99 = arith.constant 0 : index
      %c768_100 = arith.constant 768 : index
      %204 = vector.load %arg13[%c1_98, %c0_99, %c768_100] : memref<2x2x3200xbf16, #tpu.memory_space<vmem>>, vector<1x2x128xbf16>
      %205 = vector.shape_cast %204 : vector<1x2x128xbf16> to vector<2x128xbf16>
      %206 = vector.shape_cast %203 : vector<2x128xbf16> to vector<1x2x128xbf16>
      tpu.vector_store %arg13[%c1_98, %c0_99, %c768_100], %206 {strides = array<i32>} : memref<2x2x3200xbf16, #tpu.memory_space<vmem>>, vector<1x2x128xbf16>,
      %207 = vector.extract_strided_slice %44 {offsets = [64, 0], sizes = [2, 128], strides = [1, 1]} : vector<98x128xf32> to vector<2x128xf32>
      %208 = arith.truncf %207 : vector<2x128xf32> to vector<2x128xbf16>
      %c1_101 = arith.constant 1 : index
      %c0_102 = arith.constant 0 : index
      %c896_103 = arith.constant 896 : index
      %209 = vector.load %arg13[%c1_101, %c0_102, %c896_103] : memref<2x2x3200xbf16, #tpu.memory_space<vmem>>, vector<1x2x128xbf16>
      %210 = vector.shape_cast %209 : vector<1x2x128xbf16> to vector<2x128xbf16>
      %211 = vector.shape_cast %208 : vector<2x128xbf16> to vector<1x2x128xbf16>
      tpu.vector_store %arg13[%c1_101, %c0_102, %c896_103], %211 {strides = array<i32>} : memref<2x2x3200xbf16, #tpu.memory_space<vmem>>, vector<1x2x128xbf16>,
      %212 = vector.extract_strided_slice %44 {offsets = [66, 0], sizes = [2, 128], strides = [1, 1]} : vector<98x128xf32> to vector<2x128xf32>
      %213 = arith.truncf %212 : vector<2x128xf32> to vector<2x128xbf16>
      %c1_104 = arith.constant 1 : index
      %c0_105 = arith.constant 0 : index
      %c1024_106 = arith.constant 1024 : index
      %214 = vector.load %arg13[%c1_104, %c0_105, %c1024_106] : memref<2x2x3200xbf16, #tpu.memory_space<vmem>>, vector<1x2x128xbf16>
      %215 = vector.shape_cast %214 : vector<1x2x128xbf16> to vector<2x128xbf16>
      %216 = vector.shape_cast %213 : vector<2x128xbf16> to vector<1x2x128xbf16>
      tpu.vector_store %arg13[%c1_104, %c0_105, %c1024_106], %216 {strides = array<i32>} : memref<2x2x3200xbf16, #tpu.memory_space<vmem>>, vector<1x2x128xbf16>,
      %217 = vector.extract_strided_slice %44 {offsets = [68, 0], sizes = [2, 128], strides = [1, 1]} : vector<98x128xf32> to vector<2x128xf32>
      %218 = arith.truncf %217 : vector<2x128xf32> to vector<2x128xbf16>
      %c1_107 = arith.constant 1 : index
      %c0_108 = arith.constant 0 : index
      %c1152_109 = arith.constant 1152 : index
      %219 = vector.load %arg13[%c1_107, %c0_108, %c1152_109] : memref<2x2x3200xbf16, #tpu.memory_space<vmem>>, vector<1x2x128xbf16>
      %220 = vector.shape_cast %219 : vector<1x2x128xbf16> to vector<2x128xbf16>
      %221 = vector.shape_cast %218 : vector<2x128xbf16> to vector<1x2x128xbf16>
      tpu.vector_store %arg13[%c1_107, %c0_108, %c1152_109], %221 {strides = array<i32>} : memref<2x2x3200xbf16, #tpu.memory_space<vmem>>, vector<1x2x128xbf16>,
      %222 = vector.extract_strided_slice %44 {offsets = [70, 0], sizes = [2, 128], strides = [1, 1]} : vector<98x128xf32> to vector<2x128xf32>
      %223 = arith.truncf %222 : vector<2x128xf32> to vector<2x128xbf16>
      %c1_110 = arith.constant 1 : index
      %c0_111 = arith.constant 0 : index
      %c1280_112 = arith.constant 1280 : index
      %224 = vector.load %arg13[%c1_110, %c0_111, %c1280_112] : memref<2x2x3200xbf16, #tpu.memory_space<vmem>>, vector<1x2x128xbf16>
      %225 = vector.shape_cast %224 : vector<1x2x128xbf16> to vector<2x128xbf16>
      %226 = vector.shape_cast %223 : vector<2x128xbf16> to vector<1x2x128xbf16>
      tpu.vector_store %arg13[%c1_110, %c0_111, %c1280_112], %226 {strides = array<i32>} : memref<2x2x3200xbf16, #tpu.memory_space<vmem>>, vector<1x2x128xbf16>,
      %227 = vector.extract_strided_slice %44 {offsets = [72, 0], sizes = [2, 128], strides = [1, 1]} : vector<98x128xf32> to vector<2x128xf32>
      %228 = arith.truncf %227 : vector<2x128xf32> to vector<2x128xbf16>
      %c1_113 = arith.constant 1 : index
      %c0_114 = arith.constant 0 : index
      %c1408_115 = arith.constant 1408 : index
      %229 = vector.load %arg13[%c1_113, %c0_114, %c1408_115] : memref<2x2x3200xbf16, #tpu.memory_space<vmem>>, vector<1x2x128xbf16>
      %230 = vector.shape_cast %229 : vector<1x2x128xbf16> to vector<2x128xbf16>
      %231 = vector.shape_cast %228 : vector<2x128xbf16> to vector<1x2x128xbf16>
      tpu.vector_store %arg13[%c1_113, %c0_114, %c1408_115], %231 {strides = array<i32>} : memref<2x2x3200xbf16, #tpu.memory_space<vmem>>, vector<1x2x128xbf16>,
      %232 = vector.extract_strided_slice %44 {offsets = [74, 0], sizes = [2, 128], strides = [1, 1]} : vector<98x128xf32> to vector<2x128xf32>
      %233 = arith.truncf %232 : vector<2x128xf32> to vector<2x128xbf16>
      %c1_116 = arith.constant 1 : index
      %c0_117 = arith.constant 0 : index
      %c1536_118 = arith.constant 1536 : index
      %234 = vector.load %arg13[%c1_116, %c0_117, %c1536_118] : memref<2x2x3200xbf16, #tpu.memory_space<vmem>>, vector<1x2x128xbf16>
      %235 = vector.shape_cast %234 : vector<1x2x128xbf16> to vector<2x128xbf16>
      %236 = vector.shape_cast %233 : vector<2x128xbf16> to vector<1x2x128xbf16>
      tpu.vector_store %arg13[%c1_116, %c0_117, %c1536_118], %236 {strides = array<i32>} : memref<2x2x3200xbf16, #tpu.memory_space<vmem>>, vector<1x2x128xbf16>,
      %237 = vector.extract_strided_slice %44 {offsets = [76, 0], sizes = [2, 128], strides = [1, 1]} : vector<98x128xf32> to vector<2x128xf32>
      %238 = arith.truncf %237 : vector<2x128xf32> to vector<2x128xbf16>
      %c1_119 = arith.constant 1 : index
      %c0_120 = arith.constant 0 : index
      %c1664_121 = arith.constant 1664 : index
      %239 = vector.load %arg13[%c1_119, %c0_120, %c1664_121] : memref<2x2x3200xbf16, #tpu.memory_space<vmem>>, vector<1x2x128xbf16>
      %240 = vector.shape_cast %239 : vector<1x2x128xbf16> to vector<2x128xbf16>
      %241 = vector.shape_cast %238 : vector<2x128xbf16> to vector<1x2x128xbf16>
      tpu.vector_store %arg13[%c1_119, %c0_120, %c1664_121], %241 {strides = array<i32>} : memref<2x2x3200xbf16, #tpu.memory_space<vmem>>, vector<1x2x128xbf16>,
      %242 = vector.extract_strided_slice %44 {offsets = [78, 0], sizes = [2, 128], strides = [1, 1]} : vector<98x128xf32> to vector<2x128xf32>
      %243 = arith.truncf %242 : vector<2x128xf32> to vector<2x128xbf16>
      %c1_122 = arith.constant 1 : index
      %c0_123 = arith.constant 0 : index
      %c1792_124 = arith.constant 1792 : index
      %244 = vector.load %arg13[%c1_122, %c0_123, %c1792_124] : memref<2x2x3200xbf16, #tpu.memory_space<vmem>>, vector<1x2x128xbf16>
      %245 = vector.shape_cast %244 : vector<1x2x128xbf16> to vector<2x128xbf16>
      %246 = vector.shape_cast %243 : vector<2x128xbf16> to vector<1x2x128xbf16>
      tpu.vector_store %arg13[%c1_122, %c0_123, %c1792_124], %246 {strides = array<i32>} : memref<2x2x3200xbf16, #tpu.memory_space<vmem>>, vector<1x2x128xbf16>,
      %247 = vector.extract_strided_slice %44 {offsets = [80, 0], sizes = [2, 128], strides = [1, 1]} : vector<98x128xf32> to vector<2x128xf32>
      %248 = arith.truncf %247 : vector<2x128xf32> to vector<2x128xbf16>
      %c1_125 = arith.constant 1 : index
      %c0_126 = arith.constant 0 : index
      %c1920_127 = arith.constant 1920 : index
      %249 = vector.load %arg13[%c1_125, %c0_126, %c1920_127] : memref<2x2x3200xbf16, #tpu.memory_space<vmem>>, vector<1x2x128xbf16>
      %250 = vector.shape_cast %249 : vector<1x2x128xbf16> to vector<2x128xbf16>
      %251 = vector.shape_cast %248 : vector<2x128xbf16> to vector<1x2x128xbf16>
      tpu.vector_store %arg13[%c1_125, %c0_126, %c1920_127], %251 {strides = array<i32>} : memref<2x2x3200xbf16, #tpu.memory_space<vmem>>, vector<1x2x128xbf16>,
      %252 = vector.extract_strided_slice %44 {offsets = [82, 0], sizes = [2, 128], strides = [1, 1]} : vector<98x128xf32> to vector<2x128xf32>
      %253 = arith.truncf %252 : vector<2x128xf32> to vector<2x128xbf16>
      %c1_128 = arith.constant 1 : index
      %c0_129 = arith.constant 0 : index
      %c2048_130 = arith.constant 2048 : index
      %254 = vector.load %arg13[%c1_128, %c0_129, %c2048_130] : memref<2x2x3200xbf16, #tpu.memory_space<vmem>>, vector<1x2x128xbf16>
      %255 = vector.shape_cast %254 : vector<1x2x128xbf16> to vector<2x128xbf16>
      %256 = vector.shape_cast %253 : vector<2x128xbf16> to vector<1x2x128xbf16>
      tpu.vector_store %arg13[%c1_128, %c0_129, %c2048_130], %256 {strides = array<i32>} : memref<2x2x3200xbf16, #tpu.memory_space<vmem>>, vector<1x2x128xbf16>,
      %257 = vector.extract_strided_slice %44 {offsets = [84, 0], sizes = [2, 128], strides = [1, 1]} : vector<98x128xf32> to vector<2x128xf32>
      %258 = arith.truncf %257 : vector<2x128xf32> to vector<2x128xbf16>
      %c1_131 = arith.constant 1 : index
      %c0_132 = arith.constant 0 : index
      %c2176_133 = arith.constant 2176 : index
      %259 = vector.load %arg13[%c1_131, %c0_132, %c2176_133] : memref<2x2x3200xbf16, #tpu.memory_space<vmem>>, vector<1x2x128xbf16>
      %260 = vector.shape_cast %259 : vector<1x2x128xbf16> to vector<2x128xbf16>
      %261 = vector.shape_cast %258 : vector<2x128xbf16> to vector<1x2x128xbf16>
      tpu.vector_store %arg13[%c1_131, %c0_132, %c2176_133], %261 {strides = array<i32>} : memref<2x2x3200xbf16, #tpu.memory_space<vmem>>, vector<1x2x128xbf16>,
      %262 = vector.extract_strided_slice %44 {offsets = [86, 0], sizes = [2, 128], strides = [1, 1]} : vector<98x128xf32> to vector<2x128xf32>
      %263 = arith.truncf %262 : vector<2x128xf32> to vector<2x128xbf16>
      %c1_134 = arith.constant 1 : index
      %c0_135 = arith.constant 0 : index
      %c2304_136 = arith.constant 2304 : index
      %264 = vector.load %arg13[%c1_134, %c0_135, %c2304_136] : memref<2x2x3200xbf16, #tpu.memory_space<vmem>>, vector<1x2x128xbf16>
      %265 = vector.shape_cast %264 : vector<1x2x128xbf16> to vector<2x128xbf16>
      %266 = vector.shape_cast %263 : vector<2x128xbf16> to vector<1x2x128xbf16>
      tpu.vector_store %arg13[%c1_134, %c0_135, %c2304_136], %266 {strides = array<i32>} : memref<2x2x3200xbf16, #tpu.memory_space<vmem>>, vector<1x2x128xbf16>,
      %267 = vector.extract_strided_slice %44 {offsets = [88, 0], sizes = [2, 128], strides = [1, 1]} : vector<98x128xf32> to vector<2x128xf32>
      %268 = arith.truncf %267 : vector<2x128xf32> to vector<2x128xbf16>
      %c1_137 = arith.constant 1 : index
      %c0_138 = arith.constant 0 : index
      %c2432_139 = arith.constant 2432 : index
      %269 = vector.load %arg13[%c1_137, %c0_138, %c2432_139] : memref<2x2x3200xbf16, #tpu.memory_space<vmem>>, vector<1x2x128xbf16>
      %270 = vector.shape_cast %269 : vector<1x2x128xbf16> to vector<2x128xbf16>
      %271 = vector.shape_cast %268 : vector<2x128xbf16> to vector<1x2x128xbf16>
      tpu.vector_store %arg13[%c1_137, %c0_138, %c2432_139], %271 {strides = array<i32>} : memref<2x2x3200xbf16, #tpu.memory_space<vmem>>, vector<1x2x128xbf16>,
      %272 = vector.extract_strided_slice %44 {offsets = [90, 0], sizes = [2, 128], strides = [1, 1]} : vector<98x128xf32> to vector<2x128xf32>
      %273 = arith.truncf %272 : vector<2x128xf32> to vector<2x128xbf16>
      %c1_140 = arith.constant 1 : index
      %c0_141 = arith.constant 0 : index
      %c2560_142 = arith.constant 2560 : index
      %274 = vector.load %arg13[%c1_140, %c0_141, %c2560_142] : memref<2x2x3200xbf16, #tpu.memory_space<vmem>>, vector<1x2x128xbf16>
      %275 = vector.shape_cast %274 : vector<1x2x128xbf16> to vector<2x128xbf16>
      %276 = vector.shape_cast %273 : vector<2x128xbf16> to vector<1x2x128xbf16>
      tpu.vector_store %arg13[%c1_140, %c0_141, %c2560_142], %276 {strides = array<i32>} : memref<2x2x3200xbf16, #tpu.memory_space<vmem>>, vector<1x2x128xbf16>,
      %277 = vector.extract_strided_slice %44 {offsets = [92, 0], sizes = [2, 128], strides = [1, 1]} : vector<98x128xf32> to vector<2x128xf32>
      %278 = arith.truncf %277 : vector<2x128xf32> to vector<2x128xbf16>
      %c1_143 = arith.constant 1 : index
      %c0_144 = arith.constant 0 : index
      %c2688_145 = arith.constant 2688 : index
      %279 = vector.load %arg13[%c1_143, %c0_144, %c2688_145] : memref<2x2x3200xbf16, #tpu.memory_space<vmem>>, vector<1x2x128xbf16>
      %280 = vector.shape_cast %279 : vector<1x2x128xbf16> to vector<2x128xbf16>
      %281 = vector.shape_cast %278 : vector<2x128xbf16> to vector<1x2x128xbf16>
      tpu.vector_store %arg13[%c1_143, %c0_144, %c2688_145], %281 {strides = array<i32>} : memref<2x2x3200xbf16, #tpu.memory_space<vmem>>, vector<1x2x128xbf16>,
      %282 = vector.extract_strided_slice %44 {offsets = [94, 0], sizes = [2, 128], strides = [1, 1]} : vector<98x128xf32> to vector<2x128xf32>
      %283 = arith.truncf %282 : vector<2x128xf32> to vector<2x128xbf16>
      %c1_146 = arith.constant 1 : index
      %c0_147 = arith.constant 0 : index
      %c2816_148 = arith.constant 2816 : index
      %284 = vector.load %arg13[%c1_146, %c0_147, %c2816_148] : memref<2x2x3200xbf16, #tpu.memory_space<vmem>>, vector<1x2x128xbf16>
      %285 = vector.shape_cast %284 : vector<1x2x128xbf16> to vector<2x128xbf16>
      %286 = vector.shape_cast %283 : vector<2x128xbf16> to vector<1x2x128xbf16>
      tpu.vector_store %arg13[%c1_146, %c0_147, %c2816_148], %286 {strides = array<i32>} : memref<2x2x3200xbf16, #tpu.memory_space<vmem>>, vector<1x2x128xbf16>,
      %287 = vector.extract_strided_slice %44 {offsets = [96, 0], sizes = [2, 128], strides = [1, 1]} : vector<98x128xf32> to vector<2x128xf32>
      %288 = arith.truncf %287 : vector<2x128xf32> to vector<2x128xbf16>
      %c1_149 = arith.constant 1 : index
      %c0_150 = arith.constant 0 : index
      %c2944_151 = arith.constant 2944 : index
      %289 = vector.load %arg13[%c1_149, %c0_150, %c2944_151] : memref<2x2x3200xbf16, #tpu.memory_space<vmem>>, vector<1x2x128xbf16>
      %290 = vector.shape_cast %289 : vector<1x2x128xbf16> to vector<2x128xbf16>
      %291 = vector.shape_cast %288 : vector<2x128xbf16> to vector<1x2x128xbf16>
      tpu.vector_store %arg13[%c1_149, %c0_150, %c2944_151], %291 {strides = array<i32>} : memref<2x2x3200xbf16, #tpu.memory_space<vmem>>, vector<1x2x128xbf16>,
      %cst_152 = arith.constant 0.000000e+00 : f32
      %292 = vector.broadcast %cst_152 : f32 to vector<2x512xf32>
      %c0_153 = arith.constant 0 : index
      %c0_154 = arith.constant 0 : index
      %293 = vector.load %arg14[%c0_153, %c0_154] : memref<2x512xf32, #tpu.memory_space<vmem>>, vector<2x512xf32>
      tpu.vector_store %arg14[%c0_153, %c0_154], %292 {strides = array<i32>} : memref<2x512xf32, #tpu.memory_space<vmem>>, vector<2x512xf32>,
    } else {
    }
    %c0 = arith.constant 0 : index
    %c0_1 = arith.constant 0 : index
    %3 = vector.load %arg14[%c0, %c0_1] : memref<2x512xf32, #tpu.memory_space<vmem>>, vector<2x512xf32>
    %4 = arith.index_cast %arg1 : i32 to index
    %c0_2 = arith.constant 0 : index
    %c0_3 = arith.constant 0 : index
    %5 = vector.load %arg13[%4, %c0_2, %c0_3] : memref<2x2x3200xbf16, #tpu.memory_space<vmem>>, vector<1x2x3200xbf16>
    %6 = vector.shape_cast %5 : vector<1x2x3200xbf16> to vector<2x3200xbf16>
    %c0_4 = arith.constant 0 : index
    %c0_5 = arith.constant 0 : index
    %7 = vector.load %arg7[%c0_4, %c0_5] : memref<3200x512xbf16, #tpu.memory_space<vmem>>, vector<3200x512xbf16>
    %cst = arith.constant dense<0.000000e+00> : vector<2x512xf32>
    %8 = tpu.matmul %6, %7, %cst {dimension_numbers = #tpu.dot_dimension_numbers<[1], [0], [0], [1], [0, 0, 1, 1], [], []>} : vector<2x3200xbf16>, vector<3200x512xbf16>, vector<2x512xf32> -> vector<2x512xf32>
    %9 = arith.addf %3, %8 : vector<2x512xf32>
    %c0_6 = arith.constant 0 : index
    %c0_7 = arith.constant 0 : index
    %10 = vector.load %arg14[%c0_6, %c0_7] : memref<2x512xf32, #tpu.memory_space<vmem>>, vector<2x512xf32>
    tpu.vector_store %arg14[%c0_6, %c0_7], %9 {strides = array<i32>} : memref<2x512xf32, #tpu.memory_space<vmem>>, vector<2x512xf32>,
    %c1_i32 = arith.constant 1 : i32
    %11 = arith.cmpi eq, %arg1, %c1_i32 : i32
    %12 = arith.extui %11 : i1 to i32
    %c0_i32_8 = arith.constant 0 : i32
    %13 = arith.cmpi ne, %12, %c0_i32_8 : i32
    scf.if %13 {
      %c0_9 = arith.constant 0 : index
      %c0_10 = arith.constant 0 : index
      %14 = vector.load %arg14[%c0_9, %c0_10] : memref<2x512xf32, #tpu.memory_space<vmem>>, vector<2x512xf32>
      %c0_11 = arith.constant 0 : index
      %c0_12 = arith.constant 0 : index
      %15 = vector.load %arg8[%c0_11, %c0_12] : memref<1x512xf32, #tpu.memory_space<vmem>>, vector<1x512xf32>
      %16 = vector.broadcast %15 : vector<1x512xf32> to vector<2x512xf32>
      %17 = arith.addf %14, %16 : vector<2x512xf32>
      %cst_13 = arith.constant dense<0.000000e+00> : vector<512xf32>
      %18 = vector.multi_reduction <add>, %17, %cst_13 [0] : vector<2x512xf32> to vector<512xf32>
      %19 = vector.shape_cast %18 : vector<512xf32> to vector<1x512xf32>
      %cst_14 = arith.constant 2.000000e+00 : f32
      %20 = vector.broadcast %cst_14 : f32 to vector<1x512xf32>
      %21 = arith.divf %19, %20 : vector<1x512xf32>
      %22 = vector.broadcast %21 : vector<1x512xf32> to vector<2x512xf32>
      %23 = arith.subf %17, %22 : vector<2x512xf32>
      %24 = arith.mulf %23, %23 : vector<2x512xf32>
      %cst_15 = arith.constant dense<0.000000e+00> : vector<512xf32>
      %25 = vector.multi_reduction <add>, %24, %cst_15 [0] : vector<2x512xf32> to vector<512xf32>
      %26 = vector.shape_cast %25 : vector<512xf32> to vector<1x512xf32>
      %cst_16 = arith.constant 2.000000e+00 : f32
      %27 = vector.broadcast %cst_16 : f32 to vector<1x512xf32>
      %28 = arith.divf %26, %27 : vector<1x512xf32>
      %cst_17 = arith.constant 9.99999974E-6 : f32
      %29 = vector.broadcast %cst_17 : f32 to vector<1x512xf32>
      %30 = arith.addf %28, %29 : vector<1x512xf32>
      %31 = math.rsqrt %30 : vector<1x512xf32>
      %32 = vector.broadcast %31 : vector<1x512xf32> to vector<2x512xf32>
      %33 = arith.mulf %23, %32 : vector<2x512xf32>
      %c0_18 = arith.constant 0 : index
      %c0_19 = arith.constant 0 : index
      %34 = vector.load %arg9[%c0_18, %c0_19] : memref<1x512xf32, #tpu.memory_space<vmem>>, vector<1x512xf32>
      %35 = vector.broadcast %34 : vector<1x512xf32> to vector<2x512xf32>
      %36 = arith.mulf %33, %35 : vector<2x512xf32>
      %c0_20 = arith.constant 0 : index
      %c0_21 = arith.constant 0 : index
      %37 = vector.load %arg10[%c0_20, %c0_21] : memref<1x512xf32, #tpu.memory_space<vmem>>, vector<1x512xf32>
      %38 = vector.broadcast %37 : vector<1x512xf32> to vector<2x512xf32>
      %39 = arith.addf %36, %38 : vector<2x512xf32>
      %cst_22 = arith.constant 2.000000e-01 : f32
      %40 = vector.broadcast %cst_22 : f32 to vector<2x512xf32>
      %41 = arith.mulf %40, %39 : vector<2x512xf32>
      %42 = arith.maximumf %39, %41 : vector<2x512xf32>
      %c0_23 = arith.constant 0 : index
      %c0_24 = arith.constant 0 : index
      %43 = vector.load %arg11[%c0_23, %c0_24] : memref<1x512xf32, #tpu.memory_space<vmem>>, vector<1x512xf32>
      %44 = vector.broadcast %43 : vector<1x512xf32> to vector<2x512xf32>
      %45 = arith.mulf %42, %44 : vector<2x512xf32>
      %cst_25 = arith.constant dense<0.000000e+00> : vector<2xf32>
      %46 = vector.multi_reduction <add>, %45, %cst_25 [1] : vector<2x512xf32> to vector<2xf32>
      %47 = vector.shape_cast %46 : vector<2xf32> to vector<2x1xf32>
      %c0_26 = arith.constant 0 : index
      %c0_27 = arith.constant 0 : index
      %c0_28 = arith.constant 0 : index
      %48 = vector.load %arg12[%c0_26, %c0_27, %c0_28] : memref<1x2x1xf32, #tpu.memory_space<vmem>>, vector<1x2x1xf32>
      %49 = vector.shape_cast %48 : vector<1x2x1xf32> to vector<2x1xf32>
      %50 = vector.shape_cast %47 : vector<2x1xf32> to vector<1x2x1xf32>
      tpu.vector_store %arg12[%c0_26, %c0_27, %c0_28], %50 {strides = array<i32>} : memref<1x2x1xf32, #tpu.memory_space<vmem>>, vector<1x2x1xf32>,
    } else {
    }
    return
  }
  func.func @transform_0(%arg0: i32, %arg1: i32) -> (i32, i32) {
    %c0_i32 = arith.constant 0 : i32
    %c0_i32_0 = arith.constant 0 : i32
    %c0_i32_1 = arith.constant 0 : i32
    return %c0_i32, %c0_i32_0 : i32, i32
  }
  func.func @transform_1(%arg0: i32, %arg1: i32) -> (i32, i32) {
    %c0_i32 = arith.constant 0 : i32
    %c0_i32_0 = arith.constant 0 : i32
    %c0_i32_1 = arith.constant 0 : i32
    return %c0_i32, %c0_i32_0 : i32, i32
  }
  func.func @transform_2(%arg0: i32, %arg1: i32) -> (i32, i32) {
    %c0_i32 = arith.constant 0 : i32
    %c0_i32_0 = arith.constant 0 : i32
    %c0_i32_1 = arith.constant 0 : i32
    return %c0_i32, %c0_i32_0 : i32, i32
  }
  func.func @transform_3(%arg0: i32, %arg1: i32) -> (i32, i32) {
    %c0_i32 = arith.constant 0 : i32
    %c0_i32_0 = arith.constant 0 : i32
    %c0_i32_1 = arith.constant 0 : i32
    return %c0_i32, %c0_i32_0 : i32, i32
  }
  func.func @transform_4(%arg0: i32, %arg1: i32) -> (i32, i32) {
    %c0_i32 = arith.constant 0 : i32
    %c0_i32_0 = arith.constant 0 : i32
    %c0_i32_1 = arith.constant 0 : i32
    return %c0_i32, %c0_i32_0 : i32, i32
  }
  func.func @transform_5(%arg0: i32, %arg1: i32) -> (i32, i32) {
    %c0_i32 = arith.constant 0 : i32
    return %arg1, %arg0 : i32, i32
  }
  func.func @transform_6(%arg0: i32, %arg1: i32) -> (i32, i32) {
    %c0_i32 = arith.constant 0 : i32
    %c0_i32_0 = arith.constant 0 : i32
    return %c0_i32, %arg0 : i32, i32
  }
  func.func @transform_7(%arg0: i32, %arg1: i32) -> (i32, i32) {
    %c0_i32 = arith.constant 0 : i32
    %c0_i32_0 = arith.constant 0 : i32
    return %c0_i32, %arg0 : i32, i32
  }
  func.func @transform_8(%arg0: i32, %arg1: i32) -> (i32, i32) {
    %c0_i32 = arith.constant 0 : i32
    %c0_i32_0 = arith.constant 0 : i32
    return %c0_i32, %arg0 : i32, i32
  }
  func.func @transform_9(%arg0: i32, %arg1: i32) -> (i32, i32) {
    %c0_i32 = arith.constant 0 : i32
    %c0_i32_0 = arith.constant 0 : i32
    return %c0_i32, %arg0 : i32, i32
  }
  func.func @transform_10(%arg0: i32, %arg1: i32) -> (i32, i32, i32) {
    %c0_i32 = arith.constant 0 : i32
    %c0_i32_0 = arith.constant 0 : i32
    %c0_i32_1 = arith.constant 0 : i32
    return %arg0, %c0_i32, %c0_i32_0 : i32, i32, i32
  }
}

</mosaic_0001>

<bundles_post_ra>
// kernel: forward_pallas.1
= control target key start
LH: loop header
LB: loop body
LE: loop exit
PB: predicated region body
PF: predicated region fallthrough
CT: control target
= control target key end

     0   :  { %s13938_s0 = inlined_call_operand.vmem [shape: bf16[98,1024], index: 0, kind: input, shape index: {}]   ;;  %s13939_s1 = inlined_call_operand.hbm [shape: bf16[1024,128], index: 1, kind: input, shape index: {}]   ;;  %s13940_s2 = inlined_call_operand.hbm [shape: f32[1,128], index: 2, kind: input, shape index: {}]   ;;  %s13941_s3 = inlined_call_operand.hbm [shape: f32[1,128], index: 3, kind: input, shape index: {}]   ;;  %s13942_s4 = inlined_call_operand.hbm [shape: f32[1,128], index: 4, kind: input, shape index: {}]   ;;  %s13943_s5 = inlined_call_operand.hbm [shape: bf16[6400,1024], index: 5, kind: input, shape index: {}]   ;;  %s13944_s6 = inlined_call_operand.hbm [shape: f32[1,1024], index: 6, kind: input, shape index: {}]   ;;  %s13945_s7 = inlined_call_operand.hbm [shape: f32[1,1024], index: 7, kind: input, shape index: {}]   ;;  %s13946_s8 = inlined_call_operand.hbm [shape: f32[1,1024], index: 8, kind: input, shape index: {}]   ;;  %s13947_s9 = inlined_call_operand.hbm [shape: f32[1,1024], index: 9, kind: input, shape index: {}]   ;;  %s13948_s10 = inlined_call_operand.vmem [shape: f32[2,2,1], index: 10, kind: output, shape index: {}]  }
   0x1   :  { %13981 = sst [smem:[#allocation29_spill]] %s13938_s0 }
   0x2   :  { %13982 = sst [smem:[#allocation30_spill]] %s13939_s1 }
   0x3   :  { %13983 = sst [smem:[#allocation31_spill]] %s13940_s2 }
   0x4   :  { %13984 = sst [smem:[#allocation32_spill]] %s13941_s3 }
   0x5   :  { %13985 = sst [smem:[#allocation33_spill]] %s13942_s4 }
   0x6   :  { %13986 = sst [smem:[#allocation34_spill]] %s13943_s5 }
   0x7   :  { %13987 = sst [smem:[#allocation35_spill]] %s13944_s6 }
   0x8   :  { %13988 = sst [smem:[#allocation36_spill]] %s13945_s7 }
   0x9   :  { %13989 = sst [smem:[#allocation37_spill]] %s13946_s8 }
   0xa   :  { %13990 = sst [smem:[#allocation38_spill]] %s13947_s9 }
   0xb   :  { %13991 = sst [smem:[#allocation39_spill]] %s13948_s10 }
   0xc   :  { %15 = vsyncpa [#allocation5], 0 }
   0xd   :  { %16 = vsyncpa [#allocation7], 0 }
   0xe   :  { %17 = vsyncpa [#allocation10], 0  ;;  %s12190_s13 = smov 0   ;;  %s12192_s14 = smov 0  }
   0xf   :  { %s12194_s15 = smov 0   ;;  %s12196_s16 = smov 0  }
  0x10   :  { %s12198_s17 = smov 0   ;;  %s12200_s18 = smov 0  }
  0x11   :  { %s12202_s19 = smov 0   ;;  %s12204_s20 = smov 0  }
  0x12   :  { %s12206_s21 = smov 0   ;;  %s12208_s22 = smov 0  }
  0x13   :  { %s12210_s23 = smov 0  }
  0x14 LB: > { %13992 = sst [smem:[#allocation21_spill]] %s12089_s17  ;;  %s13949_s24 = sadd.s32 4294967295, %s12113_s23   ;;  %s12113_s23 = sphi %s12210_s23, %s23_s23   ;;  %s12109_s22 = sphi %s12208_s22, %s14055_s22   ;;  %s12105_s21 = sphi %s12206_s21, %s14054_s21   ;;  %s12101_s20 = sphi %s12204_s20, %s14045_s20   ;;  %s12097_s19 = sphi %s12202_s19, %s14053_s19   ;;  %s12093_s18 = sphi %s12200_s18, %s14052_s18   ;;  %s12089_s17 = sphi %s12198_s17, %s14051_s17   ;;  %s12085_s16 = sphi %s12196_s16, %s14044_s16   ;;  %s12081_s15 = sphi %s12194_s15, %s14050_s15   ;;  %s12077_s14 = sphi %s12192_s14, %s14049_s14   ;;  %s12073_s13 = sphi %s12190_s13, %s14048_s13  }
  0x15   : > { %13993 = sst [smem:[#allocation22_spill]] %s12097_s19  ;;  %p162_p0 = scmp.ne.s32.totalorder %s12089_s17, %s12085_s16 }
  0x16   : > { %13994 = sst [smem:[#allocation23_spill]] %s12101_s20  ;;  %p12247_p1 = scmp.eq.s32.totalorder %s13949_s24, 0 }
  0x17   : > { %13995 = sst [smem:[#allocation24_spill]] %s12109_s22  ;;  %p8985_p2 = scmp.ge.s32.totalorder %s12113_s23, 1 }
  0x18   : > { %s13996_s25 = scalar_select %p12247_p1, 1, 0 }
  0x19   : > { %p303_p3 = scmp.lt.s32.totalorder %s12113_s23, 5  ;;  %p12255_p4 = por %p12247_p1, %p162_p0 }
  0x1a   : > { %s12115_s28 = smov [#allocation4]   ;;  %s14002_s1 = sld [smem:[#allocation30_spill]] }
  0x1b   : > { %s13997_s26 = scalar_select %p12255_p4, 1, 0 }
  0x1c   : > { %p12259_p5 = pnand %p8985_p2, %p303_p3  ;;  %s318_s29 = sshll.u32 %s12115_s28, 4  ;;  %s319_s29 = int_to_ptr.vmem [resolvable:$true] %s318_s29 }
  0x1d   : > { %13998 = sst [smem:[#allocation25_spill]] %s13997_s26 }
  0x1e   : > { %s13999_s27 = scalar_select %p12259_p5, 1, 0 }
  0x1f   : > { %p10317_p6 = pneg %p12259_p5 }
  0x20   : > { %14000 = sst [smem:[#allocation26_spill]] %s13999_s27  ;;  %s11745_s16 = scalar_lea.hbm %s14002_s1, 8192 }
  0x21   : > { %p12267_p7 = pnand %p10317_p6, %p12247_p1  ;;  %p11746_p8 = scmp.ne.s32.totalorder %s14002_s1, %s11745_s16 }
  0x22   : > { %p11752_p12 = scmp.lt.u32.totalorder %s11745_s16, %s14002_s1 }
  0x23   : > { %s14001_s30 = scalar_select %p12267_p7, 1, 0 }
  0x24   : > { %p12279_p9 = pneg %p12267_p7 }
  0x26   : > { %s14003_s28 = scalar_select %p12279_p9, 1, 0 }
  0x27   : > { %p11748_p10 = pnand %p12279_p9, %p11746_p8 }
  0x29   : > { %p11749_p11 = pneg %p11748_p10 }
  0x2b   : > { %p11754_p13 = pnand %p11752_p12, %p11749_p11 }
  0x2d   : > { %11757 = shalt.err (!%p11754_p13)
}
  0x2e   : > { %s11758_s11 = scalar_lea.vmem %s319_s29, 8192  ;;  %p11766_p6 = scmp.lt.s32.totalorder %s319_s29, %s319_s29 }
  0x2f   : > { %p11759_p0 = scmp.ne.s32.totalorder %s319_s29, %s11758_s11  ;;  %p11767_p4 = scmp.lt.s32.totalorder %s11758_s11, %s11758_s11 }
  0x31   : > { %p11761_p2 = pnand %p11759_p0, %p12279_p9  ;;  %p11768_p5 = por %p11767_p4, %p11766_p6 }
  0x33   : > { %p11762_p3 = pneg %p11761_p2 }
  0x35   : > { %p11769_p1 = pnand %p11768_p5, %p11762_p3 }
  0x37   : > { %11772 = shalt.err (!%p11769_p1)
}
  0x38   : > { %s12116_s0 = smov 64   ;;  %s12117_s10 = smov 4  }
  0x39   : > { %10320 = dma.hbm_to_vmem [thread:$0]  (!%p12267_p7), %s14002_s1, 8192, %s319_s29, [#allocation5], %s12116_s0, %s12116_s0, %s12117_s10  }
  0x3a   : > { %s32_s12 = sadd.s32 1, %s12105_s21  ;;  %s35_s16 = sadd.s32 1, %s12109_s22 }
  0x3b   : > { %p33_p1 = scmp.ge.s32.totalorder %s32_s12, 2  ;;  %s149_s11 = sadd.s32 1, %s12093_s18 }
  0x3c   : > { %p156_p4 = scmp.ne.s32.totalorder %s12093_s18, %s12089_s17  ;;  %p13968_p5 = scmp.eq.s32.totalorder %s12113_s23, 0 }
  0x3d   : > { %s14057_s12 = smov (%p33_p1, %s32_s12), 0  ;;  %s14059_s16 = smov (!%p33_p1, %s35_s16), %s12109_s22 }
  0x3e   : > { %14004 = sst [smem:[#allocation27_spill]] %s14057_s12  ;;  %s144_s20 = ssub.s32 %s12105_s21, %s14057_s12 }
  0x3f   : > { %p37_p8 = scmp.ge.s32.totalorder %s14059_s16, 2  ;;  %p13967_p10 = scmp.lt.s32.totalorder %s12113_s23, 4 }
  0x40   : > { %p12309_p11 = por %p13968_p5, %p156_p4  ;;  %s365_s0 = sand.u32 1, %s12113_s23  }
  0x41   : > { %s14061_s16 = smov (%p37_p8, %s14059_s16), 0  ;;  %s367_s10 = sand.u32 1, %s12093_s18  }
  0x42   : > { %14006 = sst [smem:[#allocation28_spill]] %s14061_s16  ;;  %s12319_s19 = ssub.s32 %s12109_s22, %s14061_s16 }
  0x43   : > { %s10289_s24 = smul.u32 6400, %s367_s10  ;;  %s146_s1 = sor.u32 %s12319_s19, %s144_s20 }
  0x44   : > { %s8991_s12 = sshll.u32 %s12109_s22, 2  ;;  %p147_p12 = scmp.eq.s32.totalorder %s146_s1, 0 }
  0x45   : > { %s9956_s26 = smul.u32 3200, %s12105_s21  ;;  %s369_s17 = scalar_lea.vmem [#allocation11], %s10289_s24 }
  0x46   : > { %s379_s27 = sshll.u32 %s369_s17, 4  ;;  %p12333_p13 = pnand %p13967_p10, %p12309_p11  ;;  %s12327_s27 = int_to_ptr.vmem [resolvable:$true] %s379_s27 }
  0x47   : > { %s12325_s9 = scalar_select %p147_p12, %s12093_s18, %s149_s11  }
  0x48   : > { %s376_s4 = sadd.s32 %s9956_s26, %s8991_s12  ;;  %s14008_s5 = sld [smem:[#allocation34_spill]] }
  0x49   : > { %s8993_s3 = sshll.u32 %s376_s4, 6  ;;  %s12342_s17 = scalar_lea.sflag [#allocation5], %s365_s0 }
  0x4a   : > { %p11775_p2 = pneg %p12333_p13 }
  0x4e   : > { %s12340_s1 = scalar_lea.hbm %s14008_s5, %s8993_s3  ;;  %s11778_s12 = scalar_lea.hbm %s14008_s5, 409600 }
  0x4f   : > { %s11773_s4 = scalar_lea.hbm %s12340_s1, 102400  ;;  %p11779_p1 = scmp.lt.u32.totalorder %s12340_s1, %s14008_s5 }
  0x50   : > { %p11774_p0 = scmp.ne.s32.totalorder %s12340_s1, %s11773_s4  ;;  %p11780_p4 = scmp.lt.u32.totalorder %s11778_s12, %s11773_s4 }
  0x51   : > { %p11782_p11 = scmp.lt.u32.totalorder %s11773_s4, %s12340_s1 }
  0x52   : > { %p11776_p3 = pnand %p11775_p2, %p11774_p0  ;;  %p11781_p8 = por %p11780_p4, %p11779_p1 }
  0x54   : > { %p11777_p6 = pneg %p11776_p3  ;;  %p11783_p12 = por %p11782_p11, %p11781_p8 }
  0x56   : > { %p11784_p10 = pnand %p11783_p12, %p11777_p6 }
  0x58   : > { %11787 = shalt.err (!%p11784_p10)
}
  0x59   : > { %s11788_s11 = scalar_lea.vmem %s12327_s27, 102400  ;;  %s12118_s29 = smov [#allocation11]  }
  0x5a   : > { %p11789_p0 = scmp.ne.s32.totalorder %s12327_s27, %s11788_s11  ;;  %s11793_s0 = sshll.u32 %s12118_s29, 4  ;;  %s11794_s0 = int_to_ptr.vmem [resolvable:$false] %s11793_s0 }
  0x5b   : > { %s11795_s24 = scalar_lea.vmem %s11794_s0, 204800  ;;  %p11796_p7 = scmp.lt.s32.totalorder %s12327_s27, %s11794_s0 }
  0x5c   : > { %p11791_p3 = pnand %p11789_p0, %p11775_p2  ;;  %p11797_p1 = scmp.lt.s32.totalorder %s11795_s24, %s11788_s11 }
  0x5e   : > { %p11792_p5 = pneg %p11791_p3  ;;  %p11798_p4 = por %p11797_p1, %p11796_p7 }
  0x60   : > { %p11799_p8 = pnand %p11798_p4, %p11792_p5 }
  0x62   : > { %11802 = shalt.err (!%p11799_p8)
}
  0x63   : > { %s12119_s10 = smov 512   ;;  %s12120_s4 = smov 256  }
  0x64   : > { %s12121_s20 = smov 16   ;;  %p173_p7 = scmp.eq.s32.totalorder %s12319_s19, 0 }
  0x65   : > { %10333 = dma.hbm_to_vmem [thread:$0]  (!%p12333_p13), %s12340_s1, 102400, %s12327_s27, %s12342_s17, %s12119_s10, %s12120_s4, %s12121_s20  }
  0x66   : > { %s175_s26 = sadd.s32 1, %s12081_s15  ;;  %p182_p5 = scmp.ne.s32.totalorder %s12081_s15, %s12077_s14 }
  0x67   : > { %s12375_s12 = scalar_select %p173_p7, %s12081_s15, %s175_s26  }
  0x68   : > { %p14009_p10 = scmp.eq.s32.totalorder %s12113_s23, 0  ;;  %p188_p6 = scmp.ne.s32.totalorder %s12077_s14, %s12073_s13 }
  0x69   : > { %s391_s3 = sand.u32 1, %s12081_s15   ;;  %s12383_s16 = sshll.u32 %s12109_s22, 6 }
  0x6a   : > { %p184_p2 = por %p182_p5, %p14009_p10  ;;  %p14010_p11 = scmp.ne.s32.totalorder %s13996_s25, 0 }
  0x6b   : > { %s12391_s8 = sshll.u32 %s391_s3, 2  ;;  %s14012_s6 = sld [smem:[#allocation35_spill]] }
  0x6c   : > { %p12387_p12 = por %p188_p6, %p14010_p11  ;;  %s393_s13 = scalar_lea.vmem [#allocation12], %s12391_s8 }
  0x6d   : > { %s401_s29 = sshll.u32 %s393_s13, 4  ;;  %p14013_p13 = scmp.lt.s32.totalorder %s12113_s23, 4  ;;  %s12406_s29 = int_to_ptr.vmem [resolvable:$true] %s401_s29 }
  0x6e   : > { %s14011_s11 = scalar_select %p12387_p12, 1, 0 }
  0x6f   : > { %p12402_p0 = pnand %p14013_p13, %p184_p2  ;;  %s14015_s7 = sld [smem:[#allocation36_spill]] }
  0x71   : > { %s12397_s1 = scalar_lea.hbm %s14012_s6, %s12383_s16  ;;  %p12418_p1 = pneg %p12402_p0 }
  0x72   : > { %s14014_s0 = scalar_select %p12402_p0, 1, 0 }
  0x73   : > { %s11803_s20 = scalar_lea.hbm %s12397_s1, 64  ;;  %s11808_s19 = scalar_lea.hbm %s14012_s6, 128 }
  0x74   : > { %p11804_p3 = scmp.ne.s32.totalorder %s12397_s1, %s11803_s20  ;;  %p11809_p7 = scmp.lt.u32.totalorder %s12397_s1, %s14012_s6 }
  0x75   : > { %s12412_s4 = scalar_lea.hbm %s14015_s7, %s12383_s16  ;;  %p11810_p5 = scmp.lt.u32.totalorder %s11808_s19, %s11803_s20 }
  0x76   : > { %s14016_s26 = scalar_select %p12418_p1, 1, 0 }
  0x77   : > { %p11806_p4 = pnand %p12418_p1, %p11804_p3  ;;  %p11811_p10 = por %p11810_p5, %p11809_p7 }
  0x78   : > { %p11812_p2 = scmp.lt.u32.totalorder %s11803_s20, %s12397_s1 }
  0x79   : > { %p11807_p8 = pneg %p11806_p4 }
  0x7a   : > { %p11813_p6 = por %p11812_p2, %p11811_p10 }
  0x7c   : > { %p11814_p11 = pnand %p11813_p6, %p11807_p8 }
  0x7e   : > { %11817 = shalt.err (!%p11814_p11)
}
  0x7f   : > { %s11818_s24 = scalar_lea.vmem %s12406_s29, 64  ;;  %s12122_s10 = smov [#allocation12]  }
  0x80   : > { %p11819_p13 = scmp.ne.s32.totalorder %s12406_s29, %s11818_s24  ;;  %s11823_s3 = sshll.u32 %s12122_s10, 4  ;;  %s11824_s3 = int_to_ptr.vmem [resolvable:$false] %s11823_s3 }
  0x81   : > { %s11825_s5 = scalar_lea.vmem %s11824_s3, 128  ;;  %p11826_p12 = scmp.lt.s32.totalorder %s12406_s29, %s11824_s3 }
  0x82   : > { %p11821_p3 = pnand %p11819_p13, %p12418_p1  ;;  %p11827_p9 = scmp.lt.s32.totalorder %s11825_s5, %s11818_s24 }
  0x84   : > { %p11822_p4 = pneg %p11821_p3  ;;  %p11828_p7 = por %p11827_p9, %p11826_p12 }
  0x86   : > { %p11829_p5 = pnand %p11828_p7, %p11822_p4 }
  0x88   : > { %11832 = shalt.err (!%p11829_p5)
}
  0x89   : > { %10336 = dma.hbm_to_vmem [thread:$0]  (!%p12402_p0), %s12397_s1, 64, %s12406_s29, %s12342_s17  }
  0x8a   : > { %s412_s20 = scalar_lea.vmem [#allocation13], %s12391_s8  ;;  %s12123_s19 = smov [#allocation6]  }
  0x8b   : > { %s420_s27 = sshll.u32 %s412_s20, 4  ;;  %s332_s13 = sshll.u32 %s12123_s19, 4  ;;  %s12443_s27 = int_to_ptr.vmem [resolvable:$true] %s420_s27  ;;  %s333_s13 = int_to_ptr.vmem [resolvable:$true] %s332_s13 }
  0x8c   : > { %s11833_s24 = scalar_lea.hbm %s12412_s4, 64  ;;  %s11838_s5 = scalar_lea.hbm %s14015_s7, 128 }
  0x8d   : > { %p11834_p9 = scmp.ne.s32.totalorder %s12412_s4, %s11833_s24  ;;  %p11839_p10 = scmp.lt.u32.totalorder %s12412_s4, %s14015_s7 }
  0x8e   : > { %p11840_p2 = scmp.lt.u32.totalorder %s11838_s5, %s11833_s24  ;;  %p11842_p11 = scmp.lt.u32.totalorder %s11833_s24, %s12412_s4 }
  0x8f   : > { %p11836_p12 = pnand %p11834_p9, %p12418_p1 }
  0x90   : > { %p11841_p6 = por %p11840_p2, %p11839_p10 }
  0x91   : > { %p11837_p8 = pneg %p11836_p12 }
  0x92   : > { %p11843_p13 = por %p11842_p11, %p11841_p6 }
  0x94   : > { %p11844_p3 = pnand %p11843_p13, %p11837_p8 }
  0x96   : > { %11847 = shalt.err (!%p11844_p3)
}
  0x97   : > { %s11848_s1 = scalar_lea.vmem %s12443_s27, 64  ;;  %s12124_s29 = smov [#allocation13]  }
  0x98   : > { %p11849_p4 = scmp.ne.s32.totalorder %s12443_s27, %s11848_s1  ;;  %s11853_s20 = sshll.u32 %s12124_s29, 4  ;;  %s11854_s20 = int_to_ptr.vmem [resolvable:$false] %s11853_s20 }
  0x99   : > { %s11855_s6 = scalar_lea.vmem %s11854_s20, 128  ;;  %p11856_p9 = scmp.lt.s32.totalorder %s12443_s27, %s11854_s20 }
  0x9a   : > { %p11851_p7 = pnand %p11849_p4, %p12418_p1  ;;  %p11857_p12 = scmp.lt.s32.totalorder %s11855_s6, %s11848_s1 }
  0x9c   : > { %p11852_p5 = pneg %p11851_p7  ;;  %p11858_p10 = por %p11857_p12, %p11856_p9 }
  0x9e   : > { %p11859_p2 = pnand %p11858_p10, %p11852_p5 }
  0xa0   : > { %11862 = shalt.err (!%p11859_p2)
}
  0xa1   : > { %10339 = dma.hbm_to_vmem [thread:$0]  (!%p12402_p0), %s12412_s4, 64, %s12443_s27, %s12342_s17  }
  0xa2   : > { %s14017_s2 = sld [smem:[#allocation31_spill]]  ;;  %p14018_p6 = scmp.ne.s32.totalorder %s14003_s28, 0 }
  0xa8   : > { %s11863_s24 = scalar_lea.hbm %s14017_s2, 16 }
  0xa9   : > { %p11864_p8 = scmp.ne.s32.totalorder %s14017_s2, %s11863_s24  ;;  %p11870_p3 = scmp.lt.u32.totalorder %s11863_s24, %s14017_s2 }
  0xab   : > { %p11866_p11 = pnand %p11864_p8, %p14018_p6 }
  0xad   : > { %p11867_p13 = pneg %p11866_p11 }
  0xaf   : > { %p11872_p4 = pnand %p11870_p3, %p11867_p13 }
  0xb1   : > { %11875 = shalt.err (!%p11872_p4)
}
  0xb2   : > { %s11876_s29 = scalar_lea.vmem %s333_s13, 16  ;;  %s11883_s4 = scalar_lea.vmem %s333_s13, 32 }
  0xb3   : > { %p11877_p7 = scmp.ne.s32.totalorder %s333_s13, %s11876_s29  ;;  %p11884_p12 = scmp.lt.s32.totalorder %s333_s13, %s333_s13 }
  0xb4   : > { %p11885_p10 = scmp.lt.s32.totalorder %s11883_s4, %s11876_s29 }
  0xb5   : > { %p11879_p5 = pnand %p11877_p7, %p14018_p6 }
  0xb6   : > { %p11886_p2 = por %p11885_p10, %p11884_p12 }
  0xb7   : > { %p11880_p9 = pneg %p11879_p5 }
  0xb9   : > { %p11887_p0 = pnand %p11886_p2, %p11880_p9 }
  0xbb   : > { %11890 = shalt.err (!%p11887_p0)
}
  0xbc   : > { %p14019_p8 = scmp.ne.s32.totalorder %s14001_s30, 0  ;;  %s14020_s19 = sld [smem:[#allocation37_spill]] }
  0xbd   : > { %s431_s3 = scalar_lea.vmem [#allocation14], %s12391_s8 }
  0xbe   : > { %10323 = dma.hbm_to_vmem [thread:$0]  (!%p14019_p8), %s14017_s2, 16, %s333_s13, [#allocation7]  }
  0xbf   : > { %s439_s5 = sshll.u32 %s431_s3, 4  ;;  %s440_s5 = int_to_ptr.vmem [resolvable:$true] %s439_s5 }
  0xc2   : > { %s14021_s24 = smov %s14020_s19  ;;  %s12489_s10 = scalar_lea.hbm %s14020_s19, %s12383_s16 }
  0xc3   : > { %s11891_s1 = scalar_lea.hbm %s12489_s10, 64  ;;  %s11896_s13 = scalar_lea.hbm %s14021_s24, 128 }
  0xc4   : > { %p11892_p0 = scmp.ne.s32.totalorder %s12489_s10, %s11891_s1  ;;  %p11897_p3 = scmp.lt.u32.totalorder %s12489_s10, %s14021_s24 }
  0xc5   : > { %p11898_p4 = scmp.lt.u32.totalorder %s11896_s13, %s11891_s1  ;;  %p11900_p5 = scmp.lt.u32.totalorder %s11891_s1, %s12489_s10 }
  0xc6   : > { %p11894_p11 = pnand %p11892_p0, %p12418_p1 }
  0xc7   : > { %p11899_p7 = por %p11898_p4, %p11897_p3 }
  0xc8   : > { %p11895_p13 = pneg %p11894_p11 }
  0xc9   : > { %p11901_p9 = por %p11900_p5, %p11899_p7 }
  0xcb   : > { %p11902_p12 = pnand %p11901_p9, %p11895_p13 }
  0xcd   : > { %11905 = shalt.err (!%p11902_p12)
}
  0xce   : > { %s11906_s6 = scalar_lea.vmem %s440_s5, 64  ;;  %s12125_s22 = smov [#allocation14]  }
  0xcf   : > { %p11907_p10 = scmp.ne.s32.totalorder %s440_s5, %s11906_s6  ;;  %s11911_s19 = sshll.u32 %s12125_s22, 4  ;;  %s11912_s19 = int_to_ptr.vmem [resolvable:$false] %s11911_s19 }
  0xd0   : > { %s11913_s3 = scalar_lea.vmem %s11912_s19, 128  ;;  %p11914_p11 = scmp.lt.s32.totalorder %s440_s5, %s11912_s19 }
  0xd1   : > { %p11909_p2 = pnand %p11907_p10, %p12418_p1  ;;  %p11915_p8 = scmp.lt.s32.totalorder %s11913_s3, %s11906_s6 }
  0xd3   : > { %p11910_p0 = pneg %p11909_p2  ;;  %p11916_p6 = por %p11915_p8, %p11914_p11 }
  0xd5   : > { %p11917_p3 = pnand %p11916_p6, %p11910_p0 }
  0xd7   : > { %11920 = shalt.err (!%p11917_p3)
}
  0xd8   : > { %p14022_p4 = scmp.ne.s32.totalorder %s14014_s0, 0  ;;  %s12126_s1 = smov [#allocation8]  }
  0xd9   : > { %s343_s29 = sshll.u32 %s12126_s1, 4  ;;  %s12127_s4 = smov [#allocation9]   ;;  %s344_s29 = int_to_ptr.vmem [resolvable:$true] %s343_s29 }
  0xda   : > { %10342 = dma.hbm_to_vmem [thread:$0]  (!%p14022_p4), %s12489_s10, 64, %s440_s5, %s12342_s17  }
  0xdb   : > { %s354_s13 = sshll.u32 %s12127_s4, 4  ;;  %s14023_s22 = sld [smem:[#allocation32_spill]]  ;;  %s355_s13 = int_to_ptr.vmem [resolvable:$true] %s354_s13 }
  0xdc   : > { %p14025_p8 = scmp.ne.s32.totalorder %s14003_s28, 0 }
  0xe1   : > { %s14024_s2 = smov %s14023_s22  ;;  %s11921_s7 = scalar_lea.hbm %s14023_s22, 16 }
  0xe2   : > { %p11922_p6 = scmp.ne.s32.totalorder %s14024_s2, %s11921_s7  ;;  %p11928_p5 = scmp.lt.u32.totalorder %s11921_s7, %s14024_s2 }
  0xe4   : > { %p11924_p13 = pnand %p11922_p6, %p14025_p8 }
  0xe6   : > { %p11925_p7 = pneg %p11924_p13 }
  0xe8   : > { %p11930_p9 = pnand %p11928_p5, %p11925_p7 }
  0xea   : > { %11933 = shalt.err (!%p11930_p9)
}
  0xeb   : > { %s11934_s10 = scalar_lea.vmem %s344_s29, 16  ;;  %s11941_s5 = scalar_lea.vmem %s344_s29, 32 }
  0xec   : > { %p11935_p12 = scmp.ne.s32.totalorder %s344_s29, %s11934_s10  ;;  %p11942_p0 = scmp.lt.s32.totalorder %s344_s29, %s344_s29 }
  0xed   : > { %p11943_p11 = scmp.lt.s32.totalorder %s11941_s5, %s11934_s10 }
  0xee   : > { %p11937_p10 = pnand %p11935_p12, %p14025_p8 }
  0xef   : > { %p11944_p3 = por %p11943_p11, %p11942_p0 }
  0xf0   : > { %p11938_p2 = pneg %p11937_p10 }
  0xf2   : > { %p11945_p4 = pnand %p11944_p3, %p11938_p2 }
  0xf4   : > { %11948 = shalt.err (!%p11945_p4)
}
  0xf5   : > { %p14026_p6 = scmp.ne.s32.totalorder %s14001_s30, 0  ;;  %s14027_s27 = sld [smem:[#allocation33_spill]] }
  0xf7   : > { %10326 = dma.hbm_to_vmem [thread:$0]  (!%p14026_p6), %s14024_s2, 16, %s344_s29, [#allocation7]  }
  0xfb   : > { %s11949_s20 = scalar_lea.hbm %s14027_s27, 16 }
  0xfc   : > { %p11950_p13 = scmp.ne.s32.totalorder %s14027_s27, %s11949_s20  ;;  %p11956_p4 = scmp.lt.u32.totalorder %s11949_s20, %s14027_s27 }
  0xfe   : > { %p11952_p7 = pnand %p11950_p13, %p14025_p8 }
 0x100   : > { %p11953_p5 = pneg %p11952_p7 }
 0x102   : > { %p11958_p9 = pnand %p11956_p4, %p11953_p5 }
 0x104   : > { %11961 = shalt.err (!%p11958_p9)
}
 0x105   : > { %s11962_s10 = scalar_lea.vmem %s355_s13, 16  ;;  %s11969_s29 = scalar_lea.vmem %s355_s13, 32 }
 0x106   : > { %p11963_p12 = scmp.ne.s32.totalorder %s355_s13, %s11962_s10  ;;  %p11970_p0 = scmp.lt.s32.totalorder %s355_s13, %s355_s13 }
 0x107   : > { %p11971_p11 = scmp.lt.s32.totalorder %s11969_s29, %s11962_s10 }
 0x108   : > { %p11965_p10 = pnand %p11963_p12, %p14025_p8 }
 0x109   : > { %p11972_p3 = por %p11971_p11, %p11970_p0 }
 0x10a   : > { %p11966_p2 = pneg %p11965_p10 }
 0x10c   : > { %p11973_p1 = pnand %p11972_p3, %p11966_p2 }
 0x10e   : > { %11976 = shalt.err (!%p11973_p1)
}
 0x10f   : > { %10329 = dma.hbm_to_vmem [thread:$0]  (!%p14026_p6), %s14027_s27, 16, %s355_s13, [#allocation10]  }
 0x110   : > { %s14028_s28 = sld [smem:[#allocation38_spill]]  ;;  %s450_s20 = scalar_lea.vmem [#allocation15], %s12391_s8 }
 0x111   : > { %s458_s22 = sshll.u32 %s450_s20, 4  ;;  %p14029_p8 = scmp.ne.s32.totalorder %s14016_s26, 0  ;;  %s459_s22 = int_to_ptr.vmem [resolvable:$true] %s458_s22 }
 0x116   : > { %s12550_s24 = scalar_lea.hbm %s14028_s28, %s12383_s16  ;;  %s11982_s13 = scalar_lea.hbm %s14028_s28, 128 }
 0x117   : > { %s11977_s30 = scalar_lea.hbm %s12550_s24, 64  ;;  %p11983_p6 = scmp.lt.u32.totalorder %s12550_s24, %s14028_s28 }
 0x118   : > { %p11978_p1 = scmp.ne.s32.totalorder %s12550_s24, %s11977_s30  ;;  %p11984_p5 = scmp.lt.u32.totalorder %s11982_s13, %s11977_s30 }
 0x119   : > { %p11986_p9 = scmp.lt.u32.totalorder %s11977_s30, %s12550_s24 }
 0x11a   : > { %p11980_p13 = pnand %p11978_p1, %p14029_p8  ;;  %p11985_p4 = por %p11984_p5, %p11983_p6 }
 0x11c   : > { %p11981_p7 = pneg %p11980_p13  ;;  %p11987_p12 = por %p11986_p9, %p11985_p4 }
 0x11e   : > { %p11988_p10 = pnand %p11987_p12, %p11981_p7 }
 0x120   : > { %11991 = shalt.err (!%p11988_p10)
}
 0x121   : > { %s11992_s16 = scalar_lea.vmem %s459_s22, 64  ;;  %s12128_s8 = smov [#allocation15]  }
 0x122   : > { %p11993_p2 = scmp.ne.s32.totalorder %s459_s22, %s11992_s16  ;;  %s11997_s29 = sshll.u32 %s12128_s8, 4  ;;  %s11998_s29 = int_to_ptr.vmem [resolvable:$false] %s11997_s29 }
 0x123   : > { %s11999_s5 = scalar_lea.vmem %s11998_s29, 128  ;;  %p12000_p3 = scmp.lt.s32.totalorder %s459_s22, %s11998_s29 }
 0x124   : > { %p11995_p0 = pnand %p11993_p2, %p14029_p8  ;;  %p12001_p1 = scmp.lt.s32.totalorder %s11999_s5, %s11992_s16 }
 0x126   : > { %p11996_p11 = pneg %p11995_p0  ;;  %p12002_p13 = por %p12001_p1, %p12000_p3 }
 0x128   : > { %p12003_p5 = pnand %p12002_p13, %p11996_p11 }
 0x12a   : > { %12006 = shalt.err (!%p12003_p5)
}
 0x12b   : > { %p14030_p6 = scmp.ne.s32.totalorder %s14014_s0, 0  ;;  %s14031_s1 = sld [smem:[#allocation26_spill]] }
 0x12d   : > { %10345 = dma.hbm_to_vmem [thread:$0]  (!%p14030_p6), %s12550_s24, 64, %s459_s22, %s12342_s17  }
 0x131   : > { %p14032_p7 = scmp.ne.s32.totalorder %s14031_s1, 0 }
 0x132   : > { %p14033_p8 = scmp.ne.s32.totalorder (!%p14032_p7), %s13996_s25, 0 }
 0x133   : > { %467 = sbr.rel (%p14032_p7) target bundleno = 2090 (0x82a), region = 60 }
 0x13a   : > { %12052 = dma.done.wait (%p14033_p8), [#allocation5], 8192  }
 0x13b   : > { %12054 = vsyncadd (%p14033_p8), [#allocation5], 4294959104 }
 0x13c   : > { %12056 = dma.done.wait (%p14033_p8), [#allocation7], 32  }
 0x13d   : > { %12058 = vsyncadd (%p14033_p8), [#allocation7], 4294967264 }
 0x13e   : > { %12060 = dma.done.wait (%p14033_p8), [#allocation10], 16  }
 0x13f   : > { %12062 = vsyncadd (%p14033_p8), [#allocation10], 4294967280  ;;  %s14034_s17 = sadd.s32 4294967295, %s12113_s23   ;;  %s14035_s0 = sld [smem:[#allocation21_spill]] }
 0x140   : > { %s14036_s26 = sld [smem:[#allocation25_spill]]  ;;  %s485_s4 = sand.u32 1, %s14034_s17  }
 0x141   : > { %s486_s20 = scalar_lea.sflag [#allocation5], %s485_s4 }
 0x145   : > { %s487_s7 = sand.u32 1, %s14035_s0  }
 0x146   : > { %s10290_s24 = smul.u32 6400, %s487_s7  ;;  %p14037_p4 = scmp.ne.s32.totalorder %s14036_s26, 0 }
 0x148   : > { %s12588_s22 = scalar_lea.vmem [#allocation11], %s10290_s24 }
 0x149   : > { %12064 = dma.done.wait (%p14037_p4), %s486_s20, 102400  }
 0x14a   : > { %12066 = vsyncadd (%p14037_p4), %s486_s20, 4294864896  ;;  %s496_s30 = sand.u32 1, %s12077_s14   ;;  %p14038_p9 = scmp.ne.s32.totalorder %s14011_s11, 0 }
 0x14b   : > { %s12595_s25 = sshll.u32 %s496_s30, 2 }
 0x14c   : > { %s498_s19 = scalar_lea.vmem [#allocation12], %s12595_s25 }
 0x14d   : > { %12068 = dma.done.wait (%p14038_p9), %s486_s20, 256  }
 0x14e   : > { %12070 = vsyncadd (%p14038_p9), %s486_s20, 4294967040  ;;  %s14039_s6 = sld [smem:[#allocation23_spill]]  ;;  %s14040_s16 = sld [smem:[#allocation39_spill]] }
 0x14f   : > { %s507_s29 = scalar_lea.vmem [#allocation13], %s12595_s25  ;;  %s516_s5 = scalar_lea.vmem [#allocation14], %s12595_s25 }
 0x150   : > { %s525_s1 = scalar_lea.vmem [#allocation15], %s12595_s25  ;;  %s14041_s17 = sld [smem:[#allocation22_spill]] }
 0x154   : > { %p587_p12 = scmp.lt.s32.totalorder %s14039_s6, 1 }
 0x156   : > { %s14063_s6 = smov (!%p587_p12, %s14039_s6), 1  ;;  %p9016_p10 = scmp.ne.s32.totalorder %s14041_s17, 0 }
 0x157   : > { %s9015_s13 = sshll.u32 %s14063_s6, 1  ;;  %v10458_v0 = vld [vmem:[#allocation4 + $0x40] sm:$0xff] (!%p9016_p10)   ;;  %v10462_v4 = vld [vmem:[#allocation4 + $0x48] sm:$0xff] (!%p9016_p10)   ;;  %v10466_v8 = vld [vmem:[#allocation4 + $0x50] sm:$0xff] (!%p9016_p10)   ;;  %s14042_s26 = sld [smem:[#allocation29_spill]] (!%p9016_p10)  ;;  %vm1798_vm0 = vcmask (!%p9016_p10), 1041408  }
 0x158   : > { %s12607_s8 = scalar_lea.vmem %s14040_s16, %s9015_s13  ;;  %595 = sbr.rel (%p9016_p10) target bundleno = 821 (0x335), region = 100  ;;  %v10459_v1 = vld [vmem:[#allocation4 + $0xc0] sm:$0xff] (!%p9016_p10)   ;;  %9961 = vmatprep.subr.bf16.mxu0 (!%p9016_p10), %v10458_v0  ;;  %v10463_v5 = vld [vmem:[#allocation4 + $0xc8] sm:$0xff] (!%p9016_p10)   ;;  %v10467_v9 = vld [vmem:[#allocation4 + $0xd0] sm:$0xff] (!%p9016_p10)  }
 0x159   : > { %v10460_v2 = vld [vmem:[#allocation4] sm:$0xff] (!%p9016_p10)   ;;  %10019 = vmatprep.subr.bf16.mxu1 (!%p9016_p10), %v10459_v1  ;;  %v10464_v6 = vld [vmem:[#allocation4 + $0x8] sm:$0xff] (!%p9016_p10)   ;;  %v10468_v10 = vld [vmem:[#allocation4 + $0x10] sm:$0xff] (!%p9016_p10)  }
 0x15a   : > { %v10461_v3 = vld [vmem:[#allocation4 + $0x80] sm:$0xff] (!%p9016_p10)   ;;  %9962 = vmatpush3.bf16.msra.mxu0 (!%p9016_p10), %v10460_v2  ;;  %v10465_v7 = vld [vmem:[#allocation4 + $0x88] sm:$0xff] (!%p9016_p10)   ;;  %v10469_v11 = vld [vmem:[#allocation4 + $0x90] sm:$0xff] (!%p9016_p10)  }
 0x15b   : > { %10020 = vmatpush3.bf16.msra.mxu1 (!%p9016_p10), %v10461_v3  ;;  %9963 = vmatprep.subr.bf16.mxu0 (!%p9016_p10), %v10462_v4  ;;  %v10470_v12 = vld [vmem:[#allocation4 + $0x58] sm:$0xff] (!%p9016_p10)   ;;  %v10474_v16 = vld [vmem:[#allocation4 + $0x60] sm:$0xff] (!%p9016_p10)   ;;  %v10478_v20 = vld [vmem:[#allocation4 + $0x68] sm:$0xff] (!%p9016_p10)  }
 0x15c   : > { %10021 = vmatprep.subr.bf16.mxu1 (!%p9016_p10), %v10463_v5  ;;  %v10471_v13 = vld [vmem:[#allocation4 + $0xd8] sm:$0xff] (!%p9016_p10)   ;;  %v10475_v17 = vld [vmem:[#allocation4 + $0xe0] sm:$0xff] (!%p9016_p10)   ;;  %v10479_v21 = vld [vmem:[#allocation4 + $0xe8] sm:$0xff] (!%p9016_p10)  }
 0x15d   : > { %v10472_v14 = vld [vmem:[#allocation4 + $0x18] sm:$0xff] (!%p9016_p10)   ;;  %v10476_v18 = vld [vmem:[#allocation4 + $0x20] sm:$0xff] (!%p9016_p10)   ;;  %v10480_v22 = vld [vmem:[#allocation4 + $0x28] sm:$0xff] (!%p9016_p10)  }
 0x15e   : > { %9964 = vmatpush3.bf16.msra.mxu0 (!%p9016_p10), %v10464_v6  ;;  %v10473_v15 = vld [vmem:[#allocation4 + $0x98] sm:$0xff] (!%p9016_p10)   ;;  %v10477_v19 = vld [vmem:[#allocation4 + $0xa0] sm:$0xff] (!%p9016_p10)   ;;  %v10481_v23 = vld [vmem:[#allocation4 + $0xa8] sm:$0xff] (!%p9016_p10)  }
 0x15f   : > { %10022 = vmatpush3.bf16.msra.mxu1 %v10465_v7  ;;  %9965 = vmatprep.subr.bf16.mxu0 %v10466_v8  ;;  %v10482_v24 = vld [vmem:[#allocation4 + $0x70] sm:$0xff]   ;;  %v10486_v28 = vld [vmem:[#allocation4 + $0x78] sm:$0xff]   ;;  %v596_v32 = vld [vmem:[%s14042_s26] sm:$0xff] }
 0x160   : > { %10023 = vmatprep.subr.bf16.mxu1 %v10467_v9  ;;  %v10483_v25 = vld [vmem:[#allocation4 + $0xf0] sm:$0xff]   ;;  %v10487_v29 = vld [vmem:[#allocation4 + $0xf8] sm:$0xff]   ;;  %v600_v33 = vld [vmem:[%s14042_s26 + $0x20] sm:$0xff] }
 0x161   : > { %v10484_v26 = vld [vmem:[#allocation4 + $0x30] sm:$0xff]   ;;  %v10488_v30 = vld [vmem:[#allocation4 + $0x38] sm:$0xff]   ;;  %v9018_v35 = vcombine.low %v596_v32, %v600_v33  ;;  %v9019_v36 = vcombine.high %v596_v32, %v600_v33  ;;  %v10490_v40 = vld [vmem:[#allocation4 + $0x140] sm:$0xff]  }
 0x162   : > { %9966 = vmatpush3.bf16.msra.mxu0 %v10468_v10  ;;  %v10485_v27 = vld [vmem:[#allocation4 + $0xb0] sm:$0xff]   ;;  %v10489_v31 = vld [vmem:[#allocation4 + $0xb8] sm:$0xff]   ;;  %v10491_v41 = vld [vmem:[#allocation4 + $0x100] sm:$0xff]  }
 0x163   : > { %10024 = vmatpush3.bf16.msra.mxu1 %v10469_v11  ;;  %9967 = vmatprep.subr.bf16.mxu0 %v10470_v12  ;;  %v597_v34 = vld [vmem:[%s14042_s26 + $0x8] sm:$0xff]  ;;  %v10492_v42 = vld [vmem:[#allocation4 + $0x1c0] sm:$0xff]   ;;  %v10502_v3 = vld [vmem:[#allocation4 + $0x158] sm:$0xff]  }
 0x164   : > { %10025 = vmatprep.subr.bf16.mxu1 %v10471_v13  ;;  %v601_v37 = vld [vmem:[%s14042_s26 + $0x28] sm:$0xff]  ;;  %1467 = vmatprep.mubr.bf16.mxu0 %v9019_v36  ;;  %v10493_v43 = vld [vmem:[#allocation4 + $0x180] sm:$0xff]   ;;  %v10503_v5 = vld [vmem:[#allocation4 + $0x118] sm:$0xff]  }
 0x165   : > { %v9020_v38 = vcombine.low %v597_v34, %v601_v37  ;;  %v9021_v39 = vcombine.high %v597_v34, %v601_v37  ;;  %v604_v44 = vld [vmem:[%s14042_s26 + $0x40] sm:$0xff]  ;;  %v605_v47 = vld [vmem:[%s14042_s26 + $0x48] sm:$0xff]  ;;  %v10504_v12 = vld [vmem:[#allocation4 + $0x1d8] sm:$0xff]  }
 0x166   : > { %9968 = vmatpush3.bf16.msra.mxu0 %v10472_v14  ;;  %v608_v45 = vld [vmem:[%s14042_s26 + $0x60] sm:$0xff]  ;;  %v609_v48 = vld [vmem:[%s14042_s26 + $0x68] sm:$0xff]  ;;  %v10505_v13 = vld [vmem:[#allocation4 + $0x198] sm:$0xff]  }
 0x167   : > { %10026 = vmatpush3.bf16.msra.mxu1 %v10473_v15  ;;  %9969 = vmatprep.subr.bf16.mxu0 %v10474_v16  ;;  %v9027_v46 = vcombine.high %v604_v44, %v608_v45  ;;  %v9029_v49 = vcombine.high %v605_v47, %v609_v48  ;;  %v10494_v50 = vld [vmem:[#allocation4 + $0x148] sm:$0xff]   ;;  %v9026_v51 = vcombine.low %v604_v44, %v608_v45  ;;  %v10498_v56 = vld [vmem:[#allocation4 + $0x150] sm:$0xff]   ;;  %v10506_v14 = vld [vmem:[#allocation4 + $0x160] sm:$0xff]  }
 0x168   : > { %10027 = vmatprep.subr.bf16.mxu1 %v10475_v17  ;;  %1555 = vmatprep.mubr.bf16.mxu1 %v9021_v39  ;;  %v10495_v52 = vld [vmem:[#allocation4 + $0x108] sm:$0xff]   ;;  %v9028_v53 = vcombine.low %v605_v47, %v609_v48  ;;  %v10499_v63 = vld [vmem:[#allocation4 + $0x110] sm:$0xff]   ;;  %v10507_v15 = vld [vmem:[#allocation4 + $0x120] sm:$0xff]  }
 0x169   : > { %v10496_v54 = vld [vmem:[#allocation4 + $0x1c8] sm:$0xff]   ;;  %v10500_v0 = vld [vmem:[#allocation4 + $0x1d0] sm:$0xff]   ;;  %v10508_v17 = vld [vmem:[#allocation4 + $0x1e0] sm:$0xff]  }
 0x16a   : > { %9970 = vmatpush3.bf16.msra.mxu0 %v10476_v18  ;;  %v10497_v55 = vld [vmem:[#allocation4 + $0x188] sm:$0xff]   ;;  %v10501_v1 = vld [vmem:[#allocation4 + $0x190] sm:$0xff]   ;;  %v10522_v44 = vld [vmem:[#allocation4 + $0x178] sm:$0xff]  }
 0x16b   : > { %10028 = vmatpush3.bf16.msra.mxu1 %v10477_v19  ;;  %9971 = vmatprep.subr.bf16.mxu0 %v10478_v20  ;;  %v612_v57 = vld [vmem:[%s14042_s26 + $0x80] sm:$0xff]  ;;  %v613_v59 = vld [vmem:[%s14042_s26 + $0x88] sm:$0xff]  ;;  %v10523_v45 = vld [vmem:[#allocation4 + $0x138] sm:$0xff]  }
 0x16c   : > { %10029 = vmatprep.subr.bf16.mxu1 %v10479_v21  ;;  %v616_v58 = vld [vmem:[%s14042_s26 + $0xa0] sm:$0xff]  ;;  %v617_v60 = vld [vmem:[%s14042_s26 + $0xa8] sm:$0xff]  ;;  %v10525_v48 = vld [vmem:[#allocation4 + $0x1b8] sm:$0xff]  }
 0x16d   : > { %v9035_v61 = vcombine.high %v612_v57, %v616_v58  ;;  %v9037_v62 = vcombine.high %v613_v59, %v617_v60  ;;  %v9034_v2 = vcombine.low %v612_v57, %v616_v58  ;;  %v9036_v4 = vcombine.low %v613_v59, %v617_v60  ;;  %v620_v6 = vld [vmem:[%s14042_s26 + $0xc0] sm:$0xff]  ;;  %v621_v8 = vld [vmem:[%s14042_s26 + $0xc8] sm:$0xff]  ;;  %v606_v60 = vld [vmem:[%s14042_s26 + $0x50] sm:$0xff] }
 0x16e   : > { %9972 = vmatpush3.bf16.msra.mxu0 %v10480_v22  ;;  %v624_v7 = vld [vmem:[%s14042_s26 + $0xe0] sm:$0xff]  ;;  %v625_v10 = vld [vmem:[%s14042_s26 + $0xe8] sm:$0xff] }
 0x16f   : > { %10030 = vmatpush3.bf16.msra.mxu1 %v10481_v23  ;;  %9973 = vmatprep.subr.bf16.mxu0 %v10482_v24  ;;  %v9043_v9 = vcombine.high %v620_v6, %v624_v7  ;;  %v9045_v11 = vcombine.high %v621_v8, %v625_v10  ;;  %v9042_v16 = vcombine.low %v620_v6, %v624_v7  ;;  %v628_v18 = vld [vmem:[%s14042_s26 + $0x100] sm:$0xff]  ;;  %v629_v22 = vld [vmem:[%s14042_s26 + $0x108] sm:$0xff]  ;;  %v615_v6 = vld [vmem:[%s14042_s26 + $0x98] sm:$0xff] }
 0x170   : > { %10031 = vmatprep.subr.bf16.mxu1 %v10483_v25  ;;  %v632_v19 = vld [vmem:[%s14042_s26 + $0x120] sm:$0xff]  ;;  %v9044_v20 = vcombine.low %v621_v8, %v625_v10  ;;  %v633_v23 = vld [vmem:[%s14042_s26 + $0x128] sm:$0xff]  ;;  %v619_v7 = vld [vmem:[%s14042_s26 + $0xb8] sm:$0xff] }
 0x171   : > { %v9051_v21 = vcombine.high %v628_v18, %v632_v19  ;;  %v9053_v24 = vcombine.high %v629_v22, %v633_v23  ;;  %v10509_v25 = vld [vmem:[#allocation4 + $0x1a0] sm:$0xff]   ;;  %v637_v32 = vld [vmem:[%s14042_s26 + $0x148] sm:$0xff]  ;;  %v9050_v34 = vcombine.low %v628_v18, %v632_v19  ;;  %v9052_v36 = vcombine.low %v629_v22, %v633_v23 }
 0x172   : > { %9974 = vmatpush3.bf16.msra.mxu0 %v10484_v26  ;;  %v10510_v26 = vld [vmem:[#allocation4 + $0x168] sm:$0xff]   ;;  %v631_v22 = vld [vmem:[%s14042_s26 + $0x118] sm:$0xff] }
 0x173   : > { %10032 = vmatpush3.bf16.msra.mxu1 %v10485_v27  ;;  %9975 = vmatprep.subr.bf16.mxu0 %v10486_v28  ;;  %v10511_v27 = vld [vmem:[#allocation4 + $0x128] sm:$0xff]   ;;  %v635_v23 = vld [vmem:[%s14042_s26 + $0x138] sm:$0xff] }
 0x174   : > { %10033 = vmatprep.subr.bf16.mxu1 %v10487_v29  ;;  %v10512_v28 = vld [vmem:[#allocation4 + $0x1e8] sm:$0xff]  }
 0x175   : > { %v10513_v29 = vld [vmem:[#allocation4 + $0x1a8] sm:$0xff]  }
 0x176   : > { %9976 = vmatpush3.bf16.msra.mxu0 %v10488_v30  ;;  %v636_v30 = vld [vmem:[%s14042_s26 + $0x140] sm:$0xff]  ;;  %v641_v33 = vld [vmem:[%s14042_s26 + $0x168] sm:$0xff] }
 0x177   : > { %10034 = vmatpush3.bf16.msra.mxu1 %v10489_v31  ;;  %10077 = vmatprep.subr.bf16.mxu0 %v10490_v40  ;;  %v640_v31 = vld [vmem:[%s14042_s26 + $0x160] sm:$0xff]  ;;  %v9061_v39 = vcombine.high %v637_v32, %v641_v33  ;;  %v10516_v40 = vld [vmem:[#allocation4 + $0x1f0] sm:$0xff]  }
 0x178   : > { %10135 = vmatprep.subr.bf16.mxu1 %v10492_v42  ;;  %v9059_v37 = vcombine.high %v636_v30, %v640_v31  ;;  %v644_v42 = vld [vmem:[%s14042_s26 + $0x180] sm:$0x11]  ;;  %v9058_v47 = vcombine.low %v636_v30, %v640_v31  ;;  %v639_v30 = vld [vmem:[%s14042_s26 + $0x158] sm:$0xff] }
 0x179   : > { %1468 = vmatmul.mubr.bf16.vlgmr.msra.gmra.mrb[0].mxu0 %v9018_v35  ;;  %v10514_v35 = vld [vmem:[#allocation4 + $0x170] sm:$0xff]   ;;  %v643_v31 = vld [vmem:[%s14042_s26 + $0x178] sm:$0xff] }
 0x17a   : > { %1556 = vmatmul.mubr.bf16.vlgmr.msra.gmra.mrb[0].mxu1 %v9020_v38  ;;  %10078 = vmatpush3.bf16.msra.mxu0 %v10491_v41  ;;  %v10515_v38 = vld [vmem:[#allocation4 + $0x130] sm:$0xff]  }
 0x17b   : > { %10136 = vmatpush3.bf16.msra.mxu1 %v10493_v43  ;;  %1475 = vmatprep.mubr.bf16.mxu0 %v9027_v46  ;;  %v10517_v41 = vld [vmem:[#allocation4 + $0x1b0] sm:$0xff]   ;;  %v10524_v46 = vld [vmem:[#allocation4 + $0x1f8] sm:$0xff]  }
 0x17c   : > { %1563 = vmatprep.mubr.bf16.mxu1 %v9029_v49  ;;  %10079 = vmatprep.subr.bf16.mxu0 %v10494_v50  ;;  %v645_v43 = vld [vmem:[%s14042_s26 + $0x188] sm:$0x11]  ;;  %v9060_v49 = vcombine.low %v637_v32, %v641_v33  ;;  %v9067_v50 = vcombine.high %v644_v42, %v644_v42  ;;  %v9056_v33 = vcombine.low %v631_v22, %v635_v23 }
 0x17d   : > { %10137 = vmatprep.subr.bf16.mxu1 %v10496_v54  ;;  %v599_v54 = vld [vmem:[%s14042_s26 + $0x18] sm:$0xff]  ;;  %v9068_v57 = vcombine.low %v645_v43, %v645_v43 }
 0x17e   : > { %10080 = vmatpush3.bf16.msra.mxu0 %v10495_v52  ;;  %v598_v52 = vld [vmem:[%s14042_s26 + $0x10] sm:$0xff] }
 0x17f   : > { %10138 = vmatpush3.bf16.msra.mxu1 %v10497_v55  ;;  %10081 = vmatprep.subr.bf16.mxu0 %v10498_v56  ;;  %v603_v55 = vld [vmem:[%s14042_s26 + $0x38] sm:$0xff]  ;;  %v9066_v56 = vcombine.low %v644_v42, %v644_v42 }
 0x180   : > { %10139 = vmatprep.subr.bf16.mxu1 %v10500_v0  ;;  %v9025_v59 = vcombine.high %v599_v54, %v603_v55 }
 0x181   : > { %1476 = vmatmul.mubr.bf16.gmra.mrb[4].mxu0 %v9026_v51  ;;  %v9069_v51 = vcombine.high %v645_v43, %v645_v43 }
 0x182   : > { %1564 = vmatmul.mubr.bf16.gmra.mrb[4].mxu1 %v9028_v53  ;;  %1483 = vmatprep.mubr.bf16.mxu0 %v9035_v61  ;;  %v602_v53 = vld [vmem:[%s14042_s26 + $0x30] sm:$0xff] }
 0x183   : > { %1571 = vmatprep.mubr.bf16.mxu1 %v9037_v62  ;;  %10082 = vmatpush3.bf16.msra.mxu0 %v10499_v63  ;;  %v9023_v58 = vcombine.high %v598_v52, %v602_v53  ;;  %v610_v61 = vld [vmem:[%s14042_s26 + $0x70] sm:$0xff]  ;;  %v607_v62 = vld [vmem:[%s14042_s26 + $0x58] sm:$0xff]  ;;  %v9022_v0 = vcombine.low %v598_v52, %v602_v53 }
 0x184   : > { %10140 = vmatpush3.bf16.msra.mxu1 %v10501_v1  ;;  %10083 = vmatprep.subr.bf16.mxu0 %v10502_v3  ;;  %v611_v63 = vld [vmem:[%s14042_s26 + $0x78] sm:$0xff]  ;;  %v9024_v1 = vcombine.low %v599_v54, %v603_v55  ;;  %v9030_v8 = vcombine.low %v606_v60, %v610_v61 }
 0x185   : > { %10141 = vmatprep.subr.bf16.mxu1 %v10504_v12  ;;  %v9033_v3 = vcombine.high %v607_v62, %v611_v63  ;;  %v622_v12 = vld [vmem:[%s14042_s26 + $0xd0] sm:$0xff] }
 0x187   : > { %10084 = vmatpush3.bf16.msra.mxu0 %v10503_v5  ;;  %v618_v5 = vld [vmem:[%s14042_s26 + $0xb0] sm:$0xff] }
 0x188   : > { %10142 = vmatpush3.bf16.msra.mxu1 %v10505_v13  ;;  %10085 = vmatprep.subr.bf16.mxu0 %v10506_v14  ;;  %v626_v13 = vld [vmem:[%s14042_s26 + $0xf0] sm:$0xff]  ;;  %v623_v14 = vld [vmem:[%s14042_s26 + $0xd8] sm:$0xff] }
 0x189   : > { %1484 = vmatmul.mubr.bf16.gmra.mrb[8].mxu0 %v9034_v2  ;;  %10143 = vmatprep.subr.bf16.mxu1 %v10508_v17  ;;  %v9031_v2 = vcombine.high %v606_v60, %v610_v61  ;;  %v9040_v17 = vcombine.low %v615_v6, %v619_v7  ;;  %v9047_v18 = vcombine.high %v622_v12, %v626_v13 }
 0x18a   : > { %1572 = vmatmul.mubr.bf16.gmra.mrb[8].mxu1 %v9036_v4  ;;  %1491 = vmatprep.mubr.bf16.mxu0 %v9043_v9  ;;  %v614_v4 = vld [vmem:[%s14042_s26 + $0x90] sm:$0xff]  ;;  %v9032_v9 = vcombine.low %v607_v62, %v611_v63 }
 0x18b   : > { %1579 = vmatprep.mubr.bf16.mxu1 %v9045_v11  ;;  %10086 = vmatpush3.bf16.msra.mxu0 %v10507_v15  ;;  %v9039_v10 = vcombine.high %v614_v4, %v618_v5  ;;  %v9041_v11 = vcombine.high %v615_v6, %v619_v7  ;;  %v627_v15 = vld [vmem:[%s14042_s26 + $0xf8] sm:$0xff] }
 0x18c   : > { %10144 = vmatpush3.bf16.msra.mxu1 %v10509_v25  ;;  %10087 = vmatprep.subr.bf16.mxu0 %v10510_v26  ;;  %v9049_v19 = vcombine.high %v623_v14, %v627_v15  ;;  %v9048_v25 = vcombine.low %v623_v14, %v627_v15 }
 0x18d   : > { %10145 = vmatprep.subr.bf16.mxu1 %v10512_v28  ;;  %v638_v28 = vld [vmem:[%s14042_s26 + $0x150] sm:$0xff] }
 0x18f   : > { %10088 = vmatpush3.bf16.msra.mxu0 %v10511_v27  ;;  %v9057_v27 = vcombine.high %v631_v22, %v635_v23 }
 0x190   : > { %10146 = vmatpush3.bf16.msra.mxu1 %v10513_v29  ;;  %10089 = vmatprep.subr.bf16.mxu0 %v10514_v35  ;;  %v642_v29 = vld [vmem:[%s14042_s26 + $0x170] sm:$0xff]  ;;  %v9065_v35 = vcombine.high %v639_v30, %v643_v31 }
 0x191   : > { %1492 = vmatmul.mubr.bf16.gmra.mrb[12].mxu0 %v9042_v16  ;;  %10147 = vmatprep.subr.bf16.mxu1 %v10516_v40  ;;  %v9038_v16 = vcombine.low %v614_v4, %v618_v5 }
 0x192   : > { %1580 = vmatmul.mubr.bf16.gmra.mrb[12].mxu1 %v9044_v20  ;;  %1499 = vmatprep.mubr.bf16.mxu0 %v9051_v21  ;;  %v630_v20 = vld [vmem:[%s14042_s26 + $0x110] sm:$0xff] }
 0x193   : > { %1587 = vmatprep.mubr.bf16.mxu1 %v9053_v24  ;;  %10090 = vmatpush3.bf16.msra.mxu0 %v10515_v38  ;;  %v634_v21 = vld [vmem:[%s14042_s26 + $0x130] sm:$0xff]  ;;  %v9046_v24 = vcombine.low %v622_v12, %v626_v13  ;;  %v9062_v38 = vcombine.low %v638_v28, %v642_v29 }
 0x194   : > { %10148 = vmatpush3.bf16.msra.mxu1 %v10517_v41  ;;  %10091 = vmatprep.subr.bf16.mxu0 %v10522_v44  ;;  %v9055_v26 = vcombine.high %v630_v20, %v634_v21  ;;  %v9054_v32 = vcombine.low %v630_v20, %v634_v21 }
 0x195   : > { %10149 = vmatprep.subr.bf16.mxu1 %v10524_v46  ;;  %v12769_v46 = vld [vmem:[#allocation6] ss:$0 sm:$0xff] }
 0x197   : > { %10092 = vmatpush3.bf16.msra.mxu0 %v10523_v45 }
 0x198   : > { %10150 = vmatpush3.bf16.msra.mxu1 %v10525_v48 }
 0x199   : > { %1500 = vmatmul.mubr.bf16.gmra.mrb[16].mxu0 %v9050_v34  ;;  %v9063_v34 = vcombine.high %v638_v28, %v642_v29 }
 0x19a   : > { %1588 = vmatmul.mubr.bf16.gmra.mrb[16].mxu1 %v9052_v36  ;;  %1507 = vmatprep.mubr.bf16.mxu0 %v9059_v37  ;;  %v646_v36 = vld [vmem:[%s14042_s26 + $0x190] sm:$0x11]  ;;  %v647_v37 = vld [vmem:[%s14042_s26 + $0x198] sm:$0x11] }
 0x19b   : > { %1595 = vmatprep.mubr.bf16.mxu1 %v9061_v39  ;;  %v9064_v39 = vcombine.low %v639_v30, %v643_v31  ;;  %v9071_v40 = vcombine.high %v646_v36, %v646_v36  ;;  %v9073_v41 = vcombine.high %v647_v37, %v647_v37  ;;  %v9070_v42 = vcombine.low %v646_v36, %v646_v36 }
 0x19c   : > { %v9072_v43 = vcombine.low %v647_v37, %v647_v37 }
 0x1a1   : > { %1508 = vmatmul.mubr.bf16.gmra.mrb[20].mxu0 %v9058_v47 }
 0x1a2   : > { %1596 = vmatmul.mubr.bf16.gmra.mrb[20].mxu1 %v9060_v49  ;;  %1515 = vmatprep.mubr.bf16.mxu0 %v9067_v50 }
 0x1a3   : > { %1603 = vmatprep.mubr.bf16.mxu1 %v9069_v51 }
 0x1a9   : > { %1516 = vmatmul.mubr.bf16.gmra.mrb[24].mxu0 %v9066_v56 }
 0x1aa   : > { %1604 = vmatmul.mubr.bf16.gmra.mrb[24].mxu1 %v9068_v57  ;;  %1643 = vmatprep.mubr.bf16.mxu0 %v9023_v58 }
 0x1ab   : > { %1731 = vmatprep.mubr.bf16.mxu1 %v9025_v59 }
 0x1b1   : > { %1644 = vmatmul.mubr.bf16.vlgmr.msra.gmra.mrb[28].mxu0 %v9022_v0 }
 0x1b2   : > { %1732 = vmatmul.mubr.bf16.vlgmr.msra.gmra.mrb[28].mxu1 %v9024_v1  ;;  %1651 = vmatprep.mubr.bf16.mxu0 %v9031_v2 }
 0x1b3   : > { %1739 = vmatprep.mubr.bf16.mxu1 %v9033_v3 }
 0x1b9   : > { %1652 = vmatmul.mubr.bf16.gmra.mrb[32].mxu0 %v9030_v8 }
 0x1ba   : > { %1740 = vmatmul.mubr.bf16.gmra.mrb[32].mxu1 %v9032_v9  ;;  %1659 = vmatprep.mubr.bf16.mxu0 %v9039_v10 }
 0x1bb   : > { %1747 = vmatprep.mubr.bf16.mxu1 %v9041_v11 }
 0x1c1   : > { %1660 = vmatmul.mubr.bf16.gmra.mrb[36].mxu0 %v9038_v16 }
 0x1c2   : > { %1748 = vmatmul.mubr.bf16.gmra.mrb[36].mxu1 %v9040_v17  ;;  %1667 = vmatprep.mubr.bf16.mxu0 %v9047_v18 }
 0x1c3   : > { %1755 = vmatprep.mubr.bf16.mxu1 %v9049_v19 }
 0x1c9   : > { %1668 = vmatmul.mubr.bf16.gmra.mrb[40].mxu0 %v9046_v24 }
 0x1ca   : > { %1756 = vmatmul.mubr.bf16.gmra.mrb[40].mxu1 %v9048_v25  ;;  %1675 = vmatprep.mubr.bf16.mxu0 %v9055_v26 }
 0x1cb   : > { %1763 = vmatprep.mubr.bf16.mxu1 %v9057_v27 }
 0x1d1   : > { %1676 = vmatmul.mubr.bf16.gmra.mrb[44].mxu0 %v9054_v32 }
 0x1d2   : > { %1764 = vmatmul.mubr.bf16.gmra.mrb[44].mxu1 %v9056_v33  ;;  %1683 = vmatprep.mubr.bf16.mxu0 %v9063_v34 }
 0x1d3   : > { %1771 = vmatprep.mubr.bf16.mxu1 %v9065_v35 }
 0x1d9   : > { %1684 = vmatmul.mubr.bf16.gmra.mrb[48].mxu0 %v9062_v38 }
 0x1da   : > { %1772 = vmatmul.mubr.bf16.gmra.mrb[48].mxu1 %v9064_v39  ;;  %1691 = vmatprep.mubr.bf16.mxu0 %v9071_v40 }
 0x1db   : > { %1779 = vmatprep.mubr.bf16.mxu1 %v9073_v41 }
 0x1e1   : > { %1692 = vmatmul.mubr.bf16.gmra.mrb[52].mxu0 %v9070_v42 }
 0x1e2   : > { %1780 = vmatmul.mubr.bf16.gmra.mrb[52].mxu1 %v9072_v43 }
 0x24c   : > { %v9977_v44 = vpop.f32.mrb[0].mxu0 }
 0x24d   : > { %v10035_v45 = vpop.f32.mrb[0].mxu1  ;;  %v9978_v47 = vpop.f32.mrb[1].mxu0 }
 0x24e   : > { %v9979_v48 = vadd.f32 %v9978_v47, %v9977_v44  ;;  %v10036_v49 = vpop.f32.mrb[1].mxu1  ;;  %v9980_v50 = vpop.f32.mrb[2].mxu0 }
 0x24f   : > { %v10037_v51 = vadd.f32 %v10036_v49, %v10035_v45  ;;  %v10038_v52 = vpop.f32.mrb[2].mxu1  ;;  %v9981_v53 = vpop.f32.mrb[3].mxu0 }
 0x250   : > { %v1470_v54 = vadd.f32 %v9979_v48, %v12769_v46  ;;  %v9982_v55 = vadd.f32 %v9981_v53, %v9980_v50  ;;  %v10039_v56 = vpop.f32.mrb[3].mxu1 }
 0x251   : > { %v10040_v57 = vadd.f32 %v10039_v56, %v10038_v52 }
 0x252   : > { %v12772_v58 = vadd.f32 %v10037_v51, %v1470_v54  ;;  %v1473_v59 = vadd.f32 %v9982_v55, %v12769_v46 }
 0x254   : > { %v12775_v60 = vadd.f32 %v10040_v57, %v1473_v59  ;;  %v9983_v61 = vpop.f32.mrb[4].mxu0 }
 0x255   : > { %v10041_v62 = vpop.f32.mrb[4].mxu1  ;;  %v9984_v63 = vpop.f32.mrb[5].mxu0 }
 0x256   : > { %v9985_v0 = vadd.f32 %v9984_v63, %v9983_v61  ;;  %v10042_v1 = vpop.f32.mrb[5].mxu1  ;;  %v9986_v2 = vpop.f32.mrb[6].mxu0 }
 0x257   : > { %v10043_v3 = vadd.f32 %v10042_v1, %v10041_v62  ;;  %v10044_v4 = vpop.f32.mrb[6].mxu1  ;;  %v9987_v5 = vpop.f32.mrb[7].mxu0 }
 0x258   : > { %v1478_v6 = vadd.f32 %v9985_v0, %v12769_v46  ;;  %v9988_v7 = vadd.f32 %v9987_v5, %v9986_v2  ;;  %v10045_v8 = vpop.f32.mrb[7].mxu1 }
 0x259   : > { %v10046_v9 = vadd.f32 %v10045_v8, %v10044_v4 }
 0x25a   : > { %v12778_v10 = vadd.f32 %v10043_v3, %v1478_v6  ;;  %v1481_v11 = vadd.f32 %v9988_v7, %v12769_v46 }
 0x25c   : > { %v12781_v12 = vadd.f32 %v10046_v9, %v1481_v11  ;;  %v9989_v13 = vpop.f32.mrb[8].mxu0 }
 0x25d   : > { %v10047_v14 = vpop.f32.mrb[8].mxu1  ;;  %v9990_v15 = vpop.f32.mrb[9].mxu0 }
 0x25e   : > { %v9991_v16 = vadd.f32 %v9990_v15, %v9989_v13  ;;  %v10048_v17 = vpop.f32.mrb[9].mxu1  ;;  %v9992_v18 = vpop.f32.mrb[10].mxu0 }
 0x25f   : > { %v10049_v19 = vadd.f32 %v10048_v17, %v10047_v14  ;;  %v10050_v20 = vpop.f32.mrb[10].mxu1  ;;  %v9993_v21 = vpop.f32.mrb[11].mxu0 }
 0x260   : > { %v1486_v22 = vadd.f32 %v9991_v16, %v12769_v46  ;;  %v9994_v23 = vadd.f32 %v9993_v21, %v9992_v18  ;;  %v10051_v24 = vpop.f32.mrb[11].mxu1 }
 0x261   : > { %v10052_v25 = vadd.f32 %v10051_v24, %v10050_v20 }
 0x262   : > { %v12784_v26 = vadd.f32 %v10049_v19, %v1486_v22  ;;  %v1489_v27 = vadd.f32 %v9994_v23, %v12769_v46 }
 0x264   : > { %v12787_v28 = vadd.f32 %v10052_v25, %v1489_v27  ;;  %v9995_v29 = vpop.f32.mrb[12].mxu0 }
 0x265   : > { %v10053_v30 = vpop.f32.mrb[12].mxu1  ;;  %v9996_v31 = vpop.f32.mrb[13].mxu0 }
 0x266   : > { %v9997_v32 = vadd.f32 %v9996_v31, %v9995_v29  ;;  %v10054_v33 = vpop.f32.mrb[13].mxu1  ;;  %v9998_v34 = vpop.f32.mrb[14].mxu0 }
 0x267   : > { %v10055_v35 = vadd.f32 %v10054_v33, %v10053_v30  ;;  %v10056_v36 = vpop.f32.mrb[14].mxu1  ;;  %v9999_v37 = vpop.f32.mrb[15].mxu0 }
 0x268   : > { %v1494_v38 = vadd.f32 %v9997_v32, %v12769_v46  ;;  %v10000_v39 = vadd.f32 %v9999_v37, %v9998_v34  ;;  %v10057_v40 = vpop.f32.mrb[15].mxu1 }
 0x269   : > { %v10058_v41 = vadd.f32 %v10057_v40, %v10056_v36 }
 0x26a   : > { %v12790_v42 = vadd.f32 %v10055_v35, %v1494_v38  ;;  %v1497_v43 = vadd.f32 %v10000_v39, %v12769_v46 }
 0x26c   : > { %v12793_v44 = vadd.f32 %v10058_v41, %v1497_v43  ;;  %v10001_v45 = vpop.f32.mrb[16].mxu0 }
 0x26d   : > { %v10059_v47 = vpop.f32.mrb[16].mxu1  ;;  %v10002_v48 = vpop.f32.mrb[17].mxu0 }
 0x26e   : > { %v10003_v49 = vadd.f32 %v10002_v48, %v10001_v45  ;;  %v10060_v50 = vpop.f32.mrb[17].mxu1  ;;  %v10004_v51 = vpop.f32.mrb[18].mxu0 }
 0x26f   : > { %v10061_v52 = vadd.f32 %v10060_v50, %v10059_v47  ;;  %v10062_v53 = vpop.f32.mrb[18].mxu1  ;;  %v10005_v54 = vpop.f32.mrb[19].mxu0 }
 0x270   : > { %v1502_v55 = vadd.f32 %v10003_v49, %v12769_v46  ;;  %v10006_v56 = vadd.f32 %v10005_v54, %v10004_v51  ;;  %v10063_v57 = vpop.f32.mrb[19].mxu1 }
 0x271   : > { %v10064_v59 = vadd.f32 %v10063_v57, %v10062_v53 }
 0x272   : > { %v12796_v61 = vadd.f32 %v10061_v52, %v1502_v55  ;;  %v1505_v62 = vadd.f32 %v10006_v56, %v12769_v46 }
 0x274   : > { %v12799_v63 = vadd.f32 %v10064_v59, %v1505_v62  ;;  %v10007_v0 = vpop.f32.mrb[20].mxu0 }
 0x275   : > { %v10065_v1 = vpop.f32.mrb[20].mxu1  ;;  %v10008_v2 = vpop.f32.mrb[21].mxu0 }
 0x276   : > { %v10009_v3 = vadd.f32 %v10008_v2, %v10007_v0  ;;  %v10066_v4 = vpop.f32.mrb[21].mxu1  ;;  %v10010_v5 = vpop.f32.mrb[22].mxu0 }
 0x277   : > { %v10067_v6 = vadd.f32 %v10066_v4, %v10065_v1  ;;  %v10068_v7 = vpop.f32.mrb[22].mxu1  ;;  %v10011_v8 = vpop.f32.mrb[23].mxu0 }
 0x278   : > { %v1510_v9 = vadd.f32 %v10009_v3, %v12769_v46  ;;  %v10012_v11 = vadd.f32 %v10011_v8, %v10010_v5  ;;  %v10069_v13 = vpop.f32.mrb[23].mxu1 }
 0x279   : > { %v10070_v14 = vadd.f32 %v10069_v13, %v10068_v7 }
 0x27a   : > { %v12802_v15 = vadd.f32 %v10067_v6, %v1510_v9  ;;  %v1513_v16 = vadd.f32 %v10012_v11, %v12769_v46 }
 0x27c   : > { %v12805_v17 = vadd.f32 %v10070_v14, %v1513_v16  ;;  %v10013_v18 = vpop.f32.mrb[24].mxu0 }
 0x27d   : > { %v10071_v19 = vpop.f32.mrb[24].mxu1  ;;  %v10014_v20 = vpop.f32.mrb[25].mxu0 }
 0x27e   : > { %v10015_v21 = vadd.f32 %v10014_v20, %v10013_v18  ;;  %v10072_v22 = vpop.f32.mrb[25].mxu1  ;;  %v10016_v23 = vpop.f32.mrb[26].mxu0 }
 0x27f   : > { %v10073_v24 = vadd.f32 %v10072_v22, %v10071_v19  ;;  %v10074_v25 = vpop.f32.mrb[26].mxu1  ;;  %v10017_v27 = vpop.f32.mrb[27].mxu0  ;;  %v12129_v19 = vmov 0  }
 0x280   : > { %v1518_v29 = vadd.f32 %v10015_v21, %v12769_v46  ;;  %v10075_v30 = vpop.f32.mrb[27].mxu1  ;;  %1936 = vst [vmem:[#allocation2] sm:$0xff] %v12129_v19  ;;  %1937 = vst [vmem:[#allocation2 + $0x8] sm:$0xff] %v12129_v19 }
 0x281   : > { %1938 = vst [vmem:[#allocation2 + $0x10] sm:$0xff] %v12129_v19  ;;  %1939 = vst [vmem:[#allocation2 + $0x18] sm:$0x1] %v12129_v19 }
 0x282   : > { %v12808_v31 = vadd.f32 %v10073_v24, %v1518_v29  ;;  %1940 = vst [vmem:[#allocation2 + $0x19] sm:$0xff] %v12129_v19  ;;  %1941 = vst [vmem:[#allocation2 + $0x21] sm:$0xff] %v12129_v19 }
 0x283   : > { %1942 = vst [vmem:[#allocation2 + $0x29] sm:$0xff] %v12129_v19  ;;  %1943 = vst [vmem:[#allocation2 + $0x31] sm:$0x1] %v12129_v19 }
 0x284   : > { %v10093_v32 = vpop.f32.mrb[28].mxu0 }
 0x285   : > { %v10151_v33 = vpop.f32.mrb[28].mxu1  ;;  %v10094_v34 = vpop.f32.mrb[29].mxu0 }
 0x286   : > { %v10095_v35 = vadd.f32 %v10094_v34, %v10093_v32  ;;  %v10152_v36 = vpop.f32.mrb[29].mxu1  ;;  %v10096_v37 = vpop.f32.mrb[30].mxu0 }
 0x287   : > { %v10153_v38 = vadd.f32 %v10152_v36, %v10151_v33  ;;  %v10154_v39 = vpop.f32.mrb[30].mxu1  ;;  %v10097_v40 = vpop.f32.mrb[31].mxu0 }
 0x288   : > { %v1646_v41 = vadd.f32 %v10095_v35, %v12772_v58  ;;  %v10098_v43 = vadd.f32 %v10097_v40, %v10096_v37  ;;  %v10155_v45 = vpop.f32.mrb[31].mxu1 }
 0x289   : > { %v10156_v47 = vadd.f32 %v10155_v45, %v10154_v39 }
 0x28a   : > { %v12811_v48 = vadd.f32 %v10153_v38, %v1646_v41  ;;  %v1649_v46 = vadd.f32 %v10098_v43, %v12775_v60 }
 0x28c   : > { %v12814_v49 = vadd.f32 %v10156_v47, %v1649_v46  ;;  %v10099_v50 = vpop.f32.mrb[32].mxu0 }
 0x28d   : > { %v10157_v51 = vpop.f32.mrb[32].mxu1  ;;  %v10100_v52 = vpop.f32.mrb[33].mxu0 }
 0x28e   : > { %v1787_v53 = vadd.f32 %v12814_v49, %v12811_v48  ;;  %v10101_v54 = vadd.f32 %v10100_v52, %v10099_v50  ;;  %v10158_v55 = vpop.f32.mrb[33].mxu1  ;;  %v10102_v56 = vpop.f32.mrb[34].mxu0 }
 0x28f   : > { %v10159_v57 = vadd.f32 %v10158_v55, %v10157_v51  ;;  %v10160_v58 = vpop.f32.mrb[34].mxu1  ;;  %v10103_v59 = vpop.f32.mrb[35].mxu0 }
 0x290   : > { %v1654_v62 = vadd.f32 %v10101_v54, %v12778_v10  ;;  %v10104_v0 = vadd.f32 %v10103_v59, %v10102_v56  ;;  %v10161_v1 = vpop.f32.mrb[35].mxu1 }
 0x291   : > { %v10162_v2 = vadd.f32 %v10161_v1, %v10160_v58 }
 0x292   : > { %v12819_v60 = vadd.f32 %v10159_v57, %v1654_v62  ;;  %v1657_v3 = vadd.f32 %v10104_v0, %v12781_v12 }
 0x294   : > { %v1788_v4 = vadd.f32 %v1787_v53, %v12819_v60  ;;  %v12823_v5 = vadd.f32 %v10162_v2, %v1657_v3  ;;  %v10105_v6 = vpop.f32.mrb[36].mxu0 }
 0x295   : > { %v10163_v7 = vpop.f32.mrb[36].mxu1  ;;  %v10106_v8 = vpop.f32.mrb[37].mxu0 }
 0x296   : > { %v1789_v9 = vadd.f32 %v1788_v4, %v12823_v5  ;;  %v10107_v11 = vadd.f32 %v10106_v8, %v10105_v6  ;;  %v10164_v13 = vpop.f32.mrb[37].mxu1  ;;  %v10108_v14 = vpop.f32.mrb[38].mxu0 }
 0x297   : > { %v10165_v10 = vadd.f32 %v10164_v13, %v10163_v7  ;;  %v10166_v16 = vpop.f32.mrb[38].mxu1  ;;  %v10109_v18 = vpop.f32.mrb[39].mxu0 }
 0x298   : > { %v1662_v12 = vadd.f32 %v10107_v11, %v12784_v26  ;;  %v10110_v20 = vadd.f32 %v10109_v18, %v10108_v14  ;;  %v10167_v21 = vpop.f32.mrb[39].mxu1 }
 0x299   : > { %v10168_v22 = vadd.f32 %v10167_v21, %v10166_v16 }
 0x29a   : > { %v12827_v23 = vadd.f32 %v10165_v10, %v1662_v12  ;;  %v1665_v24 = vadd.f32 %v10110_v20, %v12787_v28 }
 0x29c   : > { %v1790_v25 = vadd.f32 %v1789_v9, %v12827_v23  ;;  %v12831_v27 = vadd.f32 %v10168_v22, %v1665_v24  ;;  %v10111_v29 = vpop.f32.mrb[40].mxu0  ;;  %v12130_v22 = vmov 0.0  }
 0x29d   : > { %v10169_v30 = vpop.f32.mrb[40].mxu1  ;;  %v10112_v32 = vpop.f32.mrb[41].mxu0  ;;  %2343 = vst [vmem:[#allocation3] sm:$0xff] %v12130_v22 }
 0x29e   : > { %v1791_v33 = vadd.f32 %v1790_v25, %v12831_v27  ;;  %v10113_v34 = vadd.f32 %v10112_v32, %v10111_v29  ;;  %v10170_v35 = vpop.f32.mrb[41].mxu1  ;;  %v10114_v36 = vpop.f32.mrb[42].mxu0 }
 0x29f   : > { %v10171_v26 = vadd.f32 %v10170_v35, %v10169_v30  ;;  %v10172_v37 = vpop.f32.mrb[42].mxu1  ;;  %v10115_v38 = vpop.f32.mrb[43].mxu0 }
 0x2a0   : > { %v1670_v39 = vadd.f32 %v10113_v34, %v12790_v42  ;;  %v10116_v40 = vadd.f32 %v10115_v38, %v10114_v36  ;;  %v10173_v41 = vpop.f32.mrb[43].mxu1 }
 0x2a1   : > { %v10174_v28 = vadd.f32 %v10173_v41, %v10172_v37 }
 0x2a2   : > { %v12835_v43 = vadd.f32 %v10171_v26, %v1670_v39  ;;  %v1673_v45 = vadd.f32 %v10116_v40, %v12793_v44 }
 0x2a4   : > { %v1792_v47 = vadd.f32 %v1791_v33, %v12835_v43  ;;  %v12839_v46 = vadd.f32 %v10174_v28, %v1673_v45  ;;  %v10117_v50 = vpop.f32.mrb[44].mxu0 }
 0x2a5   : > { %v10175_v51 = vpop.f32.mrb[44].mxu1  ;;  %v10118_v52 = vpop.f32.mrb[45].mxu0 }
 0x2a6   : > { %v1793_v53 = vadd.f32 %v1792_v47, %v12839_v46  ;;  %v10119_v54 = vadd.f32 %v10118_v52, %v10117_v50  ;;  %v10176_v55 = vpop.f32.mrb[45].mxu1  ;;  %v10120_v56 = vpop.f32.mrb[46].mxu0 }
 0x2a7   : > { %v10177_v42 = vadd.f32 %v10176_v55, %v10175_v51  ;;  %v10178_v57 = vpop.f32.mrb[46].mxu1  ;;  %v10121_v58 = vpop.f32.mrb[47].mxu0 }
 0x2a8   : > { %v1678_v59 = vadd.f32 %v10119_v54, %v12796_v61  ;;  %v10122_v62 = vadd.f32 %v10121_v58, %v10120_v56  ;;  %v10179_v0 = vpop.f32.mrb[47].mxu1 }
 0x2a9   : > { %v10180_v44 = vadd.f32 %v10179_v0, %v10178_v57 }
 0x2aa   : > { %v1766_v1 = vadd.f32 %v10177_v42, %v1678_v59  ;;  %v1681_v2 = vadd.f32 %v10122_v62, %v12799_v63 }
 0x2ac   : > { %v1794_v3 = vadd.f32 %v1793_v53, %v1766_v1  ;;  %v1769_v4 = vadd.f32 %v10180_v44, %v1681_v2  ;;  %v10123_v6 = vpop.f32.mrb[48].mxu0 }
 0x2ad   : > { %v10181_v7 = vpop.f32.mrb[48].mxu1  ;;  %v10124_v8 = vpop.f32.mrb[49].mxu0 }
 0x2ae   : > { %v1795_v9 = vadd.f32 %v1794_v3, %v1769_v4  ;;  %v10125_v11 = vadd.f32 %v10124_v8, %v10123_v6  ;;  %v10182_v13 = vpop.f32.mrb[49].mxu1  ;;  %v10126_v14 = vpop.f32.mrb[50].mxu0 }
 0x2af   : > { %v10183_v10 = vadd.f32 %v10182_v13, %v10181_v7  ;;  %v10184_v16 = vpop.f32.mrb[50].mxu1  ;;  %v10127_v18 = vpop.f32.mrb[51].mxu0 }
 0x2b0   : > { %v1686_v61 = vadd.f32 %v10125_v11, %v12802_v15  ;;  %v10128_v19 = vadd.f32 %v10127_v18, %v10126_v14  ;;  %v10185_v12 = vpop.f32.mrb[51].mxu1 }
 0x2b1   : > { %v10186_v20 = vadd.f32 %v10185_v12, %v10184_v16 }
 0x2b2   : > { %v1774_v21 = vadd.f32 %v10183_v10, %v1686_v61  ;;  %v1689_v63 = vadd.f32 %v10128_v19, %v12805_v17 }
 0x2b4   : > { %v1796_v24 = vadd.f32 %v1795_v9, %v1774_v21  ;;  %v1777_v25 = vadd.f32 %v10186_v20, %v1689_v63  ;;  %v10129_v29 = vpop.f32.mrb[52].mxu0 }
 0x2b5   : > { %v10187_v30 = vpop.f32.mrb[52].mxu1  ;;  %v10130_v32 = vpop.f32.mrb[53].mxu0 }
 0x2b6   : > { %v1797_v33 = vadd.f32 %v1796_v24, %v1777_v25  ;;  %v10131_v34 = vadd.f32 %v10130_v32, %v10129_v29  ;;  %v10188_v35 = vpop.f32.mrb[53].mxu1  ;;  %v10132_v36 = vpop.f32.mrb[54].mxu0 }
 0x2b7   : > { %v10189_v26 = vadd.f32 %v10188_v35, %v10187_v30  ;;  %v10190_v37 = vpop.f32.mrb[54].mxu1  ;;  %v10133_v15 = vpop.f32.mrb[55].mxu0  ;;  %v12131_v35 = vmov 1966171168  }
 0x2b8   : > { %v1694_v38 = vadd.f32 %v10131_v34, %v12808_v31  ;;  %v10191_v39 = vpop.f32.mrb[55].mxu1  ;;  %v1948_v36 = vunpack.c.l.s4 %v12131_v35 }
 0x2ba   : > { %v1782_v40 = vadd.f32 %v10189_v26, %v1694_v38  ;;  %v1950_v26 = vlaneseq  ;;  %v1949_v15 = vunpack.c.0.s8 %v1948_v36 }
 0x2bc   : > { %v1799_v17 = vsel %vm1798_vm0, %v1782_v40, 0.0  ;;  %v1951_v38 = vshrl.u32 %v1950_v26, 7 }
 0x2bd   : > { %v1800_v41 = vadd.f32 %v1799_v17, %v1797_v33 }
 0x2bf   : > { %v1801_v28 = vrot.slane %v1800_v41, 4 }
 0x2c1   : > { %v1802_v45 = vadd.f32 %v1801_v28, %v1800_v41  ;;  %v9138_v28 = vld [vmem:[#allocation8] ss:$0 sm:$0xff] }
 0x2c3   : > { %v1803_v47 = vrot.slane %v1802_v45, 2 }
 0x2c5   : > { %v1804_v50 = vadd.f32 %v1803_v47, %v1802_v45 }
 0x2c7   : > { %v1805_v51 = vrot.slane %v1804_v50, 1 }
 0x2c9   : > { %v1806_v52 = vadd.f32 %v1805_v51, %v1804_v50 }
 0x2cb   : > { %v1808_v53 = vmul.f32 0.010204081, %v1806_v52 }
 0x2cd   : > { %v1809_v54 = vsub.f32 %v12811_v48, %v1808_v53  ;;  %v1810_v55 = vsub.f32 %v12814_v49, %v1808_v53  ;;  %v1811_v56 = vsub.f32 %v12819_v60, %v1808_v53  ;;  %v1812_v31 = vsub.f32 %v12823_v5, %v1808_v53 }
 0x2ce   : > { %v1813_v42 = vsub.f32 %v12827_v23, %v1808_v53  ;;  %v1814_v57 = vsub.f32 %v12831_v27, %v1808_v53  ;;  %v1815_v58 = vsub.f32 %v12835_v43, %v1808_v53  ;;  %v1816_v59 = vsub.f32 %v12839_v46, %v1808_v53 }
 0x2cf   : > { %v1817_v62 = vsub.f32 %v1766_v1, %v1808_v53  ;;  %v1818_v0 = vsub.f32 %v1769_v4, %v1808_v53  ;;  %v1819_v44 = vsub.f32 %v1774_v21, %v1808_v53  ;;  %v1820_v2 = vsub.f32 %v1777_v25, %v1808_v53 }
 0x2d0   : > { %v1821_v3 = vsub.f32 %v1782_v40, %v1808_v53  ;;  %v1822_v48 = vmul.f32 %v1809_v54, %v1809_v54  ;;  %v1823_v6 = vmul.f32 %v1810_v55, %v1810_v55  ;;  %v1824_v49 = vmul.f32 %v1811_v56, %v1811_v56 }
 0x2d1   : > { %v1825_v60 = vmul.f32 %v1812_v31, %v1812_v31  ;;  %v1826_v5 = vmul.f32 %v1813_v42, %v1813_v42  ;;  %v1827_v23 = vmul.f32 %v1814_v57, %v1814_v57  ;;  %v1828_v27 = vmul.f32 %v1815_v58, %v1815_v58 }
 0x2d2   : > { %v1835_v7 = vadd.f32 %v1823_v6, %v1822_v48  ;;  %v1829_v43 = vmul.f32 %v1816_v59, %v1816_v59  ;;  %v1830_v46 = vmul.f32 %v1817_v62, %v1817_v62  ;;  %v1831_v4 = vmul.f32 %v1818_v0, %v1818_v0 }
 0x2d3   : > { %v1832_v16 = vmul.f32 %v1819_v44, %v1819_v44  ;;  %v1834_v61 = vmul.f32 %v1821_v3, %v1821_v3  ;;  %v1833_v19 = vmul.f32 %v1820_v2, %v1820_v2 }
 0x2d4   : > { %v1836_v8 = vadd.f32 %v1835_v7, %v1824_v49 }
 0x2d5   : > { %v1846_v21 = vsel %vm1798_vm0, %v1834_v61, 0.0 }
 0x2d6   : > { %v1837_v9 = vadd.f32 %v1836_v8, %v1825_v60 }
 0x2d8   : > { %v1838_v11 = vadd.f32 %v1837_v9, %v1826_v5  ;;  %v9139_v5 = vld [vmem:[#allocation9] ss:$0 sm:$0xff] }
 0x2da   : > { %v1839_v13 = vadd.f32 %v1838_v11, %v1827_v23 }
 0x2dc   : > { %v1840_v14 = vadd.f32 %v1839_v13, %v1828_v27 }
 0x2de   : > { %v1841_v1 = vadd.f32 %v1840_v14, %v1829_v43 }
 0x2e0   : > { %v1842_v10 = vadd.f32 %v1841_v1, %v1830_v46 }
 0x2e2   : > { %v1843_v18 = vadd.f32 %v1842_v10, %v1831_v4 }
 0x2e4   : > { %v1844_v12 = vadd.f32 %v1843_v18, %v1832_v16 }
 0x2e6   : > { %v1845_v20 = vadd.f32 %v1844_v12, %v1833_v19  ;;  %v12857_v19 = vsub.s32 %v1949_v15, %v1951_v38 }
 0x2e8   : > { %v1847_v63 = vadd.f32 %v1846_v21, %v1845_v20 }
 0x2ea   : > { %v1848_v22 = vrot.slane %v1847_v63, 4 }
 0x2ec   : > { %v1849_v24 = vadd.f32 %v1848_v22, %v1847_v63 }
 0x2ee   : > { %v1850_v25 = vrot.slane %v1849_v24, 2 }
 0x2f0   : > { %v1851_v29 = vadd.f32 %v1850_v25, %v1849_v24 }
 0x2f2   : > { %v1852_v30 = vrot.slane %v1851_v29, 1 }
 0x2f4   : > { %v1853_v32 = vadd.f32 %v1852_v30, %v1851_v29 }
 0x2f6   : > { %v1854_v33 = vmul.f32 0.010204081, %v1853_v32 }
 0x2f8   : > { %v1855_v34 = vadd.f32 1e-05, %v1854_v33 }
 0x2fa   : > { %10530 = vrsqrt.f32 %v1855_v34 }
 0x304   : > { %v10531_v37 = vpop.eup %10530 }
 0x305   : > { %v1857_v39 = vmul.f32 %v10531_v37, %v1809_v54  ;;  %v1858_v40 = vmul.f32 %v10531_v37, %v1810_v55  ;;  %v1859_v17 = vmul.f32 %v10531_v37, %v1811_v56  ;;  %v1860_v41 = vmul.f32 %v10531_v37, %v1812_v31 }
 0x306   : > { %v1861_v45 = vmul.f32 %v10531_v37, %v1813_v42  ;;  %v1862_v47 = vmul.f32 %v10531_v37, %v1814_v57  ;;  %v1863_v50 = vmul.f32 %v10531_v37, %v1815_v58  ;;  %v1864_v51 = vmul.f32 %v10531_v37, %v1816_v59 }
 0x307   : > { %v1865_v52 = vmul.f32 %v10531_v37, %v1817_v62  ;;  %v1866_v53 = vmul.f32 %v10531_v37, %v1818_v0  ;;  %v1867_v48 = vmul.f32 %v10531_v37, %v1819_v44  ;;  %v1868_v6 = vmul.f32 %v10531_v37, %v1820_v2 }
 0x308   : > { %v1869_v49 = vmul.f32 %v10531_v37, %v1821_v3  ;;  %v1877_v7 = vmul.f32 %v9138_v28, %v1857_v39  ;;  %v1878_v60 = vmul.f32 %v9138_v28, %v1858_v40  ;;  %v1879_v8 = vmul.f32 %v9138_v28, %v1859_v17 }
 0x309   : > { %v1880_v9 = vmul.f32 %v9138_v28, %v1860_v41  ;;  %v1881_v23 = vmul.f32 %v9138_v28, %v1861_v45  ;;  %v1882_v54 = vmul.f32 %v9138_v28, %v1862_v47  ;;  %v1883_v55 = vmul.f32 %v9138_v28, %v1863_v50 }
 0x30a   : > { %v1884_v56 = vmul.f32 %v9138_v28, %v1864_v51  ;;  %v1885_v31 = vmul.f32 %v9138_v28, %v1865_v52  ;;  %v1886_v11 = vmul.f32 %v9138_v28, %v1866_v53  ;;  %v1887_v42 = vmul.f32 %v9138_v28, %v1867_v48 }
 0x30b   : > { %v1888_v57 = vmul.f32 %v9138_v28, %v1868_v6  ;;  %v1889_v58 = vmul.f32 %v9138_v28, %v1869_v49  ;;  %v1897_v59 = vadd.f32 %v9139_v5, %v1877_v7  ;;  %v1898_v62 = vadd.f32 %v9139_v5, %v1878_v60 }
 0x30c   : > { %v1899_v0 = vadd.f32 %v9139_v5, %v1879_v8  ;;  %v1900_v44 = vadd.f32 %v9139_v5, %v1880_v9  ;;  %v1901_v2 = vadd.f32 %v9139_v5, %v1881_v23  ;;  %v1902_v3 = vadd.f32 %v9139_v5, %v1882_v54 }
 0x30d   : > { %v1903_v27 = vadd.f32 %v9139_v5, %v1883_v55  ;;  %v1904_v13 = vadd.f32 %v9139_v5, %v1884_v56  ;;  %v1905_v43 = vadd.f32 %v9139_v5, %v1885_v31  ;;  %v1906_v14 = vadd.f32 %v9139_v5, %v1886_v11 }
 0x30e   : > { %v1907_v46 = vadd.f32 %v9139_v5, %v1887_v42  ;;  %v1908_v1 = vadd.f32 %v9139_v5, %v1888_v57  ;;  %v1909_v4 = vadd.f32 %v9139_v5, %v1889_v58  ;;  %v1910_v10 = vmul.f32 0.2, %v1897_v59 }
 0x30f   : > { %v1911_v16 = vmul.f32 0.2, %v1898_v62  ;;  %v1912_v18 = vmul.f32 0.2, %v1899_v0  ;;  %v1913_v61 = vmul.f32 0.2, %v1900_v44 }
 0x310   : > { %v1914_v12 = vmul.f32 0.2, %v1901_v2  ;;  %v1915_v20 = vmul.f32 0.2, %v1902_v3  ;;  %v1916_v21 = vmul.f32 0.2, %v1903_v27  ;;  %v1923_v63 = vmax.f32 %v1897_v59, %v1910_v10 }
 0x311   : > { %v1917_v22 = vmul.f32 0.2, %v1904_v13  ;;  %v1918_v24 = vmul.f32 0.2, %v1905_v43  ;;  %v1919_v25 = vmul.f32 0.2, %v1906_v14  ;;  %v1924_v29 = vmax.f32 %v1898_v62, %v1911_v16 }
 0x312   : > { %v1920_v30 = vmul.f32 0.2, %v1907_v46  ;;  %v1921_v32 = vmul.f32 0.2, %v1908_v1  ;;  %v1922_v33 = vmul.f32 0.2, %v1909_v4  ;;  %v1925_v34 = vmax.f32 %v1899_v0, %v1912_v18 }
 0x313   : > { %v1926_v35 = vmax.f32 %v1900_v44, %v1913_v61  ;;  %v1927_v36 = vmax.f32 %v1901_v2, %v1914_v12  ;;  %v1928_v26 = vmax.f32 %v1902_v3, %v1915_v20  ;;  %v1929_v37 = vmax.f32 %v1903_v27, %v1916_v21 }
 0x314   : > { %v1930_v39 = vmax.f32 %v1904_v13, %v1917_v22  ;;  %v12859_v40 = vmax.f32 %v1905_v43, %v1918_v24  ;;  %v12861_v15 = vmax.f32 %v1906_v14, %v1919_v25  ;;  %v12863_v38 = vmax.f32 %v1907_v46, %v1920_v30 }
 0x315   : > { %v12865_v17 = vmax.f32 %v1908_v1, %v1921_v32  ;;  %v12867_v41 = vmax.f32 %v1909_v4, %v1922_v33  ;;  %v1944_v28 = vpack.c.bf16 %v1923_v63, %v1923_v63  ;;  %v1977_v45 = vpack.c.bf16 %v1924_v29, %v1924_v29 }
 0x316   : > { %v2010_v47 = vpack.c.bf16 %v1925_v34, %v1925_v34  ;;  %v2043_v50 = vpack.c.bf16 %v1926_v35, %v1926_v35  ;;  %v2076_v51 = vpack.c.bf16 %v1927_v36, %v1927_v36  ;;  %v2109_v52 = vpack.c.bf16 %v1928_v26, %v1928_v26 }
 0x317   : > { %1945 = vst [vmem:[#allocation2] sm:$0x1] %v1944_v28  ;;  %v1953_v53 = vrot.slane %v1944_v28, %v12857_v19  ;;  %1978 = vst [vmem:[#allocation2 + $0x4] sm:$0x1] %v1977_v45  ;;  %v1986_v48 = vrot.slane %v1977_v45, %v12857_v19  ;;  %v2142_v6 = vpack.c.bf16 %v1929_v37, %v1929_v37 }
 0x318   : > { %v2176_v49 = vpack.c.bf16 %v1930_v39, %v1930_v39  ;;  %2011 = vst [vmem:[#allocation2 + $0x8] sm:$0x1] %v2010_v47  ;;  %v2019_v7 = vrot.slane %v2010_v47, %v12857_v19  ;;  %2044 = vst [vmem:[#allocation2 + $0xc] sm:$0x1] %v2043_v50  ;;  %v2052_v60 = vrot.slane %v2043_v50, %v12857_v19 }
 0x319   : > { %2077 = vst [vmem:[#allocation2 + $0x10] sm:$0x1] %v2076_v51  ;;  %v2085_v8 = vrot.slane %v2076_v51, %v12857_v19  ;;  %2110 = vst [vmem:[#allocation2 + $0x14] sm:$0x1] %v2109_v52  ;;  %v2118_v5 = vrot.slane %v2109_v52, %v12857_v19  ;;  %v1954_v9 = vcombine.high %v1953_v53, %v1953_v53 }
 0x31a   : > { %v1961_v23 = vrot.slane %v1953_v53, %v12857_v19  ;;  %v1987_v54 = vcombine.high %v1986_v48, %v1986_v48  ;;  %v1994_v55 = vrot.slane %v1986_v48, %v12857_v19  ;;  %2143 = vst [vmem:[#allocation2 + $0x18] sm:$0x1] %v2142_v6  ;;  %2177 = vst [vmem:[#allocation2 + $0x1c] sm:$0x1] %v2176_v49 }
 0x31b   : > { %v2020_v56 = vcombine.high %v2019_v7, %v2019_v7  ;;  %v2027_v31 = vrot.slane %v2019_v7, %v12857_v19  ;;  %v2053_v11 = vcombine.high %v2052_v60, %v2052_v60  ;;  %v2060_v42 = vrot.slane %v2052_v60, %v12857_v19  ;;  %9140 = vst.sshfl [vmem:[#allocation2 + $0x1] sm:$0x1 pattern:$0x73625140] %v1954_v9 }
 0x31c   : > { %v1968_v57 = vrot.slane %v1954_v9, %v12857_v19  ;;  %v1971_v58 = vcombine.high %v1961_v23, %v1961_v23  ;;  %v2001_v59 = vrot.slane %v1987_v54, %v12857_v19  ;;  %9141 = vst.sshfl [vmem:[#allocation2 + $0x5] sm:$0x1 pattern:$0x73625140] %v1987_v54  ;;  %v2004_v62 = vcombine.high %v1994_v55, %v1994_v55 }
 0x31d   : > { %v2034_v0 = vrot.slane %v2020_v56, %v12857_v19  ;;  %9142 = vst.sshfl [vmem:[#allocation2 + $0x9] sm:$0x1 pattern:$0x73625140] %v2020_v56  ;;  %v2037_v44 = vcombine.high %v2027_v31, %v2027_v31  ;;  %v2067_v2 = vrot.slane %v2053_v11, %v12857_v19  ;;  %v2070_v3 = vcombine.high %v2060_v42, %v2060_v42 }
 0x31e   : > { %9143 = vst.sshfl [vmem:[#allocation2 + $0xd] sm:$0x1 pattern:$0x73625140] %v2053_v11  ;;  %1973 = vst [vmem:[#allocation2 + $0x2] sm:$0x1] %v1971_v58  ;;  %v1974_v27 = vcombine.high %v1968_v57, %v1968_v57  ;;  %v2007_v13 = vcombine.high %v2001_v59, %v2001_v59  ;;  %v2086_v43 = vcombine.high %v2085_v8, %v2085_v8 }
 0x31f   : > { %2006 = vst [vmem:[#allocation2 + $0x6] sm:$0x1] %v2004_v62  ;;  %v2093_v14 = vrot.slane %v2085_v8, %v12857_v19  ;;  %2039 = vst [vmem:[#allocation2 + $0xa] sm:$0x1] %v2037_v44  ;;  %v2040_v46 = vcombine.high %v2034_v0, %v2034_v0  ;;  %v2073_v1 = vcombine.high %v2067_v2, %v2067_v2 }
 0x320   : > { %2072 = vst [vmem:[#allocation2 + $0xe] sm:$0x1] %v2070_v3  ;;  %v2119_v4 = vcombine.high %v2118_v5, %v2118_v5  ;;  %v2126_v10 = vrot.slane %v2118_v5, %v12857_v19  ;;  %1976 = vst [vmem:[#allocation2 + $0x3] sm:$0x1] %v1974_v27  ;;  %v2100_v16 = vrot.slane %v2086_v43, %v12857_v19 }
 0x321   : > { %2009 = vst [vmem:[#allocation2 + $0x7] sm:$0x1] %v2007_v13  ;;  %9144 = vst.sshfl [vmem:[#allocation2 + $0x11] sm:$0x1 pattern:$0x73625140] %v2086_v43  ;;  %v2103_v18 = vcombine.high %v2093_v14, %v2093_v14  ;;  %v2151_v61 = vrot.slane %v2142_v6, %v12857_v19  ;;  %v2185_v12 = vrot.slane %v2176_v49, %v12857_v19 }
 0x322   : > { %2042 = vst [vmem:[#allocation2 + $0xb] sm:$0x1] %v2040_v46  ;;  %2075 = vst [vmem:[#allocation2 + $0xf] sm:$0x1] %v2073_v1  ;;  %v2133_v20 = vrot.slane %v2119_v4, %v12857_v19  ;;  %v2136_v21 = vcombine.high %v2126_v10, %v2126_v10  ;;  %v2209_v63 = vpack.c.bf16 %v12859_v40, %v12859_v40 }
 0x323   : > { %9145 = vst.sshfl [vmem:[#allocation2 + $0x15] sm:$0x1 pattern:$0x73625140] %v2119_v4  ;;  %v2242_v22 = vpack.c.bf16 %v12861_v15, %v12861_v15  ;;  %2105 = vst [vmem:[#allocation2 + $0x12] sm:$0x1] %v2103_v18  ;;  %v2106_v24 = vcombine.high %v2100_v16, %v2100_v16  ;;  %v2152_v25 = vcombine.high %v2151_v61, %v2151_v61 }
 0x324   : > { %v2159_v29 = vrot.slane %v2151_v61, %v12857_v19  ;;  %v2186_v30 = vcombine.high %v2185_v12, %v2185_v12  ;;  %2138 = vst [vmem:[#allocation2 + $0x16] sm:$0x1] %v2136_v21  ;;  %v2139_v32 = vcombine.high %v2133_v20, %v2133_v20  ;;  %v2193_v33 = vrot.slane %v2185_v12, %v12857_v19 }
 0x325   : > { %2210 = vst [vmem:[#allocation2 + $0x20] sm:$0x1] %v2209_v63  ;;  %v2218_v34 = vrot.slane %v2209_v63, %v12857_v19  ;;  %2243 = vst [vmem:[#allocation2 + $0x24] sm:$0x1] %v2242_v22  ;;  %v2251_v35 = vrot.slane %v2242_v22, %v12857_v19  ;;  %v2166_v36 = vrot.slane %v2152_v25, %v12857_v19 }
 0x326   : > { %2108 = vst [vmem:[#allocation2 + $0x13] sm:$0x1] %v2106_v24  ;;  %9146 = vst.sshfl [vmem:[#allocation2 + $0x19] sm:$0x1 pattern:$0x73625140] %v2152_v25  ;;  %v2170_v26 = vcombine.high %v2159_v29, %v2159_v29  ;;  %v2200_v37 = vrot.slane %v2186_v30, %v12857_v19  ;;  %v2275_v39 = vpack.c.bf16 %v12863_v38, %v12863_v38 }
 0x327   : > { %9147 = vst.sshfl [vmem:[#allocation2 + $0x1d] sm:$0x1 pattern:$0x73625140] %v2186_v30  ;;  %2141 = vst [vmem:[#allocation2 + $0x17] sm:$0x1] %v2139_v32  ;;  %v2203_v40 = vcombine.high %v2193_v33, %v2193_v33  ;;  %v2219_v15 = vcombine.high %v2218_v34, %v2218_v34  ;;  %v2226_v28 = vrot.slane %v2218_v34, %v12857_v19 }
 0x328   : > { %v2252_v45 = vcombine.high %v2251_v35, %v2251_v35  ;;  %2172 = vst [vmem:[#allocation2 + $0x1a] sm:$0x1] %v2170_v26  ;;  %v2173_v47 = vcombine.high %v2166_v36, %v2166_v36  ;;  %v2206_v50 = vcombine.high %v2200_v37, %v2200_v37  ;;  %v2259_v51 = vrot.slane %v2251_v35, %v12857_v19 }
 0x329   : > { %2276 = vst [vmem:[#allocation2 + $0x28] sm:$0x1] %v2275_v39  ;;  %v2284_v52 = vrot.slane %v2275_v39, %v12857_v19  ;;  %2205 = vst [vmem:[#allocation2 + $0x1e] sm:$0x1] %v2203_v40  ;;  %v2233_v53 = vrot.slane %v2219_v15, %v12857_v19  ;;  %v2236_v48 = vcombine.high %v2226_v28, %v2226_v28 }
 0x32a   : > { %9148 = vst.sshfl [vmem:[#allocation2 + $0x21] sm:$0x1 pattern:$0x73625140] %v2219_v15  ;;  %v2266_v38 = vrot.slane %v2252_v45, %v12857_v19  ;;  %v2308_v6 = vpack.c.bf16 %v12865_v17, %v12865_v17  ;;  %2175 = vst [vmem:[#allocation2 + $0x1b] sm:$0x1] %v2173_v47  ;;  %v2269_v49 = vcombine.high %v2259_v51, %v2259_v51 }
 0x32b   : > { %9149 = vst.sshfl [vmem:[#allocation2 + $0x25] sm:$0x1 pattern:$0x73625140] %v2252_v45  ;;  %2208 = vst [vmem:[#allocation2 + $0x1f] sm:$0x1] %v2206_v50  ;;  %v2285_v7 = vcombine.high %v2284_v52, %v2284_v52  ;;  %v2292_v60 = vrot.slane %v2284_v52, %v12857_v19  ;;  %v2341_v8 = vpack.c.bf16 %v12867_v41, %v12867_v41 }
 0x32c   : > { %2238 = vst [vmem:[#allocation2 + $0x22] sm:$0x1] %v2236_v48  ;;  %v2239_v5 = vcombine.high %v2233_v53, %v2233_v53  ;;  %v2272_v9 = vcombine.high %v2266_v38, %v2266_v38  ;;  %2309 = vst [vmem:[#allocation2 + $0x2c] sm:$0x1] %v2308_v6  ;;  %v2317_v23 = vrot.slane %v2308_v6, %v12857_v19 }
 0x32d   : > { %2271 = vst [vmem:[#allocation2 + $0x26] sm:$0x1] %v2269_v49  ;;  %v2299_v54 = vrot.slane %v2285_v7, %v12857_v19  ;;  %9150 = vst.sshfl [vmem:[#allocation2 + $0x29] sm:$0x1 pattern:$0x73625140] %v2285_v7  ;;  %v2302_v17 = vcombine.high %v2292_v60, %v2292_v60 }
 0x32e   : > { %2342 = vst [vmem:[#allocation2 + $0x30] sm:$0x1] %v2341_v8  ;;  %2241 = vst [vmem:[#allocation2 + $0x23] sm:$0x1] %v2239_v5  ;;  %v2318_v55 = vcombine.high %v2317_v23, %v2317_v23  ;;  %v2325_v56 = vrot.slane %v2317_v23, %v12857_v19 }
 0x32f   : > { %2274 = vst [vmem:[#allocation2 + $0x27] sm:$0x1] %v2272_v9  ;;  %2304 = vst [vmem:[#allocation2 + $0x2a] sm:$0x1] %v2302_v17  ;;  %v2305_v31 = vcombine.high %v2299_v54, %v2299_v54 }
 0x330   : > { %v2332_v41 = vrot.slane %v2318_v55, %v12857_v19  ;;  %9151 = vst.sshfl [vmem:[#allocation2 + $0x2d] sm:$0x1 pattern:$0x73625140] %v2318_v55  ;;  %v2335_v11 = vcombine.high %v2325_v56, %v2325_v56 }
 0x331   : > { %2307 = vst [vmem:[#allocation2 + $0x2b] sm:$0x1] %v2305_v31 }
 0x332   : > { %2337 = vst [vmem:[#allocation2 + $0x2e] sm:$0x1] %v2335_v11  ;;  %v2338_v42 = vcombine.high %v2332_v41, %v2332_v41 }
 0x334   : > { %2340 = vst [vmem:[#allocation2 + $0x2f] sm:$0x1] %v2338_v42 }
 0x335 PF: > { %v10532_v57 = vld [vmem:[%s12588_s22 + $0x4] ss:$16 sps:$4 sm:$0xff]   ;;  %v10534_v19 = vld [vmem:[%s12588_s22 + $0xc] ss:$16 sps:$4 sm:$0xff]   ;;  %v10536_v58 = vld [vmem:[%s12588_s22] ss:$16 sps:$4 sm:$0xff]   ;;  %v3159_v15 = vlaneseq }
 0x336   : > { %7341 = vmatprep.subr.bf16.mxu0 %v10532_v57  ;;  %v10537_v59 = vld [vmem:[%s12588_s22 + $0x8] ss:$16 sps:$4 sm:$0xff]   ;;  %7874 = vmatprep.subr.bf16.mxu1 %v10534_v19  ;;  %v10538_v62 = vld [vmem:[%s12588_s22 + $0x24] ss:$16 sps:$4 sm:$0xff]   ;;  %v10540_v0 = vld [vmem:[%s12588_s22 + $0x2c] ss:$16 sps:$4 sm:$0xff]  }
 0x337   : > { %7342 = vmatpush1.bf16.msra.mxu0 %v10536_v58  ;;  %7875 = vmatpush1.bf16.msra.mxu1 %v10537_v59  ;;  %v10542_v44 = vld [vmem:[%s12588_s22 + $0x20] ss:$16 sps:$4 sm:$0xff]   ;;  %v10543_v2 = vld [vmem:[%s12588_s22 + $0x28] ss:$16 sps:$4 sm:$0xff]   ;;  %v10544_v3 = vld [vmem:[%s12588_s22 + $0x44] ss:$16 sps:$4 sm:$0xff]  }
 0x338   : > { %7343 = vmatprep.subr.bf16.mxu0 %v10538_v62  ;;  %7876 = vmatprep.subr.bf16.mxu1 %v10540_v0  ;;  %v10546_v27 = vld [vmem:[%s12588_s22 + $0x4c] ss:$16 sps:$4 sm:$0xff]   ;;  %v10548_v13 = vld [vmem:[%s12588_s22 + $0x40] ss:$16 sps:$4 sm:$0xff]   ;;  %v10549_v43 = vld [vmem:[%s12588_s22 + $0x48] ss:$16 sps:$4 sm:$0xff]  }
 0x339   : > { %v10550_v14 = vld [vmem:[%s12588_s22 + $0x64] ss:$16 sps:$4 sm:$0xff]   ;;  %v10552_v46 = vld [vmem:[%s12588_s22 + $0x6c] ss:$16 sps:$4 sm:$0xff]   ;;  %v10554_v1 = vld [vmem:[%s12588_s22 + $0x60] ss:$16 sps:$4 sm:$0xff]  }
 0x33a   : > { %v10555_v4 = vld [vmem:[%s12588_s22 + $0x68] ss:$16 sps:$4 sm:$0xff]   ;;  %v10556_v10 = vld [vmem:[%s12588_s22 + $0x84] ss:$16 sps:$4 sm:$0xff]   ;;  %v10558_v16 = vld [vmem:[%s12588_s22 + $0x8c] ss:$16 sps:$4 sm:$0xff]  }
 0x33b   : > { %7344 = vmatpush1.bf16.msra.mxu0 %v10542_v44  ;;  %7877 = vmatpush1.bf16.msra.mxu1 %v10543_v2  ;;  %v10560_v18 = vld [vmem:[%s12588_s22 + $0x80] ss:$16 sps:$4 sm:$0xff]   ;;  %v10561_v61 = vld [vmem:[%s12588_s22 + $0x88] ss:$16 sps:$4 sm:$0xff]   ;;  %v10562_v12 = vld [vmem:[%s12588_s22 + $0xa4] ss:$16 sps:$4 sm:$0xff]  }
 0x33c   : > { %7345 = vmatprep.subr.bf16.mxu0 %v10544_v3  ;;  %7878 = vmatprep.subr.bf16.mxu1 %v10546_v27  ;;  %v10564_v20 = vld [vmem:[%s12588_s22 + $0xac] ss:$16 sps:$4 sm:$0xff]   ;;  %v10566_v21 = vld [vmem:[%s12588_s22 + $0xa0] ss:$16 sps:$4 sm:$0xff]   ;;  %v10567_v63 = vld [vmem:[%s12588_s22 + $0xa8] ss:$16 sps:$4 sm:$0xff]  }
 0x33d   : > { %v10568_v22 = vld [vmem:[%s12588_s22 + $0xc4] ss:$16 sps:$4 sm:$0xff]   ;;  %v10570_v24 = vld [vmem:[%s12588_s22 + $0xcc] ss:$16 sps:$4 sm:$0xff]   ;;  %v10572_v25 = vld [vmem:[%s12588_s22 + $0xc0] ss:$16 sps:$4 sm:$0xff]  }
 0x33e   : > { %v10573_v29 = vld [vmem:[%s12588_s22 + $0xc8] ss:$16 sps:$4 sm:$0xff]   ;;  %v10574_v30 = vld [vmem:[%s12588_s22 + $0xe4] ss:$16 sps:$4 sm:$0xff]   ;;  %v10576_v32 = vld [vmem:[%s12588_s22 + $0xec] ss:$16 sps:$4 sm:$0xff]  }
 0x33f   : > { %7346 = vmatpush1.bf16.msra.mxu0 %v10548_v13  ;;  %7879 = vmatpush1.bf16.msra.mxu1 %v10549_v43  ;;  %v10578_v33 = vld [vmem:[%s12588_s22 + $0xe0] ss:$16 sps:$4 sm:$0xff]   ;;  %v10579_v34 = vld [vmem:[%s12588_s22 + $0xe8] ss:$16 sps:$4 sm:$0xff]   ;;  %v10580_v35 = vld [vmem:[%s12588_s22 + $0x104] ss:$16 sps:$4 sm:$0xff]  }
 0x340   : > { %7347 = vmatprep.subr.bf16.mxu0 %v10550_v14  ;;  %7880 = vmatprep.subr.bf16.mxu1 %v10552_v46  ;;  %s14043_s11 = sld [smem:[#allocation22_spill]]  ;;  %v10582_v36 = vld [vmem:[%s12588_s22 + $0x10c] ss:$16 sps:$4 sm:$0xff]   ;;  %v10584_v26 = vld [vmem:[%s12588_s22 + $0x100] ss:$16 sps:$4 sm:$0xff]   ;;  %v12955_v51 = vshrl.u32 %v3159_v15, 7 }
 0x341   : > { %v10585_v37 = vld [vmem:[%s12588_s22 + $0x108] ss:$16 sps:$4 sm:$0xff]   ;;  %v12132_v39 = vmov 1966171168   ;;  %v10586_v28 = vld [vmem:[%s12588_s22 + $0x124] ss:$16 sps:$4 sm:$0xff]  }
 0x342   : > { %v3157_v40 = vunpack.c.l.s4 %v12132_v39  ;;  %v10588_v45 = vld [vmem:[%s12588_s22 + $0x12c] ss:$16 sps:$4 sm:$0xff]   ;;  %v10590_v47 = vld [vmem:[%s12588_s22 + $0x120] ss:$16 sps:$4 sm:$0xff]   ;;  %v10591_v52 = vld [vmem:[%s12588_s22 + $0x128] ss:$16 sps:$4 sm:$0xff]  }
 0x343   : > { %7348 = vmatpush1.bf16.msra.mxu0 %v10554_v1  ;;  %7881 = vmatpush1.bf16.msra.mxu1 %v10555_v4  ;;  %v10592_v53 = vld [vmem:[%s12588_s22 + $0x144] ss:$16 sps:$4 sm:$0xff]   ;;  %v10594_v48 = vld [vmem:[%s12588_s22 + $0x14c] ss:$16 sps:$4 sm:$0xff]   ;;  %v10596_v38 = vld [vmem:[%s12588_s22 + $0x140] ss:$16 sps:$4 sm:$0xff]  }
 0x344   : > { %7349 = vmatprep.subr.bf16.mxu0 %v10556_v10  ;;  %7882 = vmatprep.subr.bf16.mxu1 %v10558_v16  ;;  %v3158_v50 = vunpack.c.0.s8 %v3157_v40  ;;  %v10597_v6 = vld [vmem:[%s12588_s22 + $0x148] ss:$16 sps:$4 sm:$0xff]   ;;  %v10598_v7 = vld [vmem:[%s12588_s22 + $0x164] ss:$16 sps:$4 sm:$0xff]   ;;  %v10600_v60 = vld [vmem:[%s12588_s22 + $0x16c] ss:$16 sps:$4 sm:$0xff]  }
 0x345   : > { %v10602_v5 = vld [vmem:[%s12588_s22 + $0x160] ss:$16 sps:$4 sm:$0xff]   ;;  %v10603_v23 = vld [vmem:[%s12588_s22 + $0x168] ss:$16 sps:$4 sm:$0xff]   ;;  %v10604_v54 = vld [vmem:[%s12588_s22 + $0x184] ss:$16 sps:$4 sm:$0xff]  }
 0x346   : > { %s2345_s0 = smul.u32 25, %s14043_s11  ;;  %v12963_v49 = vsub.s32 %v3158_v50, %v12955_v51  ;;  %v10606_v17 = vld [vmem:[%s12588_s22 + $0x18c] ss:$16 sps:$4 sm:$0xff]   ;;  %v10608_v56 = vld [vmem:[%s12588_s22 + $0x180] ss:$16 sps:$4 sm:$0xff]   ;;  %p9953_p2 = scmp.ne.s32.totalorder %s14043_s11, 1 }
 0x347   : > { %7350 = vmatpush1.bf16.msra.mxu0 %v10560_v18  ;;  %7883 = vmatpush1.bf16.msra.mxu1 %v10561_v61  ;;  %v10609_v41 = vld [vmem:[%s12588_s22 + $0x188] ss:$16 sps:$4 sm:$0xff]   ;;  %v10610_v11 = vld [vmem:[%s12588_s22 + $0x1a4] ss:$16 sps:$4 sm:$0xff]   ;;  %v10612_v42 = vld [vmem:[%s12588_s22 + $0x1ac] ss:$16 sps:$4 sm:$0xff]  }
 0x348   : > { %7351 = vmatprep.subr.bf16.mxu0 %v10562_v12  ;;  %7884 = vmatprep.subr.bf16.mxu1 %v10564_v20  ;;  %s12967_s4 = scalar_lea.vmem [#allocation2], %s2345_s0  ;;  %v10614_v57 = vld [vmem:[%s12588_s22 + $0x1a0] ss:$16 sps:$4 sm:$0xff]   ;;  %v10615_v19 = vld [vmem:[%s12588_s22 + $0x1a8] ss:$16 sps:$4 sm:$0xff]   ;;  %vm8495_vm1 = vcmask (!%p9953_p2), 1041408  }
 0x349   : > { %v12970_v8 = vld [vmem:[%s12967_s4] sm:$0xff]  ;;  %v10618_v59 = vld [vmem:[%s12588_s22 + $0x1cc] ss:$16 sps:$4 sm:$0xff]   ;;  %v10621_v0 = vld [vmem:[%s12588_s22 + $0x1c8] ss:$16 sps:$4 sm:$0xff]   ;;  %vm8782_vm2 = vcmask (!%p9953_p2), 1024  }
 0x34a   : > { %v3162_v9 = vrot.slane %v12970_v8, %v12963_v49  ;;  %v10616_v58 = vld [vmem:[%s12588_s22 + $0x1c4] ss:$16 sps:$4 sm:$0xff]   ;;  %v10620_v62 = vld [vmem:[%s12588_s22 + $0x1c0] ss:$16 sps:$4 sm:$0xff]   ;;  %v10624_v2 = vld [vmem:[%s12588_s22 + $0x1ec] ss:$16 sps:$4 sm:$0xff]  }
 0x34b   : > { %7352 = vmatpush1.bf16.msra.mxu0 %v10566_v21  ;;  %7885 = vmatpush1.bf16.msra.mxu1 %v10567_v63  ;;  %v10622_v44 = vld [vmem:[%s12588_s22 + $0x1e4] ss:$16 sps:$4 sm:$0xff]   ;;  %v10626_v3 = vld [vmem:[%s12588_s22 + $0x1e0] ss:$16 sps:$4 sm:$0xff]   ;;  %v10627_v27 = vld [vmem:[%s12588_s22 + $0x1e8] ss:$16 sps:$4 sm:$0xff]  }
 0x34c   : > { %7353 = vmatprep.subr.bf16.mxu0 %v10568_v22  ;;  %7886 = vmatprep.subr.bf16.mxu1 %v10570_v24  ;;  %v3170_v55 = vcombine.high %v3162_v9, %v3162_v9  ;;  %v10630_v13 = vld [vmem:[%s12588_s22 + $0x204] ss:$16 sps:$4 sm:$0xff]   ;;  %v10633_v43 = vld [vmem:[%s12588_s22 + $0x20c] ss:$16 sps:$4 sm:$0xff]   ;;  %v10628_v14 = vld [vmem:[%s12588_s22 + $0x200] ss:$16 sps:$4 sm:$0xff]   ;;  %v12997_v46 = vrot.slane %v3162_v9, %v12963_v49 }
 0x34d   : > { %v10631_v1 = vld [vmem:[%s12588_s22 + $0x208] ss:$16 sps:$4 sm:$0xff]   ;;  %v10636_v4 = vld [vmem:[%s12588_s22 + $0x224] ss:$16 sps:$4 sm:$0xff]   ;;  %v10639_v10 = vld [vmem:[%s12588_s22 + $0x22c] ss:$16 sps:$4 sm:$0xff]  }
 0x34e   : > { %v3192_v31 = vrot.slane %v3170_v55, %v12963_v49  ;;  %v10634_v18 = vld [vmem:[%s12588_s22 + $0x220] ss:$16 sps:$4 sm:$0xff]   ;;  %v10637_v61 = vld [vmem:[%s12588_s22 + $0x228] ss:$16 sps:$4 sm:$0xff]   ;;  %v10642_v12 = vld [vmem:[%s12588_s22 + $0x244] ss:$16 sps:$4 sm:$0xff]  }
 0x34f   : > { %7354 = vmatpush1.bf16.msra.mxu0 %v10572_v25  ;;  %7887 = vmatpush1.bf16.msra.mxu1 %v10573_v29  ;;  %v10645_v20 = vld [vmem:[%s12588_s22 + $0x24c] ss:$16 sps:$4 sm:$0xff]   ;;  %v10640_v21 = vld [vmem:[%s12588_s22 + $0x240] ss:$16 sps:$4 sm:$0xff]   ;;  %v10643_v63 = vld [vmem:[%s12588_s22 + $0x248] ss:$16 sps:$4 sm:$0xff]  }
 0x350   : > { %7355 = vmatprep.subr.bf16.mxu0 %v10574_v30  ;;  %7888 = vmatprep.subr.bf16.mxu1 %v10576_v32  ;;  %v3202_v16 = vcombine.high %v3192_v31, %v3192_v31  ;;  %v10648_v22 = vld [vmem:[%s12588_s22 + $0x264] ss:$16 sps:$4 sm:$0xff]   ;;  %v10651_v24 = vld [vmem:[%s12588_s22 + $0x26c] ss:$16 sps:$4 sm:$0xff]   ;;  %v10646_v25 = vld [vmem:[%s12588_s22 + $0x260] ss:$16 sps:$4 sm:$0xff]  }
 0x351   : > { %7373 = vmatprep.mubr.bf16.mxu0 %v3192_v31  ;;  %7906 = vmatprep.mubr.bf16.mxu1 %v3192_v31  ;;  %v10649_v29 = vld [vmem:[%s12588_s22 + $0x268] ss:$16 sps:$4 sm:$0xff]   ;;  %v10654_v30 = vld [vmem:[%s12588_s22 + $0x284] ss:$16 sps:$4 sm:$0xff]   ;;  %v10657_v32 = vld [vmem:[%s12588_s22 + $0x28c] ss:$16 sps:$4 sm:$0xff]  }
 0x352   : > { %v10666_v39 = vld [vmem:[%s12588_s22 + $0x2c4] ss:$16 sps:$4 sm:$0xff]   ;;  %v10669_v40 = vld [vmem:[%s12588_s22 + $0x2cc] ss:$16 sps:$4 sm:$0xff]   ;;  %v10664_v15 = vld [vmem:[%s12588_s22 + $0x2c0] ss:$16 sps:$4 sm:$0xff]  }
 0x353   : > { %7356 = vmatpush1.bf16.msra.mxu0 %v10578_v33  ;;  %7889 = vmatpush1.bf16.msra.mxu1 %v10579_v34  ;;  %v10652_v33 = vld [vmem:[%s12588_s22 + $0x280] ss:$16 sps:$4 sm:$0xff]   ;;  %v10655_v34 = vld [vmem:[%s12588_s22 + $0x288] ss:$16 sps:$4 sm:$0xff]   ;;  %v10699_v31 = vld [vmem:[%s12588_s22 + $0x36c] ss:$16 sps:$4 sm:$0xff]  }
 0x354   : > { %7357 = vmatprep.subr.bf16.mxu0 %v10580_v35  ;;  %7890 = vmatprep.subr.bf16.mxu1 %v10582_v36  ;;  %v10660_v35 = vld [vmem:[%s12588_s22 + $0x2a4] ss:$16 sps:$4 sm:$0xff]   ;;  %v10663_v36 = vld [vmem:[%s12588_s22 + $0x2ac] ss:$16 sps:$4 sm:$0xff]   ;;  %v10670_v50 = vld [vmem:[%s12588_s22 + $0x2e0] ss:$16 sps:$4 sm:$0xff]  }
 0x355   : > { %v10685_v9 = vld [vmem:[%s12588_s22 + $0x328] ss:$16 sps:$4 sm:$0xff]  }
 0x356   : > { %v10691_v55 = vld [vmem:[%s12588_s22 + $0x348] ss:$16 sps:$4 sm:$0xff]  }
 0x357   : > { %7358 = vmatpush1.bf16.msra.mxu0 %v10584_v26  ;;  %7891 = vmatpush1.bf16.msra.mxu1 %v10585_v37  ;;  %v10658_v26 = vld [vmem:[%s12588_s22 + $0x2a0] ss:$16 sps:$4 sm:$0xff]   ;;  %v10661_v37 = vld [vmem:[%s12588_s22 + $0x2a8] ss:$16 sps:$4 sm:$0xff]  }
 0x358   : > { %7359 = vmatprep.subr.bf16.mxu0 %v10586_v28  ;;  %7892 = vmatprep.subr.bf16.mxu1 %v10588_v45  ;;  %v10667_v28 = vld [vmem:[%s12588_s22 + $0x2c8] ss:$16 sps:$4 sm:$0xff]   ;;  %v10672_v45 = vld [vmem:[%s12588_s22 + $0x2e4] ss:$16 sps:$4 sm:$0xff]  }
 0x35b   : > { %7360 = vmatpush1.bf16.msra.mxu0 %v10590_v47  ;;  %7893 = vmatpush1.bf16.msra.mxu1 %v10591_v52  ;;  %v10675_v47 = vld [vmem:[%s12588_s22 + $0x2ec] ss:$16 sps:$4 sm:$0xff]   ;;  %v10673_v52 = vld [vmem:[%s12588_s22 + $0x2e8] ss:$16 sps:$4 sm:$0xff]  }
 0x35c   : > { %7361 = vmatprep.subr.bf16.mxu0 %v10592_v53  ;;  %7894 = vmatprep.subr.bf16.mxu1 %v10594_v48  ;;  %v10678_v53 = vld [vmem:[%s12588_s22 + $0x304] ss:$16 sps:$4 sm:$0xff]   ;;  %v10681_v48 = vld [vmem:[%s12588_s22 + $0x30c] ss:$16 sps:$4 sm:$0xff]  }
 0x35f   : > { %7362 = vmatpush1.bf16.msra.mxu0 %v10596_v38  ;;  %7895 = vmatpush1.bf16.msra.mxu1 %v10597_v6  ;;  %v10676_v38 = vld [vmem:[%s12588_s22 + $0x300] ss:$16 sps:$4 sm:$0xff]   ;;  %v10679_v6 = vld [vmem:[%s12588_s22 + $0x308] ss:$16 sps:$4 sm:$0xff]  }
 0x360   : > { %7363 = vmatprep.subr.bf16.mxu0 %v10598_v7  ;;  %7896 = vmatprep.subr.bf16.mxu1 %v10600_v60  ;;  %v10684_v7 = vld [vmem:[%s12588_s22 + $0x324] ss:$16 sps:$4 sm:$0xff]   ;;  %v10687_v60 = vld [vmem:[%s12588_s22 + $0x32c] ss:$16 sps:$4 sm:$0xff]  }
 0x363   : > { %7364 = vmatpush1.bf16.msra.mxu0 %v10602_v5  ;;  %7897 = vmatpush1.bf16.msra.mxu1 %v10603_v23  ;;  %v10682_v5 = vld [vmem:[%s12588_s22 + $0x320] ss:$16 sps:$4 sm:$0xff]   ;;  %v10690_v23 = vld [vmem:[%s12588_s22 + $0x344] ss:$16 sps:$4 sm:$0xff]  }
 0x364   : > { %7365 = vmatprep.subr.bf16.mxu0 %v10604_v54  ;;  %7898 = vmatprep.subr.bf16.mxu1 %v10606_v17  ;;  %v10693_v54 = vld [vmem:[%s12588_s22 + $0x34c] ss:$16 sps:$4 sm:$0xff]   ;;  %v10688_v17 = vld [vmem:[%s12588_s22 + $0x340] ss:$16 sps:$4 sm:$0xff]  }
 0x367   : > { %7366 = vmatpush1.bf16.msra.mxu0 %v10608_v56  ;;  %7899 = vmatpush1.bf16.msra.mxu1 %v10609_v41  ;;  %v10696_v56 = vld [vmem:[%s12588_s22 + $0x364] ss:$16 sps:$4 sm:$0xff]   ;;  %v10694_v41 = vld [vmem:[%s12588_s22 + $0x360] ss:$16 sps:$4 sm:$0xff]  }
 0x368   : > { %7367 = vmatprep.subr.bf16.mxu0 %v10610_v11  ;;  %7900 = vmatprep.subr.bf16.mxu1 %v10612_v42  ;;  %v10697_v11 = vld [vmem:[%s12588_s22 + $0x368] ss:$16 sps:$4 sm:$0xff]   ;;  %v10702_v42 = vld [vmem:[%s12588_s22 + $0x384] ss:$16 sps:$4 sm:$0xff]  }
 0x36b   : > { %7368 = vmatpush1.bf16.msra.mxu0 %v10614_v57  ;;  %7901 = vmatpush1.bf16.msra.mxu1 %v10615_v19  ;;  %v10705_v57 = vld [vmem:[%s12588_s22 + $0x38c] ss:$16 sps:$4 sm:$0xff]   ;;  %v10700_v19 = vld [vmem:[%s12588_s22 + $0x380] ss:$16 sps:$4 sm:$0xff]  }
 0x36c   : > { %7369 = vmatprep.subr.bf16.mxu0 %v10616_v58  ;;  %7902 = vmatprep.subr.bf16.mxu1 %v10618_v59  ;;  %v10703_v58 = vld [vmem:[%s12588_s22 + $0x388] ss:$16 sps:$4 sm:$0xff]   ;;  %v10708_v59 = vld [vmem:[%s12588_s22 + $0x3a4] ss:$16 sps:$4 sm:$0xff]  }
 0x36f   : > { %7370 = vmatpush1.bf16.msra.mxu0 %v10620_v62  ;;  %7903 = vmatpush1.bf16.msra.mxu1 %v10621_v0  ;;  %v10711_v62 = vld [vmem:[%s12588_s22 + $0x3ac] ss:$16 sps:$4 sm:$0xff]   ;;  %v10706_v0 = vld [vmem:[%s12588_s22 + $0x3a0] ss:$16 sps:$4 sm:$0xff]  }
 0x370   : > { %7371 = vmatprep.subr.bf16.mxu0 %v10622_v44  ;;  %7904 = vmatprep.subr.bf16.mxu1 %v10624_v2  ;;  %v10709_v44 = vld [vmem:[%s12588_s22 + $0x3a8] ss:$16 sps:$4 sm:$0xff]   ;;  %v10714_v2 = vld [vmem:[%s12588_s22 + $0x3c4] ss:$16 sps:$4 sm:$0xff]  }
 0x373   : > { %7372 = vmatpush1.bf16.msra.mxu0 %v10626_v3  ;;  %7905 = vmatpush1.bf16.msra.mxu1 %v10627_v27  ;;  %v10717_v3 = vld [vmem:[%s12588_s22 + $0x3cc] ss:$16 sps:$4 sm:$0xff]   ;;  %v3155_v27 = vcombine.high %v12970_v8, %v12970_v8  ;;  %v10721_v8 = vld [vmem:[%s12588_s22 + $0x3e8] ss:$16 sps:$4 sm:$0xff]  }
 0x374   : > { %7382 = vmatprep.subr.bf16.mxu0 %v10630_v13  ;;  %7915 = vmatprep.subr.bf16.mxu1 %v10633_v43  ;;  %v10712_v13 = vld [vmem:[%s12588_s22 + $0x3c0] ss:$16 sps:$4 sm:$0xff]   ;;  %v10715_v43 = vld [vmem:[%s12588_s22 + $0x3c8] ss:$16 sps:$4 sm:$0xff]  }
 0x376   : > { %7374 = vmatmul.mubr.bf16.vlgmr.msra.gmra.mrb[0].mxu0 %v12997_v46  ;;  %7907 = vmatmul.mubr.bf16.vlgmr.msra.gmra.mrb[0].mxu1 %v12997_v46 }
 0x377   : > { %7383 = vmatpush1.bf16.msra.mxu0 %v10628_v14  ;;  %7916 = vmatpush1.bf16.msra.mxu1 %v10631_v1  ;;  %v10720_v14 = vld [vmem:[%s12588_s22 + $0x3e4] ss:$16 sps:$4 sm:$0xff]   ;;  %v10723_v1 = vld [vmem:[%s12588_s22 + $0x3ec] ss:$16 sps:$4 sm:$0xff]  }
 0x378   : > { %7384 = vmatprep.subr.bf16.mxu0 %v10636_v4  ;;  %7917 = vmatprep.subr.bf16.mxu1 %v10639_v10  ;;  %v13063_v4 = vrot.slane %v3155_v27, %v12963_v49  ;;  %v10718_v10 = vld [vmem:[%s12588_s22 + $0x3e0] ss:$16 sps:$4 sm:$0xff]   ;;  %v10799_v27 = vld [vmem:[%s12588_s22 + $0x588] ss:$16 sps:$4 sm:$0xff]  }
 0x379   : > { %7414 = vmatprep.mubr.bf16.mxu0 %v3202_v16  ;;  %7947 = vmatprep.mubr.bf16.mxu1 %v3202_v16  ;;  %v10726_v16 = vld [vmem:[%s12588_s22 + $0x404] ss:$16 sps:$4 sm:$0xff]  }
 0x37b   : > { %7385 = vmatpush1.bf16.msra.mxu0 %v10634_v18  ;;  %7918 = vmatpush1.bf16.msra.mxu1 %v10637_v61  ;;  %v10729_v18 = vld [vmem:[%s12588_s22 + $0x40c] ss:$16 sps:$4 sm:$0xff]   ;;  %v3171_v61 = vcombine.high %v13063_v4, %v13063_v4 }
 0x37c   : > { %7386 = vmatprep.subr.bf16.mxu0 %v10642_v12  ;;  %7919 = vmatprep.subr.bf16.mxu1 %v10645_v20  ;;  %v10724_v12 = vld [vmem:[%s12588_s22 + $0x400] ss:$16 sps:$4 sm:$0xff]   ;;  %v3200_v20 = vcombine.high %v12997_v46, %v12997_v46  ;;  %v10733_v46 = vld [vmem:[%s12588_s22 + $0x428] ss:$16 sps:$4 sm:$0xff]  }
 0x37f   : > { %7387 = vmatpush1.bf16.msra.mxu0 %v10640_v21  ;;  %7920 = vmatpush1.bf16.msra.mxu1 %v10643_v63  ;;  %v10727_v21 = vld [vmem:[%s12588_s22 + $0x408] ss:$16 sps:$4 sm:$0xff]   ;;  %v10732_v63 = vld [vmem:[%s12588_s22 + $0x424] ss:$16 sps:$4 sm:$0xff]  }
 0x380   : > { %7388 = vmatprep.subr.bf16.mxu0 %v10648_v22  ;;  %7921 = vmatprep.subr.bf16.mxu1 %v10651_v24  ;;  %v10735_v22 = vld [vmem:[%s12588_s22 + $0x42c] ss:$16 sps:$4 sm:$0xff]   ;;  %v13078_v24 = vrot.slane %v3171_v61, %v12963_v49  ;;  %v10816_v61 = vld [vmem:[%s12588_s22 + $0x5e4] ss:$16 sps:$4 sm:$0xff]  }
 0x383   : > { %7389 = vmatpush1.bf16.msra.mxu0 %v10646_v25  ;;  %7922 = vmatpush1.bf16.msra.mxu1 %v10649_v29  ;;  %v10730_v25 = vld [vmem:[%s12588_s22 + $0x420] ss:$16 sps:$4 sm:$0xff]   ;;  %v10738_v29 = vld [vmem:[%s12588_s22 + $0x444] ss:$16 sps:$4 sm:$0xff]  }
 0x384   : > { %7390 = vmatprep.subr.bf16.mxu0 %v10654_v30  ;;  %7923 = vmatprep.subr.bf16.mxu1 %v10657_v32  ;;  %v10741_v30 = vld [vmem:[%s12588_s22 + $0x44c] ss:$16 sps:$4 sm:$0xff]   ;;  %v10736_v32 = vld [vmem:[%s12588_s22 + $0x440] ss:$16 sps:$4 sm:$0xff]  }
 0x387   : > { %7391 = vmatpush1.bf16.msra.mxu0 %v10652_v33  ;;  %7924 = vmatpush1.bf16.msra.mxu1 %v10655_v34  ;;  %v10739_v33 = vld [vmem:[%s12588_s22 + $0x448] ss:$16 sps:$4 sm:$0xff]   ;;  %v10744_v34 = vld [vmem:[%s12588_s22 + $0x464] ss:$16 sps:$4 sm:$0xff]  }
 0x388   : > { %7392 = vmatprep.subr.bf16.mxu0 %v10660_v35  ;;  %7925 = vmatprep.subr.bf16.mxu1 %v10663_v36  ;;  %v10747_v35 = vld [vmem:[%s12588_s22 + $0x46c] ss:$16 sps:$4 sm:$0xff]   ;;  %v10742_v36 = vld [vmem:[%s12588_s22 + $0x460] ss:$16 sps:$4 sm:$0xff]  }
 0x38b   : > { %7393 = vmatpush1.bf16.msra.mxu0 %v10658_v26  ;;  %7926 = vmatpush1.bf16.msra.mxu1 %v10661_v37  ;;  %v10745_v26 = vld [vmem:[%s12588_s22 + $0x468] ss:$16 sps:$4 sm:$0xff]   ;;  %v10750_v37 = vld [vmem:[%s12588_s22 + $0x484] ss:$16 sps:$4 sm:$0xff]  }
 0x38c   : > { %7394 = vmatprep.subr.bf16.mxu0 %v10666_v39  ;;  %7927 = vmatprep.subr.bf16.mxu1 %v10669_v40  ;;  %v10753_v39 = vld [vmem:[%s12588_s22 + $0x48c] ss:$16 sps:$4 sm:$0xff]   ;;  %v10748_v40 = vld [vmem:[%s12588_s22 + $0x480] ss:$16 sps:$4 sm:$0xff]  }
 0x38f   : > { %7395 = vmatpush1.bf16.msra.mxu0 %v10664_v15  ;;  %7928 = vmatpush1.bf16.msra.mxu1 %v10667_v28  ;;  %v10751_v15 = vld [vmem:[%s12588_s22 + $0x488] ss:$16 sps:$4 sm:$0xff]   ;;  %v10756_v28 = vld [vmem:[%s12588_s22 + $0x4a4] ss:$16 sps:$4 sm:$0xff]  }
 0x390   : > { %7396 = vmatprep.subr.bf16.mxu0 %v10672_v45  ;;  %7929 = vmatprep.subr.bf16.mxu1 %v10675_v47  ;;  %v10759_v45 = vld [vmem:[%s12588_s22 + $0x4ac] ss:$16 sps:$4 sm:$0xff]   ;;  %v10754_v47 = vld [vmem:[%s12588_s22 + $0x4a0] ss:$16 sps:$4 sm:$0xff]  }
 0x393   : > { %7397 = vmatpush1.bf16.msra.mxu0 %v10670_v50  ;;  %7930 = vmatpush1.bf16.msra.mxu1 %v10673_v52  ;;  %v10757_v50 = vld [vmem:[%s12588_s22 + $0x4a8] ss:$16 sps:$4 sm:$0xff]   ;;  %v10762_v52 = vld [vmem:[%s12588_s22 + $0x4c4] ss:$16 sps:$4 sm:$0xff]  }
 0x394   : > { %7398 = vmatprep.subr.bf16.mxu0 %v10678_v53  ;;  %7931 = vmatprep.subr.bf16.mxu1 %v10681_v48  ;;  %v10765_v53 = vld [vmem:[%s12588_s22 + $0x4cc] ss:$16 sps:$4 sm:$0xff]   ;;  %v10760_v48 = vld [vmem:[%s12588_s22 + $0x4c0] ss:$16 sps:$4 sm:$0xff]  }
 0x397   : > { %7399 = vmatpush1.bf16.msra.mxu0 %v10676_v38  ;;  %7932 = vmatpush1.bf16.msra.mxu1 %v10679_v6  ;;  %v10763_v38 = vld [vmem:[%s12588_s22 + $0x4c8] ss:$16 sps:$4 sm:$0xff]   ;;  %v10768_v6 = vld [vmem:[%s12588_s22 + $0x4e4] ss:$16 sps:$4 sm:$0xff]  }
 0x398   : > { %7400 = vmatprep.subr.bf16.mxu0 %v10684_v7  ;;  %7933 = vmatprep.subr.bf16.mxu1 %v10687_v60  ;;  %v10771_v7 = vld [vmem:[%s12588_s22 + $0x4ec] ss:$16 sps:$4 sm:$0xff]   ;;  %v10766_v60 = vld [vmem:[%s12588_s22 + $0x4e0] ss:$16 sps:$4 sm:$0xff]  }
 0x39b   : > { %7401 = vmatpush1.bf16.msra.mxu0 %v10682_v5  ;;  %7934 = vmatpush1.bf16.msra.mxu1 %v10685_v9  ;;  %v10769_v5 = vld [vmem:[%s12588_s22 + $0x4e8] ss:$16 sps:$4 sm:$0xff]   ;;  %v10774_v9 = vld [vmem:[%s12588_s22 + $0x504] ss:$16 sps:$4 sm:$0xff]  }
 0x39c   : > { %7402 = vmatprep.subr.bf16.mxu0 %v10690_v23  ;;  %7935 = vmatprep.subr.bf16.mxu1 %v10693_v54  ;;  %v10777_v23 = vld [vmem:[%s12588_s22 + $0x50c] ss:$16 sps:$4 sm:$0xff]   ;;  %v10772_v54 = vld [vmem:[%s12588_s22 + $0x500] ss:$16 sps:$4 sm:$0xff]  }
 0x39f   : > { %7403 = vmatpush1.bf16.msra.mxu0 %v10688_v17  ;;  %7936 = vmatpush1.bf16.msra.mxu1 %v10691_v55  ;;  %v10775_v17 = vld [vmem:[%s12588_s22 + $0x508] ss:$16 sps:$4 sm:$0xff]   ;;  %v10780_v55 = vld [vmem:[%s12588_s22 + $0x524] ss:$16 sps:$4 sm:$0xff]  }
 0x3a0   : > { %7404 = vmatprep.subr.bf16.mxu0 %v10696_v56  ;;  %7937 = vmatprep.subr.bf16.mxu1 %v10699_v31  ;;  %v10783_v56 = vld [vmem:[%s12588_s22 + $0x52c] ss:$16 sps:$4 sm:$0xff]   ;;  %v10778_v31 = vld [vmem:[%s12588_s22 + $0x520] ss:$16 sps:$4 sm:$0xff]  }
 0x3a3   : > { %7405 = vmatpush1.bf16.msra.mxu0 %v10694_v41  ;;  %7938 = vmatpush1.bf16.msra.mxu1 %v10697_v11  ;;  %v10781_v41 = vld [vmem:[%s12588_s22 + $0x528] ss:$16 sps:$4 sm:$0xff]   ;;  %v10786_v11 = vld [vmem:[%s12588_s22 + $0x544] ss:$16 sps:$4 sm:$0xff]  }
 0x3a4   : > { %7406 = vmatprep.subr.bf16.mxu0 %v10702_v42  ;;  %7939 = vmatprep.subr.bf16.mxu1 %v10705_v57  ;;  %v10789_v42 = vld [vmem:[%s12588_s22 + $0x54c] ss:$16 sps:$4 sm:$0xff]   ;;  %v10784_v57 = vld [vmem:[%s12588_s22 + $0x540] ss:$16 sps:$4 sm:$0xff]  }
 0x3a7   : > { %7407 = vmatpush1.bf16.msra.mxu0 %v10700_v19  ;;  %7940 = vmatpush1.bf16.msra.mxu1 %v10703_v58  ;;  %v10787_v19 = vld [vmem:[%s12588_s22 + $0x548] ss:$16 sps:$4 sm:$0xff]   ;;  %v10792_v58 = vld [vmem:[%s12588_s22 + $0x564] ss:$16 sps:$4 sm:$0xff]  }
 0x3a8   : > { %7408 = vmatprep.subr.bf16.mxu0 %v10708_v59  ;;  %7941 = vmatprep.subr.bf16.mxu1 %v10711_v62  ;;  %v10795_v59 = vld [vmem:[%s12588_s22 + $0x56c] ss:$16 sps:$4 sm:$0xff]   ;;  %v10790_v62 = vld [vmem:[%s12588_s22 + $0x560] ss:$16 sps:$4 sm:$0xff]  }
 0x3ab   : > { %7409 = vmatpush1.bf16.msra.mxu0 %v10706_v0  ;;  %7942 = vmatpush1.bf16.msra.mxu1 %v10709_v44  ;;  %v10793_v0 = vld [vmem:[%s12588_s22 + $0x568] ss:$16 sps:$4 sm:$0xff]   ;;  %v10798_v44 = vld [vmem:[%s12588_s22 + $0x584] ss:$16 sps:$4 sm:$0xff]  }
 0x3ac   : > { %7410 = vmatprep.subr.bf16.mxu0 %v10714_v2  ;;  %7943 = vmatprep.subr.bf16.mxu1 %v10717_v3  ;;  %v10801_v2 = vld [vmem:[%s12588_s22 + $0x58c] ss:$16 sps:$4 sm:$0xff]   ;;  %v10796_v3 = vld [vmem:[%s12588_s22 + $0x580] ss:$16 sps:$4 sm:$0xff]  }
 0x3af   : > { %7411 = vmatpush1.bf16.msra.mxu0 %v10712_v13  ;;  %7944 = vmatpush1.bf16.msra.mxu1 %v10715_v43  ;;  %v10804_v13 = vld [vmem:[%s12588_s22 + $0x5a4] ss:$16 sps:$4 sm:$0xff]   ;;  %v10807_v43 = vld [vmem:[%s12588_s22 + $0x5ac] ss:$16 sps:$4 sm:$0xff]  }
 0x3b0   : > { %7412 = vmatprep.subr.bf16.mxu0 %v10720_v14  ;;  %7945 = vmatprep.subr.bf16.mxu1 %v10723_v1  ;;  %v10802_v14 = vld [vmem:[%s12588_s22 + $0x5a0] ss:$16 sps:$4 sm:$0xff]   ;;  %v10805_v1 = vld [vmem:[%s12588_s22 + $0x5a8] ss:$16 sps:$4 sm:$0xff]  }
 0x3b3   : > { %7413 = vmatpush1.bf16.msra.mxu0 %v10718_v10  ;;  %7946 = vmatpush1.bf16.msra.mxu1 %v10721_v8  ;;  %v10810_v10 = vld [vmem:[%s12588_s22 + $0x5c4] ss:$16 sps:$4 sm:$0xff]   ;;  %v10813_v8 = vld [vmem:[%s12588_s22 + $0x5cc] ss:$16 sps:$4 sm:$0xff]  }
 0x3b4   : > { %7423 = vmatprep.subr.bf16.mxu0 %v10726_v16  ;;  %7956 = vmatprep.subr.bf16.mxu1 %v10729_v18  ;;  %v10808_v16 = vld [vmem:[%s12588_s22 + $0x5c0] ss:$16 sps:$4 sm:$0xff]   ;;  %v10811_v18 = vld [vmem:[%s12588_s22 + $0x5c8] ss:$16 sps:$4 sm:$0xff]  }
 0x3b6   : > { %7415 = vmatmul.mubr.bf16.vlgmr.msra.gmra.mrb[0].mxu0 %v3200_v20  ;;  %7948 = vmatmul.mubr.bf16.vlgmr.msra.gmra.mrb[0].mxu1 %v3200_v20  ;;  %v10814_v20 = vld [vmem:[%s12588_s22 + $0x5e0] ss:$16 sps:$4 sm:$0xff]  }
 0x3b7   : > { %7424 = vmatpush1.bf16.msra.mxu0 %v10724_v12  ;;  %7957 = vmatpush1.bf16.msra.mxu1 %v10727_v21  ;;  %v10819_v12 = vld [vmem:[%s12588_s22 + $0x5ec] ss:$16 sps:$4 sm:$0xff]   ;;  %v10817_v21 = vld [vmem:[%s12588_s22 + $0x5e8] ss:$16 sps:$4 sm:$0xff]  }
 0x3b8   : > { %7425 = vmatprep.subr.bf16.mxu0 %v10732_v63  ;;  %7958 = vmatprep.subr.bf16.mxu1 %v10735_v22  ;;  %v10823_v63 = vld [vmem:[%s12588_s22 + $0x604] ss:$16 sps:$4 sm:$0xff]   ;;  %v10826_v22 = vld [vmem:[%s12588_s22 + $0x60c] ss:$16 sps:$4 sm:$0xff]  }
 0x3b9   : > { %7455 = vmatprep.mubr.bf16.mxu0 %v13078_v24  ;;  %7988 = vmatprep.mubr.bf16.mxu1 %v13078_v24 }
 0x3bb   : > { %7426 = vmatpush1.bf16.msra.mxu0 %v10730_v25  ;;  %7959 = vmatpush1.bf16.msra.mxu1 %v10733_v46  ;;  %v10821_v25 = vld [vmem:[%s12588_s22 + $0x600] ss:$16 sps:$4 sm:$0xff]   ;;  %v13145_v46 = vrot.slane %v13063_v4, %v12963_v49 }
 0x3bc   : > { %7427 = vmatprep.subr.bf16.mxu0 %v10738_v29  ;;  %7960 = vmatprep.subr.bf16.mxu1 %v10741_v30  ;;  %v10824_v29 = vld [vmem:[%s12588_s22 + $0x608] ss:$16 sps:$4 sm:$0xff]   ;;  %v10829_v30 = vld [vmem:[%s12588_s22 + $0x624] ss:$16 sps:$4 sm:$0xff]   ;;  %v10827_v4 = vld [vmem:[%s12588_s22 + $0x620] ss:$16 sps:$4 sm:$0xff]  }
 0x3bf   : > { %7428 = vmatpush1.bf16.msra.mxu0 %v10736_v32  ;;  %7961 = vmatpush1.bf16.msra.mxu1 %v10739_v33  ;;  %v10832_v32 = vld [vmem:[%s12588_s22 + $0x62c] ss:$16 sps:$4 sm:$0xff]   ;;  %v3203_v33 = vcombine.high %v13078_v24, %v13078_v24  ;;  %v10833_v24 = vld [vmem:[%s12588_s22 + $0x640] ss:$16 sps:$4 sm:$0xff]  }
 0x3c0   : > { %7429 = vmatprep.subr.bf16.mxu0 %v10744_v34  ;;  %7962 = vmatprep.subr.bf16.mxu1 %v10747_v35  ;;  %v10830_v34 = vld [vmem:[%s12588_s22 + $0x628] ss:$16 sps:$4 sm:$0xff]   ;;  %v10835_v35 = vld [vmem:[%s12588_s22 + $0x644] ss:$16 sps:$4 sm:$0xff]  }
 0x3c3   : > { %7430 = vmatpush1.bf16.msra.mxu0 %v10742_v36  ;;  %7963 = vmatpush1.bf16.msra.mxu1 %v10745_v26  ;;  %v10838_v36 = vld [vmem:[%s12588_s22 + $0x64c] ss:$16 sps:$4 sm:$0xff]   ;;  %v10836_v26 = vld [vmem:[%s12588_s22 + $0x648] ss:$16 sps:$4 sm:$0xff]  }
 0x3c4   : > { %7431 = vmatprep.subr.bf16.mxu0 %v10750_v37  ;;  %7964 = vmatprep.subr.bf16.mxu1 %v10753_v39  ;;  %v10841_v37 = vld [vmem:[%s12588_s22 + $0x664] ss:$16 sps:$4 sm:$0xff]   ;;  %v10844_v39 = vld [vmem:[%s12588_s22 + $0x66c] ss:$16 sps:$4 sm:$0xff]  }
 0x3c7   : > { %7432 = vmatpush1.bf16.msra.mxu0 %v10748_v40  ;;  %7965 = vmatpush1.bf16.msra.mxu1 %v10751_v15  ;;  %v10839_v40 = vld [vmem:[%s12588_s22 + $0x660] ss:$16 sps:$4 sm:$0xff]   ;;  %v10842_v15 = vld [vmem:[%s12588_s22 + $0x668] ss:$16 sps:$4 sm:$0xff]  }
 0x3c8   : > { %7433 = vmatprep.subr.bf16.mxu0 %v10756_v28  ;;  %7966 = vmatprep.subr.bf16.mxu1 %v10759_v45  ;;  %v10847_v28 = vld [vmem:[%s12588_s22 + $0x684] ss:$16 sps:$4 sm:$0xff]   ;;  %v10850_v45 = vld [vmem:[%s12588_s22 + $0x68c] ss:$16 sps:$4 sm:$0xff]  }
 0x3cb   : > { %7434 = vmatpush1.bf16.msra.mxu0 %v10754_v47  ;;  %7967 = vmatpush1.bf16.msra.mxu1 %v10757_v50  ;;  %v10845_v47 = vld [vmem:[%s12588_s22 + $0x680] ss:$16 sps:$4 sm:$0xff]   ;;  %v10848_v50 = vld [vmem:[%s12588_s22 + $0x688] ss:$16 sps:$4 sm:$0xff]  }
 0x3cc   : > { %7435 = vmatprep.subr.bf16.mxu0 %v10762_v52  ;;  %7968 = vmatprep.subr.bf16.mxu1 %v10765_v53  ;;  %v10853_v52 = vld [vmem:[%s12588_s22 + $0x6a4] ss:$16 sps:$4 sm:$0xff]   ;;  %v10856_v53 = vld [vmem:[%s12588_s22 + $0x6ac] ss:$16 sps:$4 sm:$0xff]  }
 0x3cf   : > { %7436 = vmatpush1.bf16.msra.mxu0 %v10760_v48  ;;  %7969 = vmatpush1.bf16.msra.mxu1 %v10763_v38  ;;  %v10851_v48 = vld [vmem:[%s12588_s22 + $0x6a0] ss:$16 sps:$4 sm:$0xff]   ;;  %v10854_v38 = vld [vmem:[%s12588_s22 + $0x6a8] ss:$16 sps:$4 sm:$0xff]  }
 0x3d0   : > { %7437 = vmatprep.subr.bf16.mxu0 %v10768_v6  ;;  %7970 = vmatprep.subr.bf16.mxu1 %v10771_v7  ;;  %v10859_v6 = vld [vmem:[%s12588_s22 + $0x6c4] ss:$16 sps:$4 sm:$0xff]   ;;  %v10862_v7 = vld [vmem:[%s12588_s22 + $0x6cc] ss:$16 sps:$4 sm:$0xff]  }
 0x3d3   : > { %7438 = vmatpush1.bf16.msra.mxu0 %v10766_v60  ;;  %7971 = vmatpush1.bf16.msra.mxu1 %v10769_v5  ;;  %v10857_v60 = vld [vmem:[%s12588_s22 + $0x6c0] ss:$16 sps:$4 sm:$0xff]   ;;  %v10860_v5 = vld [vmem:[%s12588_s22 + $0x6c8] ss:$16 sps:$4 sm:$0xff]  }
 0x3d4   : > { %7439 = vmatprep.subr.bf16.mxu0 %v10774_v9  ;;  %7972 = vmatprep.subr.bf16.mxu1 %v10777_v23  ;;  %v10865_v9 = vld [vmem:[%s12588_s22 + $0x6e4] ss:$16 sps:$4 sm:$0xff]   ;;  %v10868_v23 = vld [vmem:[%s12588_s22 + $0x6ec] ss:$16 sps:$4 sm:$0xff]  }
 0x3d7   : > { %7440 = vmatpush1.bf16.msra.mxu0 %v10772_v54  ;;  %7973 = vmatpush1.bf16.msra.mxu1 %v10775_v17  ;;  %v10863_v54 = vld [vmem:[%s12588_s22 + $0x6e0] ss:$16 sps:$4 sm:$0xff]   ;;  %v10866_v17 = vld [vmem:[%s12588_s22 + $0x6e8] ss:$16 sps:$4 sm:$0xff]  }
 0x3d8   : > { %7441 = vmatprep.subr.bf16.mxu0 %v10780_v55  ;;  %7974 = vmatprep.subr.bf16.mxu1 %v10783_v56  ;;  %v10871_v55 = vld [vmem:[%s12588_s22 + $0x704] ss:$16 sps:$4 sm:$0xff]   ;;  %v10874_v56 = vld [vmem:[%s12588_s22 + $0x70c] ss:$16 sps:$4 sm:$0xff]  }
 0x3db   : > { %7442 = vmatpush1.bf16.msra.mxu0 %v10778_v31  ;;  %7975 = vmatpush1.bf16.msra.mxu1 %v10781_v41  ;;  %v10869_v31 = vld [vmem:[%s12588_s22 + $0x700] ss:$16 sps:$4 sm:$0xff]   ;;  %v10872_v41 = vld [vmem:[%s12588_s22 + $0x708] ss:$16 sps:$4 sm:$0xff]  }
 0x3dc   : > { %7443 = vmatprep.subr.bf16.mxu0 %v10786_v11  ;;  %7976 = vmatprep.subr.bf16.mxu1 %v10789_v42  ;;  %v10877_v11 = vld [vmem:[%s12588_s22 + $0x724] ss:$16 sps:$4 sm:$0xff]   ;;  %v10880_v42 = vld [vmem:[%s12588_s22 + $0x72c] ss:$16 sps:$4 sm:$0xff]  }
 0x3df   : > { %7444 = vmatpush1.bf16.msra.mxu0 %v10784_v57  ;;  %7977 = vmatpush1.bf16.msra.mxu1 %v10787_v19  ;;  %v10875_v57 = vld [vmem:[%s12588_s22 + $0x720] ss:$16 sps:$4 sm:$0xff]   ;;  %v10878_v19 = vld [vmem:[%s12588_s22 + $0x728] ss:$16 sps:$4 sm:$0xff]  }
 0x3e0   : > { %7445 = vmatprep.subr.bf16.mxu0 %v10792_v58  ;;  %7978 = vmatprep.subr.bf16.mxu1 %v10795_v59  ;;  %v10883_v58 = vld [vmem:[%s12588_s22 + $0x744] ss:$16 sps:$4 sm:$0xff]   ;;  %v10886_v59 = vld [vmem:[%s12588_s22 + $0x74c] ss:$16 sps:$4 sm:$0xff]  }
 0x3e3   : > { %7446 = vmatpush1.bf16.msra.mxu0 %v10790_v62  ;;  %7979 = vmatpush1.bf16.msra.mxu1 %v10793_v0  ;;  %v10881_v62 = vld [vmem:[%s12588_s22 + $0x740] ss:$16 sps:$4 sm:$0xff]   ;;  %v10884_v0 = vld [vmem:[%s12588_s22 + $0x748] ss:$16 sps:$4 sm:$0xff]  }
 0x3e4   : > { %7447 = vmatprep.subr.bf16.mxu0 %v10798_v44  ;;  %7980 = vmatprep.subr.bf16.mxu1 %v10801_v2  ;;  %v10889_v44 = vld [vmem:[%s12588_s22 + $0x764] ss:$16 sps:$4 sm:$0xff]   ;;  %v10892_v2 = vld [vmem:[%s12588_s22 + $0x76c] ss:$16 sps:$4 sm:$0xff]  }
 0x3e7   : > { %7448 = vmatpush1.bf16.msra.mxu0 %v10796_v3  ;;  %7981 = vmatpush1.bf16.msra.mxu1 %v10799_v27  ;;  %v10887_v3 = vld [vmem:[%s12588_s22 + $0x760] ss:$16 sps:$4 sm:$0xff]   ;;  %v10890_v27 = vld [vmem:[%s12588_s22 + $0x768] ss:$16 sps:$4 sm:$0xff]  }
 0x3e8   : > { %7449 = vmatprep.subr.bf16.mxu0 %v10804_v13  ;;  %7982 = vmatprep.subr.bf16.mxu1 %v10807_v43  ;;  %v10895_v13 = vld [vmem:[%s12588_s22 + $0x784] ss:$16 sps:$4 sm:$0xff]   ;;  %v10898_v43 = vld [vmem:[%s12588_s22 + $0x78c] ss:$16 sps:$4 sm:$0xff]  }
 0x3eb   : > { %7450 = vmatpush1.bf16.msra.mxu0 %v10802_v14  ;;  %7983 = vmatpush1.bf16.msra.mxu1 %v10805_v1  ;;  %v10893_v14 = vld [vmem:[%s12588_s22 + $0x780] ss:$16 sps:$4 sm:$0xff]   ;;  %v10896_v1 = vld [vmem:[%s12588_s22 + $0x788] ss:$16 sps:$4 sm:$0xff]  }
 0x3ec   : > { %7451 = vmatprep.subr.bf16.mxu0 %v10810_v10  ;;  %7984 = vmatprep.subr.bf16.mxu1 %v10813_v8  ;;  %v10901_v10 = vld [vmem:[%s12588_s22 + $0x7a4] ss:$16 sps:$4 sm:$0xff]   ;;  %v10904_v8 = vld [vmem:[%s12588_s22 + $0x7ac] ss:$16 sps:$4 sm:$0xff]  }
 0x3ef   : > { %7452 = vmatpush1.bf16.msra.mxu0 %v10808_v16  ;;  %7985 = vmatpush1.bf16.msra.mxu1 %v10811_v18  ;;  %v10899_v16 = vld [vmem:[%s12588_s22 + $0x7a0] ss:$16 sps:$4 sm:$0xff]   ;;  %v10902_v18 = vld [vmem:[%s12588_s22 + $0x7a8] ss:$16 sps:$4 sm:$0xff]  }
 0x3f0   : > { %7453 = vmatprep.subr.bf16.mxu0 %v10816_v61  ;;  %7986 = vmatprep.subr.bf16.mxu1 %v10819_v12  ;;  %v10907_v61 = vld [vmem:[%s12588_s22 + $0x7c4] ss:$16 sps:$4 sm:$0xff]   ;;  %v10910_v12 = vld [vmem:[%s12588_s22 + $0x7cc] ss:$16 sps:$4 sm:$0xff]  }
 0x3f3   : > { %7454 = vmatpush1.bf16.msra.mxu0 %v10814_v20  ;;  %7987 = vmatpush1.bf16.msra.mxu1 %v10817_v21  ;;  %v13207_v20 = vld.sshfl [vmem:[%s12967_s4 + $0x8] sm:$0xff pattern:$0x75316420]  ;;  %v10905_v21 = vld [vmem:[%s12588_s22 + $0x7c0] ss:$16 sps:$4 sm:$0xff]  }
 0x3f4   : > { %7464 = vmatprep.subr.bf16.mxu0 %v10823_v63  ;;  %7997 = vmatprep.subr.bf16.mxu1 %v10826_v22  ;;  %v10908_v63 = vld [vmem:[%s12588_s22 + $0x7c8] ss:$16 sps:$4 sm:$0xff]   ;;  %v10913_v22 = vld [vmem:[%s12588_s22 + $0x7e4] ss:$16 sps:$4 sm:$0xff]  }
 0x3f6   : > { %7456 = vmatmul.mubr.bf16.vlgmr.msra.gmra.mrb[0].mxu0 %v13145_v46  ;;  %7989 = vmatmul.mubr.bf16.vlgmr.msra.gmra.mrb[0].mxu1 %v13145_v46 }
 0x3f7   : > { %7465 = vmatpush1.bf16.msra.mxu0 %v10821_v25  ;;  %7998 = vmatpush1.bf16.msra.mxu1 %v10824_v29  ;;  %v10916_v25 = vld [vmem:[%s12588_s22 + $0x7ec] ss:$16 sps:$4 sm:$0xff]   ;;  %v10911_v29 = vld [vmem:[%s12588_s22 + $0x7e0] ss:$16 sps:$4 sm:$0xff]  }
 0x3f8   : > { %7466 = vmatprep.subr.bf16.mxu0 %v10829_v30  ;;  %7999 = vmatprep.subr.bf16.mxu1 %v10832_v32  ;;  %v10914_v30 = vld [vmem:[%s12588_s22 + $0x7e8] ss:$16 sps:$4 sm:$0xff]   ;;  %v10919_v32 = vld [vmem:[%s12588_s22 + $0x804] ss:$16 sps:$4 sm:$0xff]  }
 0x3f9   : > { %7496 = vmatprep.mubr.bf16.mxu0 %v3203_v33  ;;  %8029 = vmatprep.mubr.bf16.mxu1 %v3203_v33  ;;  %v10922_v33 = vld [vmem:[%s12588_s22 + $0x80c] ss:$16 sps:$4 sm:$0xff]  }
 0x3fb   : > { %7467 = vmatpush1.bf16.msra.mxu0 %v10827_v4  ;;  %8000 = vmatpush1.bf16.msra.mxu1 %v10830_v34  ;;  %v3219_v4 = vcombine.high %v13207_v20, %v13207_v20  ;;  %v3201_v34 = vcombine.high %v13145_v46, %v13145_v46  ;;  %v10923_v46 = vld [vmem:[%s12588_s22 + $0x820] ss:$16 sps:$4 sm:$0xff]  }
 0x3fc   : > { %7468 = vmatprep.subr.bf16.mxu0 %v10835_v35  ;;  %8001 = vmatprep.subr.bf16.mxu1 %v10838_v36  ;;  %v10917_v35 = vld [vmem:[%s12588_s22 + $0x800] ss:$16 sps:$4 sm:$0xff]   ;;  %v10920_v36 = vld [vmem:[%s12588_s22 + $0x808] ss:$16 sps:$4 sm:$0xff]  }
 0x3ff   : > { %7469 = vmatpush1.bf16.msra.mxu0 %v10833_v24  ;;  %8002 = vmatpush1.bf16.msra.mxu1 %v10836_v26  ;;  %v10925_v24 = vld [vmem:[%s12588_s22 + $0x824] ss:$16 sps:$4 sm:$0xff]   ;;  %v10928_v26 = vld [vmem:[%s12588_s22 + $0x82c] ss:$16 sps:$4 sm:$0xff]  }
 0x400   : > { %7470 = vmatprep.subr.bf16.mxu0 %v10841_v37  ;;  %8003 = vmatprep.subr.bf16.mxu1 %v10844_v39  ;;  %v13226_v37 = vrot.slane %v3219_v4, %v12963_v49  ;;  %v10926_v39 = vld [vmem:[%s12588_s22 + $0x828] ss:$16 sps:$4 sm:$0xff]   ;;  %v11009_v4 = vld [vmem:[%s12588_s22 + $0x9e4] ss:$16 sps:$4 sm:$0xff]  }
 0x403   : > { %7471 = vmatpush1.bf16.msra.mxu0 %v10839_v40  ;;  %8004 = vmatpush1.bf16.msra.mxu1 %v10842_v15  ;;  %v10931_v40 = vld [vmem:[%s12588_s22 + $0x844] ss:$16 sps:$4 sm:$0xff]   ;;  %v10934_v15 = vld [vmem:[%s12588_s22 + $0x84c] ss:$16 sps:$4 sm:$0xff]  }
 0x404   : > { %7472 = vmatprep.subr.bf16.mxu0 %v10847_v28  ;;  %8005 = vmatprep.subr.bf16.mxu1 %v10850_v45  ;;  %v10929_v28 = vld [vmem:[%s12588_s22 + $0x840] ss:$16 sps:$4 sm:$0xff]   ;;  %v10932_v45 = vld [vmem:[%s12588_s22 + $0x848] ss:$16 sps:$4 sm:$0xff]  }
 0x407   : > { %7473 = vmatpush1.bf16.msra.mxu0 %v10845_v47  ;;  %8006 = vmatpush1.bf16.msra.mxu1 %v10848_v50  ;;  %v10937_v47 = vld [vmem:[%s12588_s22 + $0x864] ss:$16 sps:$4 sm:$0xff]   ;;  %v10940_v50 = vld [vmem:[%s12588_s22 + $0x86c] ss:$16 sps:$4 sm:$0xff]  }
 0x408   : > { %7474 = vmatprep.subr.bf16.mxu0 %v10853_v52  ;;  %8007 = vmatprep.subr.bf16.mxu1 %v10856_v53  ;;  %v10935_v52 = vld [vmem:[%s12588_s22 + $0x860] ss:$16 sps:$4 sm:$0xff]   ;;  %v10938_v53 = vld [vmem:[%s12588_s22 + $0x868] ss:$16 sps:$4 sm:$0xff]  }
 0x40b   : > { %7475 = vmatpush1.bf16.msra.mxu0 %v10851_v48  ;;  %8008 = vmatpush1.bf16.msra.mxu1 %v10854_v38  ;;  %v10943_v48 = vld [vmem:[%s12588_s22 + $0x884] ss:$16 sps:$4 sm:$0xff]   ;;  %v10946_v38 = vld [vmem:[%s12588_s22 + $0x88c] ss:$16 sps:$4 sm:$0xff]  }
 0x40c   : > { %7476 = vmatprep.subr.bf16.mxu0 %v10859_v6  ;;  %8009 = vmatprep.subr.bf16.mxu1 %v10862_v7  ;;  %v10941_v6 = vld [vmem:[%s12588_s22 + $0x880] ss:$16 sps:$4 sm:$0xff]   ;;  %v10944_v7 = vld [vmem:[%s12588_s22 + $0x888] ss:$16 sps:$4 sm:$0xff]  }
 0x40f   : > { %7477 = vmatpush1.bf16.msra.mxu0 %v10857_v60  ;;  %8010 = vmatpush1.bf16.msra.mxu1 %v10860_v5  ;;  %v10949_v60 = vld [vmem:[%s12588_s22 + $0x8a4] ss:$16 sps:$4 sm:$0xff]   ;;  %v10952_v5 = vld [vmem:[%s12588_s22 + $0x8ac] ss:$16 sps:$4 sm:$0xff]  }
 0x410   : > { %7478 = vmatprep.subr.bf16.mxu0 %v10865_v9  ;;  %8011 = vmatprep.subr.bf16.mxu1 %v10868_v23  ;;  %v10947_v9 = vld [vmem:[%s12588_s22 + $0x8a0] ss:$16 sps:$4 sm:$0xff]   ;;  %v10950_v23 = vld [vmem:[%s12588_s22 + $0x8a8] ss:$16 sps:$4 sm:$0xff]  }
 0x413   : > { %7479 = vmatpush1.bf16.msra.mxu0 %v10863_v54  ;;  %8012 = vmatpush1.bf16.msra.mxu1 %v10866_v17  ;;  %v10955_v54 = vld [vmem:[%s12588_s22 + $0x8c4] ss:$16 sps:$4 sm:$0xff]   ;;  %v10958_v17 = vld [vmem:[%s12588_s22 + $0x8cc] ss:$16 sps:$4 sm:$0xff]  }
 0x414   : > { %7480 = vmatprep.subr.bf16.mxu0 %v10871_v55  ;;  %8013 = vmatprep.subr.bf16.mxu1 %v10874_v56  ;;  %v10953_v55 = vld [vmem:[%s12588_s22 + $0x8c0] ss:$16 sps:$4 sm:$0xff]   ;;  %v10956_v56 = vld [vmem:[%s12588_s22 + $0x8c8] ss:$16 sps:$4 sm:$0xff]  }
 0x417   : > { %7481 = vmatpush1.bf16.msra.mxu0 %v10869_v31  ;;  %8014 = vmatpush1.bf16.msra.mxu1 %v10872_v41  ;;  %v10961_v31 = vld [vmem:[%s12588_s22 + $0x8e4] ss:$16 sps:$4 sm:$0xff]   ;;  %v10964_v41 = vld [vmem:[%s12588_s22 + $0x8ec] ss:$16 sps:$4 sm:$0xff]  }
 0x418   : > { %7482 = vmatprep.subr.bf16.mxu0 %v10877_v11  ;;  %8015 = vmatprep.subr.bf16.mxu1 %v10880_v42  ;;  %v10959_v11 = vld [vmem:[%s12588_s22 + $0x8e0] ss:$16 sps:$4 sm:$0xff]   ;;  %v10962_v42 = vld [vmem:[%s12588_s22 + $0x8e8] ss:$16 sps:$4 sm:$0xff]  }
 0x41b   : > { %7483 = vmatpush1.bf16.msra.mxu0 %v10875_v57  ;;  %8016 = vmatpush1.bf16.msra.mxu1 %v10878_v19  ;;  %v10967_v57 = vld [vmem:[%s12588_s22 + $0x904] ss:$16 sps:$4 sm:$0xff]   ;;  %v10970_v19 = vld [vmem:[%s12588_s22 + $0x90c] ss:$16 sps:$4 sm:$0xff]  }
 0x41c   : > { %7484 = vmatprep.subr.bf16.mxu0 %v10883_v58  ;;  %8017 = vmatprep.subr.bf16.mxu1 %v10886_v59  ;;  %v10965_v58 = vld [vmem:[%s12588_s22 + $0x900] ss:$16 sps:$4 sm:$0xff]   ;;  %v10968_v59 = vld [vmem:[%s12588_s22 + $0x908] ss:$16 sps:$4 sm:$0xff]  }
 0x41f   : > { %7485 = vmatpush1.bf16.msra.mxu0 %v10881_v62  ;;  %8018 = vmatpush1.bf16.msra.mxu1 %v10884_v0  ;;  %v10973_v62 = vld [vmem:[%s12588_s22 + $0x924] ss:$16 sps:$4 sm:$0xff]   ;;  %v10976_v0 = vld [vmem:[%s12588_s22 + $0x92c] ss:$16 sps:$4 sm:$0xff]  }
 0x420   : > { %7486 = vmatprep.subr.bf16.mxu0 %v10889_v44  ;;  %8019 = vmatprep.subr.bf16.mxu1 %v10892_v2  ;;  %v10971_v44 = vld [vmem:[%s12588_s22 + $0x920] ss:$16 sps:$4 sm:$0xff]   ;;  %v10974_v2 = vld [vmem:[%s12588_s22 + $0x928] ss:$16 sps:$4 sm:$0xff]  }
 0x423   : > { %7487 = vmatpush1.bf16.msra.mxu0 %v10887_v3  ;;  %8020 = vmatpush1.bf16.msra.mxu1 %v10890_v27  ;;  %v10979_v3 = vld [vmem:[%s12588_s22 + $0x944] ss:$16 sps:$4 sm:$0xff]   ;;  %v10982_v27 = vld [vmem:[%s12588_s22 + $0x94c] ss:$16 sps:$4 sm:$0xff]  }
 0x424   : > { %7488 = vmatprep.subr.bf16.mxu0 %v10895_v13  ;;  %8021 = vmatprep.subr.bf16.mxu1 %v10898_v43  ;;  %v10977_v13 = vld [vmem:[%s12588_s22 + $0x940] ss:$16 sps:$4 sm:$0xff]   ;;  %v10980_v43 = vld [vmem:[%s12588_s22 + $0x948] ss:$16 sps:$4 sm:$0xff]  }
 0x427   : > { %7489 = vmatpush1.bf16.msra.mxu0 %v10893_v14  ;;  %8022 = vmatpush1.bf16.msra.mxu1 %v10896_v1  ;;  %v10985_v14 = vld [vmem:[%s12588_s22 + $0x964] ss:$16 sps:$4 sm:$0xff]   ;;  %v10988_v1 = vld [vmem:[%s12588_s22 + $0x96c] ss:$16 sps:$4 sm:$0xff]  }
 0x428   : > { %7490 = vmatprep.subr.bf16.mxu0 %v10901_v10  ;;  %8023 = vmatprep.subr.bf16.mxu1 %v10904_v8  ;;  %v10983_v10 = vld [vmem:[%s12588_s22 + $0x960] ss:$16 sps:$4 sm:$0xff]   ;;  %v10986_v8 = vld [vmem:[%s12588_s22 + $0x968] ss:$16 sps:$4 sm:$0xff]  }
 0x42b   : > { %7491 = vmatpush1.bf16.msra.mxu0 %v10899_v16  ;;  %8024 = vmatpush1.bf16.msra.mxu1 %v10902_v18  ;;  %v10991_v16 = vld [vmem:[%s12588_s22 + $0x984] ss:$16 sps:$4 sm:$0xff]   ;;  %v10994_v18 = vld [vmem:[%s12588_s22 + $0x98c] ss:$16 sps:$4 sm:$0xff]  }
 0x42c   : > { %7492 = vmatprep.subr.bf16.mxu0 %v10907_v61  ;;  %8025 = vmatprep.subr.bf16.mxu1 %v10910_v12  ;;  %v10989_v61 = vld [vmem:[%s12588_s22 + $0x980] ss:$16 sps:$4 sm:$0xff]   ;;  %v10992_v12 = vld [vmem:[%s12588_s22 + $0x988] ss:$16 sps:$4 sm:$0xff]  }
 0x42f   : > { %7493 = vmatpush1.bf16.msra.mxu0 %v10905_v21  ;;  %8026 = vmatpush1.bf16.msra.mxu1 %v10908_v63  ;;  %v10997_v21 = vld [vmem:[%s12588_s22 + $0x9a4] ss:$16 sps:$4 sm:$0xff]   ;;  %v11000_v63 = vld [vmem:[%s12588_s22 + $0x9ac] ss:$16 sps:$4 sm:$0xff]  }
 0x430   : > { %7494 = vmatprep.subr.bf16.mxu0 %v10913_v22  ;;  %8027 = vmatprep.subr.bf16.mxu1 %v10916_v25  ;;  %v10995_v22 = vld [vmem:[%s12588_s22 + $0x9a0] ss:$16 sps:$4 sm:$0xff]   ;;  %v10998_v25 = vld [vmem:[%s12588_s22 + $0x9a8] ss:$16 sps:$4 sm:$0xff]  }
 0x433   : > { %7495 = vmatpush1.bf16.msra.mxu0 %v10911_v29  ;;  %8028 = vmatpush1.bf16.msra.mxu1 %v10914_v30  ;;  %v11003_v29 = vld [vmem:[%s12588_s22 + $0x9c4] ss:$16 sps:$4 sm:$0xff]   ;;  %v11006_v30 = vld [vmem:[%s12588_s22 + $0x9cc] ss:$16 sps:$4 sm:$0xff]  }
 0x434   : > { %7505 = vmatprep.subr.bf16.mxu0 %v10919_v32  ;;  %8038 = vmatprep.subr.bf16.mxu1 %v10922_v33  ;;  %v11001_v32 = vld [vmem:[%s12588_s22 + $0x9c0] ss:$16 sps:$4 sm:$0xff]   ;;  %v11004_v33 = vld [vmem:[%s12588_s22 + $0x9c8] ss:$16 sps:$4 sm:$0xff]  }
 0x436   : > { %7497 = vmatmul.mubr.bf16.vlgmr.msra.gmra.mrb[0].mxu0 %v3201_v34  ;;  %8030 = vmatmul.mubr.bf16.vlgmr.msra.gmra.mrb[0].mxu1 %v3201_v34  ;;  %v11012_v34 = vld [vmem:[%s12588_s22 + $0x9ec] ss:$16 sps:$4 sm:$0xff]  }
 0x437   : > { %7506 = vmatpush1.bf16.msra.mxu0 %v10917_v35  ;;  %8039 = vmatpush1.bf16.msra.mxu1 %v10920_v36  ;;  %v11007_v35 = vld [vmem:[%s12588_s22 + $0x9e0] ss:$16 sps:$4 sm:$0xff]   ;;  %v11010_v36 = vld [vmem:[%s12588_s22 + $0x9e8] ss:$16 sps:$4 sm:$0xff]  }
 0x438   : > { %7507 = vmatprep.subr.bf16.mxu0 %v10925_v24  ;;  %8040 = vmatprep.subr.bf16.mxu1 %v10928_v26  ;;  %v11015_v24 = vld [vmem:[%s12588_s22 + $0xa04] ss:$16 sps:$4 sm:$0xff]   ;;  %v11018_v26 = vld [vmem:[%s12588_s22 + $0xa0c] ss:$16 sps:$4 sm:$0xff]  }
 0x439   : > { %7537 = vmatprep.mubr.bf16.mxu0 %v13226_v37  ;;  %8070 = vmatprep.mubr.bf16.mxu1 %v13226_v37 }
 0x43b   : > { %7508 = vmatpush1.bf16.msra.mxu0 %v10923_v46  ;;  %8041 = vmatpush1.bf16.msra.mxu1 %v10926_v39  ;;  %v13292_v46 = vrot.slane %v13207_v20, %v12963_v49  ;;  %v11013_v39 = vld [vmem:[%s12588_s22 + $0xa00] ss:$16 sps:$4 sm:$0xff]  }
 0x43c   : > { %7509 = vmatprep.subr.bf16.mxu0 %v10931_v40  ;;  %8042 = vmatprep.subr.bf16.mxu1 %v10934_v15  ;;  %v11016_v40 = vld [vmem:[%s12588_s22 + $0xa08] ss:$16 sps:$4 sm:$0xff]   ;;  %v11021_v15 = vld [vmem:[%s12588_s22 + $0xa24] ss:$16 sps:$4 sm:$0xff]   ;;  %v11019_v20 = vld [vmem:[%s12588_s22 + $0xa20] ss:$16 sps:$4 sm:$0xff]  }
 0x43f   : > { %7510 = vmatpush1.bf16.msra.mxu0 %v10929_v28  ;;  %8043 = vmatpush1.bf16.msra.mxu1 %v10932_v45  ;;  %v11024_v28 = vld [vmem:[%s12588_s22 + $0xa2c] ss:$16 sps:$4 sm:$0xff]   ;;  %v3251_v45 = vcombine.high %v13226_v37, %v13226_v37  ;;  %v11025_v37 = vld [vmem:[%s12588_s22 + $0xa40] ss:$16 sps:$4 sm:$0xff]  }
 0x440   : > { %7511 = vmatprep.subr.bf16.mxu0 %v10937_v47  ;;  %8044 = vmatprep.subr.bf16.mxu1 %v10940_v50  ;;  %v11022_v47 = vld [vmem:[%s12588_s22 + $0xa28] ss:$16 sps:$4 sm:$0xff]   ;;  %v11027_v50 = vld [vmem:[%s12588_s22 + $0xa44] ss:$16 sps:$4 sm:$0xff]  }
 0x443   : > { %7512 = vmatpush1.bf16.msra.mxu0 %v10935_v52  ;;  %8045 = vmatpush1.bf16.msra.mxu1 %v10938_v53  ;;  %v11030_v52 = vld [vmem:[%s12588_s22 + $0xa4c] ss:$16 sps:$4 sm:$0xff]   ;;  %v11028_v53 = vld [vmem:[%s12588_s22 + $0xa48] ss:$16 sps:$4 sm:$0xff]  }
 0x444   : > { %7513 = vmatprep.subr.bf16.mxu0 %v10943_v48  ;;  %8046 = vmatprep.subr.bf16.mxu1 %v10946_v38  ;;  %v11033_v48 = vld [vmem:[%s12588_s22 + $0xa64] ss:$16 sps:$4 sm:$0xff]   ;;  %v11036_v38 = vld [vmem:[%s12588_s22 + $0xa6c] ss:$16 sps:$4 sm:$0xff]  }
 0x447   : > { %7514 = vmatpush1.bf16.msra.mxu0 %v10941_v6  ;;  %8047 = vmatpush1.bf16.msra.mxu1 %v10944_v7  ;;  %v11031_v6 = vld [vmem:[%s12588_s22 + $0xa60] ss:$16 sps:$4 sm:$0xff]   ;;  %v11034_v7 = vld [vmem:[%s12588_s22 + $0xa68] ss:$16 sps:$4 sm:$0xff]  }
 0x448   : > { %7515 = vmatprep.subr.bf16.mxu0 %v10949_v60  ;;  %8048 = vmatprep.subr.bf16.mxu1 %v10952_v5  ;;  %v11039_v60 = vld [vmem:[%s12588_s22 + $0xa84] ss:$16 sps:$4 sm:$0xff]   ;;  %v11042_v5 = vld [vmem:[%s12588_s22 + $0xa8c] ss:$16 sps:$4 sm:$0xff]  }
 0x44b   : > { %7516 = vmatpush1.bf16.msra.mxu0 %v10947_v9  ;;  %8049 = vmatpush1.bf16.msra.mxu1 %v10950_v23  ;;  %v11037_v9 = vld [vmem:[%s12588_s22 + $0xa80] ss:$16 sps:$4 sm:$0xff]   ;;  %v11040_v23 = vld [vmem:[%s12588_s22 + $0xa88] ss:$16 sps:$4 sm:$0xff]  }
 0x44c   : > { %7517 = vmatprep.subr.bf16.mxu0 %v10955_v54  ;;  %8050 = vmatprep.subr.bf16.mxu1 %v10958_v17  ;;  %v11045_v54 = vld [vmem:[%s12588_s22 + $0xaa4] ss:$16 sps:$4 sm:$0xff]   ;;  %v11048_v17 = vld [vmem:[%s12588_s22 + $0xaac] ss:$16 sps:$4 sm:$0xff]  }
 0x44f   : > { %7518 = vmatpush1.bf16.msra.mxu0 %v10953_v55  ;;  %8051 = vmatpush1.bf16.msra.mxu1 %v10956_v56  ;;  %v11043_v55 = vld [vmem:[%s12588_s22 + $0xaa0] ss:$16 sps:$4 sm:$0xff]   ;;  %v11046_v56 = vld [vmem:[%s12588_s22 + $0xaa8] ss:$16 sps:$4 sm:$0xff]  }
 0x450   : > { %7519 = vmatprep.subr.bf16.mxu0 %v10961_v31  ;;  %8052 = vmatprep.subr.bf16.mxu1 %v10964_v41  ;;  %v11051_v31 = vld [vmem:[%s12588_s22 + $0xac4] ss:$16 sps:$4 sm:$0xff]   ;;  %v11054_v41 = vld [vmem:[%s12588_s22 + $0xacc] ss:$16 sps:$4 sm:$0xff]  }
 0x453   : > { %7520 = vmatpush1.bf16.msra.mxu0 %v10959_v11  ;;  %8053 = vmatpush1.bf16.msra.mxu1 %v10962_v42  ;;  %v11049_v11 = vld [vmem:[%s12588_s22 + $0xac0] ss:$16 sps:$4 sm:$0xff]   ;;  %v11052_v42 = vld [vmem:[%s12588_s22 + $0xac8] ss:$16 sps:$4 sm:$0xff]  }
 0x454   : > { %7521 = vmatprep.subr.bf16.mxu0 %v10967_v57  ;;  %8054 = vmatprep.subr.bf16.mxu1 %v10970_v19  ;;  %v11057_v57 = vld [vmem:[%s12588_s22 + $0xae4] ss:$16 sps:$4 sm:$0xff]   ;;  %v11060_v19 = vld [vmem:[%s12588_s22 + $0xaec] ss:$16 sps:$4 sm:$0xff]  }
 0x457   : > { %7522 = vmatpush1.bf16.msra.mxu0 %v10965_v58  ;;  %8055 = vmatpush1.bf16.msra.mxu1 %v10968_v59  ;;  %v11055_v58 = vld [vmem:[%s12588_s22 + $0xae0] ss:$16 sps:$4 sm:$0xff]   ;;  %v11058_v59 = vld [vmem:[%s12588_s22 + $0xae8] ss:$16 sps:$4 sm:$0xff]  }
 0x458   : > { %7523 = vmatprep.subr.bf16.mxu0 %v10973_v62  ;;  %8056 = vmatprep.subr.bf16.mxu1 %v10976_v0  ;;  %v11063_v62 = vld [vmem:[%s12588_s22 + $0xb04] ss:$16 sps:$4 sm:$0xff]   ;;  %v11066_v0 = vld [vmem:[%s12588_s22 + $0xb0c] ss:$16 sps:$4 sm:$0xff]  }
 0x45b   : > { %7524 = vmatpush1.bf16.msra.mxu0 %v10971_v44  ;;  %8057 = vmatpush1.bf16.msra.mxu1 %v10974_v2  ;;  %v11061_v44 = vld [vmem:[%s12588_s22 + $0xb00] ss:$16 sps:$4 sm:$0xff]   ;;  %v11064_v2 = vld [vmem:[%s12588_s22 + $0xb08] ss:$16 sps:$4 sm:$0xff]  }
 0x45c   : > { %7525 = vmatprep.subr.bf16.mxu0 %v10979_v3  ;;  %8058 = vmatprep.subr.bf16.mxu1 %v10982_v27  ;;  %v11069_v3 = vld [vmem:[%s12588_s22 + $0xb24] ss:$16 sps:$4 sm:$0xff]   ;;  %v11072_v27 = vld [vmem:[%s12588_s22 + $0xb2c] ss:$16 sps:$4 sm:$0xff]  }
 0x45f   : > { %7526 = vmatpush1.bf16.msra.mxu0 %v10977_v13  ;;  %8059 = vmatpush1.bf16.msra.mxu1 %v10980_v43  ;;  %v11067_v13 = vld [vmem:[%s12588_s22 + $0xb20] ss:$16 sps:$4 sm:$0xff]   ;;  %v11070_v43 = vld [vmem:[%s12588_s22 + $0xb28] ss:$16 sps:$4 sm:$0xff]  }
 0x460   : > { %7527 = vmatprep.subr.bf16.mxu0 %v10985_v14  ;;  %8060 = vmatprep.subr.bf16.mxu1 %v10988_v1  ;;  %v11075_v14 = vld [vmem:[%s12588_s22 + $0xb44] ss:$16 sps:$4 sm:$0xff]   ;;  %v11078_v1 = vld [vmem:[%s12588_s22 + $0xb4c] ss:$16 sps:$4 sm:$0xff]  }
 0x463   : > { %7528 = vmatpush1.bf16.msra.mxu0 %v10983_v10  ;;  %8061 = vmatpush1.bf16.msra.mxu1 %v10986_v8  ;;  %v11073_v10 = vld [vmem:[%s12588_s22 + $0xb40] ss:$16 sps:$4 sm:$0xff]   ;;  %v11076_v8 = vld [vmem:[%s12588_s22 + $0xb48] ss:$16 sps:$4 sm:$0xff]  }
 0x464   : > { %7529 = vmatprep.subr.bf16.mxu0 %v10991_v16  ;;  %8062 = vmatprep.subr.bf16.mxu1 %v10994_v18  ;;  %v11081_v16 = vld [vmem:[%s12588_s22 + $0xb64] ss:$16 sps:$4 sm:$0xff]   ;;  %v11084_v18 = vld [vmem:[%s12588_s22 + $0xb6c] ss:$16 sps:$4 sm:$0xff]  }
 0x467   : > { %7530 = vmatpush1.bf16.msra.mxu0 %v10989_v61  ;;  %8063 = vmatpush1.bf16.msra.mxu1 %v10992_v12  ;;  %v11079_v61 = vld [vmem:[%s12588_s22 + $0xb60] ss:$16 sps:$4 sm:$0xff]   ;;  %v11082_v12 = vld [vmem:[%s12588_s22 + $0xb68] ss:$16 sps:$4 sm:$0xff]  }
 0x468   : > { %7531 = vmatprep.subr.bf16.mxu0 %v10997_v21  ;;  %8064 = vmatprep.subr.bf16.mxu1 %v11000_v63  ;;  %v11087_v21 = vld [vmem:[%s12588_s22 + $0xb84] ss:$16 sps:$4 sm:$0xff]   ;;  %v11090_v63 = vld [vmem:[%s12588_s22 + $0xb8c] ss:$16 sps:$4 sm:$0xff]  }
 0x46b   : > { %7532 = vmatpush1.bf16.msra.mxu0 %v10995_v22  ;;  %8065 = vmatpush1.bf16.msra.mxu1 %v10998_v25  ;;  %v11085_v22 = vld [vmem:[%s12588_s22 + $0xb80] ss:$16 sps:$4 sm:$0xff]   ;;  %v11088_v25 = vld [vmem:[%s12588_s22 + $0xb88] ss:$16 sps:$4 sm:$0xff]  }
 0x46c   : > { %7533 = vmatprep.subr.bf16.mxu0 %v11003_v29  ;;  %8066 = vmatprep.subr.bf16.mxu1 %v11006_v30  ;;  %v11093_v29 = vld [vmem:[%s12588_s22 + $0xba4] ss:$16 sps:$4 sm:$0xff]   ;;  %v11096_v30 = vld [vmem:[%s12588_s22 + $0xbac] ss:$16 sps:$4 sm:$0xff]  }
 0x46f   : > { %7534 = vmatpush1.bf16.msra.mxu0 %v11001_v32  ;;  %8067 = vmatpush1.bf16.msra.mxu1 %v11004_v33  ;;  %v11091_v32 = vld [vmem:[%s12588_s22 + $0xba0] ss:$16 sps:$4 sm:$0xff]   ;;  %v11094_v33 = vld [vmem:[%s12588_s22 + $0xba8] ss:$16 sps:$4 sm:$0xff]  }
 0x470   : > { %7535 = vmatprep.subr.bf16.mxu0 %v11009_v4  ;;  %8068 = vmatprep.subr.bf16.mxu1 %v11012_v34  ;;  %v11099_v4 = vld [vmem:[%s12588_s22 + $0xbc4] ss:$16 sps:$4 sm:$0xff]   ;;  %v11102_v34 = vld [vmem:[%s12588_s22 + $0xbcc] ss:$16 sps:$4 sm:$0xff]  }
 0x473   : > { %7536 = vmatpush1.bf16.msra.mxu0 %v11007_v35  ;;  %8069 = vmatpush1.bf16.msra.mxu1 %v11010_v36  ;;  %v11735_v35 = vld [vmem:[%s12967_s4 + $0x8] sm:$0xff] }
 0x474   : > { %7546 = vmatprep.subr.bf16.mxu0 %v11015_v24  ;;  %8079 = vmatprep.subr.bf16.mxu1 %v11018_v26  ;;  %v3204_v36 = vcombine.high %v11735_v35, %v11735_v35  ;;  %v11097_v24 = vld [vmem:[%s12588_s22 + $0xbc0] ss:$16 sps:$4 sm:$0xff]   ;;  %v11100_v26 = vld [vmem:[%s12588_s22 + $0xbc8] ss:$16 sps:$4 sm:$0xff]  }
 0x475   : > { %v11181_v35 = vld [vmem:[%s12588_s22 + $0xd80] ss:$16 sps:$4 sm:$0xff]  }
 0x476   : > { %7538 = vmatmul.mubr.bf16.vlgmr.msra.gmra.mrb[0].mxu0 %v13292_v46  ;;  %8071 = vmatmul.mubr.bf16.vlgmr.msra.gmra.mrb[0].mxu1 %v13292_v46 }
 0x477   : > { %7547 = vmatpush1.bf16.msra.mxu0 %v11013_v39  ;;  %8080 = vmatpush1.bf16.msra.mxu1 %v11016_v40  ;;  %v11105_v39 = vld [vmem:[%s12588_s22 + $0xbe4] ss:$16 sps:$4 sm:$0xff]   ;;  %v11108_v40 = vld [vmem:[%s12588_s22 + $0xbec] ss:$16 sps:$4 sm:$0xff]  }
 0x478   : > { %7548 = vmatprep.subr.bf16.mxu0 %v11021_v15  ;;  %8081 = vmatprep.subr.bf16.mxu1 %v11024_v28  ;;  %v13360_v15 = vrot.slane %v3204_v36, %v12963_v49  ;;  %v11103_v28 = vld [vmem:[%s12588_s22 + $0xbe0] ss:$16 sps:$4 sm:$0xff]   ;;  %v11184_v36 = vld [vmem:[%s12588_s22 + $0xd88] ss:$16 sps:$4 sm:$0xff]  }
 0x479   : > { %7578 = vmatprep.mubr.bf16.mxu0 %v3251_v45  ;;  %8111 = vmatprep.mubr.bf16.mxu1 %v3251_v45  ;;  %v11106_v45 = vld [vmem:[%s12588_s22 + $0xbe8] ss:$16 sps:$4 sm:$0xff]  }
 0x47b   : > { %7549 = vmatpush1.bf16.msra.mxu0 %v11019_v20  ;;  %8082 = vmatpush1.bf16.msra.mxu1 %v11022_v47  ;;  %v11111_v20 = vld [vmem:[%s12588_s22 + $0xc04] ss:$16 sps:$4 sm:$0xff]   ;;  %v11114_v47 = vld [vmem:[%s12588_s22 + $0xc0c] ss:$16 sps:$4 sm:$0xff]  }
 0x47c   : > { %7550 = vmatprep.subr.bf16.mxu0 %v11027_v50  ;;  %8083 = vmatprep.subr.bf16.mxu1 %v11030_v52  ;;  %v3220_v50 = vcombine.high %v13360_v15, %v13360_v15  ;;  %v3249_v52 = vcombine.high %v13292_v46, %v13292_v46  ;;  %v11115_v46 = vld [vmem:[%s12588_s22 + $0xc20] ss:$16 sps:$4 sm:$0xff]  }
 0x47f   : > { %7551 = vmatpush1.bf16.msra.mxu0 %v11025_v37  ;;  %8084 = vmatpush1.bf16.msra.mxu1 %v11028_v53  ;;  %v11109_v37 = vld [vmem:[%s12588_s22 + $0xc00] ss:$16 sps:$4 sm:$0xff]   ;;  %v11112_v53 = vld [vmem:[%s12588_s22 + $0xc08] ss:$16 sps:$4 sm:$0xff]  }
 0x480   : > { %7552 = vmatprep.subr.bf16.mxu0 %v11033_v48  ;;  %8085 = vmatprep.subr.bf16.mxu1 %v11036_v38  ;;  %v11117_v48 = vld [vmem:[%s12588_s22 + $0xc24] ss:$16 sps:$4 sm:$0xff]   ;;  %v11120_v38 = vld [vmem:[%s12588_s22 + $0xc2c] ss:$16 sps:$4 sm:$0xff]  }
 0x483   : > { %7553 = vmatpush1.bf16.msra.mxu0 %v11031_v6  ;;  %8086 = vmatpush1.bf16.msra.mxu1 %v11034_v7  ;;  %v13375_v6 = vrot.slane %v3220_v50, %v12963_v49  ;;  %v11118_v7 = vld [vmem:[%s12588_s22 + $0xc28] ss:$16 sps:$4 sm:$0xff]   ;;  %v11201_v50 = vld [vmem:[%s12588_s22 + $0xde4] ss:$16 sps:$4 sm:$0xff]  }
 0x484   : > { %7554 = vmatprep.subr.bf16.mxu0 %v11039_v60  ;;  %8087 = vmatprep.subr.bf16.mxu1 %v11042_v5  ;;  %v11123_v60 = vld [vmem:[%s12588_s22 + $0xc44] ss:$16 sps:$4 sm:$0xff]   ;;  %v11126_v5 = vld [vmem:[%s12588_s22 + $0xc4c] ss:$16 sps:$4 sm:$0xff]  }
 0x487   : > { %7555 = vmatpush1.bf16.msra.mxu0 %v11037_v9  ;;  %8088 = vmatpush1.bf16.msra.mxu1 %v11040_v23  ;;  %v11121_v9 = vld [vmem:[%s12588_s22 + $0xc40] ss:$16 sps:$4 sm:$0xff]   ;;  %v11124_v23 = vld [vmem:[%s12588_s22 + $0xc48] ss:$16 sps:$4 sm:$0xff]  }
 0x488   : > { %7556 = vmatprep.subr.bf16.mxu0 %v11045_v54  ;;  %8089 = vmatprep.subr.bf16.mxu1 %v11048_v17  ;;  %v11129_v54 = vld [vmem:[%s12588_s22 + $0xc64] ss:$16 sps:$4 sm:$0xff]   ;;  %v11132_v17 = vld [vmem:[%s12588_s22 + $0xc6c] ss:$16 sps:$4 sm:$0xff]  }
 0x48b   : > { %7557 = vmatpush1.bf16.msra.mxu0 %v11043_v55  ;;  %8090 = vmatpush1.bf16.msra.mxu1 %v11046_v56  ;;  %v11127_v55 = vld [vmem:[%s12588_s22 + $0xc60] ss:$16 sps:$4 sm:$0xff]   ;;  %v11130_v56 = vld [vmem:[%s12588_s22 + $0xc68] ss:$16 sps:$4 sm:$0xff]  }
 0x48c   : > { %7558 = vmatprep.subr.bf16.mxu0 %v11051_v31  ;;  %8091 = vmatprep.subr.bf16.mxu1 %v11054_v41  ;;  %v11135_v31 = vld [vmem:[%s12588_s22 + $0xc84] ss:$16 sps:$4 sm:$0xff]   ;;  %v11138_v41 = vld [vmem:[%s12588_s22 + $0xc8c] ss:$16 sps:$4 sm:$0xff]  }
 0x48f   : > { %7559 = vmatpush1.bf16.msra.mxu0 %v11049_v11  ;;  %8092 = vmatpush1.bf16.msra.mxu1 %v11052_v42  ;;  %v11133_v11 = vld [vmem:[%s12588_s22 + $0xc80] ss:$16 sps:$4 sm:$0xff]   ;;  %v11136_v42 = vld [vmem:[%s12588_s22 + $0xc88] ss:$16 sps:$4 sm:$0xff]  }
 0x490   : > { %7560 = vmatprep.subr.bf16.mxu0 %v11057_v57  ;;  %8093 = vmatprep.subr.bf16.mxu1 %v11060_v19  ;;  %v11141_v57 = vld [vmem:[%s12588_s22 + $0xca4] ss:$16 sps:$4 sm:$0xff]   ;;  %v11144_v19 = vld [vmem:[%s12588_s22 + $0xcac] ss:$16 sps:$4 sm:$0xff]  }
 0x493   : > { %7561 = vmatpush1.bf16.msra.mxu0 %v11055_v58  ;;  %8094 = vmatpush1.bf16.msra.mxu1 %v11058_v59  ;;  %v11139_v58 = vld [vmem:[%s12588_s22 + $0xca0] ss:$16 sps:$4 sm:$0xff]   ;;  %v11142_v59 = vld [vmem:[%s12588_s22 + $0xca8] ss:$16 sps:$4 sm:$0xff]  }
 0x494   : > { %7562 = vmatprep.subr.bf16.mxu0 %v11063_v62  ;;  %8095 = vmatprep.subr.bf16.mxu1 %v11066_v0  ;;  %v11147_v62 = vld [vmem:[%s12588_s22 + $0xcc4] ss:$16 sps:$4 sm:$0xff]   ;;  %v11150_v0 = vld [vmem:[%s12588_s22 + $0xccc] ss:$16 sps:$4 sm:$0xff]  }
 0x497   : > { %7563 = vmatpush1.bf16.msra.mxu0 %v11061_v44  ;;  %8096 = vmatpush1.bf16.msra.mxu1 %v11064_v2  ;;  %v11145_v44 = vld [vmem:[%s12588_s22 + $0xcc0] ss:$16 sps:$4 sm:$0xff]   ;;  %v11148_v2 = vld [vmem:[%s12588_s22 + $0xcc8] ss:$16 sps:$4 sm:$0xff]  }
 0x498   : > { %7564 = vmatprep.subr.bf16.mxu0 %v11069_v3  ;;  %8097 = vmatprep.subr.bf16.mxu1 %v11072_v27  ;;  %v11153_v3 = vld [vmem:[%s12588_s22 + $0xce4] ss:$16 sps:$4 sm:$0xff]   ;;  %v11156_v27 = vld [vmem:[%s12588_s22 + $0xcec] ss:$16 sps:$4 sm:$0xff]  }
 0x49b   : > { %7565 = vmatpush1.bf16.msra.mxu0 %v11067_v13  ;;  %8098 = vmatpush1.bf16.msra.mxu1 %v11070_v43  ;;  %v11151_v13 = vld [vmem:[%s12588_s22 + $0xce0] ss:$16 sps:$4 sm:$0xff]   ;;  %v11154_v43 = vld [vmem:[%s12588_s22 + $0xce8] ss:$16 sps:$4 sm:$0xff]  }
 0x49c   : > { %7566 = vmatprep.subr.bf16.mxu0 %v11075_v14  ;;  %8099 = vmatprep.subr.bf16.mxu1 %v11078_v1  ;;  %v11159_v14 = vld [vmem:[%s12588_s22 + $0xd04] ss:$16 sps:$4 sm:$0xff]   ;;  %v11162_v1 = vld [vmem:[%s12588_s22 + $0xd0c] ss:$16 sps:$4 sm:$0xff]  }
 0x49f   : > { %7567 = vmatpush1.bf16.msra.mxu0 %v11073_v10  ;;  %8100 = vmatpush1.bf16.msra.mxu1 %v11076_v8  ;;  %v11157_v10 = vld [vmem:[%s12588_s22 + $0xd00] ss:$16 sps:$4 sm:$0xff]   ;;  %v11160_v8 = vld [vmem:[%s12588_s22 + $0xd08] ss:$16 sps:$4 sm:$0xff]  }
 0x4a0   : > { %7568 = vmatprep.subr.bf16.mxu0 %v11081_v16  ;;  %8101 = vmatprep.subr.bf16.mxu1 %v11084_v18  ;;  %v11165_v16 = vld [vmem:[%s12588_s22 + $0xd24] ss:$16 sps:$4 sm:$0xff]   ;;  %v11168_v18 = vld [vmem:[%s12588_s22 + $0xd2c] ss:$16 sps:$4 sm:$0xff]  }
 0x4a3   : > { %7569 = vmatpush1.bf16.msra.mxu0 %v11079_v61  ;;  %8102 = vmatpush1.bf16.msra.mxu1 %v11082_v12  ;;  %v11163_v61 = vld [vmem:[%s12588_s22 + $0xd20] ss:$16 sps:$4 sm:$0xff]   ;;  %v11166_v12 = vld [vmem:[%s12588_s22 + $0xd28] ss:$16 sps:$4 sm:$0xff]  }
 0x4a4   : > { %7570 = vmatprep.subr.bf16.mxu0 %v11087_v21  ;;  %8103 = vmatprep.subr.bf16.mxu1 %v11090_v63  ;;  %v11171_v21 = vld [vmem:[%s12588_s22 + $0xd44] ss:$16 sps:$4 sm:$0xff]   ;;  %v11174_v63 = vld [vmem:[%s12588_s22 + $0xd4c] ss:$16 sps:$4 sm:$0xff]  }
 0x4a7   : > { %7571 = vmatpush1.bf16.msra.mxu0 %v11085_v22  ;;  %8104 = vmatpush1.bf16.msra.mxu1 %v11088_v25  ;;  %v11169_v22 = vld [vmem:[%s12588_s22 + $0xd40] ss:$16 sps:$4 sm:$0xff]   ;;  %v11172_v25 = vld [vmem:[%s12588_s22 + $0xd48] ss:$16 sps:$4 sm:$0xff]  }
 0x4a8   : > { %7572 = vmatprep.subr.bf16.mxu0 %v11093_v29  ;;  %8105 = vmatprep.subr.bf16.mxu1 %v11096_v30  ;;  %v11177_v29 = vld [vmem:[%s12588_s22 + $0xd64] ss:$16 sps:$4 sm:$0xff]   ;;  %v11180_v30 = vld [vmem:[%s12588_s22 + $0xd6c] ss:$16 sps:$4 sm:$0xff]  }
 0x4ab   : > { %7573 = vmatpush1.bf16.msra.mxu0 %v11091_v32  ;;  %8106 = vmatpush1.bf16.msra.mxu1 %v11094_v33  ;;  %v11175_v32 = vld [vmem:[%s12588_s22 + $0xd60] ss:$16 sps:$4 sm:$0xff]   ;;  %v11178_v33 = vld [vmem:[%s12588_s22 + $0xd68] ss:$16 sps:$4 sm:$0xff]  }
 0x4ac   : > { %7574 = vmatprep.subr.bf16.mxu0 %v11099_v4  ;;  %8107 = vmatprep.subr.bf16.mxu1 %v11102_v34  ;;  %v11183_v4 = vld [vmem:[%s12588_s22 + $0xd84] ss:$16 sps:$4 sm:$0xff]   ;;  %v11186_v34 = vld [vmem:[%s12588_s22 + $0xd8c] ss:$16 sps:$4 sm:$0xff]  }
 0x4af   : > { %7575 = vmatpush1.bf16.msra.mxu0 %v11097_v24  ;;  %8108 = vmatpush1.bf16.msra.mxu1 %v11100_v26  ;;  %v11189_v24 = vld [vmem:[%s12588_s22 + $0xda4] ss:$16 sps:$4 sm:$0xff]   ;;  %v11192_v26 = vld [vmem:[%s12588_s22 + $0xdac] ss:$16 sps:$4 sm:$0xff]  }
 0x4b0   : > { %7576 = vmatprep.subr.bf16.mxu0 %v11105_v39  ;;  %8109 = vmatprep.subr.bf16.mxu1 %v11108_v40  ;;  %v11187_v39 = vld [vmem:[%s12588_s22 + $0xda0] ss:$16 sps:$4 sm:$0xff]   ;;  %v11190_v40 = vld [vmem:[%s12588_s22 + $0xda8] ss:$16 sps:$4 sm:$0xff]  }
 0x4b3   : > { %7577 = vmatpush1.bf16.msra.mxu0 %v11103_v28  ;;  %8110 = vmatpush1.bf16.msra.mxu1 %v11106_v45  ;;  %v11195_v28 = vld [vmem:[%s12588_s22 + $0xdc4] ss:$16 sps:$4 sm:$0xff]   ;;  %v11198_v45 = vld [vmem:[%s12588_s22 + $0xdcc] ss:$16 sps:$4 sm:$0xff]  }
 0x4b4   : > { %7587 = vmatprep.subr.bf16.mxu0 %v11111_v20  ;;  %8120 = vmatprep.subr.bf16.mxu1 %v11114_v47  ;;  %v11193_v20 = vld [vmem:[%s12588_s22 + $0xdc0] ss:$16 sps:$4 sm:$0xff]   ;;  %v11196_v47 = vld [vmem:[%s12588_s22 + $0xdc8] ss:$16 sps:$4 sm:$0xff]  }
 0x4b6   : > { %7579 = vmatmul.mubr.bf16.vlgmr.msra.gmra.mrb[0].mxu0 %v3249_v52  ;;  %8112 = vmatmul.mubr.bf16.vlgmr.msra.gmra.mrb[0].mxu1 %v3249_v52  ;;  %v11204_v52 = vld [vmem:[%s12588_s22 + $0xdec] ss:$16 sps:$4 sm:$0xff]  }
 0x4b7   : > { %7588 = vmatpush1.bf16.msra.mxu0 %v11109_v37  ;;  %8121 = vmatpush1.bf16.msra.mxu1 %v11112_v53  ;;  %v11199_v37 = vld [vmem:[%s12588_s22 + $0xde0] ss:$16 sps:$4 sm:$0xff]   ;;  %v11202_v53 = vld [vmem:[%s12588_s22 + $0xde8] ss:$16 sps:$4 sm:$0xff]  }
 0x4b8   : > { %7589 = vmatprep.subr.bf16.mxu0 %v11117_v48  ;;  %8122 = vmatprep.subr.bf16.mxu1 %v11120_v38  ;;  %v11208_v48 = vld [vmem:[%s12588_s22 + $0xe04] ss:$16 sps:$4 sm:$0xff]   ;;  %v11211_v38 = vld [vmem:[%s12588_s22 + $0xe0c] ss:$16 sps:$4 sm:$0xff]  }
 0x4b9   : > { %7619 = vmatprep.mubr.bf16.mxu0 %v13375_v6  ;;  %8152 = vmatprep.mubr.bf16.mxu1 %v13375_v6 }
 0x4bb   : > { %7590 = vmatpush1.bf16.msra.mxu0 %v11115_v46  ;;  %8123 = vmatpush1.bf16.msra.mxu1 %v11118_v7  ;;  %v13441_v46 = vrot.slane %v13360_v15, %v12963_v49  ;;  %v11206_v7 = vld [vmem:[%s12588_s22 + $0xe00] ss:$16 sps:$4 sm:$0xff]  }
 0x4bc   : > { %7591 = vmatprep.subr.bf16.mxu0 %v11123_v60  ;;  %8124 = vmatprep.subr.bf16.mxu1 %v11126_v5  ;;  %v11209_v60 = vld [vmem:[%s12588_s22 + $0xe08] ss:$16 sps:$4 sm:$0xff]   ;;  %v11214_v5 = vld [vmem:[%s12588_s22 + $0xe24] ss:$16 sps:$4 sm:$0xff]   ;;  %v11212_v15 = vld [vmem:[%s12588_s22 + $0xe20] ss:$16 sps:$4 sm:$0xff]  }
 0x4bf   : > { %7592 = vmatpush1.bf16.msra.mxu0 %v11121_v9  ;;  %8125 = vmatpush1.bf16.msra.mxu1 %v11124_v23  ;;  %v11217_v9 = vld [vmem:[%s12588_s22 + $0xe2c] ss:$16 sps:$4 sm:$0xff]   ;;  %v3252_v23 = vcombine.high %v13375_v6, %v13375_v6  ;;  %v11218_v6 = vld [vmem:[%s12588_s22 + $0xe40] ss:$16 sps:$4 sm:$0xff]  }
 0x4c0   : > { %7593 = vmatprep.subr.bf16.mxu0 %v11129_v54  ;;  %8126 = vmatprep.subr.bf16.mxu1 %v11132_v17  ;;  %v11215_v54 = vld [vmem:[%s12588_s22 + $0xe28] ss:$16 sps:$4 sm:$0xff]   ;;  %v11220_v17 = vld [vmem:[%s12588_s22 + $0xe44] ss:$16 sps:$4 sm:$0xff]  }
 0x4c3   : > { %7594 = vmatpush1.bf16.msra.mxu0 %v11127_v55  ;;  %8127 = vmatpush1.bf16.msra.mxu1 %v11130_v56  ;;  %v11223_v55 = vld [vmem:[%s12588_s22 + $0xe4c] ss:$16 sps:$4 sm:$0xff]   ;;  %v11221_v56 = vld [vmem:[%s12588_s22 + $0xe48] ss:$16 sps:$4 sm:$0xff]  }
 0x4c4   : > { %7595 = vmatprep.subr.bf16.mxu0 %v11135_v31  ;;  %8128 = vmatprep.subr.bf16.mxu1 %v11138_v41  ;;  %v11226_v31 = vld [vmem:[%s12588_s22 + $0xe64] ss:$16 sps:$4 sm:$0xff]   ;;  %v11229_v41 = vld [vmem:[%s12588_s22 + $0xe6c] ss:$16 sps:$4 sm:$0xff]  }
 0x4c7   : > { %7596 = vmatpush1.bf16.msra.mxu0 %v11133_v11  ;;  %8129 = vmatpush1.bf16.msra.mxu1 %v11136_v42  ;;  %v11224_v11 = vld [vmem:[%s12588_s22 + $0xe60] ss:$16 sps:$4 sm:$0xff]   ;;  %v11227_v42 = vld [vmem:[%s12588_s22 + $0xe68] ss:$16 sps:$4 sm:$0xff]  }
 0x4c8   : > { %7597 = vmatprep.subr.bf16.mxu0 %v11141_v57  ;;  %8130 = vmatprep.subr.bf16.mxu1 %v11144_v19  ;;  %v11232_v57 = vld [vmem:[%s12588_s22 + $0xe84] ss:$16 sps:$4 sm:$0xff]   ;;  %v11235_v19 = vld [vmem:[%s12588_s22 + $0xe8c] ss:$16 sps:$4 sm:$0xff]  }
 0x4cb   : > { %7598 = vmatpush1.bf16.msra.mxu0 %v11139_v58  ;;  %8131 = vmatpush1.bf16.msra.mxu1 %v11142_v59  ;;  %v11230_v58 = vld [vmem:[%s12588_s22 + $0xe80] ss:$16 sps:$4 sm:$0xff]   ;;  %v11233_v59 = vld [vmem:[%s12588_s22 + $0xe88] ss:$16 sps:$4 sm:$0xff]  }
 0x4cc   : > { %7599 = vmatprep.subr.bf16.mxu0 %v11147_v62  ;;  %8132 = vmatprep.subr.bf16.mxu1 %v11150_v0  ;;  %v11238_v62 = vld [vmem:[%s12588_s22 + $0xea4] ss:$16 sps:$4 sm:$0xff]   ;;  %v11241_v0 = vld [vmem:[%s12588_s22 + $0xeac] ss:$16 sps:$4 sm:$0xff]  }
 0x4cf   : > { %7600 = vmatpush1.bf16.msra.mxu0 %v11145_v44  ;;  %8133 = vmatpush1.bf16.msra.mxu1 %v11148_v2  ;;  %v11236_v44 = vld [vmem:[%s12588_s22 + $0xea0] ss:$16 sps:$4 sm:$0xff]   ;;  %v11239_v2 = vld [vmem:[%s12588_s22 + $0xea8] ss:$16 sps:$4 sm:$0xff]  }
 0x4d0   : > { %7601 = vmatprep.subr.bf16.mxu0 %v11153_v3  ;;  %8134 = vmatprep.subr.bf16.mxu1 %v11156_v27  ;;  %v11244_v3 = vld [vmem:[%s12588_s22 + $0xec4] ss:$16 sps:$4 sm:$0xff]   ;;  %v11247_v27 = vld [vmem:[%s12588_s22 + $0xecc] ss:$16 sps:$4 sm:$0xff]  }
 0x4d3   : > { %7602 = vmatpush1.bf16.msra.mxu0 %v11151_v13  ;;  %8135 = vmatpush1.bf16.msra.mxu1 %v11154_v43  ;;  %v11242_v13 = vld [vmem:[%s12588_s22 + $0xec0] ss:$16 sps:$4 sm:$0xff]   ;;  %v11245_v43 = vld [vmem:[%s12588_s22 + $0xec8] ss:$16 sps:$4 sm:$0xff]  }
 0x4d4   : > { %7603 = vmatprep.subr.bf16.mxu0 %v11159_v14  ;;  %8136 = vmatprep.subr.bf16.mxu1 %v11162_v1  ;;  %v11250_v14 = vld [vmem:[%s12588_s22 + $0xee4] ss:$16 sps:$4 sm:$0xff]   ;;  %v11253_v1 = vld [vmem:[%s12588_s22 + $0xeec] ss:$16 sps:$4 sm:$0xff]  }
 0x4d7   : > { %7604 = vmatpush1.bf16.msra.mxu0 %v11157_v10  ;;  %8137 = vmatpush1.bf16.msra.mxu1 %v11160_v8  ;;  %v11248_v10 = vld [vmem:[%s12588_s22 + $0xee0] ss:$16 sps:$4 sm:$0xff]   ;;  %v11251_v8 = vld [vmem:[%s12588_s22 + $0xee8] ss:$16 sps:$4 sm:$0xff]  }
 0x4d8   : > { %7605 = vmatprep.subr.bf16.mxu0 %v11165_v16  ;;  %8138 = vmatprep.subr.bf16.mxu1 %v11168_v18  ;;  %v11256_v16 = vld [vmem:[%s12588_s22 + $0xf04] ss:$16 sps:$4 sm:$0xff]   ;;  %v11259_v18 = vld [vmem:[%s12588_s22 + $0xf0c] ss:$16 sps:$4 sm:$0xff]  }
 0x4db   : > { %7606 = vmatpush1.bf16.msra.mxu0 %v11163_v61  ;;  %8139 = vmatpush1.bf16.msra.mxu1 %v11166_v12  ;;  %v11254_v61 = vld [vmem:[%s12588_s22 + $0xf00] ss:$16 sps:$4 sm:$0xff]   ;;  %v11257_v12 = vld [vmem:[%s12588_s22 + $0xf08] ss:$16 sps:$4 sm:$0xff]  }
 0x4dc   : > { %7607 = vmatprep.subr.bf16.mxu0 %v11171_v21  ;;  %8140 = vmatprep.subr.bf16.mxu1 %v11174_v63  ;;  %v11262_v21 = vld [vmem:[%s12588_s22 + $0xf24] ss:$16 sps:$4 sm:$0xff]   ;;  %v11265_v63 = vld [vmem:[%s12588_s22 + $0xf2c] ss:$16 sps:$4 sm:$0xff]  }
 0x4df   : > { %7608 = vmatpush1.bf16.msra.mxu0 %v11169_v22  ;;  %8141 = vmatpush1.bf16.msra.mxu1 %v11172_v25  ;;  %v11260_v22 = vld [vmem:[%s12588_s22 + $0xf20] ss:$16 sps:$4 sm:$0xff]   ;;  %v11263_v25 = vld [vmem:[%s12588_s22 + $0xf28] ss:$16 sps:$4 sm:$0xff]  }
 0x4e0   : > { %7609 = vmatprep.subr.bf16.mxu0 %v11177_v29  ;;  %8142 = vmatprep.subr.bf16.mxu1 %v11180_v30  ;;  %v11268_v29 = vld [vmem:[%s12588_s22 + $0xf44] ss:$16 sps:$4 sm:$0xff]   ;;  %v11271_v30 = vld [vmem:[%s12588_s22 + $0xf4c] ss:$16 sps:$4 sm:$0xff]  }
 0x4e3   : > { %7610 = vmatpush1.bf16.msra.mxu0 %v11175_v32  ;;  %8143 = vmatpush1.bf16.msra.mxu1 %v11178_v33  ;;  %v11266_v32 = vld [vmem:[%s12588_s22 + $0xf40] ss:$16 sps:$4 sm:$0xff]   ;;  %v11269_v33 = vld [vmem:[%s12588_s22 + $0xf48] ss:$16 sps:$4 sm:$0xff]  }
 0x4e4   : > { %7611 = vmatprep.subr.bf16.mxu0 %v11183_v4  ;;  %8144 = vmatprep.subr.bf16.mxu1 %v11186_v34  ;;  %v11274_v4 = vld [vmem:[%s12588_s22 + $0xf64] ss:$16 sps:$4 sm:$0xff]   ;;  %v11277_v34 = vld [vmem:[%s12588_s22 + $0xf6c] ss:$16 sps:$4 sm:$0xff]  }
 0x4e7   : > { %7612 = vmatpush1.bf16.msra.mxu0 %v11181_v35  ;;  %8145 = vmatpush1.bf16.msra.mxu1 %v11184_v36  ;;  %v11272_v35 = vld [vmem:[%s12588_s22 + $0xf60] ss:$16 sps:$4 sm:$0xff]   ;;  %v11275_v36 = vld [vmem:[%s12588_s22 + $0xf68] ss:$16 sps:$4 sm:$0xff]  }
 0x4e8   : > { %7613 = vmatprep.subr.bf16.mxu0 %v11189_v24  ;;  %8146 = vmatprep.subr.bf16.mxu1 %v11192_v26  ;;  %v11280_v24 = vld [vmem:[%s12588_s22 + $0xf84] ss:$16 sps:$4 sm:$0xff]   ;;  %v11283_v26 = vld [vmem:[%s12588_s22 + $0xf8c] ss:$16 sps:$4 sm:$0xff]  }
 0x4eb   : > { %7614 = vmatpush1.bf16.msra.mxu0 %v11187_v39  ;;  %8147 = vmatpush1.bf16.msra.mxu1 %v11190_v40  ;;  %v11278_v39 = vld [vmem:[%s12588_s22 + $0xf80] ss:$16 sps:$4 sm:$0xff]   ;;  %v11281_v40 = vld [vmem:[%s12588_s22 + $0xf88] ss:$16 sps:$4 sm:$0xff]  }
 0x4ec   : > { %7615 = vmatprep.subr.bf16.mxu0 %v11195_v28  ;;  %8148 = vmatprep.subr.bf16.mxu1 %v11198_v45  ;;  %v11286_v28 = vld [vmem:[%s12588_s22 + $0xfa4] ss:$16 sps:$4 sm:$0xff]   ;;  %v11289_v45 = vld [vmem:[%s12588_s22 + $0xfac] ss:$16 sps:$4 sm:$0xff]  }
 0x4ef   : > { %7616 = vmatpush1.bf16.msra.mxu0 %v11193_v20  ;;  %8149 = vmatpush1.bf16.msra.mxu1 %v11196_v47  ;;  %v11284_v20 = vld [vmem:[%s12588_s22 + $0xfa0] ss:$16 sps:$4 sm:$0xff]   ;;  %v11287_v47 = vld [vmem:[%s12588_s22 + $0xfa8] ss:$16 sps:$4 sm:$0xff]  }
 0x4f0   : > { %7617 = vmatprep.subr.bf16.mxu0 %v11201_v50  ;;  %8150 = vmatprep.subr.bf16.mxu1 %v11204_v52  ;;  %v11292_v50 = vld [vmem:[%s12588_s22 + $0xfc4] ss:$16 sps:$4 sm:$0xff]   ;;  %v11295_v52 = vld [vmem:[%s12588_s22 + $0xfcc] ss:$16 sps:$4 sm:$0xff]  }
 0x4f3   : > { %7618 = vmatpush1.bf16.msra.mxu0 %v11199_v37  ;;  %8151 = vmatpush1.bf16.msra.mxu1 %v11202_v53  ;;  %v13504_v37 = vld [vmem:[%s12967_s4 + $0x10] sm:$0xff] }
 0x4f4   : > { %7628 = vmatprep.subr.bf16.mxu0 %v11208_v48  ;;  %8161 = vmatprep.subr.bf16.mxu1 %v11211_v38  ;;  %v11290_v53 = vld [vmem:[%s12588_s22 + $0xfc0] ss:$16 sps:$4 sm:$0xff]   ;;  %v11293_v48 = vld [vmem:[%s12588_s22 + $0xfc8] ss:$16 sps:$4 sm:$0xff]   ;;  %v11298_v38 = vld [vmem:[%s12588_s22 + $0xfe4] ss:$16 sps:$4 sm:$0xff]  }
 0x4f6   : > { %7620 = vmatmul.mubr.bf16.vlgmr.msra.gmra.mrb[0].mxu0 %v13441_v46  ;;  %8153 = vmatmul.mubr.bf16.vlgmr.msra.gmra.mrb[0].mxu1 %v13441_v46 }
 0x4f7   : > { %7629 = vmatpush1.bf16.msra.mxu0 %v11206_v7  ;;  %8162 = vmatpush1.bf16.msra.mxu1 %v11209_v60  ;;  %v11301_v7 = vld [vmem:[%s12588_s22 + $0xfec] ss:$16 sps:$4 sm:$0xff]   ;;  %v13512_v60 = vrot.slane %v13504_v37, %v12963_v49 }
 0x4f8   : > { %7630 = vmatprep.subr.bf16.mxu0 %v11214_v5  ;;  %8163 = vmatprep.subr.bf16.mxu1 %v11217_v9  ;;  %v11296_v5 = vld [vmem:[%s12588_s22 + $0xfe0] ss:$16 sps:$4 sm:$0xff]   ;;  %v11299_v9 = vld [vmem:[%s12588_s22 + $0xfe8] ss:$16 sps:$4 sm:$0xff]  }
 0x4f9   : > { %7660 = vmatprep.mubr.bf16.mxu0 %v3252_v23  ;;  %8193 = vmatprep.mubr.bf16.mxu1 %v3252_v23  ;;  %v11304_v23 = vld [vmem:[%s12588_s22 + $0x1004] ss:$16 sps:$4 sm:$0xff]  }
 0x4fb   : > { %7631 = vmatpush1.bf16.msra.mxu0 %v11212_v15  ;;  %8164 = vmatpush1.bf16.msra.mxu1 %v11215_v54  ;;  %v11307_v15 = vld [vmem:[%s12588_s22 + $0x100c] ss:$16 sps:$4 sm:$0xff]   ;;  %v3268_v54 = vcombine.high %v13512_v60, %v13512_v60 }
 0x4fc   : > { %7632 = vmatprep.subr.bf16.mxu0 %v11220_v17  ;;  %8165 = vmatprep.subr.bf16.mxu1 %v11223_v55  ;;  %v3250_v17 = vcombine.high %v13441_v46, %v13441_v46  ;;  %v11302_v55 = vld [vmem:[%s12588_s22 + $0x1000] ss:$16 sps:$4 sm:$0xff]  }
 0x4fd   : > { %v11308_v46 = vld [vmem:[%s12588_s22 + $0x1020] ss:$16 sps:$4 sm:$0xff]  }
 0x4ff   : > { %7633 = vmatpush1.bf16.msra.mxu0 %v11218_v6  ;;  %8166 = vmatpush1.bf16.msra.mxu1 %v11221_v56  ;;  %v11305_v6 = vld [vmem:[%s12588_s22 + $0x1008] ss:$16 sps:$4 sm:$0xff]   ;;  %v11310_v56 = vld [vmem:[%s12588_s22 + $0x1024] ss:$16 sps:$4 sm:$0xff]  }
 0x500   : > { %7634 = vmatprep.subr.bf16.mxu0 %v11226_v31  ;;  %8167 = vmatprep.subr.bf16.mxu1 %v11229_v41  ;;  %v11313_v31 = vld [vmem:[%s12588_s22 + $0x102c] ss:$16 sps:$4 sm:$0xff]   ;;  %v13527_v41 = vrot.slane %v3268_v54, %v12963_v49  ;;  %v11389_v54 = vld [vmem:[%s12588_s22 + $0x11c8] ss:$16 sps:$4 sm:$0xff]  }
 0x503   : > { %7635 = vmatpush1.bf16.msra.mxu0 %v11224_v11  ;;  %8168 = vmatpush1.bf16.msra.mxu1 %v11227_v42  ;;  %v11311_v11 = vld [vmem:[%s12588_s22 + $0x1028] ss:$16 sps:$4 sm:$0xff]   ;;  %v11316_v42 = vld [vmem:[%s12588_s22 + $0x1044] ss:$16 sps:$4 sm:$0xff]  }
 0x504   : > { %7636 = vmatprep.subr.bf16.mxu0 %v11232_v57  ;;  %8169 = vmatprep.subr.bf16.mxu1 %v11235_v19  ;;  %v11319_v57 = vld [vmem:[%s12588_s22 + $0x104c] ss:$16 sps:$4 sm:$0xff]   ;;  %v11314_v19 = vld [vmem:[%s12588_s22 + $0x1040] ss:$16 sps:$4 sm:$0xff]  }
 0x507   : > { %7637 = vmatpush1.bf16.msra.mxu0 %v11230_v58  ;;  %8170 = vmatpush1.bf16.msra.mxu1 %v11233_v59  ;;  %v11317_v58 = vld [vmem:[%s12588_s22 + $0x1048] ss:$16 sps:$4 sm:$0xff]   ;;  %v11322_v59 = vld [vmem:[%s12588_s22 + $0x1064] ss:$16 sps:$4 sm:$0xff]  }
 0x508   : > { %7638 = vmatprep.subr.bf16.mxu0 %v11238_v62  ;;  %8171 = vmatprep.subr.bf16.mxu1 %v11241_v0  ;;  %v11325_v62 = vld [vmem:[%s12588_s22 + $0x106c] ss:$16 sps:$4 sm:$0xff]   ;;  %v11320_v0 = vld [vmem:[%s12588_s22 + $0x1060] ss:$16 sps:$4 sm:$0xff]  }
 0x50b   : > { %7639 = vmatpush1.bf16.msra.mxu0 %v11236_v44  ;;  %8172 = vmatpush1.bf16.msra.mxu1 %v11239_v2  ;;  %v11323_v44 = vld [vmem:[%s12588_s22 + $0x1068] ss:$16 sps:$4 sm:$0xff]   ;;  %v11328_v2 = vld [vmem:[%s12588_s22 + $0x1084] ss:$16 sps:$4 sm:$0xff]  }
 0x50c   : > { %7640 = vmatprep.subr.bf16.mxu0 %v11244_v3  ;;  %8173 = vmatprep.subr.bf16.mxu1 %v11247_v27  ;;  %v11331_v3 = vld [vmem:[%s12588_s22 + $0x108c] ss:$16 sps:$4 sm:$0xff]   ;;  %v11326_v27 = vld [vmem:[%s12588_s22 + $0x1080] ss:$16 sps:$4 sm:$0xff]  }
 0x50f   : > { %7641 = vmatpush1.bf16.msra.mxu0 %v11242_v13  ;;  %8174 = vmatpush1.bf16.msra.mxu1 %v11245_v43  ;;  %v11329_v13 = vld [vmem:[%s12588_s22 + $0x1088] ss:$16 sps:$4 sm:$0xff]   ;;  %v11334_v43 = vld [vmem:[%s12588_s22 + $0x10a4] ss:$16 sps:$4 sm:$0xff]  }
 0x510   : > { %7642 = vmatprep.subr.bf16.mxu0 %v11250_v14  ;;  %8175 = vmatprep.subr.bf16.mxu1 %v11253_v1  ;;  %v11337_v14 = vld [vmem:[%s12588_s22 + $0x10ac] ss:$16 sps:$4 sm:$0xff]   ;;  %v11332_v1 = vld [vmem:[%s12588_s22 + $0x10a0] ss:$16 sps:$4 sm:$0xff]  }
 0x513   : > { %7643 = vmatpush1.bf16.msra.mxu0 %v11248_v10  ;;  %8176 = vmatpush1.bf16.msra.mxu1 %v11251_v8  ;;  %v11335_v10 = vld [vmem:[%s12588_s22 + $0x10a8] ss:$16 sps:$4 sm:$0xff]   ;;  %v11340_v8 = vld [vmem:[%s12588_s22 + $0x10c4] ss:$16 sps:$4 sm:$0xff]  }
 0x514   : > { %7644 = vmatprep.subr.bf16.mxu0 %v11256_v16  ;;  %8177 = vmatprep.subr.bf16.mxu1 %v11259_v18  ;;  %v11343_v16 = vld [vmem:[%s12588_s22 + $0x10cc] ss:$16 sps:$4 sm:$0xff]   ;;  %v11338_v18 = vld [vmem:[%s12588_s22 + $0x10c0] ss:$16 sps:$4 sm:$0xff]  }
 0x517   : > { %7645 = vmatpush1.bf16.msra.mxu0 %v11254_v61  ;;  %8178 = vmatpush1.bf16.msra.mxu1 %v11257_v12  ;;  %v11341_v61 = vld [vmem:[%s12588_s22 + $0x10c8] ss:$16 sps:$4 sm:$0xff]   ;;  %v11346_v12 = vld [vmem:[%s12588_s22 + $0x10e4] ss:$16 sps:$4 sm:$0xff]  }
 0x518   : > { %7646 = vmatprep.subr.bf16.mxu0 %v11262_v21  ;;  %8179 = vmatprep.subr.bf16.mxu1 %v11265_v63  ;;  %v11349_v21 = vld [vmem:[%s12588_s22 + $0x10ec] ss:$16 sps:$4 sm:$0xff]   ;;  %v11344_v63 = vld [vmem:[%s12588_s22 + $0x10e0] ss:$16 sps:$4 sm:$0xff]  }
 0x51b   : > { %7647 = vmatpush1.bf16.msra.mxu0 %v11260_v22  ;;  %8180 = vmatpush1.bf16.msra.mxu1 %v11263_v25  ;;  %v11347_v22 = vld [vmem:[%s12588_s22 + $0x10e8] ss:$16 sps:$4 sm:$0xff]   ;;  %v11352_v25 = vld [vmem:[%s12588_s22 + $0x1104] ss:$16 sps:$4 sm:$0xff]  }
 0x51c   : > { %7648 = vmatprep.subr.bf16.mxu0 %v11268_v29  ;;  %8181 = vmatprep.subr.bf16.mxu1 %v11271_v30  ;;  %v11355_v29 = vld [vmem:[%s12588_s22 + $0x110c] ss:$16 sps:$4 sm:$0xff]   ;;  %v11350_v30 = vld [vmem:[%s12588_s22 + $0x1100] ss:$16 sps:$4 sm:$0xff]  }
 0x51f   : > { %7649 = vmatpush1.bf16.msra.mxu0 %v11266_v32  ;;  %8182 = vmatpush1.bf16.msra.mxu1 %v11269_v33  ;;  %v11353_v32 = vld [vmem:[%s12588_s22 + $0x1108] ss:$16 sps:$4 sm:$0xff]   ;;  %v11358_v33 = vld [vmem:[%s12588_s22 + $0x1124] ss:$16 sps:$4 sm:$0xff]  }
 0x520   : > { %7650 = vmatprep.subr.bf16.mxu0 %v11274_v4  ;;  %8183 = vmatprep.subr.bf16.mxu1 %v11277_v34  ;;  %v11361_v4 = vld [vmem:[%s12588_s22 + $0x112c] ss:$16 sps:$4 sm:$0xff]   ;;  %v11356_v34 = vld [vmem:[%s12588_s22 + $0x1120] ss:$16 sps:$4 sm:$0xff]  }
 0x523   : > { %7651 = vmatpush1.bf16.msra.mxu0 %v11272_v35  ;;  %8184 = vmatpush1.bf16.msra.mxu1 %v11275_v36  ;;  %v11359_v35 = vld [vmem:[%s12588_s22 + $0x1128] ss:$16 sps:$4 sm:$0xff]   ;;  %v11364_v36 = vld [vmem:[%s12588_s22 + $0x1144] ss:$16 sps:$4 sm:$0xff]  }
 0x524   : > { %7652 = vmatprep.subr.bf16.mxu0 %v11280_v24  ;;  %8185 = vmatprep.subr.bf16.mxu1 %v11283_v26  ;;  %v11367_v24 = vld [vmem:[%s12588_s22 + $0x114c] ss:$16 sps:$4 sm:$0xff]   ;;  %v11362_v26 = vld [vmem:[%s12588_s22 + $0x1140] ss:$16 sps:$4 sm:$0xff]  }
 0x527   : > { %7653 = vmatpush1.bf16.msra.mxu0 %v11278_v39  ;;  %8186 = vmatpush1.bf16.msra.mxu1 %v11281_v40  ;;  %v11365_v39 = vld [vmem:[%s12588_s22 + $0x1148] ss:$16 sps:$4 sm:$0xff]   ;;  %v11370_v40 = vld [vmem:[%s12588_s22 + $0x1164] ss:$16 sps:$4 sm:$0xff]  }
 0x528   : > { %7654 = vmatprep.subr.bf16.mxu0 %v11286_v28  ;;  %8187 = vmatprep.subr.bf16.mxu1 %v11289_v45  ;;  %v11373_v28 = vld [vmem:[%s12588_s22 + $0x116c] ss:$16 sps:$4 sm:$0xff]   ;;  %v11368_v45 = vld [vmem:[%s12588_s22 + $0x1160] ss:$16 sps:$4 sm:$0xff]  }
 0x52b   : > { %7655 = vmatpush1.bf16.msra.mxu0 %v11284_v20  ;;  %8188 = vmatpush1.bf16.msra.mxu1 %v11287_v47  ;;  %v11371_v20 = vld [vmem:[%s12588_s22 + $0x1168] ss:$16 sps:$4 sm:$0xff]   ;;  %v11376_v47 = vld [vmem:[%s12588_s22 + $0x1184] ss:$16 sps:$4 sm:$0xff]  }
 0x52c   : > { %7656 = vmatprep.subr.bf16.mxu0 %v11292_v50  ;;  %8189 = vmatprep.subr.bf16.mxu1 %v11295_v52  ;;  %v11379_v50 = vld [vmem:[%s12588_s22 + $0x118c] ss:$16 sps:$4 sm:$0xff]   ;;  %v11374_v52 = vld [vmem:[%s12588_s22 + $0x1180] ss:$16 sps:$4 sm:$0xff]  }
 0x52f   : > { %7657 = vmatpush1.bf16.msra.mxu0 %v11290_v53  ;;  %8190 = vmatpush1.bf16.msra.mxu1 %v11293_v48  ;;  %v11377_v53 = vld [vmem:[%s12588_s22 + $0x1188] ss:$16 sps:$4 sm:$0xff]   ;;  %v11382_v48 = vld [vmem:[%s12588_s22 + $0x11a4] ss:$16 sps:$4 sm:$0xff]  }
 0x530   : > { %7658 = vmatprep.subr.bf16.mxu0 %v11298_v38  ;;  %8191 = vmatprep.subr.bf16.mxu1 %v11301_v7  ;;  %v11385_v38 = vld [vmem:[%s12588_s22 + $0x11ac] ss:$16 sps:$4 sm:$0xff]   ;;  %v11380_v7 = vld [vmem:[%s12588_s22 + $0x11a0] ss:$16 sps:$4 sm:$0xff]  }
 0x533   : > { %7659 = vmatpush1.bf16.msra.mxu0 %v11296_v5  ;;  %8192 = vmatpush1.bf16.msra.mxu1 %v11299_v9  ;;  %v11383_v5 = vld [vmem:[%s12588_s22 + $0x11a8] ss:$16 sps:$4 sm:$0xff]   ;;  %v11388_v9 = vld [vmem:[%s12588_s22 + $0x11c4] ss:$16 sps:$4 sm:$0xff]  }
 0x534   : > { %7669 = vmatprep.subr.bf16.mxu0 %v11304_v23  ;;  %8202 = vmatprep.subr.bf16.mxu1 %v11307_v15  ;;  %v11391_v23 = vld [vmem:[%s12588_s22 + $0x11cc] ss:$16 sps:$4 sm:$0xff]   ;;  %v11386_v15 = vld [vmem:[%s12588_s22 + $0x11c0] ss:$16 sps:$4 sm:$0xff]  }
 0x536   : > { %7661 = vmatmul.mubr.bf16.vlgmr.msra.gmra.mrb[0].mxu0 %v3250_v17  ;;  %8194 = vmatmul.mubr.bf16.vlgmr.msra.gmra.mrb[0].mxu1 %v3250_v17  ;;  %v11394_v17 = vld [vmem:[%s12588_s22 + $0x11e4] ss:$16 sps:$4 sm:$0xff]  }
 0x537   : > { %7670 = vmatpush1.bf16.msra.mxu0 %v11302_v55  ;;  %8203 = vmatpush1.bf16.msra.mxu1 %v11305_v6  ;;  %v11397_v55 = vld [vmem:[%s12588_s22 + $0x11ec] ss:$16 sps:$4 sm:$0xff]   ;;  %v11392_v6 = vld [vmem:[%s12588_s22 + $0x11e0] ss:$16 sps:$4 sm:$0xff]  }
 0x538   : > { %7671 = vmatprep.subr.bf16.mxu0 %v11310_v56  ;;  %8204 = vmatprep.subr.bf16.mxu1 %v11313_v31  ;;  %v11395_v56 = vld [vmem:[%s12588_s22 + $0x11e8] ss:$16 sps:$4 sm:$0xff]   ;;  %v11400_v31 = vld [vmem:[%s12588_s22 + $0x1204] ss:$16 sps:$4 sm:$0xff]  }
 0x539   : > { %7701 = vmatprep.mubr.bf16.mxu0 %v13527_v41  ;;  %8234 = vmatprep.mubr.bf16.mxu1 %v13527_v41 }
 0x53b   : > { %7672 = vmatpush1.bf16.msra.mxu0 %v11308_v46  ;;  %8205 = vmatpush1.bf16.msra.mxu1 %v11311_v11  ;;  %v11403_v46 = vld [vmem:[%s12588_s22 + $0x120c] ss:$16 sps:$4 sm:$0xff]   ;;  %v13593_v11 = vrot.slane %v13512_v60, %v12963_v49  ;;  %v11404_v60 = vld [vmem:[%s12588_s22 + $0x1220] ss:$16 sps:$4 sm:$0xff]  }
 0x53c   : > { %7673 = vmatprep.subr.bf16.mxu0 %v11316_v42  ;;  %8206 = vmatprep.subr.bf16.mxu1 %v11319_v57  ;;  %v11398_v42 = vld [vmem:[%s12588_s22 + $0x1200] ss:$16 sps:$4 sm:$0xff]   ;;  %v11401_v57 = vld [vmem:[%s12588_s22 + $0x1208] ss:$16 sps:$4 sm:$0xff]  }
 0x53f   : > { %7674 = vmatpush1.bf16.msra.mxu0 %v11314_v19  ;;  %8207 = vmatpush1.bf16.msra.mxu1 %v11317_v58  ;;  %v11406_v19 = vld [vmem:[%s12588_s22 + $0x1224] ss:$16 sps:$4 sm:$0xff]   ;;  %v11409_v58 = vld [vmem:[%s12588_s22 + $0x122c] ss:$16 sps:$4 sm:$0xff]  }
 0x540   : > { %7675 = vmatprep.subr.bf16.mxu0 %v11322_v59  ;;  %8208 = vmatprep.subr.bf16.mxu1 %v11325_v62  ;;  %v3300_v59 = vcombine.high %v13527_v41, %v13527_v41  ;;  %v11407_v62 = vld [vmem:[%s12588_s22 + $0x1228] ss:$16 sps:$4 sm:$0xff]   ;;  %v11410_v41 = vld [vmem:[%s12588_s22 + $0x1240] ss:$16 sps:$4 sm:$0xff]  }
 0x543   : > { %7676 = vmatpush1.bf16.msra.mxu0 %v11320_v0  ;;  %8209 = vmatpush1.bf16.msra.mxu1 %v11323_v44  ;;  %v11412_v0 = vld [vmem:[%s12588_s22 + $0x1244] ss:$16 sps:$4 sm:$0xff]   ;;  %v11415_v44 = vld [vmem:[%s12588_s22 + $0x124c] ss:$16 sps:$4 sm:$0xff]  }
 0x544   : > { %7677 = vmatprep.subr.bf16.mxu0 %v11328_v2  ;;  %8210 = vmatprep.subr.bf16.mxu1 %v11331_v3  ;;  %v11413_v2 = vld [vmem:[%s12588_s22 + $0x1248] ss:$16 sps:$4 sm:$0xff]   ;;  %v11418_v3 = vld [vmem:[%s12588_s22 + $0x1264] ss:$16 sps:$4 sm:$0xff]  }
 0x547   : > { %7678 = vmatpush1.bf16.msra.mxu0 %v11326_v27  ;;  %8211 = vmatpush1.bf16.msra.mxu1 %v11329_v13  ;;  %v11421_v27 = vld [vmem:[%s12588_s22 + $0x126c] ss:$16 sps:$4 sm:$0xff]   ;;  %v11416_v13 = vld [vmem:[%s12588_s22 + $0x1260] ss:$16 sps:$4 sm:$0xff]  }
 0x548   : > { %7679 = vmatprep.subr.bf16.mxu0 %v11334_v43  ;;  %8212 = vmatprep.subr.bf16.mxu1 %v11337_v14  ;;  %v11419_v43 = vld [vmem:[%s12588_s22 + $0x1268] ss:$16 sps:$4 sm:$0xff]   ;;  %v11424_v14 = vld [vmem:[%s12588_s22 + $0x1284] ss:$16 sps:$4 sm:$0xff]  }
 0x54b   : > { %7680 = vmatpush1.bf16.msra.mxu0 %v11332_v1  ;;  %8213 = vmatpush1.bf16.msra.mxu1 %v11335_v10  ;;  %v11427_v1 = vld [vmem:[%s12588_s22 + $0x128c] ss:$16 sps:$4 sm:$0xff]   ;;  %v11422_v10 = vld [vmem:[%s12588_s22 + $0x1280] ss:$16 sps:$4 sm:$0xff]  }
 0x54c   : > { %7681 = vmatprep.subr.bf16.mxu0 %v11340_v8  ;;  %8214 = vmatprep.subr.bf16.mxu1 %v11343_v16  ;;  %v11425_v8 = vld [vmem:[%s12588_s22 + $0x1288] ss:$16 sps:$4 sm:$0xff]   ;;  %v11430_v16 = vld [vmem:[%s12588_s22 + $0x12a4] ss:$16 sps:$4 sm:$0xff]  }
 0x54f   : > { %7682 = vmatpush1.bf16.msra.mxu0 %v11338_v18  ;;  %8215 = vmatpush1.bf16.msra.mxu1 %v11341_v61  ;;  %v11433_v18 = vld [vmem:[%s12588_s22 + $0x12ac] ss:$16 sps:$4 sm:$0xff]   ;;  %v11428_v61 = vld [vmem:[%s12588_s22 + $0x12a0] ss:$16 sps:$4 sm:$0xff]  }
 0x550   : > { %7683 = vmatprep.subr.bf16.mxu0 %v11346_v12  ;;  %8216 = vmatprep.subr.bf16.mxu1 %v11349_v21  ;;  %v11431_v12 = vld [vmem:[%s12588_s22 + $0x12a8] ss:$16 sps:$4 sm:$0xff]   ;;  %v11436_v21 = vld [vmem:[%s12588_s22 + $0x12c4] ss:$16 sps:$4 sm:$0xff]  }
 0x553   : > { %7684 = vmatpush1.bf16.msra.mxu0 %v11344_v63  ;;  %8217 = vmatpush1.bf16.msra.mxu1 %v11347_v22  ;;  %v11439_v63 = vld [vmem:[%s12588_s22 + $0x12cc] ss:$16 sps:$4 sm:$0xff]   ;;  %v11434_v22 = vld [vmem:[%s12588_s22 + $0x12c0] ss:$16 sps:$4 sm:$0xff]  }
 0x554   : > { %7685 = vmatprep.subr.bf16.mxu0 %v11352_v25  ;;  %8218 = vmatprep.subr.bf16.mxu1 %v11355_v29  ;;  %v11437_v25 = vld [vmem:[%s12588_s22 + $0x12c8] ss:$16 sps:$4 sm:$0xff]   ;;  %v11442_v29 = vld [vmem:[%s12588_s22 + $0x12e4] ss:$16 sps:$4 sm:$0xff]  }
 0x557   : > { %7686 = vmatpush1.bf16.msra.mxu0 %v11350_v30  ;;  %8219 = vmatpush1.bf16.msra.mxu1 %v11353_v32  ;;  %v11445_v30 = vld [vmem:[%s12588_s22 + $0x12ec] ss:$16 sps:$4 sm:$0xff]   ;;  %v11440_v32 = vld [vmem:[%s12588_s22 + $0x12e0] ss:$16 sps:$4 sm:$0xff]  }
 0x558   : > { %7687 = vmatprep.subr.bf16.mxu0 %v11358_v33  ;;  %8220 = vmatprep.subr.bf16.mxu1 %v11361_v4  ;;  %v11443_v33 = vld [vmem:[%s12588_s22 + $0x12e8] ss:$16 sps:$4 sm:$0xff]   ;;  %v11448_v4 = vld [vmem:[%s12588_s22 + $0x1304] ss:$16 sps:$4 sm:$0xff]  }
 0x55b   : > { %7688 = vmatpush1.bf16.msra.mxu0 %v11356_v34  ;;  %8221 = vmatpush1.bf16.msra.mxu1 %v11359_v35  ;;  %v11451_v34 = vld [vmem:[%s12588_s22 + $0x130c] ss:$16 sps:$4 sm:$0xff]   ;;  %v11446_v35 = vld [vmem:[%s12588_s22 + $0x1300] ss:$16 sps:$4 sm:$0xff]  }
 0x55c   : > { %7689 = vmatprep.subr.bf16.mxu0 %v11364_v36  ;;  %8222 = vmatprep.subr.bf16.mxu1 %v11367_v24  ;;  %v11449_v36 = vld [vmem:[%s12588_s22 + $0x1308] ss:$16 sps:$4 sm:$0xff]   ;;  %v11454_v24 = vld [vmem:[%s12588_s22 + $0x1324] ss:$16 sps:$4 sm:$0xff]  }
 0x55f   : > { %7690 = vmatpush1.bf16.msra.mxu0 %v11362_v26  ;;  %8223 = vmatpush1.bf16.msra.mxu1 %v11365_v39  ;;  %v11457_v26 = vld [vmem:[%s12588_s22 + $0x132c] ss:$16 sps:$4 sm:$0xff]   ;;  %v11452_v39 = vld [vmem:[%s12588_s22 + $0x1320] ss:$16 sps:$4 sm:$0xff]  }
 0x560   : > { %7691 = vmatprep.subr.bf16.mxu0 %v11370_v40  ;;  %8224 = vmatprep.subr.bf16.mxu1 %v11373_v28  ;;  %v11455_v40 = vld [vmem:[%s12588_s22 + $0x1328] ss:$16 sps:$4 sm:$0xff]   ;;  %v11460_v28 = vld [vmem:[%s12588_s22 + $0x1344] ss:$16 sps:$4 sm:$0xff]  }
 0x563   : > { %7692 = vmatpush1.bf16.msra.mxu0 %v11368_v45  ;;  %8225 = vmatpush1.bf16.msra.mxu1 %v11371_v20  ;;  %v11463_v45 = vld [vmem:[%s12588_s22 + $0x134c] ss:$16 sps:$4 sm:$0xff]   ;;  %v11458_v20 = vld [vmem:[%s12588_s22 + $0x1340] ss:$16 sps:$4 sm:$0xff]  }
 0x564   : > { %7693 = vmatprep.subr.bf16.mxu0 %v11376_v47  ;;  %8226 = vmatprep.subr.bf16.mxu1 %v11379_v50  ;;  %v11461_v47 = vld [vmem:[%s12588_s22 + $0x1348] ss:$16 sps:$4 sm:$0xff]   ;;  %v11466_v50 = vld [vmem:[%s12588_s22 + $0x1364] ss:$16 sps:$4 sm:$0xff]  }
 0x567   : > { %7694 = vmatpush1.bf16.msra.mxu0 %v11374_v52  ;;  %8227 = vmatpush1.bf16.msra.mxu1 %v11377_v53  ;;  %v11469_v52 = vld [vmem:[%s12588_s22 + $0x136c] ss:$16 sps:$4 sm:$0xff]   ;;  %v11464_v53 = vld [vmem:[%s12588_s22 + $0x1360] ss:$16 sps:$4 sm:$0xff]  }
 0x568   : > { %7695 = vmatprep.subr.bf16.mxu0 %v11382_v48  ;;  %8228 = vmatprep.subr.bf16.mxu1 %v11385_v38  ;;  %v11467_v48 = vld [vmem:[%s12588_s22 + $0x1368] ss:$16 sps:$4 sm:$0xff]   ;;  %v11472_v38 = vld [vmem:[%s12588_s22 + $0x1384] ss:$16 sps:$4 sm:$0xff]  }
 0x56b   : > { %7696 = vmatpush1.bf16.msra.mxu0 %v11380_v7  ;;  %8229 = vmatpush1.bf16.msra.mxu1 %v11383_v5  ;;  %v11475_v7 = vld [vmem:[%s12588_s22 + $0x138c] ss:$16 sps:$4 sm:$0xff]   ;;  %v11470_v5 = vld [vmem:[%s12588_s22 + $0x1380] ss:$16 sps:$4 sm:$0xff]  }
 0x56c   : > { %7697 = vmatprep.subr.bf16.mxu0 %v11388_v9  ;;  %8230 = vmatprep.subr.bf16.mxu1 %v11391_v23  ;;  %v11473_v9 = vld [vmem:[%s12588_s22 + $0x1388] ss:$16 sps:$4 sm:$0xff]   ;;  %v11478_v23 = vld [vmem:[%s12588_s22 + $0x13a4] ss:$16 sps:$4 sm:$0xff]  }
 0x56f   : > { %7698 = vmatpush1.bf16.msra.mxu0 %v11386_v15  ;;  %8231 = vmatpush1.bf16.msra.mxu1 %v11389_v54  ;;  %v11481_v15 = vld [vmem:[%s12588_s22 + $0x13ac] ss:$16 sps:$4 sm:$0xff]   ;;  %v11476_v54 = vld [vmem:[%s12588_s22 + $0x13a0] ss:$16 sps:$4 sm:$0xff]  }
 0x570   : > { %7699 = vmatprep.subr.bf16.mxu0 %v11394_v17  ;;  %8232 = vmatprep.subr.bf16.mxu1 %v11397_v55  ;;  %v11479_v17 = vld [vmem:[%s12588_s22 + $0x13a8] ss:$16 sps:$4 sm:$0xff]   ;;  %v11484_v55 = vld [vmem:[%s12588_s22 + $0x13c4] ss:$16 sps:$4 sm:$0xff]  }
 0x573   : > { %7700 = vmatpush1.bf16.msra.mxu0 %v11392_v6  ;;  %8233 = vmatpush1.bf16.msra.mxu1 %v11395_v56  ;;  %v11487_v6 = vld [vmem:[%s12588_s22 + $0x13cc] ss:$16 sps:$4 sm:$0xff]   ;;  %v3253_v56 = vcombine.high %v13504_v37, %v13504_v37  ;;  %v11488_v37 = vld [vmem:[%s12588_s22 + $0x13e0] ss:$16 sps:$4 sm:$0xff]  }
 0x574   : > { %7710 = vmatprep.subr.bf16.mxu0 %v11400_v31  ;;  %8243 = vmatprep.subr.bf16.mxu1 %v11403_v46  ;;  %v11482_v31 = vld [vmem:[%s12588_s22 + $0x13c0] ss:$16 sps:$4 sm:$0xff]   ;;  %v11485_v46 = vld [vmem:[%s12588_s22 + $0x13c8] ss:$16 sps:$4 sm:$0xff]  }
 0x576   : > { %7702 = vmatmul.mubr.bf16.vlgmr.msra.gmra.mrb[0].mxu0 %v13593_v11  ;;  %8235 = vmatmul.mubr.bf16.vlgmr.msra.gmra.mrb[0].mxu1 %v13593_v11 }
 0x577   : > { %7711 = vmatpush1.bf16.msra.mxu0 %v11398_v42  ;;  %8244 = vmatpush1.bf16.msra.mxu1 %v11401_v57  ;;  %v11490_v42 = vld [vmem:[%s12588_s22 + $0x13e4] ss:$16 sps:$4 sm:$0xff]   ;;  %v11493_v57 = vld [vmem:[%s12588_s22 + $0x13ec] ss:$16 sps:$4 sm:$0xff]  }
 0x578   : > { %7712 = vmatprep.subr.bf16.mxu0 %v11406_v19  ;;  %8245 = vmatprep.subr.bf16.mxu1 %v11409_v58  ;;  %v13662_v19 = vrot.slane %v3253_v56, %v12963_v49  ;;  %v11491_v58 = vld [vmem:[%s12588_s22 + $0x13e8] ss:$16 sps:$4 sm:$0xff]  }
 0x579   : > { %7742 = vmatprep.mubr.bf16.mxu0 %v3300_v59  ;;  %8275 = vmatprep.mubr.bf16.mxu1 %v3300_v59  ;;  %v11496_v59 = vld [vmem:[%s12588_s22 + $0x1404] ss:$16 sps:$4 sm:$0xff]   ;;  %v11569_v56 = vld [vmem:[%s12588_s22 + $0x1588] ss:$16 sps:$4 sm:$0xff]  }
 0x57b   : > { %7713 = vmatpush1.bf16.msra.mxu0 %v11404_v60  ;;  %8246 = vmatpush1.bf16.msra.mxu1 %v11407_v62  ;;  %v11499_v60 = vld [vmem:[%s12588_s22 + $0x140c] ss:$16 sps:$4 sm:$0xff]   ;;  %v3269_v62 = vcombine.high %v13662_v19, %v13662_v19 }
 0x57c   : > { %7714 = vmatprep.subr.bf16.mxu0 %v11412_v0  ;;  %8247 = vmatprep.subr.bf16.mxu1 %v11415_v44  ;;  %v3298_v0 = vcombine.high %v13593_v11, %v13593_v11  ;;  %v11494_v44 = vld [vmem:[%s12588_s22 + $0x1400] ss:$16 sps:$4 sm:$0xff]  }
 0x57d   : > { %v11500_v11 = vld [vmem:[%s12588_s22 + $0x1420] ss:$16 sps:$4 sm:$0xff]  }
 0x57f   : > { %7715 = vmatpush1.bf16.msra.mxu0 %v11410_v41  ;;  %8248 = vmatpush1.bf16.msra.mxu1 %v11413_v2  ;;  %v11497_v41 = vld [vmem:[%s12588_s22 + $0x1408] ss:$16 sps:$4 sm:$0xff]   ;;  %v11502_v2 = vld [vmem:[%s12588_s22 + $0x1424] ss:$16 sps:$4 sm:$0xff]  }
 0x580   : > { %7716 = vmatprep.subr.bf16.mxu0 %v11418_v3  ;;  %8249 = vmatprep.subr.bf16.mxu1 %v11421_v27  ;;  %v11505_v3 = vld [vmem:[%s12588_s22 + $0x142c] ss:$16 sps:$4 sm:$0xff]   ;;  %v13677_v27 = vrot.slane %v3269_v62, %v12963_v49  ;;  %v11586_v62 = vld [vmem:[%s12588_s22 + $0x15e4] ss:$16 sps:$4 sm:$0xff]  }
 0x583   : > { %7717 = vmatpush1.bf16.msra.mxu0 %v11416_v13  ;;  %8250 = vmatpush1.bf16.msra.mxu1 %v11419_v43  ;;  %v11503_v13 = vld [vmem:[%s12588_s22 + $0x1428] ss:$16 sps:$4 sm:$0xff]   ;;  %v11508_v43 = vld [vmem:[%s12588_s22 + $0x1444] ss:$16 sps:$4 sm:$0xff]  }
 0x584   : > { %7718 = vmatprep.subr.bf16.mxu0 %v11424_v14  ;;  %8251 = vmatprep.subr.bf16.mxu1 %v11427_v1  ;;  %v11511_v14 = vld [vmem:[%s12588_s22 + $0x144c] ss:$16 sps:$4 sm:$0xff]   ;;  %v11506_v1 = vld [vmem:[%s12588_s22 + $0x1440] ss:$16 sps:$4 sm:$0xff]  }
 0x587   : > { %7719 = vmatpush1.bf16.msra.mxu0 %v11422_v10  ;;  %8252 = vmatpush1.bf16.msra.mxu1 %v11425_v8  ;;  %v11509_v10 = vld [vmem:[%s12588_s22 + $0x1448] ss:$16 sps:$4 sm:$0xff]   ;;  %v11514_v8 = vld [vmem:[%s12588_s22 + $0x1464] ss:$16 sps:$4 sm:$0xff]  }
 0x588   : > { %7720 = vmatprep.subr.bf16.mxu0 %v11430_v16  ;;  %8253 = vmatprep.subr.bf16.mxu1 %v11433_v18  ;;  %v11517_v16 = vld [vmem:[%s12588_s22 + $0x146c] ss:$16 sps:$4 sm:$0xff]   ;;  %v11512_v18 = vld [vmem:[%s12588_s22 + $0x1460] ss:$16 sps:$4 sm:$0xff]  }
 0x58b   : > { %7721 = vmatpush1.bf16.msra.mxu0 %v11428_v61  ;;  %8254 = vmatpush1.bf16.msra.mxu1 %v11431_v12  ;;  %v11515_v61 = vld [vmem:[%s12588_s22 + $0x1468] ss:$16 sps:$4 sm:$0xff]   ;;  %v11520_v12 = vld [vmem:[%s12588_s22 + $0x1484] ss:$16 sps:$4 sm:$0xff]  }
 0x58c   : > { %7722 = vmatprep.subr.bf16.mxu0 %v11436_v21  ;;  %8255 = vmatprep.subr.bf16.mxu1 %v11439_v63  ;;  %v11523_v21 = vld [vmem:[%s12588_s22 + $0x148c] ss:$16 sps:$4 sm:$0xff]   ;;  %v11518_v63 = vld [vmem:[%s12588_s22 + $0x1480] ss:$16 sps:$4 sm:$0xff]  }
 0x58f   : > { %7723 = vmatpush1.bf16.msra.mxu0 %v11434_v22  ;;  %8256 = vmatpush1.bf16.msra.mxu1 %v11437_v25  ;;  %v11521_v22 = vld [vmem:[%s12588_s22 + $0x1488] ss:$16 sps:$4 sm:$0xff]   ;;  %v11526_v25 = vld [vmem:[%s12588_s22 + $0x14a4] ss:$16 sps:$4 sm:$0xff]  }
 0x590   : > { %7724 = vmatprep.subr.bf16.mxu0 %v11442_v29  ;;  %8257 = vmatprep.subr.bf16.mxu1 %v11445_v30  ;;  %v11529_v29 = vld [vmem:[%s12588_s22 + $0x14ac] ss:$16 sps:$4 sm:$0xff]   ;;  %v11524_v30 = vld [vmem:[%s12588_s22 + $0x14a0] ss:$16 sps:$4 sm:$0xff]  }
 0x593   : > { %7725 = vmatpush1.bf16.msra.mxu0 %v11440_v32  ;;  %8258 = vmatpush1.bf16.msra.mxu1 %v11443_v33  ;;  %v11527_v32 = vld [vmem:[%s12588_s22 + $0x14a8] ss:$16 sps:$4 sm:$0xff]   ;;  %v11532_v33 = vld [vmem:[%s12588_s22 + $0x14c4] ss:$16 sps:$4 sm:$0xff]  }
 0x594   : > { %7726 = vmatprep.subr.bf16.mxu0 %v11448_v4  ;;  %8259 = vmatprep.subr.bf16.mxu1 %v11451_v34  ;;  %v11535_v4 = vld [vmem:[%s12588_s22 + $0x14cc] ss:$16 sps:$4 sm:$0xff]   ;;  %v11530_v34 = vld [vmem:[%s12588_s22 + $0x14c0] ss:$16 sps:$4 sm:$0xff]  }
 0x597   : > { %7727 = vmatpush1.bf16.msra.mxu0 %v11446_v35  ;;  %8260 = vmatpush1.bf16.msra.mxu1 %v11449_v36  ;;  %v11533_v35 = vld [vmem:[%s12588_s22 + $0x14c8] ss:$16 sps:$4 sm:$0xff]   ;;  %v11538_v36 = vld [vmem:[%s12588_s22 + $0x14e4] ss:$16 sps:$4 sm:$0xff]  }
 0x598   : > { %7728 = vmatprep.subr.bf16.mxu0 %v11454_v24  ;;  %8261 = vmatprep.subr.bf16.mxu1 %v11457_v26  ;;  %v11541_v24 = vld [vmem:[%s12588_s22 + $0x14ec] ss:$16 sps:$4 sm:$0xff]   ;;  %v11536_v26 = vld [vmem:[%s12588_s22 + $0x14e0] ss:$16 sps:$4 sm:$0xff]  }
 0x59b   : > { %7729 = vmatpush1.bf16.msra.mxu0 %v11452_v39  ;;  %8262 = vmatpush1.bf16.msra.mxu1 %v11455_v40  ;;  %v11539_v39 = vld [vmem:[%s12588_s22 + $0x14e8] ss:$16 sps:$4 sm:$0xff]   ;;  %v11544_v40 = vld [vmem:[%s12588_s22 + $0x1504] ss:$16 sps:$4 sm:$0xff]  }
 0x59c   : > { %7730 = vmatprep.subr.bf16.mxu0 %v11460_v28  ;;  %8263 = vmatprep.subr.bf16.mxu1 %v11463_v45  ;;  %v11547_v28 = vld [vmem:[%s12588_s22 + $0x150c] ss:$16 sps:$4 sm:$0xff]   ;;  %v11542_v45 = vld [vmem:[%s12588_s22 + $0x1500] ss:$16 sps:$4 sm:$0xff]  }
 0x59f   : > { %7731 = vmatpush1.bf16.msra.mxu0 %v11458_v20  ;;  %8264 = vmatpush1.bf16.msra.mxu1 %v11461_v47  ;;  %v11545_v20 = vld [vmem:[%s12588_s22 + $0x1508] ss:$16 sps:$4 sm:$0xff]   ;;  %v11550_v47 = vld [vmem:[%s12588_s22 + $0x1524] ss:$16 sps:$4 sm:$0xff]  }
 0x5a0   : > { %7732 = vmatprep.subr.bf16.mxu0 %v11466_v50  ;;  %8265 = vmatprep.subr.bf16.mxu1 %v11469_v52  ;;  %v11553_v50 = vld [vmem:[%s12588_s22 + $0x152c] ss:$16 sps:$4 sm:$0xff]   ;;  %v11548_v52 = vld [vmem:[%s12588_s22 + $0x1520] ss:$16 sps:$4 sm:$0xff]  }
 0x5a3   : > { %7733 = vmatpush1.bf16.msra.mxu0 %v11464_v53  ;;  %8266 = vmatpush1.bf16.msra.mxu1 %v11467_v48  ;;  %v11551_v53 = vld [vmem:[%s12588_s22 + $0x1528] ss:$16 sps:$4 sm:$0xff]   ;;  %v11556_v48 = vld [vmem:[%s12588_s22 + $0x1544] ss:$16 sps:$4 sm:$0xff]  }
 0x5a4   : > { %7734 = vmatprep.subr.bf16.mxu0 %v11472_v38  ;;  %8267 = vmatprep.subr.bf16.mxu1 %v11475_v7  ;;  %v11559_v38 = vld [vmem:[%s12588_s22 + $0x154c] ss:$16 sps:$4 sm:$0xff]   ;;  %v11554_v7 = vld [vmem:[%s12588_s22 + $0x1540] ss:$16 sps:$4 sm:$0xff]  }
 0x5a7   : > { %7735 = vmatpush1.bf16.msra.mxu0 %v11470_v5  ;;  %8268 = vmatpush1.bf16.msra.mxu1 %v11473_v9  ;;  %v11557_v5 = vld [vmem:[%s12588_s22 + $0x1548] ss:$16 sps:$4 sm:$0xff]   ;;  %v11562_v9 = vld [vmem:[%s12588_s22 + $0x1564] ss:$16 sps:$4 sm:$0xff]  }
 0x5a8   : > { %7736 = vmatprep.subr.bf16.mxu0 %v11478_v23  ;;  %8269 = vmatprep.subr.bf16.mxu1 %v11481_v15  ;;  %v11565_v23 = vld [vmem:[%s12588_s22 + $0x156c] ss:$16 sps:$4 sm:$0xff]   ;;  %v11560_v15 = vld [vmem:[%s12588_s22 + $0x1560] ss:$16 sps:$4 sm:$0xff]  }
 0x5ab   : > { %7737 = vmatpush1.bf16.msra.mxu0 %v11476_v54  ;;  %8270 = vmatpush1.bf16.msra.mxu1 %v11479_v17  ;;  %v11563_v54 = vld [vmem:[%s12588_s22 + $0x1568] ss:$16 sps:$4 sm:$0xff]   ;;  %v11568_v17 = vld [vmem:[%s12588_s22 + $0x1584] ss:$16 sps:$4 sm:$0xff]  }
 0x5ac   : > { %7738 = vmatprep.subr.bf16.mxu0 %v11484_v55  ;;  %8271 = vmatprep.subr.bf16.mxu1 %v11487_v6  ;;  %v11571_v55 = vld [vmem:[%s12588_s22 + $0x158c] ss:$16 sps:$4 sm:$0xff]   ;;  %v11566_v6 = vld [vmem:[%s12588_s22 + $0x1580] ss:$16 sps:$4 sm:$0xff]  }
 0x5af   : > { %7739 = vmatpush1.bf16.msra.mxu0 %v11482_v31  ;;  %8272 = vmatpush1.bf16.msra.mxu1 %v11485_v46  ;;  %v11574_v31 = vld [vmem:[%s12588_s22 + $0x15a4] ss:$16 sps:$4 sm:$0xff]   ;;  %v11577_v46 = vld [vmem:[%s12588_s22 + $0x15ac] ss:$16 sps:$4 sm:$0xff]  }
 0x5b0   : > { %7740 = vmatprep.subr.bf16.mxu0 %v11490_v42  ;;  %8273 = vmatprep.subr.bf16.mxu1 %v11493_v57  ;;  %v11572_v42 = vld [vmem:[%s12588_s22 + $0x15a0] ss:$16 sps:$4 sm:$0xff]   ;;  %v11575_v57 = vld [vmem:[%s12588_s22 + $0x15a8] ss:$16 sps:$4 sm:$0xff]  }
 0x5b3   : > { %7741 = vmatpush1.bf16.msra.mxu0 %v11488_v37  ;;  %8274 = vmatpush1.bf16.msra.mxu1 %v11491_v58  ;;  %v11580_v37 = vld [vmem:[%s12588_s22 + $0x15c4] ss:$16 sps:$4 sm:$0xff]   ;;  %v11583_v58 = vld [vmem:[%s12588_s22 + $0x15cc] ss:$16 sps:$4 sm:$0xff]  }
 0x5b4   : > { %7751 = vmatprep.subr.bf16.mxu0 %v11496_v59  ;;  %8284 = vmatprep.subr.bf16.mxu1 %v11499_v60  ;;  %v11578_v59 = vld [vmem:[%s12588_s22 + $0x15c0] ss:$16 sps:$4 sm:$0xff]   ;;  %v11581_v60 = vld [vmem:[%s12588_s22 + $0x15c8] ss:$16 sps:$4 sm:$0xff]  }
 0x5b6   : > { %7743 = vmatmul.mubr.bf16.vlgmr.msra.gmra.mrb[0].mxu0 %v3298_v0  ;;  %8276 = vmatmul.mubr.bf16.vlgmr.msra.gmra.mrb[0].mxu1 %v3298_v0  ;;  %v11589_v0 = vld [vmem:[%s12588_s22 + $0x15ec] ss:$16 sps:$4 sm:$0xff]  }
 0x5b7   : > { %7752 = vmatpush1.bf16.msra.mxu0 %v11494_v44  ;;  %8285 = vmatpush1.bf16.msra.mxu1 %v11497_v41  ;;  %v11584_v44 = vld [vmem:[%s12588_s22 + $0x15e0] ss:$16 sps:$4 sm:$0xff]   ;;  %v11587_v41 = vld [vmem:[%s12588_s22 + $0x15e8] ss:$16 sps:$4 sm:$0xff]  }
 0x5b8   : > { %7753 = vmatprep.subr.bf16.mxu0 %v11502_v2  ;;  %8286 = vmatprep.subr.bf16.mxu1 %v11505_v3  ;;  %v11593_v2 = vld [vmem:[%s12588_s22 + $0x1604] ss:$16 sps:$4 sm:$0xff]   ;;  %v11596_v3 = vld [vmem:[%s12588_s22 + $0x160c] ss:$16 sps:$4 sm:$0xff]  }
 0x5b9   : > { %7783 = vmatprep.mubr.bf16.mxu0 %v13677_v27  ;;  %8316 = vmatprep.mubr.bf16.mxu1 %v13677_v27 }
 0x5bb   : > { %7754 = vmatpush1.bf16.msra.mxu0 %v11500_v11  ;;  %8287 = vmatpush1.bf16.msra.mxu1 %v11503_v13  ;;  %v13743_v11 = vrot.slane %v13662_v19, %v12963_v49  ;;  %v11591_v13 = vld [vmem:[%s12588_s22 + $0x1600] ss:$16 sps:$4 sm:$0xff]  }
 0x5bc   : > { %7755 = vmatprep.subr.bf16.mxu0 %v11508_v43  ;;  %8288 = vmatprep.subr.bf16.mxu1 %v11511_v14  ;;  %v11594_v43 = vld [vmem:[%s12588_s22 + $0x1608] ss:$16 sps:$4 sm:$0xff]   ;;  %v11599_v14 = vld [vmem:[%s12588_s22 + $0x1624] ss:$16 sps:$4 sm:$0xff]   ;;  %v11597_v19 = vld [vmem:[%s12588_s22 + $0x1620] ss:$16 sps:$4 sm:$0xff]  }
 0x5bf   : > { %7756 = vmatpush1.bf16.msra.mxu0 %v11506_v1  ;;  %8289 = vmatpush1.bf16.msra.mxu1 %v11509_v10  ;;  %v11602_v1 = vld [vmem:[%s12588_s22 + $0x162c] ss:$16 sps:$4 sm:$0xff]   ;;  %v3301_v10 = vcombine.high %v13677_v27, %v13677_v27  ;;  %v11603_v27 = vld [vmem:[%s12588_s22 + $0x1640] ss:$16 sps:$4 sm:$0xff]  }
 0x5c0   : > { %7757 = vmatprep.subr.bf16.mxu0 %v11514_v8  ;;  %8290 = vmatprep.subr.bf16.mxu1 %v11517_v16  ;;  %v11600_v8 = vld [vmem:[%s12588_s22 + $0x1628] ss:$16 sps:$4 sm:$0xff]   ;;  %v11605_v16 = vld [vmem:[%s12588_s22 + $0x1644] ss:$16 sps:$4 sm:$0xff]  }
 0x5c3   : > { %7758 = vmatpush1.bf16.msra.mxu0 %v11512_v18  ;;  %8291 = vmatpush1.bf16.msra.mxu1 %v11515_v61  ;;  %v11608_v18 = vld [vmem:[%s12588_s22 + $0x164c] ss:$16 sps:$4 sm:$0xff]   ;;  %v11606_v61 = vld [vmem:[%s12588_s22 + $0x1648] ss:$16 sps:$4 sm:$0xff]  }
 0x5c4   : > { %7759 = vmatprep.subr.bf16.mxu0 %v11520_v12  ;;  %8292 = vmatprep.subr.bf16.mxu1 %v11523_v21  ;;  %v11611_v12 = vld [vmem:[%s12588_s22 + $0x1664] ss:$16 sps:$4 sm:$0xff]   ;;  %v11614_v21 = vld [vmem:[%s12588_s22 + $0x166c] ss:$16 sps:$4 sm:$0xff]  }
 0x5c7   : > { %7760 = vmatpush1.bf16.msra.mxu0 %v11518_v63  ;;  %8293 = vmatpush1.bf16.msra.mxu1 %v11521_v22  ;;  %v11609_v63 = vld [vmem:[%s12588_s22 + $0x1660] ss:$16 sps:$4 sm:$0xff]   ;;  %v11612_v22 = vld [vmem:[%s12588_s22 + $0x1668] ss:$16 sps:$4 sm:$0xff]  }
 0x5c8   : > { %7761 = vmatprep.subr.bf16.mxu0 %v11526_v25  ;;  %8294 = vmatprep.subr.bf16.mxu1 %v11529_v29  ;;  %v11617_v25 = vld [vmem:[%s12588_s22 + $0x1684] ss:$16 sps:$4 sm:$0xff]   ;;  %v11620_v29 = vld [vmem:[%s12588_s22 + $0x168c] ss:$16 sps:$4 sm:$0xff]  }
 0x5cb   : > { %7762 = vmatpush1.bf16.msra.mxu0 %v11524_v30  ;;  %8295 = vmatpush1.bf16.msra.mxu1 %v11527_v32  ;;  %v11615_v30 = vld [vmem:[%s12588_s22 + $0x1680] ss:$16 sps:$4 sm:$0xff]   ;;  %v11618_v32 = vld [vmem:[%s12588_s22 + $0x1688] ss:$16 sps:$4 sm:$0xff]  }
 0x5cc   : > { %7763 = vmatprep.subr.bf16.mxu0 %v11532_v33  ;;  %8296 = vmatprep.subr.bf16.mxu1 %v11535_v4  ;;  %v11623_v33 = vld [vmem:[%s12588_s22 + $0x16a4] ss:$16 sps:$4 sm:$0xff]   ;;  %v11626_v4 = vld [vmem:[%s12588_s22 + $0x16ac] ss:$16 sps:$4 sm:$0xff]  }
 0x5cf   : > { %7764 = vmatpush1.bf16.msra.mxu0 %v11530_v34  ;;  %8297 = vmatpush1.bf16.msra.mxu1 %v11533_v35  ;;  %v11621_v34 = vld [vmem:[%s12588_s22 + $0x16a0] ss:$16 sps:$4 sm:$0xff]   ;;  %v11624_v35 = vld [vmem:[%s12588_s22 + $0x16a8] ss:$16 sps:$4 sm:$0xff]  }
 0x5d0   : > { %7765 = vmatprep.subr.bf16.mxu0 %v11538_v36  ;;  %8298 = vmatprep.subr.bf16.mxu1 %v11541_v24  ;;  %v11629_v36 = vld [vmem:[%s12588_s22 + $0x16c4] ss:$16 sps:$4 sm:$0xff]   ;;  %v11632_v24 = vld [vmem:[%s12588_s22 + $0x16cc] ss:$16 sps:$4 sm:$0xff]  }
 0x5d3   : > { %7766 = vmatpush1.bf16.msra.mxu0 %v11536_v26  ;;  %8299 = vmatpush1.bf16.msra.mxu1 %v11539_v39  ;;  %v11627_v26 = vld [vmem:[%s12588_s22 + $0x16c0] ss:$16 sps:$4 sm:$0xff]   ;;  %v11630_v39 = vld [vmem:[%s12588_s22 + $0x16c8] ss:$16 sps:$4 sm:$0xff]  }
 0x5d4   : > { %7767 = vmatprep.subr.bf16.mxu0 %v11544_v40  ;;  %8300 = vmatprep.subr.bf16.mxu1 %v11547_v28  ;;  %v11635_v40 = vld [vmem:[%s12588_s22 + $0x16e4] ss:$16 sps:$4 sm:$0xff]   ;;  %v11638_v28 = vld [vmem:[%s12588_s22 + $0x16ec] ss:$16 sps:$4 sm:$0xff]  }
 0x5d7   : > { %7768 = vmatpush1.bf16.msra.mxu0 %v11542_v45  ;;  %8301 = vmatpush1.bf16.msra.mxu1 %v11545_v20  ;;  %v11633_v45 = vld [vmem:[%s12588_s22 + $0x16e0] ss:$16 sps:$4 sm:$0xff]   ;;  %v11636_v20 = vld [vmem:[%s12588_s22 + $0x16e8] ss:$16 sps:$4 sm:$0xff]  }
 0x5d8   : > { %7769 = vmatprep.subr.bf16.mxu0 %v11550_v47  ;;  %8302 = vmatprep.subr.bf16.mxu1 %v11553_v50  ;;  %v11641_v47 = vld [vmem:[%s12588_s22 + $0x1704] ss:$16 sps:$4 sm:$0xff]   ;;  %v11644_v50 = vld [vmem:[%s12588_s22 + $0x170c] ss:$16 sps:$4 sm:$0xff]  }
 0x5db   : > { %7770 = vmatpush1.bf16.msra.mxu0 %v11548_v52  ;;  %8303 = vmatpush1.bf16.msra.mxu1 %v11551_v53  ;;  %v11639_v52 = vld [vmem:[%s12588_s22 + $0x1700] ss:$16 sps:$4 sm:$0xff]   ;;  %v11642_v53 = vld [vmem:[%s12588_s22 + $0x1708] ss:$16 sps:$4 sm:$0xff]  }
 0x5dc   : > { %7771 = vmatprep.subr.bf16.mxu0 %v11556_v48  ;;  %8304 = vmatprep.subr.bf16.mxu1 %v11559_v38  ;;  %v11647_v48 = vld [vmem:[%s12588_s22 + $0x1724] ss:$16 sps:$4 sm:$0xff]   ;;  %v11650_v38 = vld [vmem:[%s12588_s22 + $0x172c] ss:$16 sps:$4 sm:$0xff]  }
 0x5df   : > { %7772 = vmatpush1.bf16.msra.mxu0 %v11554_v7  ;;  %8305 = vmatpush1.bf16.msra.mxu1 %v11557_v5  ;;  %v11645_v7 = vld [vmem:[%s12588_s22 + $0x1720] ss:$16 sps:$4 sm:$0xff]   ;;  %v11648_v5 = vld [vmem:[%s12588_s22 + $0x1728] ss:$16 sps:$4 sm:$0xff]  }
 0x5e0   : > { %7773 = vmatprep.subr.bf16.mxu0 %v11562_v9  ;;  %8306 = vmatprep.subr.bf16.mxu1 %v11565_v23  ;;  %v11653_v9 = vld [vmem:[%s12588_s22 + $0x1744] ss:$16 sps:$4 sm:$0xff]   ;;  %v11656_v23 = vld [vmem:[%s12588_s22 + $0x174c] ss:$16 sps:$4 sm:$0xff]  }
 0x5e3   : > { %7774 = vmatpush1.bf16.msra.mxu0 %v11560_v15  ;;  %8307 = vmatpush1.bf16.msra.mxu1 %v11563_v54  ;;  %v11651_v15 = vld [vmem:[%s12588_s22 + $0x1740] ss:$16 sps:$4 sm:$0xff]   ;;  %v11654_v54 = vld [vmem:[%s12588_s22 + $0x1748] ss:$16 sps:$4 sm:$0xff]  }
 0x5e4   : > { %7775 = vmatprep.subr.bf16.mxu0 %v11568_v17  ;;  %8308 = vmatprep.subr.bf16.mxu1 %v11571_v55  ;;  %v11659_v17 = vld [vmem:[%s12588_s22 + $0x1764] ss:$16 sps:$4 sm:$0xff]   ;;  %v11662_v55 = vld [vmem:[%s12588_s22 + $0x176c] ss:$16 sps:$4 sm:$0xff]  }
 0x5e7   : > { %7776 = vmatpush1.bf16.msra.mxu0 %v11566_v6  ;;  %8309 = vmatpush1.bf16.msra.mxu1 %v11569_v56  ;;  %v11657_v6 = vld [vmem:[%s12588_s22 + $0x1760] ss:$16 sps:$4 sm:$0xff]   ;;  %v11660_v56 = vld [vmem:[%s12588_s22 + $0x1768] ss:$16 sps:$4 sm:$0xff]  }
 0x5e8   : > { %7777 = vmatprep.subr.bf16.mxu0 %v11574_v31  ;;  %8310 = vmatprep.subr.bf16.mxu1 %v11577_v46  ;;  %v11665_v31 = vld [vmem:[%s12588_s22 + $0x1784] ss:$16 sps:$4 sm:$0xff]   ;;  %v11668_v46 = vld [vmem:[%s12588_s22 + $0x178c] ss:$16 sps:$4 sm:$0xff]  }
 0x5eb   : > { %7778 = vmatpush1.bf16.msra.mxu0 %v11572_v42  ;;  %8311 = vmatpush1.bf16.msra.mxu1 %v11575_v57  ;;  %v11663_v42 = vld [vmem:[%s12588_s22 + $0x1780] ss:$16 sps:$4 sm:$0xff]   ;;  %v11666_v57 = vld [vmem:[%s12588_s22 + $0x1788] ss:$16 sps:$4 sm:$0xff]  }
 0x5ec   : > { %7779 = vmatprep.subr.bf16.mxu0 %v11580_v37  ;;  %8312 = vmatprep.subr.bf16.mxu1 %v11583_v58  ;;  %v11671_v37 = vld [vmem:[%s12588_s22 + $0x17a4] ss:$16 sps:$4 sm:$0xff]   ;;  %v11674_v58 = vld [vmem:[%s12588_s22 + $0x17ac] ss:$16 sps:$4 sm:$0xff]  }
 0x5ef   : > { %7780 = vmatpush1.bf16.msra.mxu0 %v11578_v59  ;;  %8313 = vmatpush1.bf16.msra.mxu1 %v11581_v60  ;;  %v11669_v59 = vld [vmem:[%s12588_s22 + $0x17a0] ss:$16 sps:$4 sm:$0xff]   ;;  %v11672_v60 = vld [vmem:[%s12588_s22 + $0x17a8] ss:$16 sps:$4 sm:$0xff]  }
 0x5f0   : > { %7781 = vmatprep.subr.bf16.mxu0 %v11586_v62  ;;  %8314 = vmatprep.subr.bf16.mxu1 %v11589_v0  ;;  %v11677_v62 = vld [vmem:[%s12588_s22 + $0x17c4] ss:$16 sps:$4 sm:$0xff]   ;;  %v11680_v0 = vld [vmem:[%s12588_s22 + $0x17cc] ss:$16 sps:$4 sm:$0xff]  }
 0x5f3   : > { %7782 = vmatpush1.bf16.msra.mxu0 %v11584_v44  ;;  %8315 = vmatpush1.bf16.msra.mxu1 %v11587_v41  ;;  %v11675_v44 = vld [vmem:[%s12588_s22 + $0x17c0] ss:$16 sps:$4 sm:$0xff]   ;;  %v11678_v41 = vld [vmem:[%s12588_s22 + $0x17c8] ss:$16 sps:$4 sm:$0xff]  }
 0x5f4   : > { %7792 = vmatprep.subr.bf16.mxu0 %v11593_v2  ;;  %8325 = vmatprep.subr.bf16.mxu1 %v11596_v3  ;;  %v11683_v2 = vld [vmem:[%s12588_s22 + $0x17e4] ss:$16 sps:$4 sm:$0xff]   ;;  %v11686_v3 = vld [vmem:[%s12588_s22 + $0x17ec] ss:$16 sps:$4 sm:$0xff]  }
 0x5f6   : > { %7784 = vmatmul.mubr.bf16.vlgmr.msra.gmra.mrb[0].mxu0 %v13743_v11  ;;  %8317 = vmatmul.mubr.bf16.vlgmr.msra.gmra.mrb[0].mxu1 %v13743_v11 }
 0x5f7   : > { %7793 = vmatpush1.bf16.msra.mxu0 %v11591_v13  ;;  %8326 = vmatpush1.bf16.msra.mxu1 %v11594_v43  ;;  %v11681_v13 = vld [vmem:[%s12588_s22 + $0x17e0] ss:$16 sps:$4 sm:$0xff]   ;;  %v11684_v43 = vld [vmem:[%s12588_s22 + $0x17e8] ss:$16 sps:$4 sm:$0xff]  }
 0x5f8   : > { %7794 = vmatprep.subr.bf16.mxu0 %v11599_v14  ;;  %8327 = vmatprep.subr.bf16.mxu1 %v11602_v1  ;;  %v11689_v14 = vld [vmem:[%s12588_s22 + $0x1804] ss:$16 sps:$4 sm:$0xff]   ;;  %v11692_v1 = vld [vmem:[%s12588_s22 + $0x180c] ss:$16 sps:$4 sm:$0xff]  }
 0x5f9   : > { %7824 = vmatprep.mubr.bf16.mxu0 %v3301_v10  ;;  %8357 = vmatprep.mubr.bf16.mxu1 %v3301_v10  ;;  %v3299_v10 = vcombine.high %v13743_v11, %v13743_v11  ;;  %v11696_v11 = vld [vmem:[%s12588_s22 + $0x1828] ss:$16 sps:$4 sm:$0xff]  }
 0x5fb   : > { %7795 = vmatpush1.bf16.msra.mxu0 %v11597_v19  ;;  %8328 = vmatpush1.bf16.msra.mxu1 %v11600_v8  ;;  %v11687_v19 = vld [vmem:[%s12588_s22 + $0x1800] ss:$16 sps:$4 sm:$0xff]   ;;  %v11690_v8 = vld [vmem:[%s12588_s22 + $0x1808] ss:$16 sps:$4 sm:$0xff]  }
 0x5fc   : > { %7796 = vmatprep.subr.bf16.mxu0 %v11605_v16  ;;  %8329 = vmatprep.subr.bf16.mxu1 %v11608_v18  ;;  %v11695_v16 = vld [vmem:[%s12588_s22 + $0x1824] ss:$16 sps:$4 sm:$0xff]   ;;  %v11698_v18 = vld [vmem:[%s12588_s22 + $0x182c] ss:$16 sps:$4 sm:$0xff]  }
 0x5ff   : > { %7797 = vmatpush1.bf16.msra.mxu0 %v11603_v27  ;;  %8330 = vmatpush1.bf16.msra.mxu1 %v11606_v61  ;;  %v11693_v27 = vld [vmem:[%s12588_s22 + $0x1820] ss:$16 sps:$4 sm:$0xff]   ;;  %v11701_v61 = vld [vmem:[%s12588_s22 + $0x1844] ss:$16 sps:$4 sm:$0xff]  }
 0x600   : > { %7798 = vmatprep.subr.bf16.mxu0 %v11611_v12  ;;  %8331 = vmatprep.subr.bf16.mxu1 %v11614_v21  ;;  %v11704_v12 = vld [vmem:[%s12588_s22 + $0x184c] ss:$16 sps:$4 sm:$0xff]   ;;  %v12133_v21 = vmov 0  }
 0x603   : > { %7799 = vmatpush1.bf16.msra.mxu0 %v11609_v63  ;;  %8332 = vmatpush1.bf16.msra.mxu1 %v11612_v22  ;;  %v11699_v63 = vld [vmem:[%s12588_s22 + $0x1840] ss:$16 sps:$4 sm:$0xff]   ;;  %v11702_v22 = vld [vmem:[%s12588_s22 + $0x1848] ss:$16 sps:$4 sm:$0xff]  }
 0x604   : > { %7800 = vmatprep.subr.bf16.mxu0 %v11617_v25  ;;  %8333 = vmatprep.subr.bf16.mxu1 %v11620_v29  ;;  %v11707_v25 = vld [vmem:[%s12588_s22 + $0x1864] ss:$16 sps:$4 sm:$0xff]   ;;  %v11710_v29 = vld [vmem:[%s12588_s22 + $0x186c] ss:$16 sps:$4 sm:$0xff]  }
 0x607   : > { %7801 = vmatpush1.bf16.msra.mxu0 %v11615_v30  ;;  %8334 = vmatpush1.bf16.msra.mxu1 %v11618_v32  ;;  %v11705_v30 = vld [vmem:[%s12588_s22 + $0x1860] ss:$16 sps:$4 sm:$0xff]   ;;  %v11708_v32 = vld [vmem:[%s12588_s22 + $0x1868] ss:$16 sps:$4 sm:$0xff]  }
 0x608   : > { %7802 = vmatprep.subr.bf16.mxu0 %v11623_v33  ;;  %8335 = vmatprep.subr.bf16.mxu1 %v11626_v4  ;;  %v11713_v33 = vld [vmem:[%s12588_s22 + $0x1884] ss:$16 sps:$4 sm:$0xff]   ;;  %v11716_v4 = vld [vmem:[%s12588_s22 + $0x188c] ss:$16 sps:$4 sm:$0xff]  }
 0x60b   : > { %7803 = vmatpush1.bf16.msra.mxu0 %v11621_v34  ;;  %8336 = vmatpush1.bf16.msra.mxu1 %v11624_v35  ;;  %v11711_v34 = vld [vmem:[%s12588_s22 + $0x1880] ss:$16 sps:$4 sm:$0xff]   ;;  %v11714_v35 = vld [vmem:[%s12588_s22 + $0x1888] ss:$16 sps:$4 sm:$0xff]  }
 0x60c   : > { %7804 = vmatprep.subr.bf16.mxu0 %v11629_v36  ;;  %8337 = vmatprep.subr.bf16.mxu1 %v11632_v24  ;;  %v11719_v36 = vld [vmem:[%s12588_s22 + $0x18a4] ss:$16 sps:$4 sm:$0xff]   ;;  %v11722_v24 = vld [vmem:[%s12588_s22 + $0x18ac] ss:$16 sps:$4 sm:$0xff]  }
 0x60f   : > { %7805 = vmatpush1.bf16.msra.mxu0 %v11627_v26  ;;  %8338 = vmatpush1.bf16.msra.mxu1 %v11630_v39  ;;  %v11717_v26 = vld [vmem:[%s12588_s22 + $0x18a0] ss:$16 sps:$4 sm:$0xff]   ;;  %v11720_v39 = vld [vmem:[%s12588_s22 + $0x18a8] ss:$16 sps:$4 sm:$0xff]  }
 0x610   : > { %7806 = vmatprep.subr.bf16.mxu0 %v11635_v40  ;;  %8339 = vmatprep.subr.bf16.mxu1 %v11638_v28  ;;  %v11725_v40 = vld [vmem:[%s12588_s22 + $0x18c4] ss:$16 sps:$4 sm:$0xff]   ;;  %v11728_v28 = vld [vmem:[%s12588_s22 + $0x18cc] ss:$16 sps:$4 sm:$0xff]  }
 0x613   : > { %7807 = vmatpush1.bf16.msra.mxu0 %v11633_v45  ;;  %8340 = vmatpush1.bf16.msra.mxu1 %v11636_v20  ;;  %v11723_v45 = vld [vmem:[%s12588_s22 + $0x18c0] ss:$16 sps:$4 sm:$0xff]   ;;  %v11726_v20 = vld [vmem:[%s12588_s22 + $0x18c8] ss:$16 sps:$4 sm:$0xff]  }
 0x614   : > { %7808 = vmatprep.subr.bf16.mxu0 %v11641_v47  ;;  %8341 = vmatprep.subr.bf16.mxu1 %v11644_v50  ;;  %v11731_v47 = vld [vmem:[%s12588_s22 + $0x18e4] ss:$16 sps:$4 sm:$0xff]   ;;  %v11734_v50 = vld [vmem:[%s12588_s22 + $0x18ec] ss:$16 sps:$4 sm:$0xff]  }
 0x617   : > { %7809 = vmatpush1.bf16.msra.mxu0 %v11639_v52  ;;  %8342 = vmatpush1.bf16.msra.mxu1 %v11642_v53  ;;  %v11729_v52 = vld [vmem:[%s12588_s22 + $0x18e0] ss:$16 sps:$4 sm:$0xff]   ;;  %v11732_v53 = vld [vmem:[%s12588_s22 + $0x18e8] ss:$16 sps:$4 sm:$0xff]  }
 0x618   : > { %7810 = vmatprep.subr.bf16.mxu0 %v11647_v48  ;;  %8343 = vmatprep.subr.bf16.mxu1 %v11650_v38  ;;  %v9152_v48 = vld.sshfl [vmem:[%s12967_s4 + $0x18] sm:$0x1 pattern:$0x75316420] }
 0x619   : > { %v3315_v38 = vrot.slane %v9152_v48, %v12963_v49 }
 0x61b   : > { %7811 = vmatpush1.bf16.msra.mxu0 %v11645_v7  ;;  %8344 = vmatpush1.bf16.msra.mxu1 %v11648_v5  ;;  %v12134_v7 = vmov 1983009808  }
 0x61c   : > { %7812 = vmatprep.subr.bf16.mxu0 %v11653_v9  ;;  %8345 = vmatprep.subr.bf16.mxu1 %v11656_v23  ;;  %v8414_v5 = vunpack.c.l.s4 %v12134_v7 }
 0x61e   : > { %v8415_v9 = vunpack.c.0.s8 %v8414_v5 }
 0x61f   : > { %7813 = vmatpush1.bf16.msra.mxu0 %v11651_v15  ;;  %8346 = vmatpush1.bf16.msra.mxu1 %v11654_v54 }
 0x620   : > { %7814 = vmatprep.subr.bf16.mxu0 %v11659_v17  ;;  %8347 = vmatprep.subr.bf16.mxu1 %v11662_v55  ;;  %v13848_v54 = vsub.s32 %v8415_v9, %v12955_v51 }
 0x623   : > { %7815 = vmatpush1.bf16.msra.mxu0 %v11657_v6  ;;  %8348 = vmatpush1.bf16.msra.mxu1 %v11660_v56 }
 0x624   : > { %7816 = vmatprep.subr.bf16.mxu0 %v11665_v31  ;;  %8349 = vmatprep.subr.bf16.mxu1 %v11668_v46 }
 0x627   : > { %7817 = vmatpush1.bf16.msra.mxu0 %v11663_v42  ;;  %8350 = vmatpush1.bf16.msra.mxu1 %v11666_v57 }
 0x628   : > { %7818 = vmatprep.subr.bf16.mxu0 %v11671_v37  ;;  %8351 = vmatprep.subr.bf16.mxu1 %v11674_v58  ;;  %v2344_v58 = vld [vmem:[#allocation3] sm:$0xff] }
 0x62b   : > { %7819 = vmatpush1.bf16.msra.mxu0 %v11669_v59  ;;  %8352 = vmatpush1.bf16.msra.mxu1 %v11672_v60 }
 0x62c   : > { %7820 = vmatprep.subr.bf16.mxu0 %v11677_v62  ;;  %8353 = vmatprep.subr.bf16.mxu1 %v11680_v0  ;;  %v8436_v62 = vld [vmem:[%s498_s19] sm:$0xf] (!%p9953_p2)  ;;  %v8440_v0 = vsub.s32 (!%p9953_p2), 0, %v12955_v51 }
 0x62f   : > { %7821 = vmatpush1.bf16.msra.mxu0 %v11675_v44  ;;  %8354 = vmatpush1.bf16.msra.mxu1 %v11678_v41  ;;  %v8444_v44 = vsub.s32 (!%p9953_p2), 1, %v12955_v51  ;;  %v8448_v41 = vsub.s32 (!%p9953_p2), 2, %v12955_v51 }
 0x630   : > { %7822 = vmatprep.subr.bf16.mxu0 %v11683_v2  ;;  %8355 = vmatprep.subr.bf16.mxu1 %v11686_v3  ;;  %v8452_v2 = vsub.s32 (!%p9953_p2), 3, %v12955_v51  ;;  %v8638_v3 = vld [vmem:[%s507_s29] sm:$0xf] (!%p9953_p2) }
 0x633   : > { %7823 = vmatpush1.bf16.msra.mxu0 %v11681_v13  ;;  %8356 = vmatpush1.bf16.msra.mxu1 %v11684_v43  ;;  %v8675_v13 = vld [vmem:[%s516_s5] sm:$0xf] (!%p9953_p2)  ;;  %v8441_v43 = vrot.slane (!%p9953_p2), %v8436_v62, %v8440_v0 }
 0x634   : > { %7833 = vmatprep.subr.bf16.mxu0 %v11689_v14  ;;  %8366 = vmatprep.subr.bf16.mxu1 %v11692_v1  ;;  %v8445_v14 = vrot.slane (!%p9953_p2), %v8436_v62, %v8444_v44  ;;  %v8449_v1 = vrot.slane (!%p9953_p2), %v8436_v62, %v8448_v41 }
 0x636   : > { %7825 = vmatmul.mubr.bf16.vlgmr.msra.gmra.mrb[0].mxu0 %v3299_v10  ;;  %8358 = vmatmul.mubr.bf16.vlgmr.msra.gmra.mrb[0].mxu1 %v3299_v10  ;;  %v8643_v10 = vrot.slane (!%p9953_p2), %v8638_v3, %v8440_v0 }
 0x637   : > { %7834 = vmatpush1.bf16.msra.mxu0 %v11687_v19  ;;  %8367 = vmatpush1.bf16.msra.mxu1 %v11690_v8  ;;  %v8453_v19 = vrot.slane (!%p9953_p2), %v8436_v62, %v8452_v2  ;;  %v8647_v8 = vrot.slane (!%p9953_p2), %v8638_v3, %v8444_v44 }
 0x638   : > { %7835 = vmatprep.subr.bf16.mxu0 %v11695_v16  ;;  %8368 = vmatprep.subr.bf16.mxu1 %v11698_v18  ;;  %v8651_v16 = vrot.slane (!%p9953_p2), %v8638_v3, %v8448_v41  ;;  %v8655_v18 = vrot.slane (!%p9953_p2), %v8638_v3, %v8452_v2 }
 0x639   : > { %7865 = vmatprep.mubr.bf16.mxu0 %v12133_v21  ;;  %8398 = vmatprep.mubr.bf16.mxu1 %v12133_v21  ;;  %v8688_v21 = vrot.slane (!%p9953_p2), %v8675_v13, %v8448_v41  ;;  %v8656_v51 = vcombine.low (!%p9953_p2), %v8643_v10, %v8647_v8 }
 0x63b   : > { %7836 = vmatpush1.bf16.msra.mxu0 %v11693_v27  ;;  %8369 = vmatpush1.bf16.msra.mxu1 %v11696_v11  ;;  %v8714_v27 = vld [vmem:[%s525_s1] sm:$0xf] (!%p9953_p2)  ;;  %v8454_v11 = vcombine.low (!%p9953_p2), %v8441_v43, %v8445_v14 }
 0x63c   : > { %7837 = vmatprep.subr.bf16.mxu0 %v11701_v61  ;;  %8370 = vmatprep.subr.bf16.mxu1 %v11704_v12  ;;  %v8680_v61 = vrot.slane (!%p9953_p2), %v8675_v13, %v8440_v0  ;;  %v8684_v12 = vrot.slane (!%p9953_p2), %v8675_v13, %v8444_v44 }
 0x63f   : > { %7838 = vmatpush1.bf16.msra.mxu0 %v11699_v63  ;;  %8371 = vmatpush1.bf16.msra.mxu1 %v11702_v22  ;;  %v8455_v63 = vcombine.low (!%p9953_p2), %v8449_v1, %v8453_v19  ;;  %v8657_v22 = vcombine.low (!%p9953_p2), %v8651_v16, %v8655_v18 }
 0x640   : > { %7839 = vmatprep.subr.bf16.mxu0 %v11707_v25  ;;  %8372 = vmatprep.subr.bf16.mxu1 %v11710_v29  ;;  %v8692_v25 = vrot.slane (!%p9953_p2), %v8675_v13, %v8452_v2  ;;  %v8462_v29 = vrot.slane (!%p9953_p2), %v8454_v11, %v13848_v54 }
 0x643   : > { %7840 = vmatpush1.bf16.msra.mxu0 %v11705_v30  ;;  %8373 = vmatpush1.bf16.msra.mxu1 %v11708_v32  ;;  %v8693_v30 = vcombine.low (!%p9953_p2), %v8680_v61, %v8684_v12  ;;  %v8719_v32 = vrot.slane (!%p9953_p2), %v8714_v27, %v8440_v0 }
 0x644   : > { %7841 = vmatprep.subr.bf16.mxu0 %v11713_v33  ;;  %8374 = vmatprep.subr.bf16.mxu1 %v11716_v4  ;;  %v8723_v33 = vrot.slane (!%p9953_p2), %v8714_v27, %v8444_v44  ;;  %v8469_v4 = vrot.slane (!%p9953_p2), %v8455_v63, %v13848_v54 }
 0x647   : > { %7842 = vmatpush1.bf16.msra.mxu0 %v11711_v34  ;;  %8375 = vmatpush1.bf16.msra.mxu1 %v11714_v35  ;;  %v8664_v34 = vrot.slane (!%p9953_p2), %v8656_v51, %v13848_v54  ;;  %v8671_v35 = vrot.slane (!%p9953_p2), %v8657_v22, %v13848_v54 }
 0x648   : > { %7843 = vmatprep.subr.bf16.mxu0 %v11719_v36  ;;  %8376 = vmatprep.subr.bf16.mxu1 %v11722_v24  ;;  %v8694_v36 = vcombine.low (!%p9953_p2), %v8688_v21, %v8692_v25 }
 0x64b   : > { %7844 = vmatpush1.bf16.msra.mxu0 %v11717_v26  ;;  %8377 = vmatpush1.bf16.msra.mxu1 %v11720_v39  ;;  %v8701_v26 = vrot.slane (!%p9953_p2), %v8693_v30, %v13848_v54  ;;  %v8727_v39 = vrot.slane (!%p9953_p2), %v8714_v27, %v8448_v41 }
 0x64c   : > { %7845 = vmatprep.subr.bf16.mxu0 %v11725_v40  ;;  %8378 = vmatprep.subr.bf16.mxu1 %v11728_v28  ;;  %v8731_v40 = vrot.slane (!%p9953_p2), %v8714_v27, %v8452_v2  ;;  %v8732_v28 = vcombine.low (!%p9953_p2), %v8719_v32, %v8723_v33 }
 0x64f   : > { %7846 = vmatpush1.bf16.msra.mxu0 %v11723_v45  ;;  %8379 = vmatpush1.bf16.msra.mxu1 %v11726_v20  ;;  %v8470_v45 = vcombine.low (!%p9953_p2), %v8462_v29, %v8469_v4  ;;  %v13870_v20 = vcombine.low (!%p9953_p2), %v8664_v34, %v8671_v35 }
 0x650   : > { %7847 = vmatprep.subr.bf16.mxu0 %v11731_v47  ;;  %8380 = vmatprep.subr.bf16.mxu1 %v11734_v50  ;;  %v8708_v47 = vrot.slane (!%p9953_p2), %v8694_v36, %v13848_v54  ;;  %v8733_v50 = vcombine.low (!%p9953_p2), %v8727_v39, %v8731_v40 }
 0x652   : > { %v13874_v48 = vcombine.low (!%p9953_p2), %v8701_v26, %v8708_v47 }
 0x653   : > { %7848 = vmatpush1.bf16.msra.mxu0 %v11729_v52  ;;  %8381 = vmatpush1.bf16.msra.mxu1 %v11732_v53  ;;  %v8740_v52 = vrot.slane (!%p9953_p2), %v8732_v28, %v13848_v54 }
 0x656   : > { %7866 = vmatmul.mubr.bf16.vlgmr.msra.gmra.mrb[0].mxu0 %v3315_v38  ;;  %8399 = vmatmul.mubr.bf16.vlgmr.msra.gmra.mrb[0].mxu1 %v3315_v38  ;;  %v8747_v38 = vrot.slane (!%p9953_p2), %v8733_v50, %v13848_v54 }
 0x658   : > { %v13878_v9 = vcombine.low (!%p9953_p2), %v8740_v52, %v8747_v38 }
 0x729   : > { %v7867_v23 = vpop.f32.mrb[0].mxu0  ;;  %v8400_v15 = vpop.f32.mrb[0].mxu1 }
 0x72a   : > { %v7869_v17 = vpop.f32.mrb[1].mxu0  ;;  %v8402_v55 = vpop.f32.mrb[1].mxu1 }
 0x72b   : > { %v8411_v6 = vcombine.low %v7867_v23, %v7869_v17  ;;  %v8412_v56 = vcombine.low %v8400_v15, %v8402_v55  ;;  %v7871_v31 = vpop.f32.mrb[2].mxu0  ;;  %v8404_v46 = vpop.f32.mrb[2].mxu1 }
 0x72c   : > { %v7872_v42 = vpop.f32.mrb[3].mxu0  ;;  %v8405_v49 = vpop.f32.mrb[3].mxu1 }
 0x72d   : > { %v8419_v57 = vrot.slane %v8411_v6, %v13848_v54  ;;  %v8426_v37 = vrot.slane %v8412_v56, %v13848_v54  ;;  %8434 = sbr.rel (%p9953_p2) target bundleno = 2090 (0x82a), region = 104 }
 0x72f   : > { %v8427_v59 = vcombine.low %v8419_v57, %v8426_v37 }
 0x731   : > { %v8429_v60 = vadd.f32 %v8427_v59, %v2344_v58 }
 0x733   : > { %8430 = vst [vmem:[#allocation3] sm:$0xff] %v8429_v60 }
 0x73a   : > { %v8435_v24 = vld [vmem:[#allocation3] sm:$0xff] }
 0x73b   : > { %v8472_v53 = vadd.f32 %v8470_v45, %v8435_v24 }
 0x73d   : > { %v8474_v7 = vcombine.high %v8472_v53, %v8472_v53  ;;  %v8481_v5 = vrot.slane %v8472_v53, %v13848_v54 }
 0x73f   : > { %v8488_v23 = vrot.slane %v8474_v7, %v13848_v54  ;;  %v8489_v15 = vcombine.high %v8481_v5, %v8481_v5  ;;  %v8496_v17 = vsel %vm8495_vm1, %v8481_v5, 0.0 }
 0x740   : > { %v8497_v55 = vrot.slane %v8496_v17, 4 }
 0x741   : > { %v8490_v6 = vcombine.high %v8488_v23, %v8488_v23  ;;  %v8503_v56 = vsel %vm8495_vm1, %v8489_v15, 0.0  ;;  %v8510_v31 = vsel %vm8495_vm1, %v8488_v23, 0.0 }
 0x742   : > { %v8498_v46 = vadd.f32 %v8497_v55, %v8496_v17  ;;  %v8504_v42 = vrot.slane %v8503_v56, 4  ;;  %v8511_v49 = vrot.slane %v8510_v31, 4 }
 0x743   : > { %v8517_v57 = vsel %vm8495_vm1, %v8490_v6, 0.0 }
 0x744   : > { %v8499_v37 = vrot.slane %v8498_v46, 2  ;;  %v8505_v58 = vadd.f32 %v8504_v42, %v8503_v56  ;;  %v8512_v59 = vadd.f32 %v8511_v49, %v8510_v31  ;;  %v8518_v60 = vrot.slane %v8517_v57, 4 }
 0x746   : > { %v8500_v62 = vadd.f32 %v8499_v37, %v8498_v46  ;;  %v8506_v0 = vrot.slane %v8505_v58, 2  ;;  %v8513_v44 = vrot.slane %v8512_v59, 2  ;;  %v8519_v41 = vadd.f32 %v8518_v60, %v8517_v57 }
 0x748   : > { %v8501_v2 = vrot.slane %v8500_v62, 1  ;;  %v8507_v3 = vadd.f32 %v8506_v0, %v8505_v58  ;;  %v8514_v13 = vadd.f32 %v8513_v44, %v8512_v59  ;;  %v8520_v43 = vrot.slane %v8519_v41, 2 }
 0x74a   : > { %v8502_v14 = vadd.f32 %v8501_v2, %v8500_v62  ;;  %v8508_v1 = vrot.slane %v8507_v3, 1  ;;  %v8515_v10 = vrot.slane %v8514_v13, 1  ;;  %v8521_v19 = vadd.f32 %v8520_v43, %v8519_v41 }
 0x74c   : > { %v8509_v8 = vadd.f32 %v8508_v1, %v8507_v3  ;;  %v8516_v16 = vadd.f32 %v8515_v10, %v8514_v13  ;;  %v8522_v18 = vrot.slane %v8521_v19, 1  ;;  %v8525_v27 = vmul.f32 0.5, %v8502_v14 }
 0x74e   : > { %v8523_v11 = vadd.f32 %v8522_v18, %v8521_v19  ;;  %v8526_v61 = vmul.f32 0.5, %v8509_v8  ;;  %v8527_v12 = vmul.f32 0.5, %v8516_v16 }
 0x750   : > { %v8528_v21 = vmul.f32 0.5, %v8523_v11  ;;  %v8533_v63 = vcombine.low %v8525_v27, %v8526_v61 }
 0x752   : > { %v8534_v51 = vcombine.low %v8527_v12, %v8528_v21  ;;  %v8541_v22 = vrot.slane %v8533_v63, %v13848_v54 }
 0x754   : > { %v8548_v25 = vrot.slane %v8534_v51, %v13848_v54 }
 0x756   : > { %v8549_v29 = vcombine.low %v8541_v22, %v8548_v25 }
 0x758   : > { %v8551_v30 = vsub.f32 %v8472_v53, %v8549_v29 }
 0x75a   : > { %v8552_v32 = vmul.f32 %v8551_v30, %v8551_v30 }
 0x75c   : > { %v8554_v33 = vcombine.high %v8552_v32, %v8552_v32  ;;  %v8561_v4 = vrot.slane %v8552_v32, %v13848_v54 }
 0x75e   : > { %v8568_v34 = vrot.slane %v8554_v33, %v13848_v54  ;;  %v8569_v35 = vcombine.high %v8561_v4, %v8561_v4  ;;  %v8575_v36 = vsel %vm8495_vm1, %v8561_v4, 0.0 }
 0x75f   : > { %v8576_v24 = vrot.slane %v8575_v36, 4 }
 0x760   : > { %v8570_v26 = vcombine.high %v8568_v34, %v8568_v34  ;;  %v8582_v39 = vsel %vm8495_vm1, %v8569_v35, 0.0  ;;  %v8589_v40 = vsel %vm8495_vm1, %v8568_v34, 0.0 }
 0x761   : > { %v8577_v28 = vadd.f32 %v8576_v24, %v8575_v36  ;;  %v8583_v45 = vrot.slane %v8582_v39, 4  ;;  %v8590_v47 = vrot.slane %v8589_v40, 4 }
 0x762   : > { %v8596_v50 = vsel %vm8495_vm1, %v8570_v26, 0.0 }
 0x763   : > { %v8578_v52 = vrot.slane %v8577_v28, 2  ;;  %v8584_v53 = vadd.f32 %v8583_v45, %v8582_v39  ;;  %v8591_v38 = vadd.f32 %v8590_v47, %v8589_v40  ;;  %v8597_v7 = vrot.slane %v8596_v50, 4 }
 0x765   : > { %v8579_v5 = vadd.f32 %v8578_v52, %v8577_v28  ;;  %v8585_v23 = vrot.slane %v8584_v53, 2  ;;  %v8592_v15 = vrot.slane %v8591_v38, 2  ;;  %v8598_v17 = vadd.f32 %v8597_v7, %v8596_v50 }
 0x767   : > { %v8580_v55 = vrot.slane %v8579_v5, 1  ;;  %v8586_v6 = vadd.f32 %v8585_v23, %v8584_v53  ;;  %v8593_v56 = vadd.f32 %v8592_v15, %v8591_v38  ;;  %v8599_v31 = vrot.slane %v8598_v17, 2 }
 0x769   : > { %v8581_v46 = vadd.f32 %v8580_v55, %v8579_v5  ;;  %v8587_v42 = vrot.slane %v8586_v6, 1  ;;  %v8594_v49 = vrot.slane %v8593_v56, 1  ;;  %v8600_v57 = vadd.f32 %v8599_v31, %v8598_v17 }
 0x76b   : > { %v8588_v37 = vadd.f32 %v8587_v42, %v8586_v6  ;;  %v8595_v58 = vadd.f32 %v8594_v49, %v8593_v56  ;;  %v8601_v59 = vrot.slane %v8600_v57, 1  ;;  %v8603_v60 = vmul.f32 0.5, %v8581_v46 }
 0x76d   : > { %v8602_v62 = vadd.f32 %v8601_v59, %v8600_v57  ;;  %v8604_v0 = vmul.f32 0.5, %v8588_v37  ;;  %v8605_v44 = vmul.f32 0.5, %v8595_v58  ;;  %v8607_v41 = vadd.f32 1e-05, %v8603_v60 }
 0x76f   : > { %v8606_v2 = vmul.f32 0.5, %v8602_v62  ;;  %v8608_v3 = vadd.f32 1e-05, %v8604_v0  ;;  %v8609_v13 = vadd.f32 1e-05, %v8605_v44  ;;  %11736 = vrsqrt.f32 %v8607_v41 }
 0x771   : > { %v8610_v43 = vadd.f32 1e-05, %v8606_v2  ;;  %11738 = vrsqrt.f32 %v8608_v3 }
 0x772   : > { %11740 = vrsqrt.f32 %v8609_v13 }
 0x773   : > { %11742 = vrsqrt.f32 %v8610_v43 }
 0x779   : > { %v11737_v14 = vpop.eup %11736 }
 0x77b   : > { %v11739_v1 = vpop.eup %11738 }
 0x77c   : > { %v11741_v10 = vpop.eup %11740  ;;  %v8619_v19 = vcombine.low %v11737_v14, %v11739_v1 }
 0x77d   : > { %v11743_v8 = vpop.eup %11742 }
 0x77e   : > { %v8620_v16 = vcombine.low %v11741_v10, %v11743_v8  ;;  %v8627_v18 = vrot.slane %v8619_v19, %v13848_v54 }
 0x780   : > { %v8634_v27 = vrot.slane %v8620_v16, %v13848_v54 }
 0x782   : > { %v8635_v11 = vcombine.low %v8627_v18, %v8634_v27 }
 0x784   : > { %v8637_v61 = vmul.f32 %v8635_v11, %v8551_v30 }
 0x786   : > { %v8674_v12 = vmul.f32 %v13870_v20, %v8637_v61 }
 0x788   : > { %v8711_v21 = vadd.f32 %v13874_v48, %v8674_v12 }
 0x78a   : > { %v8712_v63 = vmul.f32 0.2, %v8711_v21 }
 0x78c   : > { %v8713_v51 = vmax.f32 %v8711_v21, %v8712_v63 }
 0x78e   : > { %v8750_v22 = vmul.f32 %v13878_v9, %v8713_v51 }
 0x790   : > { %v8752_v25 = vcombine.high %v8750_v22, %v8750_v22  ;;  %v8759_v29 = vrot.slane %v8750_v22, %v13848_v54 }
 0x792   : > { %v8766_v32 = vrot.slane %v8752_v25, %v13848_v54  ;;  %v8767_v33 = vcombine.high %v8759_v29, %v8759_v29  ;;  %v8773_v4 = vsel %vm8495_vm1, %v8759_v29, 0.0 }
 0x794   : > { %v8768_v34 = vcombine.high %v8766_v32, %v8766_v32  ;;  %v8774_v30 = vsel %vm8495_vm1, %v8767_v33, 0.0  ;;  %v8776_v20 = vsel %vm8495_vm1, %v8766_v32, 0.0 }
 0x795   : > { %v8775_v35 = vadd.f32 %v8774_v30, %v8773_v4 }
 0x796   : > { %v8778_v48 = vsel %vm8495_vm1, %v8768_v34, 0.0 }
 0x797   : > { %v8777_v36 = vadd.f32 %v8776_v20, %v8775_v35 }
 0x799   : > { %v8779_v24 = vadd.f32 %v8778_v48, %v8777_v36 }
 0x79b   : > { %8780 = vadd.xlane.f32.xlu0 %v8779_v24 }
 0x828   : > { %v8781_v9 = vpop.xlane.xlu0 %8780 }
 0x829   : > { %8783 = vst.msk [vmem:[%s12607_s8] sm:$0x3] %vm8782_vm2, %v8781_v9 }
 0x82a PF: > { %s23_s23 = sadd.s32 1, %s12113_s23   ;;  %s14044_s16 = sld [smem:[#allocation21_spill]] }
 0x82b   : > { %p20_p0 = scmp.ge.s32.totalorder %s23_s23, 6   ;;  %s14045_s20 = sld [smem:[#allocation24_spill]] }
 0x82c   : > { %s14046_s22 = sld [smem:[#allocation27_spill]]  ;;  %s14047_s25 = sld [smem:[#allocation28_spill]] }
 0x82d   : > { %s14048_s13 = smov %s12077_s14  ;;  %s14049_s14 = smov %s12081_s15 }
 0x82e   : > { %s14050_s15 = smov %s12375_s12  ;;  %s14051_s17 = smov %s12093_s18 }
 0x82f   : > { %s14052_s18 = smov %s12325_s9  ;;  %s14053_s19 = smov %s12105_s21 }
 0x830   :  { %22 = sbr.rel (!%p20_p0) target bundleno = 20 (0x14), region = 169 }
 0x832   : > { %s14054_s21 = smov %s14046_s22  ;;  %s14055_s22 = smov %s14047_s25 }
 0x837   :  { %8803 = vsyncpa [#allocation5], 1 }
 0x838   :  { %8805 = vsyncpa [#allocation5 + $0x1], 1 }
 0x839   :  { %8806 = vsyncpa [#allocation7], 1 }
 0x83a   :  { %8807 = vsyncpa [#allocation10], 1 }

</bundles_post_ra>
